<compile_context>
chip_gen: v5e
topology: v5e:2x2
jax: 0.10.0
libtpu: 0.0.40
codegen_flags: <defaults>
</compile_context>

<pallas_src>
import functools
import math

import jax
import jax.numpy as jnp
from jax import lax
from jax.experimental import pallas as pl

# ----------------------------- small config ---------------------------------
VOCAB = 64            # decoder_config['vocab_size'] == bert vocab
VOCAB_PAD = 128       # final projection padded to a lane-dense 128-wide output
H = 32                # d_model == d_word_vec == bert hidden_size
N_HEAD = 4            # num_head (both encoder & decoder)
D_K = D_V = 8         # d_k == d_v == H // N_HEAD
D_INNER = 64          # decoder d_inner
D_FF_BERT = 64        # bert intermediate size
N_LAYERS_ENC = 2      # bert encoder layers
N_LAYERS_DEC = 2      # decoder_config['n_layers']
MAX_POS = 32          # bert max_position_embeddings
LEN_MAX_SEQ = 16      # decoder_config['len_max_seq']
TYPE_VOCAB = 2
PAD = 0
BERT_LN_EPS = 1e-12   # BertLayerNorm eps
DEC_LN_EPS = 1e-5     # torch.nn.LayerNorm default eps
ATTN_SCALE = 1.0 / math.sqrt(D_K)


# ------------------------- in-kernel building blocks -------------------------
def _ln(x, g, b, eps):
    mean = jnp.mean(x, axis=-1, keepdims=True)
    xc = x - mean
    var = jnp.mean(xc * xc, axis=-1, keepdims=True)
    return xc * lax.rsqrt(var + eps) * g + b


def _gelu(x):
    # TODO(synk): reference BERT uses erf-based GELU; tanh approximation used here.
    c = math.sqrt(2.0 / math.pi)
    return 0.5 * x * (1.0 + jnp.tanh(c * (x + 0.044715 * x * x * x)))


def _mha(x_q, x_kv, bias, wqkv, bqkv, wo, bo, *, batch, s_q, s_k, cross=False):
    """Fused multi-head attention with register accumulation.

    x_q: [B*s_q, H], x_kv: [B*s_k, H] (values already in vregs).
    bias: [B, 1 or s_q, s_k] additive mask (shared across heads).
    wqkv: [H, 3H] fused Q|K|V weights, bqkv: [1, 3H], wo: [H, H], bo: [1, H].
    Returns [B*s_q, H].
    """
    if not cross:
        # one lane-dense [B*S,H] @ [H,3H] matmul for Q, K and V
        qkv = jnp.dot(x_q, wqkv, preferred_element_type=jnp.float32) + bqkv
        q, k, v = qkv[:, :H], qkv[:, H:2 * H], qkv[:, 2 * H:]
    else:
        q = jnp.dot(x_q, wqkv[:, :H], preferred_element_type=jnp.float32) + bqkv[:, :H]
        kv = jnp.dot(x_kv, wqkv[:, H:], preferred_element_type=jnp.float32) + bqkv[:, H:]
        k, v = kv[:, :H], kv[:, H:]

    q3 = q.reshape(batch, s_q, H)
    k3 = k.reshape(batch, s_k, H)
    v3 = v.reshape(batch, s_k, H)

    # per-head scores, batched over the batch dim; heads are static lane slices
    scores = []
    for h in range(N_HEAD):
        qh = q3[:, :, h * D_K:(h + 1) * D_K]
        kh = k3[:, :, h * D_K:(h + 1) * D_K]
        scores.append(jnp.einsum('bqd,bkd->bqk', qh, kh,
                                 preferred_element_type=jnp.float32))
    s = jnp.stack(scores, axis=0) * ATTN_SCALE + bias[None]       # [NH, B, s_q, s_k]

    # one batched softmax over all heads x batches
    m = jnp.max(s, axis=-1, keepdims=True)
    p = jnp.exp(s - m)
    p = p / jnp.sum(p, axis=-1, keepdims=True)

    ctxs = []
    for h in range(N_HEAD):
        vh = v3[:, :, h * D_V:(h + 1) * D_V]
        ctxs.append(jnp.einsum('bqk,bkd->bqd', p[h], vh,
                               preferred_element_type=jnp.float32))
    ctx = jnp.concatenate(ctxs, axis=-1).reshape(batch * s_q, H)   # [B*s_q, H]

    # single lane-dense output projection (accumulated in vregs, no scratch)
    return jnp.dot(ctx, wo, preferred_element_type=jnp.float32) + bo


# ----------------------------- the fused kernel -------------------------------
def _forward_kernel(
        src_emb_ref, tgt_emb_ref, tgt_pos_ref,
        enc_bias_ref, slf_bias_ref, encdec_bias_ref, nonpad_ref,
        emb_ln_ref,
        e_wqkv_ref, e_bqkv_ref, e_wo_ref, e_bo_ref,
        e_wi_ref, e_bi_ref, e_wf_ref, e_bf_ref, e_ln_ref,
        ds_wqkv_ref, ds_bqkv_ref, ds_wo_ref, ds_bo_ref,
        de_wqkv_ref, de_bqkv_ref, de_wo_ref, de_bo_ref,
        df_w1_ref, df_b1_ref, df_w2_ref, df_b2_ref, d_ln_ref,
        wlast_ref, blast_ref,
        logits_ref,
        *, batch, s_src, t_tgt):
    emb_ln = emb_ln_ref[...]                      # [4, H]
    enc_bias = enc_bias_ref[...]                  # [B, 1, S]
    slf_bias = slf_bias_ref[...]                  # [B, T, T]
    encdec_bias = encdec_bias_ref[...]            # [B, 1, S]
    nonpad = nonpad_ref[...]                      # [B*T, 1]

    # ---------------- BERT encoder ----------------
    x = _ln(src_emb_ref[...], emb_ln[0:1], emb_ln[1:2], BERT_LN_EPS)
    for l in range(N_LAYERS_ENC):
        lnp = e_ln_ref[l]                         # [4, H]: ln1_g, ln1_b, ln2_g, ln2_b
        attn = _mha(x, x, enc_bias, e_wqkv_ref[l], e_bqkv_ref[l],
                    e_wo_ref[l], e_bo_ref[l],
                    batch=batch, s_q=s_src, s_k=s_src)
        x = _ln(attn + x, lnp[0:1], lnp[1:2], BERT_LN_EPS)
        inter = _gelu(jnp.dot(x, e_wi_ref[l],
                              preferred_element_type=jnp.float32) + e_bi_ref[l])
        ffn = jnp.dot(inter, e_wf_ref[l],
                      preferred_element_type=jnp.float32) + e_bf_ref[l]
        x = _ln(ffn + x, lnp[2:3], lnp[3:4], BERT_LN_EPS)
    enc_out = x                                    # [B*S, H]

    # ---------------- decoder ----------------
    # decoder embedding is BertEmbeddings(tgt) (then LN) + sinusoid(position)
    y = _ln(tgt_emb_ref[...], emb_ln[2:3], emb_ln[3:4], BERT_LN_EPS) + tgt_pos_ref[...]
    for l in range(N_LAYERS_DEC):
        lnp = d_ln_ref[l]                         # [6, H]: slf, enc, ffn (g, b) pairs
        a = _mha(y, y, slf_bias, ds_wqkv_ref[l], ds_bqkv_ref[l],
                 ds_wo_ref[l], ds_bo_ref[l],
                 batch=batch, s_q=t_tgt, s_k=t_tgt)
        y = _ln(a + y, lnp[0:1], lnp[1:2], DEC_LN_EPS) * nonpad
        a = _mha(y, enc_out, encdec_bias, de_wqkv_ref[l], de_bqkv_ref[l],
                 de_wo_ref[l], de_bo_ref[l],
                 batch=batch, s_q=t_tgt, s_k=s_src, cross=True)
        y = _ln(a + y, lnp[2:3], lnp[3:4], DEC_LN_EPS) * nonpad
        hdn = jnp.maximum(jnp.dot(y, df_w1_ref[l],
                                  preferred_element_type=jnp.float32) + df_b1_ref[l], 0.0)
        ffn = jnp.dot(hdn, df_w2_ref[l],
                      preferred_element_type=jnp.float32) + df_b2_ref[l]
        y = _ln(ffn + y, lnp[4:5], lnp[5:6], DEC_LN_EPS) * nonpad

    # final vocab projection, 128-lane-padded output (unmasked lane-dense stores)
    logits_ref[...] = jnp.dot(y, wlast_ref[...],
                              preferred_element_type=jnp.float32) + blast_ref[...]


# ----------------------------- model (glue) ----------------------------------
def bert_abs_sum_forward(params, src, src_mask, tgt, tgt_mask):
    tgt = tgt[:, :-1]
    del tgt_mask  # sliced for parity with reference; unused downstream
    batch, s = src.shape
    t = tgt.shape[1]

    # ---- embedding gathers (plain JAX; gathers on tiny tables) ----
    be, de = params["bert_emb"], params["dec_emb"]
    pos_s = jnp.arange(s)
    src_emb = (be["word"][src] + be["pos"][pos_s][None, :, :]
               + be["type"][0][None, None, :]).reshape(batch * s, H)
    pos_t = jnp.arange(t)
    tgt_emb = (de["word"][tgt] + de["pos"][pos_t][None, :, :]
               + de["type"][0][None, None, :]).reshape(batch * t, H)
    tgt_pos = jnp.broadcast_to(params["sinusoid"][1:t + 1][None, :, :],
                               (batch, t, H)).reshape(batch * t, H)

    # ---- additive attention biases / padding masks ----
    enc_bias = ((1.0 - src_mask.astype(jnp.float32)) * -10000.0)[:, None, :]   # [B,1,S]
    subseq = jnp.triu(jnp.ones((t, t), dtype=jnp.bool_), k=1)[None]            # [1,T,T]
    keypad = (tgt == PAD)[:, None, :]                                           # [B,1,T]
    slf_bias = jnp.where(jnp.logical_or(keypad, subseq), -1e9, 0.0).astype(jnp.float32)
    encdec_bias = jnp.where((src == PAD)[:, None, :], -1e9, 0.0).astype(jnp.float32)
    nonpad = (tgt != PAD).astype(jnp.float32).reshape(batch * t, 1)

    e, d = params["enc"], params["dec"]
    logits_pad = pl.pallas_call(
        functools.partial(_forward_kernel, batch=batch, s_src=s, t_tgt=t),
        out_shape=jax.ShapeDtypeStruct((batch * t, VOCAB_PAD), jnp.float32),
    )(src_emb, tgt_emb, tgt_pos,
      enc_bias, slf_bias, encdec_bias, nonpad,
      params["emb_ln"],
      e["wqkv"], e["bqkv"], e["wo"], e["bo"],
      e["wi"], e["bi"], e["wf"], e["bf"], e["ln"],
      d["slf_wqkv"], d["slf_bqkv"], d["slf_wo"], d["slf_bo"],
      d["enc_wqkv"], d["enc_bqkv"], d["enc_wo"], d["enc_bo"],
      d["w1"], d["b1"], d["w2"], d["b2"], d["ln"],
      params["last_w"], params["last_b"])
    return logits_pad[:, :VOCAB].reshape(batch, t, VOCAB)


# ----------------------------- deterministic init ----------------------------
def sinusoid_table(n_position, d_hid):
    pos = jnp.arange(n_position, dtype=jnp.float32)[:, None]
    i = jnp.arange(d_hid, dtype=jnp.float32)[None, :]
    angle = pos / jnp.power(10000.0, 2.0 * jnp.floor(i / 2.0) / d_hid)
    even = (jnp.arange(d_hid) % 2 == 0)[None, :]
    table = jnp.where(even, jnp.sin(angle), jnp.cos(angle))
    return table.at[0].set(0.0).astype(jnp.float32)   # padding_idx = 0


def init_params(key):
    keys = iter(jax.random.split(key, 64))

    def nrm(shape):
        return jax.random.normal(next(keys), shape, jnp.float32) * 0.02

    def emb_block():
        return {"word": nrm((VOCAB, H)), "pos": nrm((MAX_POS, H)),
                "type": nrm((TYPE_VOCAB, H))}

    ones = jnp.ones((1, H), jnp.float32)
    zeros = jnp.zeros((1, H), jnp.float32)
    ln2 = jnp.concatenate([ones, zeros], axis=0)                     # (gamma, beta)

    def ln_stack(n_layers, n_norms):
        one = jnp.concatenate([ln2] * n_norms, axis=0)               # [2*n_norms, H]
        return jnp.tile(one[None], (n_layers, 1, 1))

    enc = {
        "wqkv": nrm((N_LAYERS_ENC, H, 3 * H)),
        "bqkv": jnp.zeros((N_LAYERS_ENC, 1, 3 * H), jnp.float32),
        "wo": nrm((N_LAYERS_ENC, H, H)),
        "bo": jnp.zeros((N_LAYERS_ENC, 1, H), jnp.float32),
        "wi": nrm((N_LAYERS_ENC, H, D_FF_BERT)),
        "bi": jnp.zeros((N_LAYERS_ENC, 1, D_FF_BERT), jnp.float32),
        "wf": nrm((N_LAYERS_ENC, D_FF_BERT, H)),
        "bf": jnp.zeros((N_LAYERS_ENC, 1, H), jnp.float32),
        "ln": ln_stack(N_LAYERS_ENC, 2),                             # [L, 4, H]
    }
    dec = {
        "slf_wqkv": nrm((N_LAYERS_DEC, H, 3 * H)),
        "slf_bqkv": jnp.zeros((N_LAYERS_DEC, 1, 3 * H), jnp.float32),
        "slf_wo": nrm((N_LAYERS_DEC, H, H)),
        "slf_bo": jnp.zeros((N_LAYERS_DEC, 1, H), jnp.float32),
        "enc_wqkv": nrm((N_LAYERS_DEC, H, 3 * H)),
        "enc_bqkv": jnp.zeros((N_LAYERS_DEC, 1, 3 * H), jnp.float32),
        "enc_wo": nrm((N_LAYERS_DEC, H, H)),
        "enc_bo": jnp.zeros((N_LAYERS_DEC, 1, H), jnp.float32),
        "w1": nrm((N_LAYERS_DEC, H, D_INNER)),
        "b1": jnp.zeros((N_LAYERS_DEC, 1, D_INNER), jnp.float32),
        "w2": nrm((N_LAYERS_DEC, D_INNER, H)),
        "b2": jnp.zeros((N_LAYERS_DEC, 1, H), jnp.float32),
        "ln": ln_stack(N_LAYERS_DEC, 3),                             # [L, 6, H]
    }
    # 128-lane-padded final vocab projection, built ONCE here (not per forward).
    last_w = jnp.zeros((H, VOCAB_PAD), jnp.float32).at[:, :VOCAB].set(nrm((H, VOCAB)))
    last_b = jnp.zeros((1, VOCAB_PAD), jnp.float32)

    return {
        "bert_emb": emb_block(),
        "dec_emb": emb_block(),
        # rows: bert_emb (gamma, beta), dec_emb (gamma, beta)
        "emb_ln": jnp.concatenate([ln2, ln2], axis=0),               # [4, H]
        "sinusoid": sinusoid_table(LEN_MAX_SEQ + 1, H),
        "enc": enc,
        "dec": dec,
        "last_w": last_w,
        "last_b": last_b,
    }


# ----------------------------- main ------------------------------------------
if __name__ == "__main__":
    B, S_SRC, T_TGT = 2, 8, 9   # tgt is sliced to length 8 inside forward

    root = jax.random.PRNGKey(0)
    kp, ks, kt = jax.random.split(root, 3)
    params = init_params(kp)

    src = jax.random.randint(ks, (B, S_SRC), 1, VOCAB).astype(jnp.int32)
    src = src.at[1, -2:].set(PAD)
    src_mask = (src != PAD).astype(jnp.int32)

    tgt = jax.random.randint(kt, (B, T_TGT), 1, VOCAB).astype(jnp.int32)
    tgt = tgt.at[1, -3:].set(PAD)
    tgt_mask = (tgt != PAD).astype(jnp.int32)

    fwd = jax.jit(bert_abs_sum_forward)
    logits = fwd(params, src, src_mask, tgt, tgt_mask)
    jax.block_until_ready(logits)

    assert logits.shape == (B, T_TGT - 1, VOCAB), logits.shape
    assert bool(jnp.all(jnp.isfinite(logits)))
    print("KERNEL_OK")
</pallas_src>

<mosaic_0001>
module attributes {stable_mosaic.version = 11 : i64} {
  func.func @_forward_kernel(%arg0: memref<16x32xf32, #tpu.memory_space<vmem>>, %arg1: memref<16x32xf32, #tpu.memory_space<vmem>>, %arg2: memref<16x32xf32, #tpu.memory_space<vmem>>, %arg3: memref<2x1x8xf32, #tpu.memory_space<vmem>>, %arg4: memref<2x8x8xf32, #tpu.memory_space<vmem>>, %arg5: memref<2x1x8xf32, #tpu.memory_space<vmem>>, %arg6: memref<16x1xf32, #tpu.memory_space<vmem>>, %arg7: memref<4x32xf32, #tpu.memory_space<vmem>>, %arg8: memref<2x32x96xf32, #tpu.memory_space<vmem>>, %arg9: memref<2x1x96xf32, #tpu.memory_space<vmem>>, %arg10: memref<2x32x32xf32, #tpu.memory_space<vmem>>, %arg11: memref<2x1x32xf32, #tpu.memory_space<vmem>>, %arg12: memref<2x32x64xf32, #tpu.memory_space<vmem>>, %arg13: memref<2x1x64xf32, #tpu.memory_space<vmem>>, %arg14: memref<2x64x32xf32, #tpu.memory_space<vmem>>, %arg15: memref<2x1x32xf32, #tpu.memory_space<vmem>>, %arg16: memref<2x4x32xf32, #tpu.memory_space<vmem>>, %arg17: memref<2x32x96xf32, #tpu.memory_space<vmem>>, %arg18: memref<2x1x96xf32, #tpu.memory_space<vmem>>, %arg19: memref<2x32x32xf32, #tpu.memory_space<vmem>>, %arg20: memref<2x1x32xf32, #tpu.memory_space<vmem>>, %arg21: memref<2x32x96xf32, #tpu.memory_space<vmem>>, %arg22: memref<2x1x96xf32, #tpu.memory_space<vmem>>, %arg23: memref<2x32x32xf32, #tpu.memory_space<vmem>>, %arg24: memref<2x1x32xf32, #tpu.memory_space<vmem>>, %arg25: memref<2x32x64xf32, #tpu.memory_space<vmem>>, %arg26: memref<2x1x64xf32, #tpu.memory_space<vmem>>, %arg27: memref<2x64x32xf32, #tpu.memory_space<vmem>>, %arg28: memref<2x1x32xf32, #tpu.memory_space<vmem>>, %arg29: memref<2x6x32xf32, #tpu.memory_space<vmem>>, %arg30: memref<32x128xf32, #tpu.memory_space<vmem>>, %arg31: memref<1x128xf32, #tpu.memory_space<vmem>>, %arg32: memref<16x128xf32, #tpu.memory_space<vmem>>) attributes {dimension_semantics = [], scalar_prefetch = 0 : i64, scratch_operands = 0 : i64, tpu.core_type = #tpu.core_type<tc>} {
    %c0 = arith.constant 0 : index
    %c0_0 = arith.constant 0 : index
    %0 = vector.load %arg7[%c0, %c0_0] : memref<4x32xf32, #tpu.memory_space<vmem>>, vector<4x32xf32>
    %c0_1 = arith.constant 0 : index
    %c0_2 = arith.constant 0 : index
    %c0_3 = arith.constant 0 : index
    %1 = vector.load %arg3[%c0_1, %c0_2, %c0_3] : memref<2x1x8xf32, #tpu.memory_space<vmem>>, vector<2x1x8xf32>
    %c0_4 = arith.constant 0 : index
    %c0_5 = arith.constant 0 : index
    %c0_6 = arith.constant 0 : index
    %2 = vector.load %arg4[%c0_4, %c0_5, %c0_6] : memref<2x8x8xf32, #tpu.memory_space<vmem>>, vector<2x8x8xf32>
    %c0_7 = arith.constant 0 : index
    %c0_8 = arith.constant 0 : index
    %c0_9 = arith.constant 0 : index
    %3 = vector.load %arg5[%c0_7, %c0_8, %c0_9] : memref<2x1x8xf32, #tpu.memory_space<vmem>>, vector<2x1x8xf32>
    %c0_10 = arith.constant 0 : index
    %c0_11 = arith.constant 0 : index
    %4 = vector.load %arg6[%c0_10, %c0_11] : memref<16x1xf32, #tpu.memory_space<vmem>>, vector<16x1xf32>
    %c0_12 = arith.constant 0 : index
    %c0_13 = arith.constant 0 : index
    %5 = vector.load %arg0[%c0_12, %c0_13] : memref<16x32xf32, #tpu.memory_space<vmem>>, vector<16x32xf32>
    %6 = vector.extract_strided_slice %0 {offsets = [0, 0], sizes = [1, 32], strides = [1, 1]} : vector<4x32xf32> to vector<1x32xf32>
    %7 = vector.extract_strided_slice %0 {offsets = [1, 0], sizes = [1, 32], strides = [1, 1]} : vector<4x32xf32> to vector<1x32xf32>
    %cst = arith.constant dense<0.000000e+00> : vector<16xf32>
    %8 = vector.multi_reduction <add>, %5, %cst [1] : vector<16x32xf32> to vector<16xf32>
    %9 = vector.shape_cast %8 : vector<16xf32> to vector<16x1xf32>
    %cst_14 = arith.constant 3.200000e+01 : f32
    %10 = vector.broadcast %cst_14 : f32 to vector<16x1xf32>
    %11 = arith.divf %9, %10 : vector<16x1xf32>
    %12 = vector.broadcast %11 : vector<16x1xf32> to vector<16x32xf32>
    %13 = arith.subf %5, %12 : vector<16x32xf32>
    %14 = arith.mulf %13, %13 : vector<16x32xf32>
    %cst_15 = arith.constant dense<0.000000e+00> : vector<16xf32>
    %15 = vector.multi_reduction <add>, %14, %cst_15 [1] : vector<16x32xf32> to vector<16xf32>
    %16 = vector.shape_cast %15 : vector<16xf32> to vector<16x1xf32>
    %cst_16 = arith.constant 3.200000e+01 : f32
    %17 = vector.broadcast %cst_16 : f32 to vector<16x1xf32>
    %18 = arith.divf %16, %17 : vector<16x1xf32>
    %cst_17 = arith.constant 9.99999996E-13 : f32
    %19 = vector.broadcast %cst_17 : f32 to vector<16x1xf32>
    %20 = arith.addf %18, %19 : vector<16x1xf32>
    %21 = math.rsqrt %20 : vector<16x1xf32>
    %22 = vector.broadcast %21 : vector<16x1xf32> to vector<16x32xf32>
    %23 = arith.mulf %13, %22 : vector<16x32xf32>
    %24 = vector.broadcast %6 : vector<1x32xf32> to vector<16x32xf32>
    %25 = arith.mulf %23, %24 : vector<16x32xf32>
    %26 = vector.broadcast %7 : vector<1x32xf32> to vector<16x32xf32>
    %27 = arith.addf %25, %26 : vector<16x32xf32>
    %c0_18 = arith.constant 0 : index
    %c0_19 = arith.constant 0 : index
    %c0_20 = arith.constant 0 : index
    %28 = vector.load %arg16[%c0_18, %c0_19, %c0_20] : memref<2x4x32xf32, #tpu.memory_space<vmem>>, vector<1x4x32xf32>
    %29 = vector.shape_cast %28 : vector<1x4x32xf32> to vector<4x32xf32>
    %c0_21 = arith.constant 0 : index
    %c0_22 = arith.constant 0 : index
    %c0_23 = arith.constant 0 : index
    %30 = vector.load %arg8[%c0_21, %c0_22, %c0_23] : memref<2x32x96xf32, #tpu.memory_space<vmem>>, vector<1x32x96xf32>
    %31 = vector.shape_cast %30 : vector<1x32x96xf32> to vector<32x96xf32>
    %c0_24 = arith.constant 0 : index
    %c0_25 = arith.constant 0 : index
    %c0_26 = arith.constant 0 : index
    %32 = vector.load %arg9[%c0_24, %c0_25, %c0_26] : memref<2x1x96xf32, #tpu.memory_space<vmem>>, vector<1x1x96xf32>
    %33 = vector.shape_cast %32 : vector<1x1x96xf32> to vector<1x96xf32>
    %c0_27 = arith.constant 0 : index
    %c0_28 = arith.constant 0 : index
    %c0_29 = arith.constant 0 : index
    %34 = vector.load %arg10[%c0_27, %c0_28, %c0_29] : memref<2x32x32xf32, #tpu.memory_space<vmem>>, vector<1x32x32xf32>
    %35 = vector.shape_cast %34 : vector<1x32x32xf32> to vector<32x32xf32>
    %c0_30 = arith.constant 0 : index
    %c0_31 = arith.constant 0 : index
    %c0_32 = arith.constant 0 : index
    %36 = vector.load %arg11[%c0_30, %c0_31, %c0_32] : memref<2x1x32xf32, #tpu.memory_space<vmem>>, vector<1x1x32xf32>
    %37 = vector.shape_cast %36 : vector<1x1x32xf32> to vector<1x32xf32>
    %cst_33 = arith.constant dense<0.000000e+00> : vector<16x96xf32>
    %38 = tpu.matmul %27, %31, %cst_33 {dimension_numbers = #tpu.dot_dimension_numbers<[1], [0], [0], [1], [0, 0, 1, 1], [], []>} : vector<16x32xf32>, vector<32x96xf32>, vector<16x96xf32> -> vector<16x96xf32>
    %39 = vector.broadcast %33 : vector<1x96xf32> to vector<16x96xf32>
    %40 = arith.addf %38, %39 : vector<16x96xf32>
    %41 = vector.extract_strided_slice %40 {offsets = [0, 0], sizes = [16, 32], strides = [1, 1]} : vector<16x96xf32> to vector<16x32xf32>
    %42 = vector.extract_strided_slice %40 {offsets = [0, 32], sizes = [16, 32], strides = [1, 1]} : vector<16x96xf32> to vector<16x32xf32>
    %43 = vector.extract_strided_slice %40 {offsets = [0, 64], sizes = [16, 32], strides = [1, 1]} : vector<16x96xf32> to vector<16x32xf32>
    %44 = vector.shape_cast %41 : vector<16x32xf32> to vector<2x8x32xf32>
    %45 = vector.shape_cast %42 : vector<16x32xf32> to vector<2x8x32xf32>
    %46 = vector.shape_cast %43 : vector<16x32xf32> to vector<2x8x32xf32>
    %47 = vector.extract_strided_slice %44 {offsets = [0, 0, 0], sizes = [2, 8, 8], strides = [1, 1, 1]} : vector<2x8x32xf32> to vector<2x8x8xf32>
    %48 = vector.extract_strided_slice %45 {offsets = [0, 0, 0], sizes = [2, 8, 8], strides = [1, 1, 1]} : vector<2x8x32xf32> to vector<2x8x8xf32>
    "tpu.trace_start"() <{level = 10 : i32, message = "bqd,bkd->bqk"}> : () -> ()
    %cst_34 = arith.constant dense<0.000000e+00> : vector<2x8x8xf32>
    %49 = tpu.matmul %47, %48, %cst_34 {dimension_numbers = #tpu.dot_dimension_numbers<[2], [2], [1], [1], [0, 0, 0, 1, 1, 1], [0], [0]>} : vector<2x8x8xf32>, vector<2x8x8xf32>, vector<2x8x8xf32> -> vector<2x8x8xf32>
    "tpu.trace_stop"() : () -> ()
    %50 = vector.extract_strided_slice %44 {offsets = [0, 0, 8], sizes = [2, 8, 8], strides = [1, 1, 1]} : vector<2x8x32xf32> to vector<2x8x8xf32>
    %51 = vector.extract_strided_slice %45 {offsets = [0, 0, 8], sizes = [2, 8, 8], strides = [1, 1, 1]} : vector<2x8x32xf32> to vector<2x8x8xf32>
    "tpu.trace_start"() <{level = 10 : i32, message = "bqd,bkd->bqk"}> : () -> ()
    %cst_35 = arith.constant dense<0.000000e+00> : vector<2x8x8xf32>
    %52 = tpu.matmul %50, %51, %cst_35 {dimension_numbers = #tpu.dot_dimension_numbers<[2], [2], [1], [1], [0, 0, 0, 1, 1, 1], [0], [0]>} : vector<2x8x8xf32>, vector<2x8x8xf32>, vector<2x8x8xf32> -> vector<2x8x8xf32>
    "tpu.trace_stop"() : () -> ()
    %53 = vector.extract_strided_slice %44 {offsets = [0, 0, 16], sizes = [2, 8, 8], strides = [1, 1, 1]} : vector<2x8x32xf32> to vector<2x8x8xf32>
    %54 = vector.extract_strided_slice %45 {offsets = [0, 0, 16], sizes = [2, 8, 8], strides = [1, 1, 1]} : vector<2x8x32xf32> to vector<2x8x8xf32>
    "tpu.trace_start"() <{level = 10 : i32, message = "bqd,bkd->bqk"}> : () -> ()
    %cst_36 = arith.constant dense<0.000000e+00> : vector<2x8x8xf32>
    %55 = tpu.matmul %53, %54, %cst_36 {dimension_numbers = #tpu.dot_dimension_numbers<[2], [2], [1], [1], [0, 0, 0, 1, 1, 1], [0], [0]>} : vector<2x8x8xf32>, vector<2x8x8xf32>, vector<2x8x8xf32> -> vector<2x8x8xf32>
    "tpu.trace_stop"() : () -> ()
    %56 = vector.extract_strided_slice %44 {offsets = [0, 0, 24], sizes = [2, 8, 8], strides = [1, 1, 1]} : vector<2x8x32xf32> to vector<2x8x8xf32>
    %57 = vector.extract_strided_slice %45 {offsets = [0, 0, 24], sizes = [2, 8, 8], strides = [1, 1, 1]} : vector<2x8x32xf32> to vector<2x8x8xf32>
    "tpu.trace_start"() <{level = 10 : i32, message = "bqd,bkd->bqk"}> : () -> ()
    %cst_37 = arith.constant dense<0.000000e+00> : vector<2x8x8xf32>
    %58 = tpu.matmul %56, %57, %cst_37 {dimension_numbers = #tpu.dot_dimension_numbers<[2], [2], [1], [1], [0, 0, 0, 1, 1, 1], [0], [0]>} : vector<2x8x8xf32>, vector<2x8x8xf32>, vector<2x8x8xf32> -> vector<2x8x8xf32>
    "tpu.trace_stop"() : () -> ()
    %59 = vector.shape_cast %49 : vector<2x8x8xf32> to vector<1x2x8x8xf32>
    %60 = vector.shape_cast %52 : vector<2x8x8xf32> to vector<1x2x8x8xf32>
    %61 = vector.shape_cast %55 : vector<2x8x8xf32> to vector<1x2x8x8xf32>
    %62 = vector.shape_cast %58 : vector<2x8x8xf32> to vector<1x2x8x8xf32>
    %63 = tpu.concatenate %59, %60, %61, %62 in 0 : vector<1x2x8x8xf32>, vector<1x2x8x8xf32>, vector<1x2x8x8xf32>, vector<1x2x8x8xf32> -> vector<4x2x8x8xf32>
    %cst_38 = arith.constant 0.353553385 : f32
    %64 = vector.broadcast %cst_38 : f32 to vector<4x2x8x8xf32>
    %65 = arith.mulf %63, %64 : vector<4x2x8x8xf32>
    %66 = vector.shape_cast %1 : vector<2x1x8xf32> to vector<1x2x1x8xf32>
    %67 = vector.broadcast %66 : vector<1x2x1x8xf32> to vector<4x2x8x8xf32>
    %68 = arith.addf %65, %67 : vector<4x2x8x8xf32>
    %cst_39 = arith.constant dense<0xFF800000> : vector<4x2x8xf32>
    %69 = vector.multi_reduction <maximumf>, %68, %cst_39 [3] : vector<4x2x8x8xf32> to vector<4x2x8xf32>
    %70 = vector.shape_cast %69 : vector<4x2x8xf32> to vector<4x2x8x1xf32>
    %71 = vector.broadcast %70 : vector<4x2x8x1xf32> to vector<4x2x8x8xf32>
    %72 = arith.subf %68, %71 : vector<4x2x8x8xf32>
    %73 = math.exp %72 : vector<4x2x8x8xf32>
    %cst_40 = arith.constant dense<0.000000e+00> : vector<4x2x8xf32>
    %74 = vector.multi_reduction <add>, %73, %cst_40 [3] : vector<4x2x8x8xf32> to vector<4x2x8xf32>
    %75 = vector.shape_cast %74 : vector<4x2x8xf32> to vector<4x2x8x1xf32>
    %76 = vector.broadcast %75 : vector<4x2x8x1xf32> to vector<4x2x8x8xf32>
    %77 = arith.divf %73, %76 : vector<4x2x8x8xf32>
    %78 = vector.extract_strided_slice %46 {offsets = [0, 0, 0], sizes = [2, 8, 8], strides = [1, 1, 1]} : vector<2x8x32xf32> to vector<2x8x8xf32>
    %79 = vector.extract_strided_slice %77 {offsets = [0, 0, 0, 0], sizes = [1, 2, 8, 8], strides = [1, 1, 1, 1]} : vector<4x2x8x8xf32> to vector<1x2x8x8xf32>
    %80 = vector.shape_cast %79 : vector<1x2x8x8xf32> to vector<2x8x8xf32>
    "tpu.trace_start"() <{level = 10 : i32, message = "bqk,bkd->bqd"}> : () -> ()
    %cst_41 = arith.constant dense<0.000000e+00> : vector<2x8x8xf32>
    %81 = tpu.matmul %80, %78, %cst_41 {dimension_numbers = #tpu.dot_dimension_numbers<[2], [1], [1], [2], [0, 0, 0, 1, 1, 2], [0], [0]>} : vector<2x8x8xf32>, vector<2x8x8xf32>, vector<2x8x8xf32> -> vector<2x8x8xf32>
    "tpu.trace_stop"() : () -> ()
    %82 = vector.extract_strided_slice %46 {offsets = [0, 0, 8], sizes = [2, 8, 8], strides = [1, 1, 1]} : vector<2x8x32xf32> to vector<2x8x8xf32>
    %83 = vector.extract_strided_slice %77 {offsets = [1, 0, 0, 0], sizes = [1, 2, 8, 8], strides = [1, 1, 1, 1]} : vector<4x2x8x8xf32> to vector<1x2x8x8xf32>
    %84 = vector.shape_cast %83 : vector<1x2x8x8xf32> to vector<2x8x8xf32>
    "tpu.trace_start"() <{level = 10 : i32, message = "bqk,bkd->bqd"}> : () -> ()
    %cst_42 = arith.constant dense<0.000000e+00> : vector<2x8x8xf32>
    %85 = tpu.matmul %84, %82, %cst_42 {dimension_numbers = #tpu.dot_dimension_numbers<[2], [1], [1], [2], [0, 0, 0, 1, 1, 2], [0], [0]>} : vector<2x8x8xf32>, vector<2x8x8xf32>, vector<2x8x8xf32> -> vector<2x8x8xf32>
    "tpu.trace_stop"() : () -> ()
    %86 = vector.extract_strided_slice %46 {offsets = [0, 0, 16], sizes = [2, 8, 8], strides = [1, 1, 1]} : vector<2x8x32xf32> to vector<2x8x8xf32>
    %87 = vector.extract_strided_slice %77 {offsets = [2, 0, 0, 0], sizes = [1, 2, 8, 8], strides = [1, 1, 1, 1]} : vector<4x2x8x8xf32> to vector<1x2x8x8xf32>
    %88 = vector.shape_cast %87 : vector<1x2x8x8xf32> to vector<2x8x8xf32>
    "tpu.trace_start"() <{level = 10 : i32, message = "bqk,bkd->bqd"}> : () -> ()
    %cst_43 = arith.constant dense<0.000000e+00> : vector<2x8x8xf32>
    %89 = tpu.matmul %88, %86, %cst_43 {dimension_numbers = #tpu.dot_dimension_numbers<[2], [1], [1], [2], [0, 0, 0, 1, 1, 2], [0], [0]>} : vector<2x8x8xf32>, vector<2x8x8xf32>, vector<2x8x8xf32> -> vector<2x8x8xf32>
    "tpu.trace_stop"() : () -> ()
    %90 = vector.extract_strided_slice %46 {offsets = [0, 0, 24], sizes = [2, 8, 8], strides = [1, 1, 1]} : vector<2x8x32xf32> to vector<2x8x8xf32>
    %91 = vector.extract_strided_slice %77 {offsets = [3, 0, 0, 0], sizes = [1, 2, 8, 8], strides = [1, 1, 1, 1]} : vector<4x2x8x8xf32> to vector<1x2x8x8xf32>
    %92 = vector.shape_cast %91 : vector<1x2x8x8xf32> to vector<2x8x8xf32>
    "tpu.trace_start"() <{level = 10 : i32, message = "bqk,bkd->bqd"}> : () -> ()
    %cst_44 = arith.constant dense<0.000000e+00> : vector<2x8x8xf32>
    %93 = tpu.matmul %92, %90, %cst_44 {dimension_numbers = #tpu.dot_dimension_numbers<[2], [1], [1], [2], [0, 0, 0, 1, 1, 2], [0], [0]>} : vector<2x8x8xf32>, vector<2x8x8xf32>, vector<2x8x8xf32> -> vector<2x8x8xf32>
    "tpu.trace_stop"() : () -> ()
    %94 = tpu.concatenate %81, %85, %89, %93 in 2 : vector<2x8x8xf32>, vector<2x8x8xf32>, vector<2x8x8xf32>, vector<2x8x8xf32> -> vector<2x8x32xf32>
    %95 = vector.shape_cast %94 : vector<2x8x32xf32> to vector<16x32xf32>
    %cst_45 = arith.constant dense<0.000000e+00> : vector<16x32xf32>
    %96 = tpu.matmul %95, %35, %cst_45 {dimension_numbers = #tpu.dot_dimension_numbers<[1], [0], [0], [1], [0, 0, 1, 1], [], []>} : vector<16x32xf32>, vector<32x32xf32>, vector<16x32xf32> -> vector<16x32xf32>
    %97 = vector.broadcast %37 : vector<1x32xf32> to vector<16x32xf32>
    %98 = arith.addf %96, %97 : vector<16x32xf32>
    %99 = arith.addf %98, %27 : vector<16x32xf32>
    %100 = vector.extract_strided_slice %29 {offsets = [0, 0], sizes = [1, 32], strides = [1, 1]} : vector<4x32xf32> to vector<1x32xf32>
    %101 = vector.extract_strided_slice %29 {offsets = [1, 0], sizes = [1, 32], strides = [1, 1]} : vector<4x32xf32> to vector<1x32xf32>
    %cst_46 = arith.constant dense<0.000000e+00> : vector<16xf32>
    %102 = vector.multi_reduction <add>, %99, %cst_46 [1] : vector<16x32xf32> to vector<16xf32>
    %103 = vector.shape_cast %102 : vector<16xf32> to vector<16x1xf32>
    %cst_47 = arith.constant 3.200000e+01 : f32
    %104 = vector.broadcast %cst_47 : f32 to vector<16x1xf32>
    %105 = arith.divf %103, %104 : vector<16x1xf32>
    %106 = vector.broadcast %105 : vector<16x1xf32> to vector<16x32xf32>
    %107 = arith.subf %99, %106 : vector<16x32xf32>
    %108 = arith.mulf %107, %107 : vector<16x32xf32>
    %cst_48 = arith.constant dense<0.000000e+00> : vector<16xf32>
    %109 = vector.multi_reduction <add>, %108, %cst_48 [1] : vector<16x32xf32> to vector<16xf32>
    %110 = vector.shape_cast %109 : vector<16xf32> to vector<16x1xf32>
    %cst_49 = arith.constant 3.200000e+01 : f32
    %111 = vector.broadcast %cst_49 : f32 to vector<16x1xf32>
    %112 = arith.divf %110, %111 : vector<16x1xf32>
    %cst_50 = arith.constant 9.99999996E-13 : f32
    %113 = vector.broadcast %cst_50 : f32 to vector<16x1xf32>
    %114 = arith.addf %112, %113 : vector<16x1xf32>
    %115 = math.rsqrt %114 : vector<16x1xf32>
    %116 = vector.broadcast %115 : vector<16x1xf32> to vector<16x32xf32>
    %117 = arith.mulf %107, %116 : vector<16x32xf32>
    %118 = vector.broadcast %100 : vector<1x32xf32> to vector<16x32xf32>
    %119 = arith.mulf %117, %118 : vector<16x32xf32>
    %120 = vector.broadcast %101 : vector<1x32xf32> to vector<16x32xf32>
    %121 = arith.addf %119, %120 : vector<16x32xf32>
    %c0_51 = arith.constant 0 : index
    %c0_52 = arith.constant 0 : index
    %c0_53 = arith.constant 0 : index
    %122 = vector.load %arg12[%c0_51, %c0_52, %c0_53] : memref<2x32x64xf32, #tpu.memory_space<vmem>>, vector<1x32x64xf32>
    %123 = vector.shape_cast %122 : vector<1x32x64xf32> to vector<32x64xf32>
    %cst_54 = arith.constant dense<0.000000e+00> : vector<16x64xf32>
    %124 = tpu.matmul %121, %123, %cst_54 {dimension_numbers = #tpu.dot_dimension_numbers<[1], [0], [0], [1], [0, 0, 1, 1], [], []>} : vector<16x32xf32>, vector<32x64xf32>, vector<16x64xf32> -> vector<16x64xf32>
    %c0_55 = arith.constant 0 : index
    %c0_56 = arith.constant 0 : index
    %c0_57 = arith.constant 0 : index
    %125 = vector.load %arg13[%c0_55, %c0_56, %c0_57] : memref<2x1x64xf32, #tpu.memory_space<vmem>>, vector<1x1x64xf32>
    %126 = vector.shape_cast %125 : vector<1x1x64xf32> to vector<1x64xf32>
    %127 = vector.broadcast %126 : vector<1x64xf32> to vector<16x64xf32>
    %128 = arith.addf %124, %127 : vector<16x64xf32>
    %cst_58 = arith.constant 5.000000e-01 : f32
    %129 = vector.broadcast %cst_58 : f32 to vector<16x64xf32>
    %130 = arith.mulf %129, %128 : vector<16x64xf32>
    %cst_59 = arith.constant 4.471500e-02 : f32
    %131 = vector.broadcast %cst_59 : f32 to vector<16x64xf32>
    %132 = arith.mulf %131, %128 : vector<16x64xf32>
    %133 = arith.mulf %132, %128 : vector<16x64xf32>
    %134 = arith.mulf %133, %128 : vector<16x64xf32>
    %135 = arith.addf %128, %134 : vector<16x64xf32>
    %cst_60 = arith.constant 0.797884583 : f32
    %136 = vector.broadcast %cst_60 : f32 to vector<16x64xf32>
    %137 = arith.mulf %136, %135 : vector<16x64xf32>
    %138 = math.tanh %137 : vector<16x64xf32>
    %cst_61 = arith.constant 1.000000e+00 : f32
    %139 = vector.broadcast %cst_61 : f32 to vector<16x64xf32>
    %140 = arith.addf %139, %138 : vector<16x64xf32>
    %141 = arith.mulf %130, %140 : vector<16x64xf32>
    %c0_62 = arith.constant 0 : index
    %c0_63 = arith.constant 0 : index
    %c0_64 = arith.constant 0 : index
    %142 = vector.load %arg14[%c0_62, %c0_63, %c0_64] : memref<2x64x32xf32, #tpu.memory_space<vmem>>, vector<1x64x32xf32>
    %143 = vector.shape_cast %142 : vector<1x64x32xf32> to vector<64x32xf32>
    %cst_65 = arith.constant dense<0.000000e+00> : vector<16x32xf32>
    %144 = tpu.matmul %141, %143, %cst_65 {dimension_numbers = #tpu.dot_dimension_numbers<[1], [0], [0], [1], [0, 0, 1, 1], [], []>} : vector<16x64xf32>, vector<64x32xf32>, vector<16x32xf32> -> vector<16x32xf32>
    %c0_66 = arith.constant 0 : index
    %c0_67 = arith.constant 0 : index
    %c0_68 = arith.constant 0 : index
    %145 = vector.load %arg15[%c0_66, %c0_67, %c0_68] : memref<2x1x32xf32, #tpu.memory_space<vmem>>, vector<1x1x32xf32>
    %146 = vector.shape_cast %145 : vector<1x1x32xf32> to vector<1x32xf32>
    %147 = vector.broadcast %146 : vector<1x32xf32> to vector<16x32xf32>
    %148 = arith.addf %144, %147 : vector<16x32xf32>
    %149 = arith.addf %148, %121 : vector<16x32xf32>
    %150 = vector.extract_strided_slice %29 {offsets = [2, 0], sizes = [1, 32], strides = [1, 1]} : vector<4x32xf32> to vector<1x32xf32>
    %151 = vector.extract_strided_slice %29 {offsets = [3, 0], sizes = [1, 32], strides = [1, 1]} : vector<4x32xf32> to vector<1x32xf32>
    %cst_69 = arith.constant dense<0.000000e+00> : vector<16xf32>
    %152 = vector.multi_reduction <add>, %149, %cst_69 [1] : vector<16x32xf32> to vector<16xf32>
    %153 = vector.shape_cast %152 : vector<16xf32> to vector<16x1xf32>
    %cst_70 = arith.constant 3.200000e+01 : f32
    %154 = vector.broadcast %cst_70 : f32 to vector<16x1xf32>
    %155 = arith.divf %153, %154 : vector<16x1xf32>
    %156 = vector.broadcast %155 : vector<16x1xf32> to vector<16x32xf32>
    %157 = arith.subf %149, %156 : vector<16x32xf32>
    %158 = arith.mulf %157, %157 : vector<16x32xf32>
    %cst_71 = arith.constant dense<0.000000e+00> : vector<16xf32>
    %159 = vector.multi_reduction <add>, %158, %cst_71 [1] : vector<16x32xf32> to vector<16xf32>
    %160 = vector.shape_cast %159 : vector<16xf32> to vector<16x1xf32>
    %cst_72 = arith.constant 3.200000e+01 : f32
    %161 = vector.broadcast %cst_72 : f32 to vector<16x1xf32>
    %162 = arith.divf %160, %161 : vector<16x1xf32>
    %cst_73 = arith.constant 9.99999996E-13 : f32
    %163 = vector.broadcast %cst_73 : f32 to vector<16x1xf32>
    %164 = arith.addf %162, %163 : vector<16x1xf32>
    %165 = math.rsqrt %164 : vector<16x1xf32>
    %166 = vector.broadcast %165 : vector<16x1xf32> to vector<16x32xf32>
    %167 = arith.mulf %157, %166 : vector<16x32xf32>
    %168 = vector.broadcast %150 : vector<1x32xf32> to vector<16x32xf32>
    %169 = arith.mulf %167, %168 : vector<16x32xf32>
    %170 = vector.broadcast %151 : vector<1x32xf32> to vector<16x32xf32>
    %171 = arith.addf %169, %170 : vector<16x32xf32>
    %c1 = arith.constant 1 : index
    %c0_74 = arith.constant 0 : index
    %c0_75 = arith.constant 0 : index
    %172 = vector.load %arg16[%c1, %c0_74, %c0_75] : memref<2x4x32xf32, #tpu.memory_space<vmem>>, vector<1x4x32xf32>
    %173 = vector.shape_cast %172 : vector<1x4x32xf32> to vector<4x32xf32>
    %c1_76 = arith.constant 1 : index
    %c0_77 = arith.constant 0 : index
    %c0_78 = arith.constant 0 : index
    %174 = vector.load %arg8[%c1_76, %c0_77, %c0_78] : memref<2x32x96xf32, #tpu.memory_space<vmem>>, vector<1x32x96xf32>
    %175 = vector.shape_cast %174 : vector<1x32x96xf32> to vector<32x96xf32>
    %c1_79 = arith.constant 1 : index
    %c0_80 = arith.constant 0 : index
    %c0_81 = arith.constant 0 : index
    %176 = vector.load %arg9[%c1_79, %c0_80, %c0_81] : memref<2x1x96xf32, #tpu.memory_space<vmem>>, vector<1x1x96xf32>
    %177 = vector.shape_cast %176 : vector<1x1x96xf32> to vector<1x96xf32>
    %c1_82 = arith.constant 1 : index
    %c0_83 = arith.constant 0 : index
    %c0_84 = arith.constant 0 : index
    %178 = vector.load %arg10[%c1_82, %c0_83, %c0_84] : memref<2x32x32xf32, #tpu.memory_space<vmem>>, vector<1x32x32xf32>
    %179 = vector.shape_cast %178 : vector<1x32x32xf32> to vector<32x32xf32>
    %c1_85 = arith.constant 1 : index
    %c0_86 = arith.constant 0 : index
    %c0_87 = arith.constant 0 : index
    %180 = vector.load %arg11[%c1_85, %c0_86, %c0_87] : memref<2x1x32xf32, #tpu.memory_space<vmem>>, vector<1x1x32xf32>
    %181 = vector.shape_cast %180 : vector<1x1x32xf32> to vector<1x32xf32>
    %cst_88 = arith.constant dense<0.000000e+00> : vector<16x96xf32>
    %182 = tpu.matmul %171, %175, %cst_88 {dimension_numbers = #tpu.dot_dimension_numbers<[1], [0], [0], [1], [0, 0, 1, 1], [], []>} : vector<16x32xf32>, vector<32x96xf32>, vector<16x96xf32> -> vector<16x96xf32>
    %183 = vector.broadcast %177 : vector<1x96xf32> to vector<16x96xf32>
    %184 = arith.addf %182, %183 : vector<16x96xf32>
    %185 = vector.extract_strided_slice %184 {offsets = [0, 0], sizes = [16, 32], strides = [1, 1]} : vector<16x96xf32> to vector<16x32xf32>
    %186 = vector.extract_strided_slice %184 {offsets = [0, 32], sizes = [16, 32], strides = [1, 1]} : vector<16x96xf32> to vector<16x32xf32>
    %187 = vector.extract_strided_slice %184 {offsets = [0, 64], sizes = [16, 32], strides = [1, 1]} : vector<16x96xf32> to vector<16x32xf32>
    %188 = vector.shape_cast %185 : vector<16x32xf32> to vector<2x8x32xf32>
    %189 = vector.shape_cast %186 : vector<16x32xf32> to vector<2x8x32xf32>
    %190 = vector.shape_cast %187 : vector<16x32xf32> to vector<2x8x32xf32>
    %191 = vector.extract_strided_slice %188 {offsets = [0, 0, 0], sizes = [2, 8, 8], strides = [1, 1, 1]} : vector<2x8x32xf32> to vector<2x8x8xf32>
    %192 = vector.extract_strided_slice %189 {offsets = [0, 0, 0], sizes = [2, 8, 8], strides = [1, 1, 1]} : vector<2x8x32xf32> to vector<2x8x8xf32>
    "tpu.trace_start"() <{level = 10 : i32, message = "bqd,bkd->bqk"}> : () -> ()
    %cst_89 = arith.constant dense<0.000000e+00> : vector<2x8x8xf32>
    %193 = tpu.matmul %191, %192, %cst_89 {dimension_numbers = #tpu.dot_dimension_numbers<[2], [2], [1], [1], [0, 0, 0, 1, 1, 1], [0], [0]>} : vector<2x8x8xf32>, vector<2x8x8xf32>, vector<2x8x8xf32> -> vector<2x8x8xf32>
    "tpu.trace_stop"() : () -> ()
    %194 = vector.extract_strided_slice %188 {offsets = [0, 0, 8], sizes = [2, 8, 8], strides = [1, 1, 1]} : vector<2x8x32xf32> to vector<2x8x8xf32>
    %195 = vector.extract_strided_slice %189 {offsets = [0, 0, 8], sizes = [2, 8, 8], strides = [1, 1, 1]} : vector<2x8x32xf32> to vector<2x8x8xf32>
    "tpu.trace_start"() <{level = 10 : i32, message = "bqd,bkd->bqk"}> : () -> ()
    %cst_90 = arith.constant dense<0.000000e+00> : vector<2x8x8xf32>
    %196 = tpu.matmul %194, %195, %cst_90 {dimension_numbers = #tpu.dot_dimension_numbers<[2], [2], [1], [1], [0, 0, 0, 1, 1, 1], [0], [0]>} : vector<2x8x8xf32>, vector<2x8x8xf32>, vector<2x8x8xf32> -> vector<2x8x8xf32>
    "tpu.trace_stop"() : () -> ()
    %197 = vector.extract_strided_slice %188 {offsets = [0, 0, 16], sizes = [2, 8, 8], strides = [1, 1, 1]} : vector<2x8x32xf32> to vector<2x8x8xf32>
    %198 = vector.extract_strided_slice %189 {offsets = [0, 0, 16], sizes = [2, 8, 8], strides = [1, 1, 1]} : vector<2x8x32xf32> to vector<2x8x8xf32>
    "tpu.trace_start"() <{level = 10 : i32, message = "bqd,bkd->bqk"}> : () -> ()
    %cst_91 = arith.constant dense<0.000000e+00> : vector<2x8x8xf32>
    %199 = tpu.matmul %197, %198, %cst_91 {dimension_numbers = #tpu.dot_dimension_numbers<[2], [2], [1], [1], [0, 0, 0, 1, 1, 1], [0], [0]>} : vector<2x8x8xf32>, vector<2x8x8xf32>, vector<2x8x8xf32> -> vector<2x8x8xf32>
    "tpu.trace_stop"() : () -> ()
    %200 = vector.extract_strided_slice %188 {offsets = [0, 0, 24], sizes = [2, 8, 8], strides = [1, 1, 1]} : vector<2x8x32xf32> to vector<2x8x8xf32>
    %201 = vector.extract_strided_slice %189 {offsets = [0, 0, 24], sizes = [2, 8, 8], strides = [1, 1, 1]} : vector<2x8x32xf32> to vector<2x8x8xf32>
    "tpu.trace_start"() <{level = 10 : i32, message = "bqd,bkd->bqk"}> : () -> ()
    %cst_92 = arith.constant dense<0.000000e+00> : vector<2x8x8xf32>
    %202 = tpu.matmul %200, %201, %cst_92 {dimension_numbers = #tpu.dot_dimension_numbers<[2], [2], [1], [1], [0, 0, 0, 1, 1, 1], [0], [0]>} : vector<2x8x8xf32>, vector<2x8x8xf32>, vector<2x8x8xf32> -> vector<2x8x8xf32>
    "tpu.trace_stop"() : () -> ()
    %203 = vector.shape_cast %193 : vector<2x8x8xf32> to vector<1x2x8x8xf32>
    %204 = vector.shape_cast %196 : vector<2x8x8xf32> to vector<1x2x8x8xf32>
    %205 = vector.shape_cast %199 : vector<2x8x8xf32> to vector<1x2x8x8xf32>
    %206 = vector.shape_cast %202 : vector<2x8x8xf32> to vector<1x2x8x8xf32>
    %207 = tpu.concatenate %203, %204, %205, %206 in 0 : vector<1x2x8x8xf32>, vector<1x2x8x8xf32>, vector<1x2x8x8xf32>, vector<1x2x8x8xf32> -> vector<4x2x8x8xf32>
    %cst_93 = arith.constant 0.353553385 : f32
    %208 = vector.broadcast %cst_93 : f32 to vector<4x2x8x8xf32>
    %209 = arith.mulf %207, %208 : vector<4x2x8x8xf32>
    %210 = vector.shape_cast %1 : vector<2x1x8xf32> to vector<1x2x1x8xf32>
    %211 = vector.broadcast %210 : vector<1x2x1x8xf32> to vector<4x2x8x8xf32>
    %212 = arith.addf %209, %211 : vector<4x2x8x8xf32>
    %cst_94 = arith.constant dense<0xFF800000> : vector<4x2x8xf32>
    %213 = vector.multi_reduction <maximumf>, %212, %cst_94 [3] : vector<4x2x8x8xf32> to vector<4x2x8xf32>
    %214 = vector.shape_cast %213 : vector<4x2x8xf32> to vector<4x2x8x1xf32>
    %215 = vector.broadcast %214 : vector<4x2x8x1xf32> to vector<4x2x8x8xf32>
    %216 = arith.subf %212, %215 : vector<4x2x8x8xf32>
    %217 = math.exp %216 : vector<4x2x8x8xf32>
    %cst_95 = arith.constant dense<0.000000e+00> : vector<4x2x8xf32>
    %218 = vector.multi_reduction <add>, %217, %cst_95 [3] : vector<4x2x8x8xf32> to vector<4x2x8xf32>
    %219 = vector.shape_cast %218 : vector<4x2x8xf32> to vector<4x2x8x1xf32>
    %220 = vector.broadcast %219 : vector<4x2x8x1xf32> to vector<4x2x8x8xf32>
    %221 = arith.divf %217, %220 : vector<4x2x8x8xf32>
    %222 = vector.extract_strided_slice %190 {offsets = [0, 0, 0], sizes = [2, 8, 8], strides = [1, 1, 1]} : vector<2x8x32xf32> to vector<2x8x8xf32>
    %223 = vector.extract_strided_slice %221 {offsets = [0, 0, 0, 0], sizes = [1, 2, 8, 8], strides = [1, 1, 1, 1]} : vector<4x2x8x8xf32> to vector<1x2x8x8xf32>
    %224 = vector.shape_cast %223 : vector<1x2x8x8xf32> to vector<2x8x8xf32>
    "tpu.trace_start"() <{level = 10 : i32, message = "bqk,bkd->bqd"}> : () -> ()
    %cst_96 = arith.constant dense<0.000000e+00> : vector<2x8x8xf32>
    %225 = tpu.matmul %224, %222, %cst_96 {dimension_numbers = #tpu.dot_dimension_numbers<[2], [1], [1], [2], [0, 0, 0, 1, 1, 2], [0], [0]>} : vector<2x8x8xf32>, vector<2x8x8xf32>, vector<2x8x8xf32> -> vector<2x8x8xf32>
    "tpu.trace_stop"() : () -> ()
    %226 = vector.extract_strided_slice %190 {offsets = [0, 0, 8], sizes = [2, 8, 8], strides = [1, 1, 1]} : vector<2x8x32xf32> to vector<2x8x8xf32>
    %227 = vector.extract_strided_slice %221 {offsets = [1, 0, 0, 0], sizes = [1, 2, 8, 8], strides = [1, 1, 1, 1]} : vector<4x2x8x8xf32> to vector<1x2x8x8xf32>
    %228 = vector.shape_cast %227 : vector<1x2x8x8xf32> to vector<2x8x8xf32>
    "tpu.trace_start"() <{level = 10 : i32, message = "bqk,bkd->bqd"}> : () -> ()
    %cst_97 = arith.constant dense<0.000000e+00> : vector<2x8x8xf32>
    %229 = tpu.matmul %228, %226, %cst_97 {dimension_numbers = #tpu.dot_dimension_numbers<[2], [1], [1], [2], [0, 0, 0, 1, 1, 2], [0], [0]>} : vector<2x8x8xf32>, vector<2x8x8xf32>, vector<2x8x8xf32> -> vector<2x8x8xf32>
    "tpu.trace_stop"() : () -> ()
    %230 = vector.extract_strided_slice %190 {offsets = [0, 0, 16], sizes = [2, 8, 8], strides = [1, 1, 1]} : vector<2x8x32xf32> to vector<2x8x8xf32>
    %231 = vector.extract_strided_slice %221 {offsets = [2, 0, 0, 0], sizes = [1, 2, 8, 8], strides = [1, 1, 1, 1]} : vector<4x2x8x8xf32> to vector<1x2x8x8xf32>
    %232 = vector.shape_cast %231 : vector<1x2x8x8xf32> to vector<2x8x8xf32>
    "tpu.trace_start"() <{level = 10 : i32, message = "bqk,bkd->bqd"}> : () -> ()
    %cst_98 = arith.constant dense<0.000000e+00> : vector<2x8x8xf32>
    %233 = tpu.matmul %232, %230, %cst_98 {dimension_numbers = #tpu.dot_dimension_numbers<[2], [1], [1], [2], [0, 0, 0, 1, 1, 2], [0], [0]>} : vector<2x8x8xf32>, vector<2x8x8xf32>, vector<2x8x8xf32> -> vector<2x8x8xf32>
    "tpu.trace_stop"() : () -> ()
    %234 = vector.extract_strided_slice %190 {offsets = [0, 0, 24], sizes = [2, 8, 8], strides = [1, 1, 1]} : vector<2x8x32xf32> to vector<2x8x8xf32>
    %235 = vector.extract_strided_slice %221 {offsets = [3, 0, 0, 0], sizes = [1, 2, 8, 8], strides = [1, 1, 1, 1]} : vector<4x2x8x8xf32> to vector<1x2x8x8xf32>
    %236 = vector.shape_cast %235 : vector<1x2x8x8xf32> to vector<2x8x8xf32>
    "tpu.trace_start"() <{level = 10 : i32, message = "bqk,bkd->bqd"}> : () -> ()
    %cst_99 = arith.constant dense<0.000000e+00> : vector<2x8x8xf32>
    %237 = tpu.matmul %236, %234, %cst_99 {dimension_numbers = #tpu.dot_dimension_numbers<[2], [1], [1], [2], [0, 0, 0, 1, 1, 2], [0], [0]>} : vector<2x8x8xf32>, vector<2x8x8xf32>, vector<2x8x8xf32> -> vector<2x8x8xf32>
    "tpu.trace_stop"() : () -> ()
    %238 = tpu.concatenate %225, %229, %233, %237 in 2 : vector<2x8x8xf32>, vector<2x8x8xf32>, vector<2x8x8xf32>, vector<2x8x8xf32> -> vector<2x8x32xf32>
    %239 = vector.shape_cast %238 : vector<2x8x32xf32> to vector<16x32xf32>
    %cst_100 = arith.constant dense<0.000000e+00> : vector<16x32xf32>
    %240 = tpu.matmul %239, %179, %cst_100 {dimension_numbers = #tpu.dot_dimension_numbers<[1], [0], [0], [1], [0, 0, 1, 1], [], []>} : vector<16x32xf32>, vector<32x32xf32>, vector<16x32xf32> -> vector<16x32xf32>
    %241 = vector.broadcast %181 : vector<1x32xf32> to vector<16x32xf32>
    %242 = arith.addf %240, %241 : vector<16x32xf32>
    %243 = arith.addf %242, %171 : vector<16x32xf32>
    %244 = vector.extract_strided_slice %173 {offsets = [0, 0], sizes = [1, 32], strides = [1, 1]} : vector<4x32xf32> to vector<1x32xf32>
    %245 = vector.extract_strided_slice %173 {offsets = [1, 0], sizes = [1, 32], strides = [1, 1]} : vector<4x32xf32> to vector<1x32xf32>
    %cst_101 = arith.constant dense<0.000000e+00> : vector<16xf32>
    %246 = vector.multi_reduction <add>, %243, %cst_101 [1] : vector<16x32xf32> to vector<16xf32>
    %247 = vector.shape_cast %246 : vector<16xf32> to vector<16x1xf32>
    %cst_102 = arith.constant 3.200000e+01 : f32
    %248 = vector.broadcast %cst_102 : f32 to vector<16x1xf32>
    %249 = arith.divf %247, %248 : vector<16x1xf32>
    %250 = vector.broadcast %249 : vector<16x1xf32> to vector<16x32xf32>
    %251 = arith.subf %243, %250 : vector<16x32xf32>
    %252 = arith.mulf %251, %251 : vector<16x32xf32>
    %cst_103 = arith.constant dense<0.000000e+00> : vector<16xf32>
    %253 = vector.multi_reduction <add>, %252, %cst_103 [1] : vector<16x32xf32> to vector<16xf32>
    %254 = vector.shape_cast %253 : vector<16xf32> to vector<16x1xf32>
    %cst_104 = arith.constant 3.200000e+01 : f32
    %255 = vector.broadcast %cst_104 : f32 to vector<16x1xf32>
    %256 = arith.divf %254, %255 : vector<16x1xf32>
    %cst_105 = arith.constant 9.99999996E-13 : f32
    %257 = vector.broadcast %cst_105 : f32 to vector<16x1xf32>
    %258 = arith.addf %256, %257 : vector<16x1xf32>
    %259 = math.rsqrt %258 : vector<16x1xf32>
    %260 = vector.broadcast %259 : vector<16x1xf32> to vector<16x32xf32>
    %261 = arith.mulf %251, %260 : vector<16x32xf32>
    %262 = vector.broadcast %244 : vector<1x32xf32> to vector<16x32xf32>
    %263 = arith.mulf %261, %262 : vector<16x32xf32>
    %264 = vector.broadcast %245 : vector<1x32xf32> to vector<16x32xf32>
    %265 = arith.addf %263, %264 : vector<16x32xf32>
    %c1_106 = arith.constant 1 : index
    %c0_107 = arith.constant 0 : index
    %c0_108 = arith.constant 0 : index
    %266 = vector.load %arg12[%c1_106, %c0_107, %c0_108] : memref<2x32x64xf32, #tpu.memory_space<vmem>>, vector<1x32x64xf32>
    %267 = vector.shape_cast %266 : vector<1x32x64xf32> to vector<32x64xf32>
    %cst_109 = arith.constant dense<0.000000e+00> : vector<16x64xf32>
    %268 = tpu.matmul %265, %267, %cst_109 {dimension_numbers = #tpu.dot_dimension_numbers<[1], [0], [0], [1], [0, 0, 1, 1], [], []>} : vector<16x32xf32>, vector<32x64xf32>, vector<16x64xf32> -> vector<16x64xf32>
    %c1_110 = arith.constant 1 : index
    %c0_111 = arith.constant 0 : index
    %c0_112 = arith.constant 0 : index
    %269 = vector.load %arg13[%c1_110, %c0_111, %c0_112] : memref<2x1x64xf32, #tpu.memory_space<vmem>>, vector<1x1x64xf32>
    %270 = vector.shape_cast %269 : vector<1x1x64xf32> to vector<1x64xf32>
    %271 = vector.broadcast %270 : vector<1x64xf32> to vector<16x64xf32>
    %272 = arith.addf %268, %271 : vector<16x64xf32>
    %cst_113 = arith.constant 5.000000e-01 : f32
    %273 = vector.broadcast %cst_113 : f32 to vector<16x64xf32>
    %274 = arith.mulf %273, %272 : vector<16x64xf32>
    %cst_114 = arith.constant 4.471500e-02 : f32
    %275 = vector.broadcast %cst_114 : f32 to vector<16x64xf32>
    %276 = arith.mulf %275, %272 : vector<16x64xf32>
    %277 = arith.mulf %276, %272 : vector<16x64xf32>
    %278 = arith.mulf %277, %272 : vector<16x64xf32>
    %279 = arith.addf %272, %278 : vector<16x64xf32>
    %cst_115 = arith.constant 0.797884583 : f32
    %280 = vector.broadcast %cst_115 : f32 to vector<16x64xf32>
    %281 = arith.mulf %280, %279 : vector<16x64xf32>
    %282 = math.tanh %281 : vector<16x64xf32>
    %cst_116 = arith.constant 1.000000e+00 : f32
    %283 = vector.broadcast %cst_116 : f32 to vector<16x64xf32>
    %284 = arith.addf %283, %282 : vector<16x64xf32>
    %285 = arith.mulf %274, %284 : vector<16x64xf32>
    %c1_117 = arith.constant 1 : index
    %c0_118 = arith.constant 0 : index
    %c0_119 = arith.constant 0 : index
    %286 = vector.load %arg14[%c1_117, %c0_118, %c0_119] : memref<2x64x32xf32, #tpu.memory_space<vmem>>, vector<1x64x32xf32>
    %287 = vector.shape_cast %286 : vector<1x64x32xf32> to vector<64x32xf32>
    %cst_120 = arith.constant dense<0.000000e+00> : vector<16x32xf32>
    %288 = tpu.matmul %285, %287, %cst_120 {dimension_numbers = #tpu.dot_dimension_numbers<[1], [0], [0], [1], [0, 0, 1, 1], [], []>} : vector<16x64xf32>, vector<64x32xf32>, vector<16x32xf32> -> vector<16x32xf32>
    %c1_121 = arith.constant 1 : index
    %c0_122 = arith.constant 0 : index
    %c0_123 = arith.constant 0 : index
    %289 = vector.load %arg15[%c1_121, %c0_122, %c0_123] : memref<2x1x32xf32, #tpu.memory_space<vmem>>, vector<1x1x32xf32>
    %290 = vector.shape_cast %289 : vector<1x1x32xf32> to vector<1x32xf32>
    %291 = vector.broadcast %290 : vector<1x32xf32> to vector<16x32xf32>
    %292 = arith.addf %288, %291 : vector<16x32xf32>
    %293 = arith.addf %292, %265 : vector<16x32xf32>
    %294 = vector.extract_strided_slice %173 {offsets = [2, 0], sizes = [1, 32], strides = [1, 1]} : vector<4x32xf32> to vector<1x32xf32>
    %295 = vector.extract_strided_slice %173 {offsets = [3, 0], sizes = [1, 32], strides = [1, 1]} : vector<4x32xf32> to vector<1x32xf32>
    %cst_124 = arith.constant dense<0.000000e+00> : vector<16xf32>
    %296 = vector.multi_reduction <add>, %293, %cst_124 [1] : vector<16x32xf32> to vector<16xf32>
    %297 = vector.shape_cast %296 : vector<16xf32> to vector<16x1xf32>
    %cst_125 = arith.constant 3.200000e+01 : f32
    %298 = vector.broadcast %cst_125 : f32 to vector<16x1xf32>
    %299 = arith.divf %297, %298 : vector<16x1xf32>
    %300 = vector.broadcast %299 : vector<16x1xf32> to vector<16x32xf32>
    %301 = arith.subf %293, %300 : vector<16x32xf32>
    %302 = arith.mulf %301, %301 : vector<16x32xf32>
    %cst_126 = arith.constant dense<0.000000e+00> : vector<16xf32>
    %303 = vector.multi_reduction <add>, %302, %cst_126 [1] : vector<16x32xf32> to vector<16xf32>
    %304 = vector.shape_cast %303 : vector<16xf32> to vector<16x1xf32>
    %cst_127 = arith.constant 3.200000e+01 : f32
    %305 = vector.broadcast %cst_127 : f32 to vector<16x1xf32>
    %306 = arith.divf %304, %305 : vector<16x1xf32>
    %cst_128 = arith.constant 9.99999996E-13 : f32
    %307 = vector.broadcast %cst_128 : f32 to vector<16x1xf32>
    %308 = arith.addf %306, %307 : vector<16x1xf32>
    %309 = math.rsqrt %308 : vector<16x1xf32>
    %310 = vector.broadcast %309 : vector<16x1xf32> to vector<16x32xf32>
    %311 = arith.mulf %301, %310 : vector<16x32xf32>
    %312 = vector.broadcast %294 : vector<1x32xf32> to vector<16x32xf32>
    %313 = arith.mulf %311, %312 : vector<16x32xf32>
    %314 = vector.broadcast %295 : vector<1x32xf32> to vector<16x32xf32>
    %315 = arith.addf %313, %314 : vector<16x32xf32>
    %c0_129 = arith.constant 0 : index
    %c0_130 = arith.constant 0 : index
    %316 = vector.load %arg1[%c0_129, %c0_130] : memref<16x32xf32, #tpu.memory_space<vmem>>, vector<16x32xf32>
    %317 = vector.extract_strided_slice %0 {offsets = [2, 0], sizes = [1, 32], strides = [1, 1]} : vector<4x32xf32> to vector<1x32xf32>
    %318 = vector.extract_strided_slice %0 {offsets = [3, 0], sizes = [1, 32], strides = [1, 1]} : vector<4x32xf32> to vector<1x32xf32>
    %cst_131 = arith.constant dense<0.000000e+00> : vector<16xf32>
    %319 = vector.multi_reduction <add>, %316, %cst_131 [1] : vector<16x32xf32> to vector<16xf32>
    %320 = vector.shape_cast %319 : vector<16xf32> to vector<16x1xf32>
    %cst_132 = arith.constant 3.200000e+01 : f32
    %321 = vector.broadcast %cst_132 : f32 to vector<16x1xf32>
    %322 = arith.divf %320, %321 : vector<16x1xf32>
    %323 = vector.broadcast %322 : vector<16x1xf32> to vector<16x32xf32>
    %324 = arith.subf %316, %323 : vector<16x32xf32>
    %325 = arith.mulf %324, %324 : vector<16x32xf32>
    %cst_133 = arith.constant dense<0.000000e+00> : vector<16xf32>
    %326 = vector.multi_reduction <add>, %325, %cst_133 [1] : vector<16x32xf32> to vector<16xf32>
    %327 = vector.shape_cast %326 : vector<16xf32> to vector<16x1xf32>
    %cst_134 = arith.constant 3.200000e+01 : f32
    %328 = vector.broadcast %cst_134 : f32 to vector<16x1xf32>
    %329 = arith.divf %327, %328 : vector<16x1xf32>
    %cst_135 = arith.constant 9.99999996E-13 : f32
    %330 = vector.broadcast %cst_135 : f32 to vector<16x1xf32>
    %331 = arith.addf %329, %330 : vector<16x1xf32>
    %332 = math.rsqrt %331 : vector<16x1xf32>
    %333 = vector.broadcast %332 : vector<16x1xf32> to vector<16x32xf32>
    %334 = arith.mulf %324, %333 : vector<16x32xf32>
    %335 = vector.broadcast %317 : vector<1x32xf32> to vector<16x32xf32>
    %336 = arith.mulf %334, %335 : vector<16x32xf32>
    %337 = vector.broadcast %318 : vector<1x32xf32> to vector<16x32xf32>
    %338 = arith.addf %336, %337 : vector<16x32xf32>
    %c0_136 = arith.constant 0 : index
    %c0_137 = arith.constant 0 : index
    %339 = vector.load %arg2[%c0_136, %c0_137] : memref<16x32xf32, #tpu.memory_space<vmem>>, vector<16x32xf32>
    %340 = arith.addf %338, %339 : vector<16x32xf32>
    %c0_138 = arith.constant 0 : index
    %c0_139 = arith.constant 0 : index
    %c0_140 = arith.constant 0 : index
    %341 = vector.load %arg29[%c0_138, %c0_139, %c0_140] : memref<2x6x32xf32, #tpu.memory_space<vmem>>, vector<1x6x32xf32>
    %342 = vector.shape_cast %341 : vector<1x6x32xf32> to vector<6x32xf32>
    %c0_141 = arith.constant 0 : index
    %c0_142 = arith.constant 0 : index
    %c0_143 = arith.constant 0 : index
    %343 = vector.load %arg17[%c0_141, %c0_142, %c0_143] : memref<2x32x96xf32, #tpu.memory_space<vmem>>, vector<1x32x96xf32>
    %344 = vector.shape_cast %343 : vector<1x32x96xf32> to vector<32x96xf32>
    %c0_144 = arith.constant 0 : index
    %c0_145 = arith.constant 0 : index
    %c0_146 = arith.constant 0 : index
    %345 = vector.load %arg18[%c0_144, %c0_145, %c0_146] : memref<2x1x96xf32, #tpu.memory_space<vmem>>, vector<1x1x96xf32>
    %346 = vector.shape_cast %345 : vector<1x1x96xf32> to vector<1x96xf32>
    %c0_147 = arith.constant 0 : index
    %c0_148 = arith.constant 0 : index
    %c0_149 = arith.constant 0 : index
    %347 = vector.load %arg19[%c0_147, %c0_148, %c0_149] : memref<2x32x32xf32, #tpu.memory_space<vmem>>, vector<1x32x32xf32>
    %348 = vector.shape_cast %347 : vector<1x32x32xf32> to vector<32x32xf32>
    %c0_150 = arith.constant 0 : index
    %c0_151 = arith.constant 0 : index
    %c0_152 = arith.constant 0 : index
    %349 = vector.load %arg20[%c0_150, %c0_151, %c0_152] : memref<2x1x32xf32, #tpu.memory_space<vmem>>, vector<1x1x32xf32>
    %350 = vector.shape_cast %349 : vector<1x1x32xf32> to vector<1x32xf32>
    %cst_153 = arith.constant dense<0.000000e+00> : vector<16x96xf32>
    %351 = tpu.matmul %340, %344, %cst_153 {dimension_numbers = #tpu.dot_dimension_numbers<[1], [0], [0], [1], [0, 0, 1, 1], [], []>} : vector<16x32xf32>, vector<32x96xf32>, vector<16x96xf32> -> vector<16x96xf32>
    %352 = vector.broadcast %346 : vector<1x96xf32> to vector<16x96xf32>
    %353 = arith.addf %351, %352 : vector<16x96xf32>
    %354 = vector.extract_strided_slice %353 {offsets = [0, 0], sizes = [16, 32], strides = [1, 1]} : vector<16x96xf32> to vector<16x32xf32>
    %355 = vector.extract_strided_slice %353 {offsets = [0, 32], sizes = [16, 32], strides = [1, 1]} : vector<16x96xf32> to vector<16x32xf32>
    %356 = vector.extract_strided_slice %353 {offsets = [0, 64], sizes = [16, 32], strides = [1, 1]} : vector<16x96xf32> to vector<16x32xf32>
    %357 = vector.shape_cast %354 : vector<16x32xf32> to vector<2x8x32xf32>
    %358 = vector.shape_cast %355 : vector<16x32xf32> to vector<2x8x32xf32>
    %359 = vector.shape_cast %356 : vector<16x32xf32> to vector<2x8x32xf32>
    %360 = vector.extract_strided_slice %357 {offsets = [0, 0, 0], sizes = [2, 8, 8], strides = [1, 1, 1]} : vector<2x8x32xf32> to vector<2x8x8xf32>
    %361 = vector.extract_strided_slice %358 {offsets = [0, 0, 0], sizes = [2, 8, 8], strides = [1, 1, 1]} : vector<2x8x32xf32> to vector<2x8x8xf32>
    "tpu.trace_start"() <{level = 10 : i32, message = "bqd,bkd->bqk"}> : () -> ()
    %cst_154 = arith.constant dense<0.000000e+00> : vector<2x8x8xf32>
    %362 = tpu.matmul %360, %361, %cst_154 {dimension_numbers = #tpu.dot_dimension_numbers<[2], [2], [1], [1], [0, 0, 0, 1, 1, 1], [0], [0]>} : vector<2x8x8xf32>, vector<2x8x8xf32>, vector<2x8x8xf32> -> vector<2x8x8xf32>
    "tpu.trace_stop"() : () -> ()
    %363 = vector.extract_strided_slice %357 {offsets = [0, 0, 8], sizes = [2, 8, 8], strides = [1, 1, 1]} : vector<2x8x32xf32> to vector<2x8x8xf32>
    %364 = vector.extract_strided_slice %358 {offsets = [0, 0, 8], sizes = [2, 8, 8], strides = [1, 1, 1]} : vector<2x8x32xf32> to vector<2x8x8xf32>
    "tpu.trace_start"() <{level = 10 : i32, message = "bqd,bkd->bqk"}> : () -> ()
    %cst_155 = arith.constant dense<0.000000e+00> : vector<2x8x8xf32>
    %365 = tpu.matmul %363, %364, %cst_155 {dimension_numbers = #tpu.dot_dimension_numbers<[2], [2], [1], [1], [0, 0, 0, 1, 1, 1], [0], [0]>} : vector<2x8x8xf32>, vector<2x8x8xf32>, vector<2x8x8xf32> -> vector<2x8x8xf32>
    "tpu.trace_stop"() : () -> ()
    %366 = vector.extract_strided_slice %357 {offsets = [0, 0, 16], sizes = [2, 8, 8], strides = [1, 1, 1]} : vector<2x8x32xf32> to vector<2x8x8xf32>
    %367 = vector.extract_strided_slice %358 {offsets = [0, 0, 16], sizes = [2, 8, 8], strides = [1, 1, 1]} : vector<2x8x32xf32> to vector<2x8x8xf32>
    "tpu.trace_start"() <{level = 10 : i32, message = "bqd,bkd->bqk"}> : () -> ()
    %cst_156 = arith.constant dense<0.000000e+00> : vector<2x8x8xf32>
    %368 = tpu.matmul %366, %367, %cst_156 {dimension_numbers = #tpu.dot_dimension_numbers<[2], [2], [1], [1], [0, 0, 0, 1, 1, 1], [0], [0]>} : vector<2x8x8xf32>, vector<2x8x8xf32>, vector<2x8x8xf32> -> vector<2x8x8xf32>
    "tpu.trace_stop"() : () -> ()
    %369 = vector.extract_strided_slice %357 {offsets = [0, 0, 24], sizes = [2, 8, 8], strides = [1, 1, 1]} : vector<2x8x32xf32> to vector<2x8x8xf32>
    %370 = vector.extract_strided_slice %358 {offsets = [0, 0, 24], sizes = [2, 8, 8], strides = [1, 1, 1]} : vector<2x8x32xf32> to vector<2x8x8xf32>
    "tpu.trace_start"() <{level = 10 : i32, message = "bqd,bkd->bqk"}> : () -> ()
    %cst_157 = arith.constant dense<0.000000e+00> : vector<2x8x8xf32>
    %371 = tpu.matmul %369, %370, %cst_157 {dimension_numbers = #tpu.dot_dimension_numbers<[2], [2], [1], [1], [0, 0, 0, 1, 1, 1], [0], [0]>} : vector<2x8x8xf32>, vector<2x8x8xf32>, vector<2x8x8xf32> -> vector<2x8x8xf32>
    "tpu.trace_stop"() : () -> ()
    %372 = vector.shape_cast %362 : vector<2x8x8xf32> to vector<1x2x8x8xf32>
    %373 = vector.shape_cast %365 : vector<2x8x8xf32> to vector<1x2x8x8xf32>
    %374 = vector.shape_cast %368 : vector<2x8x8xf32> to vector<1x2x8x8xf32>
    %375 = vector.shape_cast %371 : vector<2x8x8xf32> to vector<1x2x8x8xf32>
    %376 = tpu.concatenate %372, %373, %374, %375 in 0 : vector<1x2x8x8xf32>, vector<1x2x8x8xf32>, vector<1x2x8x8xf32>, vector<1x2x8x8xf32> -> vector<4x2x8x8xf32>
    %cst_158 = arith.constant 0.353553385 : f32
    %377 = vector.broadcast %cst_158 : f32 to vector<4x2x8x8xf32>
    %378 = arith.mulf %376, %377 : vector<4x2x8x8xf32>
    %379 = vector.shape_cast %2 : vector<2x8x8xf32> to vector<1x2x8x8xf32>
    %380 = vector.broadcast %379 : vector<1x2x8x8xf32> to vector<4x2x8x8xf32>
    %381 = arith.addf %378, %380 : vector<4x2x8x8xf32>
    %cst_159 = arith.constant dense<0xFF800000> : vector<4x2x8xf32>
    %382 = vector.multi_reduction <maximumf>, %381, %cst_159 [3] : vector<4x2x8x8xf32> to vector<4x2x8xf32>
    %383 = vector.shape_cast %382 : vector<4x2x8xf32> to vector<4x2x8x1xf32>
    %384 = vector.broadcast %383 : vector<4x2x8x1xf32> to vector<4x2x8x8xf32>
    %385 = arith.subf %381, %384 : vector<4x2x8x8xf32>
    %386 = math.exp %385 : vector<4x2x8x8xf32>
    %cst_160 = arith.constant dense<0.000000e+00> : vector<4x2x8xf32>
    %387 = vector.multi_reduction <add>, %386, %cst_160 [3] : vector<4x2x8x8xf32> to vector<4x2x8xf32>
    %388 = vector.shape_cast %387 : vector<4x2x8xf32> to vector<4x2x8x1xf32>
    %389 = vector.broadcast %388 : vector<4x2x8x1xf32> to vector<4x2x8x8xf32>
    %390 = arith.divf %386, %389 : vector<4x2x8x8xf32>
    %391 = vector.extract_strided_slice %359 {offsets = [0, 0, 0], sizes = [2, 8, 8], strides = [1, 1, 1]} : vector<2x8x32xf32> to vector<2x8x8xf32>
    %392 = vector.extract_strided_slice %390 {offsets = [0, 0, 0, 0], sizes = [1, 2, 8, 8], strides = [1, 1, 1, 1]} : vector<4x2x8x8xf32> to vector<1x2x8x8xf32>
    %393 = vector.shape_cast %392 : vector<1x2x8x8xf32> to vector<2x8x8xf32>
    "tpu.trace_start"() <{level = 10 : i32, message = "bqk,bkd->bqd"}> : () -> ()
    %cst_161 = arith.constant dense<0.000000e+00> : vector<2x8x8xf32>
    %394 = tpu.matmul %393, %391, %cst_161 {dimension_numbers = #tpu.dot_dimension_numbers<[2], [1], [1], [2], [0, 0, 0, 1, 1, 2], [0], [0]>} : vector<2x8x8xf32>, vector<2x8x8xf32>, vector<2x8x8xf32> -> vector<2x8x8xf32>
    "tpu.trace_stop"() : () -> ()
    %395 = vector.extract_strided_slice %359 {offsets = [0, 0, 8], sizes = [2, 8, 8], strides = [1, 1, 1]} : vector<2x8x32xf32> to vector<2x8x8xf32>
    %396 = vector.extract_strided_slice %390 {offsets = [1, 0, 0, 0], sizes = [1, 2, 8, 8], strides = [1, 1, 1, 1]} : vector<4x2x8x8xf32> to vector<1x2x8x8xf32>
    %397 = vector.shape_cast %396 : vector<1x2x8x8xf32> to vector<2x8x8xf32>
    "tpu.trace_start"() <{level = 10 : i32, message = "bqk,bkd->bqd"}> : () -> ()
    %cst_162 = arith.constant dense<0.000000e+00> : vector<2x8x8xf32>
    %398 = tpu.matmul %397, %395, %cst_162 {dimension_numbers = #tpu.dot_dimension_numbers<[2], [1], [1], [2], [0, 0, 0, 1, 1, 2], [0], [0]>} : vector<2x8x8xf32>, vector<2x8x8xf32>, vector<2x8x8xf32> -> vector<2x8x8xf32>
    "tpu.trace_stop"() : () -> ()
    %399 = vector.extract_strided_slice %359 {offsets = [0, 0, 16], sizes = [2, 8, 8], strides = [1, 1, 1]} : vector<2x8x32xf32> to vector<2x8x8xf32>
    %400 = vector.extract_strided_slice %390 {offsets = [2, 0, 0, 0], sizes = [1, 2, 8, 8], strides = [1, 1, 1, 1]} : vector<4x2x8x8xf32> to vector<1x2x8x8xf32>
    %401 = vector.shape_cast %400 : vector<1x2x8x8xf32> to vector<2x8x8xf32>
    "tpu.trace_start"() <{level = 10 : i32, message = "bqk,bkd->bqd"}> : () -> ()
    %cst_163 = arith.constant dense<0.000000e+00> : vector<2x8x8xf32>
    %402 = tpu.matmul %401, %399, %cst_163 {dimension_numbers = #tpu.dot_dimension_numbers<[2], [1], [1], [2], [0, 0, 0, 1, 1, 2], [0], [0]>} : vector<2x8x8xf32>, vector<2x8x8xf32>, vector<2x8x8xf32> -> vector<2x8x8xf32>
    "tpu.trace_stop"() : () -> ()
    %403 = vector.extract_strided_slice %359 {offsets = [0, 0, 24], sizes = [2, 8, 8], strides = [1, 1, 1]} : vector<2x8x32xf32> to vector<2x8x8xf32>
    %404 = vector.extract_strided_slice %390 {offsets = [3, 0, 0, 0], sizes = [1, 2, 8, 8], strides = [1, 1, 1, 1]} : vector<4x2x8x8xf32> to vector<1x2x8x8xf32>
    %405 = vector.shape_cast %404 : vector<1x2x8x8xf32> to vector<2x8x8xf32>
    "tpu.trace_start"() <{level = 10 : i32, message = "bqk,bkd->bqd"}> : () -> ()
    %cst_164 = arith.constant dense<0.000000e+00> : vector<2x8x8xf32>
    %406 = tpu.matmul %405, %403, %cst_164 {dimension_numbers = #tpu.dot_dimension_numbers<[2], [1], [1], [2], [0, 0, 0, 1, 1, 2], [0], [0]>} : vector<2x8x8xf32>, vector<2x8x8xf32>, vector<2x8x8xf32> -> vector<2x8x8xf32>
    "tpu.trace_stop"() : () -> ()
    %407 = tpu.concatenate %394, %398, %402, %406 in 2 : vector<2x8x8xf32>, vector<2x8x8xf32>, vector<2x8x8xf32>, vector<2x8x8xf32> -> vector<2x8x32xf32>
    %408 = vector.shape_cast %407 : vector<2x8x32xf32> to vector<16x32xf32>
    %cst_165 = arith.constant dense<0.000000e+00> : vector<16x32xf32>
    %409 = tpu.matmul %408, %348, %cst_165 {dimension_numbers = #tpu.dot_dimension_numbers<[1], [0], [0], [1], [0, 0, 1, 1], [], []>} : vector<16x32xf32>, vector<32x32xf32>, vector<16x32xf32> -> vector<16x32xf32>
    %410 = vector.broadcast %350 : vector<1x32xf32> to vector<16x32xf32>
    %411 = arith.addf %409, %410 : vector<16x32xf32>
    %412 = arith.addf %411, %340 : vector<16x32xf32>
    %413 = vector.extract_strided_slice %342 {offsets = [0, 0], sizes = [1, 32], strides = [1, 1]} : vector<6x32xf32> to vector<1x32xf32>
    %414 = vector.extract_strided_slice %342 {offsets = [1, 0], sizes = [1, 32], strides = [1, 1]} : vector<6x32xf32> to vector<1x32xf32>
    %cst_166 = arith.constant dense<0.000000e+00> : vector<16xf32>
    %415 = vector.multi_reduction <add>, %412, %cst_166 [1] : vector<16x32xf32> to vector<16xf32>
    %416 = vector.shape_cast %415 : vector<16xf32> to vector<16x1xf32>
    %cst_167 = arith.constant 3.200000e+01 : f32
    %417 = vector.broadcast %cst_167 : f32 to vector<16x1xf32>
    %418 = arith.divf %416, %417 : vector<16x1xf32>
    %419 = vector.broadcast %418 : vector<16x1xf32> to vector<16x32xf32>
    %420 = arith.subf %412, %419 : vector<16x32xf32>
    %421 = arith.mulf %420, %420 : vector<16x32xf32>
    %cst_168 = arith.constant dense<0.000000e+00> : vector<16xf32>
    %422 = vector.multi_reduction <add>, %421, %cst_168 [1] : vector<16x32xf32> to vector<16xf32>
    %423 = vector.shape_cast %422 : vector<16xf32> to vector<16x1xf32>
    %cst_169 = arith.constant 3.200000e+01 : f32
    %424 = vector.broadcast %cst_169 : f32 to vector<16x1xf32>
    %425 = arith.divf %423, %424 : vector<16x1xf32>
    %cst_170 = arith.constant 9.99999974E-6 : f32
    %426 = vector.broadcast %cst_170 : f32 to vector<16x1xf32>
    %427 = arith.addf %425, %426 : vector<16x1xf32>
    %428 = math.rsqrt %427 : vector<16x1xf32>
    %429 = vector.broadcast %428 : vector<16x1xf32> to vector<16x32xf32>
    %430 = arith.mulf %420, %429 : vector<16x32xf32>
    %431 = vector.broadcast %413 : vector<1x32xf32> to vector<16x32xf32>
    %432 = arith.mulf %430, %431 : vector<16x32xf32>
    %433 = vector.broadcast %414 : vector<1x32xf32> to vector<16x32xf32>
    %434 = arith.addf %432, %433 : vector<16x32xf32>
    %435 = vector.broadcast %4 : vector<16x1xf32> to vector<16x32xf32>
    %436 = arith.mulf %434, %435 : vector<16x32xf32>
    %c0_171 = arith.constant 0 : index
    %c0_172 = arith.constant 0 : index
    %c0_173 = arith.constant 0 : index
    %437 = vector.load %arg21[%c0_171, %c0_172, %c0_173] : memref<2x32x96xf32, #tpu.memory_space<vmem>>, vector<1x32x96xf32>
    %438 = vector.shape_cast %437 : vector<1x32x96xf32> to vector<32x96xf32>
    %c0_174 = arith.constant 0 : index
    %c0_175 = arith.constant 0 : index
    %c0_176 = arith.constant 0 : index
    %439 = vector.load %arg22[%c0_174, %c0_175, %c0_176] : memref<2x1x96xf32, #tpu.memory_space<vmem>>, vector<1x1x96xf32>
    %440 = vector.shape_cast %439 : vector<1x1x96xf32> to vector<1x96xf32>
    %c0_177 = arith.constant 0 : index
    %c0_178 = arith.constant 0 : index
    %c0_179 = arith.constant 0 : index
    %441 = vector.load %arg23[%c0_177, %c0_178, %c0_179] : memref<2x32x32xf32, #tpu.memory_space<vmem>>, vector<1x32x32xf32>
    %442 = vector.shape_cast %441 : vector<1x32x32xf32> to vector<32x32xf32>
    %c0_180 = arith.constant 0 : index
    %c0_181 = arith.constant 0 : index
    %c0_182 = arith.constant 0 : index
    %443 = vector.load %arg24[%c0_180, %c0_181, %c0_182] : memref<2x1x32xf32, #tpu.memory_space<vmem>>, vector<1x1x32xf32>
    %444 = vector.shape_cast %443 : vector<1x1x32xf32> to vector<1x32xf32>
    %445 = vector.extract_strided_slice %438 {offsets = [0, 0], sizes = [32, 32], strides = [1, 1]} : vector<32x96xf32> to vector<32x32xf32>
    %cst_183 = arith.constant dense<0.000000e+00> : vector<16x32xf32>
    %446 = tpu.matmul %436, %445, %cst_183 {dimension_numbers = #tpu.dot_dimension_numbers<[1], [0], [0], [1], [0, 0, 1, 1], [], []>} : vector<16x32xf32>, vector<32x32xf32>, vector<16x32xf32> -> vector<16x32xf32>
    %447 = vector.extract_strided_slice %440 {offsets = [0, 0], sizes = [1, 32], strides = [1, 1]} : vector<1x96xf32> to vector<1x32xf32>
    %448 = vector.broadcast %447 : vector<1x32xf32> to vector<16x32xf32>
    %449 = arith.addf %446, %448 : vector<16x32xf32>
    %450 = vector.extract_strided_slice %438 {offsets = [0, 32], sizes = [32, 64], strides = [1, 1]} : vector<32x96xf32> to vector<32x64xf32>
    %cst_184 = arith.constant dense<0.000000e+00> : vector<16x64xf32>
    %451 = tpu.matmul %315, %450, %cst_184 {dimension_numbers = #tpu.dot_dimension_numbers<[1], [0], [0], [1], [0, 0, 1, 1], [], []>} : vector<16x32xf32>, vector<32x64xf32>, vector<16x64xf32> -> vector<16x64xf32>
    %452 = vector.extract_strided_slice %440 {offsets = [0, 32], sizes = [1, 64], strides = [1, 1]} : vector<1x96xf32> to vector<1x64xf32>
    %453 = vector.broadcast %452 : vector<1x64xf32> to vector<16x64xf32>
    %454 = arith.addf %451, %453 : vector<16x64xf32>
    %455 = vector.extract_strided_slice %454 {offsets = [0, 0], sizes = [16, 32], strides = [1, 1]} : vector<16x64xf32> to vector<16x32xf32>
    %456 = vector.extract_strided_slice %454 {offsets = [0, 32], sizes = [16, 32], strides = [1, 1]} : vector<16x64xf32> to vector<16x32xf32>
    %457 = vector.shape_cast %449 : vector<16x32xf32> to vector<2x8x32xf32>
    %458 = vector.shape_cast %455 : vector<16x32xf32> to vector<2x8x32xf32>
    %459 = vector.shape_cast %456 : vector<16x32xf32> to vector<2x8x32xf32>
    %460 = vector.extract_strided_slice %457 {offsets = [0, 0, 0], sizes = [2, 8, 8], strides = [1, 1, 1]} : vector<2x8x32xf32> to vector<2x8x8xf32>
    %461 = vector.extract_strided_slice %458 {offsets = [0, 0, 0], sizes = [2, 8, 8], strides = [1, 1, 1]} : vector<2x8x32xf32> to vector<2x8x8xf32>
    "tpu.trace_start"() <{level = 10 : i32, message = "bqd,bkd->bqk"}> : () -> ()
    %cst_185 = arith.constant dense<0.000000e+00> : vector<2x8x8xf32>
    %462 = tpu.matmul %460, %461, %cst_185 {dimension_numbers = #tpu.dot_dimension_numbers<[2], [2], [1], [1], [0, 0, 0, 1, 1, 1], [0], [0]>} : vector<2x8x8xf32>, vector<2x8x8xf32>, vector<2x8x8xf32> -> vector<2x8x8xf32>
    "tpu.trace_stop"() : () -> ()
    %463 = vector.extract_strided_slice %457 {offsets = [0, 0, 8], sizes = [2, 8, 8], strides = [1, 1, 1]} : vector<2x8x32xf32> to vector<2x8x8xf32>
    %464 = vector.extract_strided_slice %458 {offsets = [0, 0, 8], sizes = [2, 8, 8], strides = [1, 1, 1]} : vector<2x8x32xf32> to vector<2x8x8xf32>
    "tpu.trace_start"() <{level = 10 : i32, message = "bqd,bkd->bqk"}> : () -> ()
    %cst_186 = arith.constant dense<0.000000e+00> : vector<2x8x8xf32>
    %465 = tpu.matmul %463, %464, %cst_186 {dimension_numbers = #tpu.dot_dimension_numbers<[2], [2], [1], [1], [0, 0, 0, 1, 1, 1], [0], [0]>} : vector<2x8x8xf32>, vector<2x8x8xf32>, vector<2x8x8xf32> -> vector<2x8x8xf32>
    "tpu.trace_stop"() : () -> ()
    %466 = vector.extract_strided_slice %457 {offsets = [0, 0, 16], sizes = [2, 8, 8], strides = [1, 1, 1]} : vector<2x8x32xf32> to vector<2x8x8xf32>
    %467 = vector.extract_strided_slice %458 {offsets = [0, 0, 16], sizes = [2, 8, 8], strides = [1, 1, 1]} : vector<2x8x32xf32> to vector<2x8x8xf32>
    "tpu.trace_start"() <{level = 10 : i32, message = "bqd,bkd->bqk"}> : () -> ()
    %cst_187 = arith.constant dense<0.000000e+00> : vector<2x8x8xf32>
    %468 = tpu.matmul %466, %467, %cst_187 {dimension_numbers = #tpu.dot_dimension_numbers<[2], [2], [1], [1], [0, 0, 0, 1, 1, 1], [0], [0]>} : vector<2x8x8xf32>, vector<2x8x8xf32>, vector<2x8x8xf32> -> vector<2x8x8xf32>
    "tpu.trace_stop"() : () -> ()
    %469 = vector.extract_strided_slice %457 {offsets = [0, 0, 24], sizes = [2, 8, 8], strides = [1, 1, 1]} : vector<2x8x32xf32> to vector<2x8x8xf32>
    %470 = vector.extract_strided_slice %458 {offsets = [0, 0, 24], sizes = [2, 8, 8], strides = [1, 1, 1]} : vector<2x8x32xf32> to vector<2x8x8xf32>
    "tpu.trace_start"() <{level = 10 : i32, message = "bqd,bkd->bqk"}> : () -> ()
    %cst_188 = arith.constant dense<0.000000e+00> : vector<2x8x8xf32>
    %471 = tpu.matmul %469, %470, %cst_188 {dimension_numbers = #tpu.dot_dimension_numbers<[2], [2], [1], [1], [0, 0, 0, 1, 1, 1], [0], [0]>} : vector<2x8x8xf32>, vector<2x8x8xf32>, vector<2x8x8xf32> -> vector<2x8x8xf32>
    "tpu.trace_stop"() : () -> ()
    %472 = vector.shape_cast %462 : vector<2x8x8xf32> to vector<1x2x8x8xf32>
    %473 = vector.shape_cast %465 : vector<2x8x8xf32> to vector<1x2x8x8xf32>
    %474 = vector.shape_cast %468 : vector<2x8x8xf32> to vector<1x2x8x8xf32>
    %475 = vector.shape_cast %471 : vector<2x8x8xf32> to vector<1x2x8x8xf32>
    %476 = tpu.concatenate %472, %473, %474, %475 in 0 : vector<1x2x8x8xf32>, vector<1x2x8x8xf32>, vector<1x2x8x8xf32>, vector<1x2x8x8xf32> -> vector<4x2x8x8xf32>
    %cst_189 = arith.constant 0.353553385 : f32
    %477 = vector.broadcast %cst_189 : f32 to vector<4x2x8x8xf32>
    %478 = arith.mulf %476, %477 : vector<4x2x8x8xf32>
    %479 = vector.shape_cast %3 : vector<2x1x8xf32> to vector<1x2x1x8xf32>
    %480 = vector.broadcast %479 : vector<1x2x1x8xf32> to vector<4x2x8x8xf32>
    %481 = arith.addf %478, %480 : vector<4x2x8x8xf32>
    %cst_190 = arith.constant dense<0xFF800000> : vector<4x2x8xf32>
    %482 = vector.multi_reduction <maximumf>, %481, %cst_190 [3] : vector<4x2x8x8xf32> to vector<4x2x8xf32>
    %483 = vector.shape_cast %482 : vector<4x2x8xf32> to vector<4x2x8x1xf32>
    %484 = vector.broadcast %483 : vector<4x2x8x1xf32> to vector<4x2x8x8xf32>
    %485 = arith.subf %481, %484 : vector<4x2x8x8xf32>
    %486 = math.exp %485 : vector<4x2x8x8xf32>
    %cst_191 = arith.constant dense<0.000000e+00> : vector<4x2x8xf32>
    %487 = vector.multi_reduction <add>, %486, %cst_191 [3] : vector<4x2x8x8xf32> to vector<4x2x8xf32>
    %488 = vector.shape_cast %487 : vector<4x2x8xf32> to vector<4x2x8x1xf32>
    %489 = vector.broadcast %488 : vector<4x2x8x1xf32> to vector<4x2x8x8xf32>
    %490 = arith.divf %486, %489 : vector<4x2x8x8xf32>
    %491 = vector.extract_strided_slice %459 {offsets = [0, 0, 0], sizes = [2, 8, 8], strides = [1, 1, 1]} : vector<2x8x32xf32> to vector<2x8x8xf32>
    %492 = vector.extract_strided_slice %490 {offsets = [0, 0, 0, 0], sizes = [1, 2, 8, 8], strides = [1, 1, 1, 1]} : vector<4x2x8x8xf32> to vector<1x2x8x8xf32>
    %493 = vector.shape_cast %492 : vector<1x2x8x8xf32> to vector<2x8x8xf32>
    "tpu.trace_start"() <{level = 10 : i32, message = "bqk,bkd->bqd"}> : () -> ()
    %cst_192 = arith.constant dense<0.000000e+00> : vector<2x8x8xf32>
    %494 = tpu.matmul %493, %491, %cst_192 {dimension_numbers = #tpu.dot_dimension_numbers<[2], [1], [1], [2], [0, 0, 0, 1, 1, 2], [0], [0]>} : vector<2x8x8xf32>, vector<2x8x8xf32>, vector<2x8x8xf32> -> vector<2x8x8xf32>
    "tpu.trace_stop"() : () -> ()
    %495 = vector.extract_strided_slice %459 {offsets = [0, 0, 8], sizes = [2, 8, 8], strides = [1, 1, 1]} : vector<2x8x32xf32> to vector<2x8x8xf32>
    %496 = vector.extract_strided_slice %490 {offsets = [1, 0, 0, 0], sizes = [1, 2, 8, 8], strides = [1, 1, 1, 1]} : vector<4x2x8x8xf32> to vector<1x2x8x8xf32>
    %497 = vector.shape_cast %496 : vector<1x2x8x8xf32> to vector<2x8x8xf32>
    "tpu.trace_start"() <{level = 10 : i32, message = "bqk,bkd->bqd"}> : () -> ()
    %cst_193 = arith.constant dense<0.000000e+00> : vector<2x8x8xf32>
    %498 = tpu.matmul %497, %495, %cst_193 {dimension_numbers = #tpu.dot_dimension_numbers<[2], [1], [1], [2], [0, 0, 0, 1, 1, 2], [0], [0]>} : vector<2x8x8xf32>, vector<2x8x8xf32>, vector<2x8x8xf32> -> vector<2x8x8xf32>
    "tpu.trace_stop"() : () -> ()
    %499 = vector.extract_strided_slice %459 {offsets = [0, 0, 16], sizes = [2, 8, 8], strides = [1, 1, 1]} : vector<2x8x32xf32> to vector<2x8x8xf32>
    %500 = vector.extract_strided_slice %490 {offsets = [2, 0, 0, 0], sizes = [1, 2, 8, 8], strides = [1, 1, 1, 1]} : vector<4x2x8x8xf32> to vector<1x2x8x8xf32>
    %501 = vector.shape_cast %500 : vector<1x2x8x8xf32> to vector<2x8x8xf32>
    "tpu.trace_start"() <{level = 10 : i32, message = "bqk,bkd->bqd"}> : () -> ()
    %cst_194 = arith.constant dense<0.000000e+00> : vector<2x8x8xf32>
    %502 = tpu.matmul %501, %499, %cst_194 {dimension_numbers = #tpu.dot_dimension_numbers<[2], [1], [1], [2], [0, 0, 0, 1, 1, 2], [0], [0]>} : vector<2x8x8xf32>, vector<2x8x8xf32>, vector<2x8x8xf32> -> vector<2x8x8xf32>
    "tpu.trace_stop"() : () -> ()
    %503 = vector.extract_strided_slice %459 {offsets = [0, 0, 24], sizes = [2, 8, 8], strides = [1, 1, 1]} : vector<2x8x32xf32> to vector<2x8x8xf32>
    %504 = vector.extract_strided_slice %490 {offsets = [3, 0, 0, 0], sizes = [1, 2, 8, 8], strides = [1, 1, 1, 1]} : vector<4x2x8x8xf32> to vector<1x2x8x8xf32>
    %505 = vector.shape_cast %504 : vector<1x2x8x8xf32> to vector<2x8x8xf32>
    "tpu.trace_start"() <{level = 10 : i32, message = "bqk,bkd->bqd"}> : () -> ()
    %cst_195 = arith.constant dense<0.000000e+00> : vector<2x8x8xf32>
    %506 = tpu.matmul %505, %503, %cst_195 {dimension_numbers = #tpu.dot_dimension_numbers<[2], [1], [1], [2], [0, 0, 0, 1, 1, 2], [0], [0]>} : vector<2x8x8xf32>, vector<2x8x8xf32>, vector<2x8x8xf32> -> vector<2x8x8xf32>
    "tpu.trace_stop"() : () -> ()
    %507 = tpu.concatenate %494, %498, %502, %506 in 2 : vector<2x8x8xf32>, vector<2x8x8xf32>, vector<2x8x8xf32>, vector<2x8x8xf32> -> vector<2x8x32xf32>
    %508 = vector.shape_cast %507 : vector<2x8x32xf32> to vector<16x32xf32>
    %cst_196 = arith.constant dense<0.000000e+00> : vector<16x32xf32>
    %509 = tpu.matmul %508, %442, %cst_196 {dimension_numbers = #tpu.dot_dimension_numbers<[1], [0], [0], [1], [0, 0, 1, 1], [], []>} : vector<16x32xf32>, vector<32x32xf32>, vector<16x32xf32> -> vector<16x32xf32>
    %510 = vector.broadcast %444 : vector<1x32xf32> to vector<16x32xf32>
    %511 = arith.addf %509, %510 : vector<16x32xf32>
    %512 = arith.addf %511, %436 : vector<16x32xf32>
    %513 = vector.extract_strided_slice %342 {offsets = [2, 0], sizes = [1, 32], strides = [1, 1]} : vector<6x32xf32> to vector<1x32xf32>
    %514 = vector.extract_strided_slice %342 {offsets = [3, 0], sizes = [1, 32], strides = [1, 1]} : vector<6x32xf32> to vector<1x32xf32>
    %cst_197 = arith.constant dense<0.000000e+00> : vector<16xf32>
    %515 = vector.multi_reduction <add>, %512, %cst_197 [1] : vector<16x32xf32> to vector<16xf32>
    %516 = vector.shape_cast %515 : vector<16xf32> to vector<16x1xf32>
    %cst_198 = arith.constant 3.200000e+01 : f32
    %517 = vector.broadcast %cst_198 : f32 to vector<16x1xf32>
    %518 = arith.divf %516, %517 : vector<16x1xf32>
    %519 = vector.broadcast %518 : vector<16x1xf32> to vector<16x32xf32>
    %520 = arith.subf %512, %519 : vector<16x32xf32>
    %521 = arith.mulf %520, %520 : vector<16x32xf32>
    %cst_199 = arith.constant dense<0.000000e+00> : vector<16xf32>
    %522 = vector.multi_reduction <add>, %521, %cst_199 [1] : vector<16x32xf32> to vector<16xf32>
    %523 = vector.shape_cast %522 : vector<16xf32> to vector<16x1xf32>
    %cst_200 = arith.constant 3.200000e+01 : f32
    %524 = vector.broadcast %cst_200 : f32 to vector<16x1xf32>
    %525 = arith.divf %523, %524 : vector<16x1xf32>
    %cst_201 = arith.constant 9.99999974E-6 : f32
    %526 = vector.broadcast %cst_201 : f32 to vector<16x1xf32>
    %527 = arith.addf %525, %526 : vector<16x1xf32>
    %528 = math.rsqrt %527 : vector<16x1xf32>
    %529 = vector.broadcast %528 : vector<16x1xf32> to vector<16x32xf32>
    %530 = arith.mulf %520, %529 : vector<16x32xf32>
    %531 = vector.broadcast %513 : vector<1x32xf32> to vector<16x32xf32>
    %532 = arith.mulf %530, %531 : vector<16x32xf32>
    %533 = vector.broadcast %514 : vector<1x32xf32> to vector<16x32xf32>
    %534 = arith.addf %532, %533 : vector<16x32xf32>
    %535 = vector.broadcast %4 : vector<16x1xf32> to vector<16x32xf32>
    %536 = arith.mulf %534, %535 : vector<16x32xf32>
    %c0_202 = arith.constant 0 : index
    %c0_203 = arith.constant 0 : index
    %c0_204 = arith.constant 0 : index
    %537 = vector.load %arg25[%c0_202, %c0_203, %c0_204] : memref<2x32x64xf32, #tpu.memory_space<vmem>>, vector<1x32x64xf32>
    %538 = vector.shape_cast %537 : vector<1x32x64xf32> to vector<32x64xf32>
    %cst_205 = arith.constant dense<0.000000e+00> : vector<16x64xf32>
    %539 = tpu.matmul %536, %538, %cst_205 {dimension_numbers = #tpu.dot_dimension_numbers<[1], [0], [0], [1], [0, 0, 1, 1], [], []>} : vector<16x32xf32>, vector<32x64xf32>, vector<16x64xf32> -> vector<16x64xf32>
    %c0_206 = arith.constant 0 : index
    %c0_207 = arith.constant 0 : index
    %c0_208 = arith.constant 0 : index
    %540 = vector.load %arg26[%c0_206, %c0_207, %c0_208] : memref<2x1x64xf32, #tpu.memory_space<vmem>>, vector<1x1x64xf32>
    %541 = vector.shape_cast %540 : vector<1x1x64xf32> to vector<1x64xf32>
    %542 = vector.broadcast %541 : vector<1x64xf32> to vector<16x64xf32>
    %543 = arith.addf %539, %542 : vector<16x64xf32>
    %cst_209 = arith.constant 0.000000e+00 : f32
    %544 = vector.broadcast %cst_209 : f32 to vector<16x64xf32>
    %545 = arith.maximumf %543, %544 : vector<16x64xf32>
    %c0_210 = arith.constant 0 : index
    %c0_211 = arith.constant 0 : index
    %c0_212 = arith.constant 0 : index
    %546 = vector.load %arg27[%c0_210, %c0_211, %c0_212] : memref<2x64x32xf32, #tpu.memory_space<vmem>>, vector<1x64x32xf32>
    %547 = vector.shape_cast %546 : vector<1x64x32xf32> to vector<64x32xf32>
    %cst_213 = arith.constant dense<0.000000e+00> : vector<16x32xf32>
    %548 = tpu.matmul %545, %547, %cst_213 {dimension_numbers = #tpu.dot_dimension_numbers<[1], [0], [0], [1], [0, 0, 1, 1], [], []>} : vector<16x64xf32>, vector<64x32xf32>, vector<16x32xf32> -> vector<16x32xf32>
    %c0_214 = arith.constant 0 : index
    %c0_215 = arith.constant 0 : index
    %c0_216 = arith.constant 0 : index
    %549 = vector.load %arg28[%c0_214, %c0_215, %c0_216] : memref<2x1x32xf32, #tpu.memory_space<vmem>>, vector<1x1x32xf32>
    %550 = vector.shape_cast %549 : vector<1x1x32xf32> to vector<1x32xf32>
    %551 = vector.broadcast %550 : vector<1x32xf32> to vector<16x32xf32>
    %552 = arith.addf %548, %551 : vector<16x32xf32>
    %553 = arith.addf %552, %536 : vector<16x32xf32>
    %554 = vector.extract_strided_slice %342 {offsets = [4, 0], sizes = [1, 32], strides = [1, 1]} : vector<6x32xf32> to vector<1x32xf32>
    %555 = vector.extract_strided_slice %342 {offsets = [5, 0], sizes = [1, 32], strides = [1, 1]} : vector<6x32xf32> to vector<1x32xf32>
    %cst_217 = arith.constant dense<0.000000e+00> : vector<16xf32>
    %556 = vector.multi_reduction <add>, %553, %cst_217 [1] : vector<16x32xf32> to vector<16xf32>
    %557 = vector.shape_cast %556 : vector<16xf32> to vector<16x1xf32>
    %cst_218 = arith.constant 3.200000e+01 : f32
    %558 = vector.broadcast %cst_218 : f32 to vector<16x1xf32>
    %559 = arith.divf %557, %558 : vector<16x1xf32>
    %560 = vector.broadcast %559 : vector<16x1xf32> to vector<16x32xf32>
    %561 = arith.subf %553, %560 : vector<16x32xf32>
    %562 = arith.mulf %561, %561 : vector<16x32xf32>
    %cst_219 = arith.constant dense<0.000000e+00> : vector<16xf32>
    %563 = vector.multi_reduction <add>, %562, %cst_219 [1] : vector<16x32xf32> to vector<16xf32>
    %564 = vector.shape_cast %563 : vector<16xf32> to vector<16x1xf32>
    %cst_220 = arith.constant 3.200000e+01 : f32
    %565 = vector.broadcast %cst_220 : f32 to vector<16x1xf32>
    %566 = arith.divf %564, %565 : vector<16x1xf32>
    %cst_221 = arith.constant 9.99999974E-6 : f32
    %567 = vector.broadcast %cst_221 : f32 to vector<16x1xf32>
    %568 = arith.addf %566, %567 : vector<16x1xf32>
    %569 = math.rsqrt %568 : vector<16x1xf32>
    %570 = vector.broadcast %569 : vector<16x1xf32> to vector<16x32xf32>
    %571 = arith.mulf %561, %570 : vector<16x32xf32>
    %572 = vector.broadcast %554 : vector<1x32xf32> to vector<16x32xf32>
    %573 = arith.mulf %571, %572 : vector<16x32xf32>
    %574 = vector.broadcast %555 : vector<1x32xf32> to vector<16x32xf32>
    %575 = arith.addf %573, %574 : vector<16x32xf32>
    %576 = vector.broadcast %4 : vector<16x1xf32> to vector<16x32xf32>
    %577 = arith.mulf %575, %576 : vector<16x32xf32>
    %c1_222 = arith.constant 1 : index
    %c0_223 = arith.constant 0 : index
    %c0_224 = arith.constant 0 : index
    %578 = vector.load %arg29[%c1_222, %c0_223, %c0_224] : memref<2x6x32xf32, #tpu.memory_space<vmem>>, vector<1x6x32xf32>
    %579 = vector.shape_cast %578 : vector<1x6x32xf32> to vector<6x32xf32>
    %c1_225 = arith.constant 1 : index
    %c0_226 = arith.constant 0 : index
    %c0_227 = arith.constant 0 : index
    %580 = vector.load %arg17[%c1_225, %c0_226, %c0_227] : memref<2x32x96xf32, #tpu.memory_space<vmem>>, vector<1x32x96xf32>
    %581 = vector.shape_cast %580 : vector<1x32x96xf32> to vector<32x96xf32>
    %c1_228 = arith.constant 1 : index
    %c0_229 = arith.constant 0 : index
    %c0_230 = arith.constant 0 : index
    %582 = vector.load %arg18[%c1_228, %c0_229, %c0_230] : memref<2x1x96xf32, #tpu.memory_space<vmem>>, vector<1x1x96xf32>
    %583 = vector.shape_cast %582 : vector<1x1x96xf32> to vector<1x96xf32>
    %c1_231 = arith.constant 1 : index
    %c0_232 = arith.constant 0 : index
    %c0_233 = arith.constant 0 : index
    %584 = vector.load %arg19[%c1_231, %c0_232, %c0_233] : memref<2x32x32xf32, #tpu.memory_space<vmem>>, vector<1x32x32xf32>
    %585 = vector.shape_cast %584 : vector<1x32x32xf32> to vector<32x32xf32>
    %c1_234 = arith.constant 1 : index
    %c0_235 = arith.constant 0 : index
    %c0_236 = arith.constant 0 : index
    %586 = vector.load %arg20[%c1_234, %c0_235, %c0_236] : memref<2x1x32xf32, #tpu.memory_space<vmem>>, vector<1x1x32xf32>
    %587 = vector.shape_cast %586 : vector<1x1x32xf32> to vector<1x32xf32>
    %cst_237 = arith.constant dense<0.000000e+00> : vector<16x96xf32>
    %588 = tpu.matmul %577, %581, %cst_237 {dimension_numbers = #tpu.dot_dimension_numbers<[1], [0], [0], [1], [0, 0, 1, 1], [], []>} : vector<16x32xf32>, vector<32x96xf32>, vector<16x96xf32> -> vector<16x96xf32>
    %589 = vector.broadcast %583 : vector<1x96xf32> to vector<16x96xf32>
    %590 = arith.addf %588, %589 : vector<16x96xf32>
    %591 = vector.extract_strided_slice %590 {offsets = [0, 0], sizes = [16, 32], strides = [1, 1]} : vector<16x96xf32> to vector<16x32xf32>
    %592 = vector.extract_strided_slice %590 {offsets = [0, 32], sizes = [16, 32], strides = [1, 1]} : vector<16x96xf32> to vector<16x32xf32>
    %593 = vector.extract_strided_slice %590 {offsets = [0, 64], sizes = [16, 32], strides = [1, 1]} : vector<16x96xf32> to vector<16x32xf32>
    %594 = vector.shape_cast %591 : vector<16x32xf32> to vector<2x8x32xf32>
    %595 = vector.shape_cast %592 : vector<16x32xf32> to vector<2x8x32xf32>
    %596 = vector.shape_cast %593 : vector<16x32xf32> to vector<2x8x32xf32>
    %597 = vector.extract_strided_slice %594 {offsets = [0, 0, 0], sizes = [2, 8, 8], strides = [1, 1, 1]} : vector<2x8x32xf32> to vector<2x8x8xf32>
    %598 = vector.extract_strided_slice %595 {offsets = [0, 0, 0], sizes = [2, 8, 8], strides = [1, 1, 1]} : vector<2x8x32xf32> to vector<2x8x8xf32>
    "tpu.trace_start"() <{level = 10 : i32, message = "bqd,bkd->bqk"}> : () -> ()
    %cst_238 = arith.constant dense<0.000000e+00> : vector<2x8x8xf32>
    %599 = tpu.matmul %597, %598, %cst_238 {dimension_numbers = #tpu.dot_dimension_numbers<[2], [2], [1], [1], [0, 0, 0, 1, 1, 1], [0], [0]>} : vector<2x8x8xf32>, vector<2x8x8xf32>, vector<2x8x8xf32> -> vector<2x8x8xf32>
    "tpu.trace_stop"() : () -> ()
    %600 = vector.extract_strided_slice %594 {offsets = [0, 0, 8], sizes = [2, 8, 8], strides = [1, 1, 1]} : vector<2x8x32xf32> to vector<2x8x8xf32>
    %601 = vector.extract_strided_slice %595 {offsets = [0, 0, 8], sizes = [2, 8, 8], strides = [1, 1, 1]} : vector<2x8x32xf32> to vector<2x8x8xf32>
    "tpu.trace_start"() <{level = 10 : i32, message = "bqd,bkd->bqk"}> : () -> ()
    %cst_239 = arith.constant dense<0.000000e+00> : vector<2x8x8xf32>
    %602 = tpu.matmul %600, %601, %cst_239 {dimension_numbers = #tpu.dot_dimension_numbers<[2], [2], [1], [1], [0, 0, 0, 1, 1, 1], [0], [0]>} : vector<2x8x8xf32>, vector<2x8x8xf32>, vector<2x8x8xf32> -> vector<2x8x8xf32>
    "tpu.trace_stop"() : () -> ()
    %603 = vector.extract_strided_slice %594 {offsets = [0, 0, 16], sizes = [2, 8, 8], strides = [1, 1, 1]} : vector<2x8x32xf32> to vector<2x8x8xf32>
    %604 = vector.extract_strided_slice %595 {offsets = [0, 0, 16], sizes = [2, 8, 8], strides = [1, 1, 1]} : vector<2x8x32xf32> to vector<2x8x8xf32>
    "tpu.trace_start"() <{level = 10 : i32, message = "bqd,bkd->bqk"}> : () -> ()
    %cst_240 = arith.constant dense<0.000000e+00> : vector<2x8x8xf32>
    %605 = tpu.matmul %603, %604, %cst_240 {dimension_numbers = #tpu.dot_dimension_numbers<[2], [2], [1], [1], [0, 0, 0, 1, 1, 1], [0], [0]>} : vector<2x8x8xf32>, vector<2x8x8xf32>, vector<2x8x8xf32> -> vector<2x8x8xf32>
    "tpu.trace_stop"() : () -> ()
    %606 = vector.extract_strided_slice %594 {offsets = [0, 0, 24], sizes = [2, 8, 8], strides = [1, 1, 1]} : vector<2x8x32xf32> to vector<2x8x8xf32>
    %607 = vector.extract_strided_slice %595 {offsets = [0, 0, 24], sizes = [2, 8, 8], strides = [1, 1, 1]} : vector<2x8x32xf32> to vector<2x8x8xf32>
    "tpu.trace_start"() <{level = 10 : i32, message = "bqd,bkd->bqk"}> : () -> ()
    %cst_241 = arith.constant dense<0.000000e+00> : vector<2x8x8xf32>
    %608 = tpu.matmul %606, %607, %cst_241 {dimension_numbers = #tpu.dot_dimension_numbers<[2], [2], [1], [1], [0, 0, 0, 1, 1, 1], [0], [0]>} : vector<2x8x8xf32>, vector<2x8x8xf32>, vector<2x8x8xf32> -> vector<2x8x8xf32>
    "tpu.trace_stop"() : () -> ()
    %609 = vector.shape_cast %599 : vector<2x8x8xf32> to vector<1x2x8x8xf32>
    %610 = vector.shape_cast %602 : vector<2x8x8xf32> to vector<1x2x8x8xf32>
    %611 = vector.shape_cast %605 : vector<2x8x8xf32> to vector<1x2x8x8xf32>
    %612 = vector.shape_cast %608 : vector<2x8x8xf32> to vector<1x2x8x8xf32>
    %613 = tpu.concatenate %609, %610, %611, %612 in 0 : vector<1x2x8x8xf32>, vector<1x2x8x8xf32>, vector<1x2x8x8xf32>, vector<1x2x8x8xf32> -> vector<4x2x8x8xf32>
    %cst_242 = arith.constant 0.353553385 : f32
    %614 = vector.broadcast %cst_242 : f32 to vector<4x2x8x8xf32>
    %615 = arith.mulf %613, %614 : vector<4x2x8x8xf32>
    %616 = vector.shape_cast %2 : vector<2x8x8xf32> to vector<1x2x8x8xf32>
    %617 = vector.broadcast %616 : vector<1x2x8x8xf32> to vector<4x2x8x8xf32>
    %618 = arith.addf %615, %617 : vector<4x2x8x8xf32>
    %cst_243 = arith.constant dense<0xFF800000> : vector<4x2x8xf32>
    %619 = vector.multi_reduction <maximumf>, %618, %cst_243 [3] : vector<4x2x8x8xf32> to vector<4x2x8xf32>
    %620 = vector.shape_cast %619 : vector<4x2x8xf32> to vector<4x2x8x1xf32>
    %621 = vector.broadcast %620 : vector<4x2x8x1xf32> to vector<4x2x8x8xf32>
    %622 = arith.subf %618, %621 : vector<4x2x8x8xf32>
    %623 = math.exp %622 : vector<4x2x8x8xf32>
    %cst_244 = arith.constant dense<0.000000e+00> : vector<4x2x8xf32>
    %624 = vector.multi_reduction <add>, %623, %cst_244 [3] : vector<4x2x8x8xf32> to vector<4x2x8xf32>
    %625 = vector.shape_cast %624 : vector<4x2x8xf32> to vector<4x2x8x1xf32>
    %626 = vector.broadcast %625 : vector<4x2x8x1xf32> to vector<4x2x8x8xf32>
    %627 = arith.divf %623, %626 : vector<4x2x8x8xf32>
    %628 = vector.extract_strided_slice %596 {offsets = [0, 0, 0], sizes = [2, 8, 8], strides = [1, 1, 1]} : vector<2x8x32xf32> to vector<2x8x8xf32>
    %629 = vector.extract_strided_slice %627 {offsets = [0, 0, 0, 0], sizes = [1, 2, 8, 8], strides = [1, 1, 1, 1]} : vector<4x2x8x8xf32> to vector<1x2x8x8xf32>
    %630 = vector.shape_cast %629 : vector<1x2x8x8xf32> to vector<2x8x8xf32>
    "tpu.trace_start"() <{level = 10 : i32, message = "bqk,bkd->bqd"}> : () -> ()
    %cst_245 = arith.constant dense<0.000000e+00> : vector<2x8x8xf32>
    %631 = tpu.matmul %630, %628, %cst_245 {dimension_numbers = #tpu.dot_dimension_numbers<[2], [1], [1], [2], [0, 0, 0, 1, 1, 2], [0], [0]>} : vector<2x8x8xf32>, vector<2x8x8xf32>, vector<2x8x8xf32> -> vector<2x8x8xf32>
    "tpu.trace_stop"() : () -> ()
    %632 = vector.extract_strided_slice %596 {offsets = [0, 0, 8], sizes = [2, 8, 8], strides = [1, 1, 1]} : vector<2x8x32xf32> to vector<2x8x8xf32>
    %633 = vector.extract_strided_slice %627 {offsets = [1, 0, 0, 0], sizes = [1, 2, 8, 8], strides = [1, 1, 1, 1]} : vector<4x2x8x8xf32> to vector<1x2x8x8xf32>
    %634 = vector.shape_cast %633 : vector<1x2x8x8xf32> to vector<2x8x8xf32>
    "tpu.trace_start"() <{level = 10 : i32, message = "bqk,bkd->bqd"}> : () -> ()
    %cst_246 = arith.constant dense<0.000000e+00> : vector<2x8x8xf32>
    %635 = tpu.matmul %634, %632, %cst_246 {dimension_numbers = #tpu.dot_dimension_numbers<[2], [1], [1], [2], [0, 0, 0, 1, 1, 2], [0], [0]>} : vector<2x8x8xf32>, vector<2x8x8xf32>, vector<2x8x8xf32> -> vector<2x8x8xf32>
    "tpu.trace_stop"() : () -> ()
    %636 = vector.extract_strided_slice %596 {offsets = [0, 0, 16], sizes = [2, 8, 8], strides = [1, 1, 1]} : vector<2x8x32xf32> to vector<2x8x8xf32>
    %637 = vector.extract_strided_slice %627 {offsets = [2, 0, 0, 0], sizes = [1, 2, 8, 8], strides = [1, 1, 1, 1]} : vector<4x2x8x8xf32> to vector<1x2x8x8xf32>
    %638 = vector.shape_cast %637 : vector<1x2x8x8xf32> to vector<2x8x8xf32>
    "tpu.trace_start"() <{level = 10 : i32, message = "bqk,bkd->bqd"}> : () -> ()
    %cst_247 = arith.constant dense<0.000000e+00> : vector<2x8x8xf32>
    %639 = tpu.matmul %638, %636, %cst_247 {dimension_numbers = #tpu.dot_dimension_numbers<[2], [1], [1], [2], [0, 0, 0, 1, 1, 2], [0], [0]>} : vector<2x8x8xf32>, vector<2x8x8xf32>, vector<2x8x8xf32> -> vector<2x8x8xf32>
    "tpu.trace_stop"() : () -> ()
    %640 = vector.extract_strided_slice %596 {offsets = [0, 0, 24], sizes = [2, 8, 8], strides = [1, 1, 1]} : vector<2x8x32xf32> to vector<2x8x8xf32>
    %641 = vector.extract_strided_slice %627 {offsets = [3, 0, 0, 0], sizes = [1, 2, 8, 8], strides = [1, 1, 1, 1]} : vector<4x2x8x8xf32> to vector<1x2x8x8xf32>
    %642 = vector.shape_cast %641 : vector<1x2x8x8xf32> to vector<2x8x8xf32>
    "tpu.trace_start"() <{level = 10 : i32, message = "bqk,bkd->bqd"}> : () -> ()
    %cst_248 = arith.constant dense<0.000000e+00> : vector<2x8x8xf32>
    %643 = tpu.matmul %642, %640, %cst_248 {dimension_numbers = #tpu.dot_dimension_numbers<[2], [1], [1], [2], [0, 0, 0, 1, 1, 2], [0], [0]>} : vector<2x8x8xf32>, vector<2x8x8xf32>, vector<2x8x8xf32> -> vector<2x8x8xf32>
    "tpu.trace_stop"() : () -> ()
    %644 = tpu.concatenate %631, %635, %639, %643 in 2 : vector<2x8x8xf32>, vector<2x8x8xf32>, vector<2x8x8xf32>, vector<2x8x8xf32> -> vector<2x8x32xf32>
    %645 = vector.shape_cast %644 : vector<2x8x32xf32> to vector<16x32xf32>
    %cst_249 = arith.constant dense<0.000000e+00> : vector<16x32xf32>
    %646 = tpu.matmul %645, %585, %cst_249 {dimension_numbers = #tpu.dot_dimension_numbers<[1], [0], [0], [1], [0, 0, 1, 1], [], []>} : vector<16x32xf32>, vector<32x32xf32>, vector<16x32xf32> -> vector<16x32xf32>
    %647 = vector.broadcast %587 : vector<1x32xf32> to vector<16x32xf32>
    %648 = arith.addf %646, %647 : vector<16x32xf32>
    %649 = arith.addf %648, %577 : vector<16x32xf32>
    %650 = vector.extract_strided_slice %579 {offsets = [0, 0], sizes = [1, 32], strides = [1, 1]} : vector<6x32xf32> to vector<1x32xf32>
    %651 = vector.extract_strided_slice %579 {offsets = [1, 0], sizes = [1, 32], strides = [1, 1]} : vector<6x32xf32> to vector<1x32xf32>
    %cst_250 = arith.constant dense<0.000000e+00> : vector<16xf32>
    %652 = vector.multi_reduction <add>, %649, %cst_250 [1] : vector<16x32xf32> to vector<16xf32>
    %653 = vector.shape_cast %652 : vector<16xf32> to vector<16x1xf32>
    %cst_251 = arith.constant 3.200000e+01 : f32
    %654 = vector.broadcast %cst_251 : f32 to vector<16x1xf32>
    %655 = arith.divf %653, %654 : vector<16x1xf32>
    %656 = vector.broadcast %655 : vector<16x1xf32> to vector<16x32xf32>
    %657 = arith.subf %649, %656 : vector<16x32xf32>
    %658 = arith.mulf %657, %657 : vector<16x32xf32>
    %cst_252 = arith.constant dense<0.000000e+00> : vector<16xf32>
    %659 = vector.multi_reduction <add>, %658, %cst_252 [1] : vector<16x32xf32> to vector<16xf32>
    %660 = vector.shape_cast %659 : vector<16xf32> to vector<16x1xf32>
    %cst_253 = arith.constant 3.200000e+01 : f32
    %661 = vector.broadcast %cst_253 : f32 to vector<16x1xf32>
    %662 = arith.divf %660, %661 : vector<16x1xf32>
    %cst_254 = arith.constant 9.99999974E-6 : f32
    %663 = vector.broadcast %cst_254 : f32 to vector<16x1xf32>
    %664 = arith.addf %662, %663 : vector<16x1xf32>
    %665 = math.rsqrt %664 : vector<16x1xf32>
    %666 = vector.broadcast %665 : vector<16x1xf32> to vector<16x32xf32>
    %667 = arith.mulf %657, %666 : vector<16x32xf32>
    %668 = vector.broadcast %650 : vector<1x32xf32> to vector<16x32xf32>
    %669 = arith.mulf %667, %668 : vector<16x32xf32>
    %670 = vector.broadcast %651 : vector<1x32xf32> to vector<16x32xf32>
    %671 = arith.addf %669, %670 : vector<16x32xf32>
    %672 = vector.broadcast %4 : vector<16x1xf32> to vector<16x32xf32>
    %673 = arith.mulf %671, %672 : vector<16x32xf32>
    %c1_255 = arith.constant 1 : index
    %c0_256 = arith.constant 0 : index
    %c0_257 = arith.constant 0 : index
    %674 = vector.load %arg21[%c1_255, %c0_256, %c0_257] : memref<2x32x96xf32, #tpu.memory_space<vmem>>, vector<1x32x96xf32>
    %675 = vector.shape_cast %674 : vector<1x32x96xf32> to vector<32x96xf32>
    %c1_258 = arith.constant 1 : index
    %c0_259 = arith.constant 0 : index
    %c0_260 = arith.constant 0 : index
    %676 = vector.load %arg22[%c1_258, %c0_259, %c0_260] : memref<2x1x96xf32, #tpu.memory_space<vmem>>, vector<1x1x96xf32>
    %677 = vector.shape_cast %676 : vector<1x1x96xf32> to vector<1x96xf32>
    %c1_261 = arith.constant 1 : index
    %c0_262 = arith.constant 0 : index
    %c0_263 = arith.constant 0 : index
    %678 = vector.load %arg23[%c1_261, %c0_262, %c0_263] : memref<2x32x32xf32, #tpu.memory_space<vmem>>, vector<1x32x32xf32>
    %679 = vector.shape_cast %678 : vector<1x32x32xf32> to vector<32x32xf32>
    %c1_264 = arith.constant 1 : index
    %c0_265 = arith.constant 0 : index
    %c0_266 = arith.constant 0 : index
    %680 = vector.load %arg24[%c1_264, %c0_265, %c0_266] : memref<2x1x32xf32, #tpu.memory_space<vmem>>, vector<1x1x32xf32>
    %681 = vector.shape_cast %680 : vector<1x1x32xf32> to vector<1x32xf32>
    %682 = vector.extract_strided_slice %675 {offsets = [0, 0], sizes = [32, 32], strides = [1, 1]} : vector<32x96xf32> to vector<32x32xf32>
    %cst_267 = arith.constant dense<0.000000e+00> : vector<16x32xf32>
    %683 = tpu.matmul %673, %682, %cst_267 {dimension_numbers = #tpu.dot_dimension_numbers<[1], [0], [0], [1], [0, 0, 1, 1], [], []>} : vector<16x32xf32>, vector<32x32xf32>, vector<16x32xf32> -> vector<16x32xf32>
    %684 = vector.extract_strided_slice %677 {offsets = [0, 0], sizes = [1, 32], strides = [1, 1]} : vector<1x96xf32> to vector<1x32xf32>
    %685 = vector.broadcast %684 : vector<1x32xf32> to vector<16x32xf32>
    %686 = arith.addf %683, %685 : vector<16x32xf32>
    %687 = vector.extract_strided_slice %675 {offsets = [0, 32], sizes = [32, 64], strides = [1, 1]} : vector<32x96xf32> to vector<32x64xf32>
    %cst_268 = arith.constant dense<0.000000e+00> : vector<16x64xf32>
    %688 = tpu.matmul %315, %687, %cst_268 {dimension_numbers = #tpu.dot_dimension_numbers<[1], [0], [0], [1], [0, 0, 1, 1], [], []>} : vector<16x32xf32>, vector<32x64xf32>, vector<16x64xf32> -> vector<16x64xf32>
    %689 = vector.extract_strided_slice %677 {offsets = [0, 32], sizes = [1, 64], strides = [1, 1]} : vector<1x96xf32> to vector<1x64xf32>
    %690 = vector.broadcast %689 : vector<1x64xf32> to vector<16x64xf32>
    %691 = arith.addf %688, %690 : vector<16x64xf32>
    %692 = vector.extract_strided_slice %691 {offsets = [0, 0], sizes = [16, 32], strides = [1, 1]} : vector<16x64xf32> to vector<16x32xf32>
    %693 = vector.extract_strided_slice %691 {offsets = [0, 32], sizes = [16, 32], strides = [1, 1]} : vector<16x64xf32> to vector<16x32xf32>
    %694 = vector.shape_cast %686 : vector<16x32xf32> to vector<2x8x32xf32>
    %695 = vector.shape_cast %692 : vector<16x32xf32> to vector<2x8x32xf32>
    %696 = vector.shape_cast %693 : vector<16x32xf32> to vector<2x8x32xf32>
    %697 = vector.extract_strided_slice %694 {offsets = [0, 0, 0], sizes = [2, 8, 8], strides = [1, 1, 1]} : vector<2x8x32xf32> to vector<2x8x8xf32>
    %698 = vector.extract_strided_slice %695 {offsets = [0, 0, 0], sizes = [2, 8, 8], strides = [1, 1, 1]} : vector<2x8x32xf32> to vector<2x8x8xf32>
    "tpu.trace_start"() <{level = 10 : i32, message = "bqd,bkd->bqk"}> : () -> ()
    %cst_269 = arith.constant dense<0.000000e+00> : vector<2x8x8xf32>
    %699 = tpu.matmul %697, %698, %cst_269 {dimension_numbers = #tpu.dot_dimension_numbers<[2], [2], [1], [1], [0, 0, 0, 1, 1, 1], [0], [0]>} : vector<2x8x8xf32>, vector<2x8x8xf32>, vector<2x8x8xf32> -> vector<2x8x8xf32>
    "tpu.trace_stop"() : () -> ()
    %700 = vector.extract_strided_slice %694 {offsets = [0, 0, 8], sizes = [2, 8, 8], strides = [1, 1, 1]} : vector<2x8x32xf32> to vector<2x8x8xf32>
    %701 = vector.extract_strided_slice %695 {offsets = [0, 0, 8], sizes = [2, 8, 8], strides = [1, 1, 1]} : vector<2x8x32xf32> to vector<2x8x8xf32>
    "tpu.trace_start"() <{level = 10 : i32, message = "bqd,bkd->bqk"}> : () -> ()
    %cst_270 = arith.constant dense<0.000000e+00> : vector<2x8x8xf32>
    %702 = tpu.matmul %700, %701, %cst_270 {dimension_numbers = #tpu.dot_dimension_numbers<[2], [2], [1], [1], [0, 0, 0, 1, 1, 1], [0], [0]>} : vector<2x8x8xf32>, vector<2x8x8xf32>, vector<2x8x8xf32> -> vector<2x8x8xf32>
    "tpu.trace_stop"() : () -> ()
    %703 = vector.extract_strided_slice %694 {offsets = [0, 0, 16], sizes = [2, 8, 8], strides = [1, 1, 1]} : vector<2x8x32xf32> to vector<2x8x8xf32>
    %704 = vector.extract_strided_slice %695 {offsets = [0, 0, 16], sizes = [2, 8, 8], strides = [1, 1, 1]} : vector<2x8x32xf32> to vector<2x8x8xf32>
    "tpu.trace_start"() <{level = 10 : i32, message = "bqd,bkd->bqk"}> : () -> ()
    %cst_271 = arith.constant dense<0.000000e+00> : vector<2x8x8xf32>
    %705 = tpu.matmul %703, %704, %cst_271 {dimension_numbers = #tpu.dot_dimension_numbers<[2], [2], [1], [1], [0, 0, 0, 1, 1, 1], [0], [0]>} : vector<2x8x8xf32>, vector<2x8x8xf32>, vector<2x8x8xf32> -> vector<2x8x8xf32>
    "tpu.trace_stop"() : () -> ()
    %706 = vector.extract_strided_slice %694 {offsets = [0, 0, 24], sizes = [2, 8, 8], strides = [1, 1, 1]} : vector<2x8x32xf32> to vector<2x8x8xf32>
    %707 = vector.extract_strided_slice %695 {offsets = [0, 0, 24], sizes = [2, 8, 8], strides = [1, 1, 1]} : vector<2x8x32xf32> to vector<2x8x8xf32>
    "tpu.trace_start"() <{level = 10 : i32, message = "bqd,bkd->bqk"}> : () -> ()
    %cst_272 = arith.constant dense<0.000000e+00> : vector<2x8x8xf32>
    %708 = tpu.matmul %706, %707, %cst_272 {dimension_numbers = #tpu.dot_dimension_numbers<[2], [2], [1], [1], [0, 0, 0, 1, 1, 1], [0], [0]>} : vector<2x8x8xf32>, vector<2x8x8xf32>, vector<2x8x8xf32> -> vector<2x8x8xf32>
    "tpu.trace_stop"() : () -> ()
    %709 = vector.shape_cast %699 : vector<2x8x8xf32> to vector<1x2x8x8xf32>
    %710 = vector.shape_cast %702 : vector<2x8x8xf32> to vector<1x2x8x8xf32>
    %711 = vector.shape_cast %705 : vector<2x8x8xf32> to vector<1x2x8x8xf32>
    %712 = vector.shape_cast %708 : vector<2x8x8xf32> to vector<1x2x8x8xf32>
    %713 = tpu.concatenate %709, %710, %711, %712 in 0 : vector<1x2x8x8xf32>, vector<1x2x8x8xf32>, vector<1x2x8x8xf32>, vector<1x2x8x8xf32> -> vector<4x2x8x8xf32>
    %cst_273 = arith.constant 0.353553385 : f32
    %714 = vector.broadcast %cst_273 : f32 to vector<4x2x8x8xf32>
    %715 = arith.mulf %713, %714 : vector<4x2x8x8xf32>
    %716 = vector.shape_cast %3 : vector<2x1x8xf32> to vector<1x2x1x8xf32>
    %717 = vector.broadcast %716 : vector<1x2x1x8xf32> to vector<4x2x8x8xf32>
    %718 = arith.addf %715, %717 : vector<4x2x8x8xf32>
    %cst_274 = arith.constant dense<0xFF800000> : vector<4x2x8xf32>
    %719 = vector.multi_reduction <maximumf>, %718, %cst_274 [3] : vector<4x2x8x8xf32> to vector<4x2x8xf32>
    %720 = vector.shape_cast %719 : vector<4x2x8xf32> to vector<4x2x8x1xf32>
    %721 = vector.broadcast %720 : vector<4x2x8x1xf32> to vector<4x2x8x8xf32>
    %722 = arith.subf %718, %721 : vector<4x2x8x8xf32>
    %723 = math.exp %722 : vector<4x2x8x8xf32>
    %cst_275 = arith.constant dense<0.000000e+00> : vector<4x2x8xf32>
    %724 = vector.multi_reduction <add>, %723, %cst_275 [3] : vector<4x2x8x8xf32> to vector<4x2x8xf32>
    %725 = vector.shape_cast %724 : vector<4x2x8xf32> to vector<4x2x8x1xf32>
    %726 = vector.broadcast %725 : vector<4x2x8x1xf32> to vector<4x2x8x8xf32>
    %727 = arith.divf %723, %726 : vector<4x2x8x8xf32>
    %728 = vector.extract_strided_slice %696 {offsets = [0, 0, 0], sizes = [2, 8, 8], strides = [1, 1, 1]} : vector<2x8x32xf32> to vector<2x8x8xf32>
    %729 = vector.extract_strided_slice %727 {offsets = [0, 0, 0, 0], sizes = [1, 2, 8, 8], strides = [1, 1, 1, 1]} : vector<4x2x8x8xf32> to vector<1x2x8x8xf32>
    %730 = vector.shape_cast %729 : vector<1x2x8x8xf32> to vector<2x8x8xf32>
    "tpu.trace_start"() <{level = 10 : i32, message = "bqk,bkd->bqd"}> : () -> ()
    %cst_276 = arith.constant dense<0.000000e+00> : vector<2x8x8xf32>
    %731 = tpu.matmul %730, %728, %cst_276 {dimension_numbers = #tpu.dot_dimension_numbers<[2], [1], [1], [2], [0, 0, 0, 1, 1, 2], [0], [0]>} : vector<2x8x8xf32>, vector<2x8x8xf32>, vector<2x8x8xf32> -> vector<2x8x8xf32>
    "tpu.trace_stop"() : () -> ()
    %732 = vector.extract_strided_slice %696 {offsets = [0, 0, 8], sizes = [2, 8, 8], strides = [1, 1, 1]} : vector<2x8x32xf32> to vector<2x8x8xf32>
    %733 = vector.extract_strided_slice %727 {offsets = [1, 0, 0, 0], sizes = [1, 2, 8, 8], strides = [1, 1, 1, 1]} : vector<4x2x8x8xf32> to vector<1x2x8x8xf32>
    %734 = vector.shape_cast %733 : vector<1x2x8x8xf32> to vector<2x8x8xf32>
    "tpu.trace_start"() <{level = 10 : i32, message = "bqk,bkd->bqd"}> : () -> ()
    %cst_277 = arith.constant dense<0.000000e+00> : vector<2x8x8xf32>
    %735 = tpu.matmul %734, %732, %cst_277 {dimension_numbers = #tpu.dot_dimension_numbers<[2], [1], [1], [2], [0, 0, 0, 1, 1, 2], [0], [0]>} : vector<2x8x8xf32>, vector<2x8x8xf32>, vector<2x8x8xf32> -> vector<2x8x8xf32>
    "tpu.trace_stop"() : () -> ()
    %736 = vector.extract_strided_slice %696 {offsets = [0, 0, 16], sizes = [2, 8, 8], strides = [1, 1, 1]} : vector<2x8x32xf32> to vector<2x8x8xf32>
    %737 = vector.extract_strided_slice %727 {offsets = [2, 0, 0, 0], sizes = [1, 2, 8, 8], strides = [1, 1, 1, 1]} : vector<4x2x8x8xf32> to vector<1x2x8x8xf32>
    %738 = vector.shape_cast %737 : vector<1x2x8x8xf32> to vector<2x8x8xf32>
    "tpu.trace_start"() <{level = 10 : i32, message = "bqk,bkd->bqd"}> : () -> ()
    %cst_278 = arith.constant dense<0.000000e+00> : vector<2x8x8xf32>
    %739 = tpu.matmul %738, %736, %cst_278 {dimension_numbers = #tpu.dot_dimension_numbers<[2], [1], [1], [2], [0, 0, 0, 1, 1, 2], [0], [0]>} : vector<2x8x8xf32>, vector<2x8x8xf32>, vector<2x8x8xf32> -> vector<2x8x8xf32>
    "tpu.trace_stop"() : () -> ()
    %740 = vector.extract_strided_slice %696 {offsets = [0, 0, 24], sizes = [2, 8, 8], strides = [1, 1, 1]} : vector<2x8x32xf32> to vector<2x8x8xf32>
    %741 = vector.extract_strided_slice %727 {offsets = [3, 0, 0, 0], sizes = [1, 2, 8, 8], strides = [1, 1, 1, 1]} : vector<4x2x8x8xf32> to vector<1x2x8x8xf32>
    %742 = vector.shape_cast %741 : vector<1x2x8x8xf32> to vector<2x8x8xf32>
    "tpu.trace_start"() <{level = 10 : i32, message = "bqk,bkd->bqd"}> : () -> ()
    %cst_279 = arith.constant dense<0.000000e+00> : vector<2x8x8xf32>
    %743 = tpu.matmul %742, %740, %cst_279 {dimension_numbers = #tpu.dot_dimension_numbers<[2], [1], [1], [2], [0, 0, 0, 1, 1, 2], [0], [0]>} : vector<2x8x8xf32>, vector<2x8x8xf32>, vector<2x8x8xf32> -> vector<2x8x8xf32>
    "tpu.trace_stop"() : () -> ()
    %744 = tpu.concatenate %731, %735, %739, %743 in 2 : vector<2x8x8xf32>, vector<2x8x8xf32>, vector<2x8x8xf32>, vector<2x8x8xf32> -> vector<2x8x32xf32>
    %745 = vector.shape_cast %744 : vector<2x8x32xf32> to vector<16x32xf32>
    %cst_280 = arith.constant dense<0.000000e+00> : vector<16x32xf32>
    %746 = tpu.matmul %745, %679, %cst_280 {dimension_numbers = #tpu.dot_dimension_numbers<[1], [0], [0], [1], [0, 0, 1, 1], [], []>} : vector<16x32xf32>, vector<32x32xf32>, vector<16x32xf32> -> vector<16x32xf32>
    %747 = vector.broadcast %681 : vector<1x32xf32> to vector<16x32xf32>
    %748 = arith.addf %746, %747 : vector<16x32xf32>
    %749 = arith.addf %748, %673 : vector<16x32xf32>
    %750 = vector.extract_strided_slice %579 {offsets = [2, 0], sizes = [1, 32], strides = [1, 1]} : vector<6x32xf32> to vector<1x32xf32>
    %751 = vector.extract_strided_slice %579 {offsets = [3, 0], sizes = [1, 32], strides = [1, 1]} : vector<6x32xf32> to vector<1x32xf32>
    %cst_281 = arith.constant dense<0.000000e+00> : vector<16xf32>
    %752 = vector.multi_reduction <add>, %749, %cst_281 [1] : vector<16x32xf32> to vector<16xf32>
    %753 = vector.shape_cast %752 : vector<16xf32> to vector<16x1xf32>
    %cst_282 = arith.constant 3.200000e+01 : f32
    %754 = vector.broadcast %cst_282 : f32 to vector<16x1xf32>
    %755 = arith.divf %753, %754 : vector<16x1xf32>
    %756 = vector.broadcast %755 : vector<16x1xf32> to vector<16x32xf32>
    %757 = arith.subf %749, %756 : vector<16x32xf32>
    %758 = arith.mulf %757, %757 : vector<16x32xf32>
    %cst_283 = arith.constant dense<0.000000e+00> : vector<16xf32>
    %759 = vector.multi_reduction <add>, %758, %cst_283 [1] : vector<16x32xf32> to vector<16xf32>
    %760 = vector.shape_cast %759 : vector<16xf32> to vector<16x1xf32>
    %cst_284 = arith.constant 3.200000e+01 : f32
    %761 = vector.broadcast %cst_284 : f32 to vector<16x1xf32>
    %762 = arith.divf %760, %761 : vector<16x1xf32>
    %cst_285 = arith.constant 9.99999974E-6 : f32
    %763 = vector.broadcast %cst_285 : f32 to vector<16x1xf32>
    %764 = arith.addf %762, %763 : vector<16x1xf32>
    %765 = math.rsqrt %764 : vector<16x1xf32>
    %766 = vector.broadcast %765 : vector<16x1xf32> to vector<16x32xf32>
    %767 = arith.mulf %757, %766 : vector<16x32xf32>
    %768 = vector.broadcast %750 : vector<1x32xf32> to vector<16x32xf32>
    %769 = arith.mulf %767, %768 : vector<16x32xf32>
    %770 = vector.broadcast %751 : vector<1x32xf32> to vector<16x32xf32>
    %771 = arith.addf %769, %770 : vector<16x32xf32>
    %772 = vector.broadcast %4 : vector<16x1xf32> to vector<16x32xf32>
    %773 = arith.mulf %771, %772 : vector<16x32xf32>
    %c1_286 = arith.constant 1 : index
    %c0_287 = arith.constant 0 : index
    %c0_288 = arith.constant 0 : index
    %774 = vector.load %arg25[%c1_286, %c0_287, %c0_288] : memref<2x32x64xf32, #tpu.memory_space<vmem>>, vector<1x32x64xf32>
    %775 = vector.shape_cast %774 : vector<1x32x64xf32> to vector<32x64xf32>
    %cst_289 = arith.constant dense<0.000000e+00> : vector<16x64xf32>
    %776 = tpu.matmul %773, %775, %cst_289 {dimension_numbers = #tpu.dot_dimension_numbers<[1], [0], [0], [1], [0, 0, 1, 1], [], []>} : vector<16x32xf32>, vector<32x64xf32>, vector<16x64xf32> -> vector<16x64xf32>
    %c1_290 = arith.constant 1 : index
    %c0_291 = arith.constant 0 : index
    %c0_292 = arith.constant 0 : index
    %777 = vector.load %arg26[%c1_290, %c0_291, %c0_292] : memref<2x1x64xf32, #tpu.memory_space<vmem>>, vector<1x1x64xf32>
    %778 = vector.shape_cast %777 : vector<1x1x64xf32> to vector<1x64xf32>
    %779 = vector.broadcast %778 : vector<1x64xf32> to vector<16x64xf32>
    %780 = arith.addf %776, %779 : vector<16x64xf32>
    %cst_293 = arith.constant 0.000000e+00 : f32
    %781 = vector.broadcast %cst_293 : f32 to vector<16x64xf32>
    %782 = arith.maximumf %780, %781 : vector<16x64xf32>
    %c1_294 = arith.constant 1 : index
    %c0_295 = arith.constant 0 : index
    %c0_296 = arith.constant 0 : index
    %783 = vector.load %arg27[%c1_294, %c0_295, %c0_296] : memref<2x64x32xf32, #tpu.memory_space<vmem>>, vector<1x64x32xf32>
    %784 = vector.shape_cast %783 : vector<1x64x32xf32> to vector<64x32xf32>
    %cst_297 = arith.constant dense<0.000000e+00> : vector<16x32xf32>
    %785 = tpu.matmul %782, %784, %cst_297 {dimension_numbers = #tpu.dot_dimension_numbers<[1], [0], [0], [1], [0, 0, 1, 1], [], []>} : vector<16x64xf32>, vector<64x32xf32>, vector<16x32xf32> -> vector<16x32xf32>
    %c1_298 = arith.constant 1 : index
    %c0_299 = arith.constant 0 : index
    %c0_300 = arith.constant 0 : index
    %786 = vector.load %arg28[%c1_298, %c0_299, %c0_300] : memref<2x1x32xf32, #tpu.memory_space<vmem>>, vector<1x1x32xf32>
    %787 = vector.shape_cast %786 : vector<1x1x32xf32> to vector<1x32xf32>
    %788 = vector.broadcast %787 : vector<1x32xf32> to vector<16x32xf32>
    %789 = arith.addf %785, %788 : vector<16x32xf32>
    %790 = arith.addf %789, %773 : vector<16x32xf32>
    %791 = vector.extract_strided_slice %579 {offsets = [4, 0], sizes = [1, 32], strides = [1, 1]} : vector<6x32xf32> to vector<1x32xf32>
    %792 = vector.extract_strided_slice %579 {offsets = [5, 0], sizes = [1, 32], strides = [1, 1]} : vector<6x32xf32> to vector<1x32xf32>
    %cst_301 = arith.constant dense<0.000000e+00> : vector<16xf32>
    %793 = vector.multi_reduction <add>, %790, %cst_301 [1] : vector<16x32xf32> to vector<16xf32>
    %794 = vector.shape_cast %793 : vector<16xf32> to vector<16x1xf32>
    %cst_302 = arith.constant 3.200000e+01 : f32
    %795 = vector.broadcast %cst_302 : f32 to vector<16x1xf32>
    %796 = arith.divf %794, %795 : vector<16x1xf32>
    %797 = vector.broadcast %796 : vector<16x1xf32> to vector<16x32xf32>
    %798 = arith.subf %790, %797 : vector<16x32xf32>
    %799 = arith.mulf %798, %798 : vector<16x32xf32>
    %cst_303 = arith.constant dense<0.000000e+00> : vector<16xf32>
    %800 = vector.multi_reduction <add>, %799, %cst_303 [1] : vector<16x32xf32> to vector<16xf32>
    %801 = vector.shape_cast %800 : vector<16xf32> to vector<16x1xf32>
    %cst_304 = arith.constant 3.200000e+01 : f32
    %802 = vector.broadcast %cst_304 : f32 to vector<16x1xf32>
    %803 = arith.divf %801, %802 : vector<16x1xf32>
    %cst_305 = arith.constant 9.99999974E-6 : f32
    %804 = vector.broadcast %cst_305 : f32 to vector<16x1xf32>
    %805 = arith.addf %803, %804 : vector<16x1xf32>
    %806 = math.rsqrt %805 : vector<16x1xf32>
    %807 = vector.broadcast %806 : vector<16x1xf32> to vector<16x32xf32>
    %808 = arith.mulf %798, %807 : vector<16x32xf32>
    %809 = vector.broadcast %791 : vector<1x32xf32> to vector<16x32xf32>
    %810 = arith.mulf %808, %809 : vector<16x32xf32>
    %811 = vector.broadcast %792 : vector<1x32xf32> to vector<16x32xf32>
    %812 = arith.addf %810, %811 : vector<16x32xf32>
    %813 = vector.broadcast %4 : vector<16x1xf32> to vector<16x32xf32>
    %814 = arith.mulf %812, %813 : vector<16x32xf32>
    %c0_306 = arith.constant 0 : index
    %c0_307 = arith.constant 0 : index
    %815 = vector.load %arg30[%c0_306, %c0_307] : memref<32x128xf32, #tpu.memory_space<vmem>>, vector<32x128xf32>
    %cst_308 = arith.constant dense<0.000000e+00> : vector<16x128xf32>
    %816 = tpu.matmul %814, %815, %cst_308 {dimension_numbers = #tpu.dot_dimension_numbers<[1], [0], [0], [1], [0, 0, 1, 1], [], []>} : vector<16x32xf32>, vector<32x128xf32>, vector<16x128xf32> -> vector<16x128xf32>
    %c0_309 = arith.constant 0 : index
    %c0_310 = arith.constant 0 : index
    %817 = vector.load %arg31[%c0_309, %c0_310] : memref<1x128xf32, #tpu.memory_space<vmem>>, vector<1x128xf32>
    %818 = vector.broadcast %817 : vector<1x128xf32> to vector<16x128xf32>
    %819 = arith.addf %816, %818 : vector<16x128xf32>
    %c0_311 = arith.constant 0 : index
    %c0_312 = arith.constant 0 : index
    %820 = vector.load %arg32[%c0_311, %c0_312] : memref<16x128xf32, #tpu.memory_space<vmem>>, vector<16x128xf32>
    tpu.vector_store %arg32[%c0_311, %c0_312], %819 {strides = array<i32>} : memref<16x128xf32, #tpu.memory_space<vmem>>, vector<16x128xf32>,
    return
  }
}

</mosaic_0001>

<bundles_post_ra>
// kernel: bert_abs_sum_forward.1
= control target key start
LH: loop header
LB: loop body
LE: loop exit
PB: predicated region body
PF: predicated region fallthrough
CT: control target
= control target key end

     0   :  { %vm145_vm0 = vcmask 261120   ;;  %v6445_v4 = vmov 32.0   ;;  %s6446_s6 = smov 9   ;;  %s8108_s10 = smov 8   ;;  %vm249_vm8 = vcmask 64512   ;;  %s8103_s0 = inlined_call_operand.smem [shape: u32[33], index: -1, kind: input, shape index: {}] }
   0x1   :  { %s1_s5 = sld [smem:[%s8103_s0]]   ;;  %6185 = vrcp.f32 %v6445_v4  ;;  %s6448_s14 = smov 7  }
   0x2   :  { %s6509_s9 = sld [smem:[%s8103_s0 + %s6446_s6]]   ;;  %s6449_s18 = smov 88  }
   0x3   :  { %s6515_s13 = sld [smem:[%s8103_s0 + %s8108_s10]]   ;;  %s6450_s19 = smov 96  }
   0x4   :  { %s6526_s17 = sld [smem:[%s8103_s0 + %s6448_s14]]   ;;  %s6451_s20 = smov 80  }
   0x5   :  { %s6452_s21 = smov 120   ;;  %s6453_s22 = smov 104  }
   0x6   :  { %s6454_s23 = smov 112   ;;  %s6455_s24 = smov 72  }
   0x7   :  { %v143_v0 = vld [vmem:[%s1_s5] sm:$0xff]  ;;  %v144_v2 = vld [vmem:[%s1_s5 + $0x8] sm:$0xff]  ;;  %v6186_v5 = vpop.eup %6185  ;;  %s6456_s25 = smov 3   ;;  %s6457_s29 = smov 56  }
   0x8   :  { %v146_v1 = vsel %vm145_vm0, %v143_v0, 0.0  ;;  %v149_v3 = vsel %vm145_vm0, %v144_v2, 0.0  ;;  %v153_v6 = vmul.f32 32.0, %v6186_v5  ;;  %vm157_vm1 = vweird.f32 %v6186_v5  ;;  %v6160_v54 = vld [vmem:[%s6509_s9] ss:$0 sm:$0xff]  ;;  %s6573_s28 = sld [smem:[%s8103_s0 + %s6456_s25]]   ;;  %s6458_s30 = smov 64  }
   0x9   :  { %147 = vadd.xlane.f32.xlu0 %v146_v1  ;;  %v207_v21 = vld [vmem:[%s6515_s13 + $0x18] sm:$0xff]  ;;  %v206_v22 = vld [vmem:[%s6515_s13 + $0x10] sm:$0xff]  ;;  %v205_v23 = vld [vmem:[%s6515_s13 + $0x8] sm:$0xff]  ;;  %s8110_s1 = smov 48   ;;  %s8112_s2 = smov 40  }
   0xa   :  { %v154_v7 = vsub.f32 1.0, %v153_v6  ;;  %235 = vmatpush.msra.mxu0 %v207_v21  ;;  %v204_v24 = vld [vmem:[%s6515_s13] sm:$0xff]  ;;  %s8106_s3 = smov 24   ;;  %s6462_s4 = smov 11  }
   0xb   :  { %v134_v36 = vld [vmem:[%s6526_s17] sm:$0xf]  ;;  %s6741_s7 = sld [smem:[%s8103_s0 + %s6462_s4]]   ;;  %s8104_s8 = smov 16  }
   0xc   :  { %v155_v8 = vmul.f32 %v6186_v5, %v154_v7  ;;  %236 = vmatpush.msra.mxu0 %v206_v22  ;;  %v197_v40 = vperm.slane %v134_v36, 0  ;;  %v200_v44 = vperm.slane %v134_v36, 1  ;;  %s6464_s11 = smov 10   ;;  %s6465_s16 = smov 13  }
   0xd   :  { %s6748_s15 = sld [smem:[%s8103_s0 + %s6464_s11]]   ;;  %s6466_s4 = smov 12  }
   0xe   :  { %v156_v9 = vadd.f32 %v6186_v5, %v155_v8  ;;  %237 = vmatpush.msra.mxu0 %v205_v23  ;;  %s6774_s27 = sld [smem:[%s8103_s0 + %s6465_s16]]   ;;  %s6467_s25 = smov 15  }
   0xf   :  { %s6779_s11 = sld [smem:[%s8103_s0 + %s6466_s4]]   ;;  %s6468_s6 = smov 14  }
  0x10   :  { %v6500_v10 = vsel %vm157_vm1, %v6186_v5, %v156_v9  ;;  %238 = vmatpush.msra.mxu0 %v204_v24  ;;  %v6161_v9 = vld [vmem:[%s6573_s28] ss:$0 sm:$0xff]  ;;  %s6791_s16 = sld [smem:[%s8103_s0 + %s8104_s8]]   ;;  %s6471_s12 = smov 18  }
  0x11   :  { %150 = vadd.xlane.f32.xlu0 %v149_v3  ;;  %s6803_s5 = sld [smem:[%s8103_s0 + %s6467_s25]]   ;;  %s6472_s25 = smov 2  }
  0x12   :  { %s6474_s4 = smov 20  }
  0x7c   :  { %v148_v11 = vpop.xlane.xlu0 %147 }
  0x7d   :  { %v159_v12 = vmul.f32 %v6500_v10, %v148_v11 }
  0x7f   :  { %v161_v13 = vsub.f32 %v143_v0, %v159_v12 }
  0x81   :  { %v163_v14 = vmul.f32 %v161_v13, %v161_v13 }
  0x83   :  { %v165_v15 = vsel %vm145_vm0, %v163_v14, 0.0 }
  0x84   :  { %166 = vadd.xlane.f32.xlu1 %v165_v15  ;;  %v151_v16 = vpop.xlane.xlu0 %150  ;;  %v6162_v15 = vld [vmem:[%s6573_s28 + $0x1] ss:$0 sm:$0xff] }
  0x85   :  { %v160_v17 = vmul.f32 %v6500_v10, %v151_v16 }
  0x87   :  { %v162_v18 = vsub.f32 %v144_v2, %v160_v17 }
  0x89   :  { %v164_v19 = vmul.f32 %v162_v18, %v162_v18 }
  0x8b   :  { %v168_v20 = vsel %vm145_vm0, %v164_v19, 0.0 }
  0x8c   :  { %169 = vadd.xlane.f32.xlu1 %v168_v20 }
  0xf7   :  { %v167_v25 = vpop.xlane.xlu1 %166 }
  0xf8   :  { %v171_v26 = vmul.f32 %v167_v25, %v6500_v10 }
  0xfa   :  { %v173_v27 = vadd.f32 1e-12, %v171_v26 }
  0xfc   :  { %6187 = vrsqrt.f32 %v173_v27  ;;  %vm181_vm3 = vweird.f32 %v173_v27 }
  0xff   :  { %v170_v28 = vpop.xlane.xlu1 %169 }
 0x100   :  { %v172_v29 = vmul.f32 %v170_v28, %v6500_v10 }
 0x102   :  { %v6188_v30 = vpop.eup %6187  ;;  %v174_v31 = vadd.f32 1e-12, %v172_v29 }
 0x103   :  { %v176_v32 = vmul.f32 %v6188_v30, %v173_v27  ;;  %vm182_vm2 = vweird.f32 %v6188_v30 }
 0x104   :  { %6189 = vrsqrt.f32 %v174_v31  ;;  %vm183_vm4 = vmor %vm181_vm3, %vm182_vm2  ;;  %vm191_vm6 = vweird.f32 %v174_v31 }
 0x105   :  { %v177_v33 = vmul.f32 %v6188_v30, %v176_v32 }
 0x107   :  { %v178_v34 = vmul.f32 0.5, %v177_v33 }
 0x109   :  { %v179_v35 = vsub.f32 1.5, %v178_v34 }
 0x10a   :  { %v6190_v37 = vpop.eup %6189 }
 0x10b   :  { %v180_v38 = vmul.f32 %v6188_v30, %v179_v35  ;;  %v186_v39 = vmul.f32 %v6190_v37, %v174_v31  ;;  %vm192_vm5 = vweird.f32 %v6190_v37 }
 0x10c   :  { %vm193_vm7 = vmor %vm191_vm6, %vm192_vm5 }
 0x10d   :  { %v187_v41 = vmul.f32 %v6190_v37, %v186_v39  ;;  %v184_v42 = vsel %vm183_vm4, %v6188_v30, %v180_v38 }
 0x10e   :  { %v195_v43 = vmul.f32 %v184_v42, %v161_v13 }
 0x10f   :  { %v188_v45 = vmul.f32 0.5, %v187_v41 }
 0x110   :  { %v198_v46 = vmul.f32 %v197_v40, %v195_v43 }
 0x111   :  { %v189_v47 = vsub.f32 1.5, %v188_v45 }
 0x112   :  { %v6529_v48 = vadd.f32 %v200_v44, %v198_v46 }
 0x113   :  { %v190_v49 = vmul.f32 %v6190_v37, %v189_v47 }
 0x114   :  { %5808 = vmatmul.msk.f32.vlgmr.msra.gmra.mxu0 %vm145_vm0, %v6529_v48 }
 0x115   :  { %v194_v50 = vsel %vm193_vm7, %v6190_v37, %v190_v49 }
 0x116   :  { %v196_v51 = vmul.f32 %v194_v50, %v162_v18 }
 0x118   :  { %v199_v52 = vmul.f32 %v197_v40, %v196_v51 }
 0x11a   :  { %v6533_v53 = vadd.f32 %v200_v44, %v199_v52 }
 0x11c   :  { %5809 = vmatmul.msk.f32.gmra.mxu0 %vm145_vm0, %v6533_v53 }
 0x191   :  { %v240_v55 = vpop.f32.mrf.mxu0 }
 0x192   :  { %v6538_v56 = vadd.f32 %v6160_v54, %v240_v55 }
 0x194   :  { %303 = vrot.lane.b32.xlu0 %v6538_v56, %s6449_s18  ;;  %247 = vrot.lane.b32.xlu2 %v6538_v56, %s6450_s19 }
 0x195   :  { %359 = vrot.lane.b32.xlu1 %v6538_v56, %s6451_s20 }
 0x199   :  { %v243_v57 = vpop.f32.mrf.mxu0 }
 0x19a   :  { %v6546_v58 = vadd.f32 %v6160_v54, %v243_v57 }
 0x19c   :  { %301 = vrot.lane.b32.xlu2 %v6538_v56, %s6452_s21  ;;  %329 = vrot.lane.b32.xlu0 %v6546_v58, %s6452_s21  ;;  %v6608_v44 = vpack.i.bf16 %v6546_v58, %v6538_v56 }
 0x19d   :  { %441 = vrot.lane.b32.xlu1 %v6546_v58, %s6453_s22 }
 0x1a4   :  { %357 = vrot.lane.b32.xlu2 %v6538_v56, %s6454_s23  ;;  %415 = vrot.lane.b32.xlu0 %v6538_v56, %s6455_s24 }
 0x1a5   :  { %413 = vrot.lane.b32.xlu1 %v6538_v56, %s6453_s22 }
 0x1ac   :  { %385 = vrot.lane.b32.xlu0 %v6546_v58, %s6454_s23  ;;  %275 = vrot.lane.b32.xlu2 %v6546_v58, %s6450_s19 }
 0x1b4   :  { %331 = vrot.lane.b32.xlu2 %v6546_v58, %s6449_s18 }
 0x1bc   :  { %443 = vrot.lane.b32.xlu2 %v6546_v58, %s6455_s24 }
 0x1c4   :  { %387 = vrot.lane.b32.xlu2 %v6546_v58, %s6451_s20 }
 0x1ee   :  { %v248_v59 = vpop.permute.xlu2 %247 }
 0x1ef   :  { %5810 = vmatpush.xpose.msk.msra.mxu1 %vm249_vm8, %v248_v59 }
 0x1f2   :  { %5811 = vmatmul.msk.f32.vlgmr.msra.gmra.mxu1 %vm249_vm8, %v6538_v56 }
 0x1f6   :  { %v302_v60 = vpop.permute.xlu2 %301 }
 0x1fe   :  { %v358_v61 = vpop.permute.xlu2 %357 }
 0x206   :  { %v276_v62 = vpop.permute.xlu2 %275  ;;  %v304_v63 = vpop.permute.xlu0 %303 }
 0x207   :  { %v360_v0 = vpop.permute.xlu1 %359  ;;  %5812 = vmatpush.xpose.msk.msra.mxu2 %vm249_vm8, %v276_v62  ;;  %5814 = vmatpush.xpose.msk.msra.mxu3 %vm249_vm8, %v304_v63 }
 0x20a   :  { %5813 = vmatmul.msk.f32.vlgmr.msra.gmra.mxu2 %vm249_vm8, %v6546_v58  ;;  %5815 = vmatmul.msk.f32.vlgmr.msra.gmra.mxu3 %vm249_vm8, %v302_v60 }
 0x20b   :  { %5818 = vmatpush.xpose.msk.msrb.mxu2 %vm249_vm8, %v360_v0 }
 0x20e   :  { %v332_v1 = vpop.permute.xlu2 %331  ;;  %v330_v2 = vpop.permute.xlu0 %329 }
 0x20f   :  { %v442_v3 = vpop.permute.xlu1 %441  ;;  %5816 = vmatpush.xpose.msk.msrb.mxu1 %vm249_vm8, %v332_v1 }
 0x212   :  { %5817 = vmatmul.msk.f32.vlgmr.msrb.gmra.mxu1 %vm249_vm8, %v330_v2  ;;  %5819 = vmatmul.msk.f32.vlgmr.msrb.gmra.mxu2 %vm249_vm8, %v358_v61 }
 0x216   :  { %v444_v4 = vpop.permute.xlu2 %443  ;;  %v416_v5 = vpop.permute.xlu0 %415 }
 0x217   :  { %5822 = vmatpush.xpose.msk.msra.mxu1 %vm249_vm8, %v416_v5  ;;  %5824 = vmatpush.xpose.msk.msra.mxu2 %vm249_vm8, %v444_v4  ;;  %v414_v6 = vpop.permute.xlu1 %413 }
 0x21a   :  { %5823 = vmatmul.msk.f32.vlgmr.msra.gmra.mxu1 %vm249_vm8, %v414_v6  ;;  %5825 = vmatmul.msk.f32.vlgmr.msra.gmra.mxu2 %vm249_vm8, %v442_v3 }
 0x21e   :  { %v388_v7 = vpop.permute.xlu2 %387  ;;  %v386_v8 = vpop.permute.xlu0 %385 }
 0x21f   :  { %5820 = vmatpush.xpose.msk.msrb.mxu3 %vm249_vm8, %v388_v7 }
 0x222   :  { %5821 = vmatmul.msk.f32.vlgmr.msrb.gmra.mxu3 %vm249_vm8, %v386_v8 }
 0x26f   :  { %v271_v11 = vpop.f32.mrf.mxu1 }
 0x270   :  { %v469_v12 = vmul.f32 0.35355338, %v271_v11 }
 0x272   :  { %v483_v13 = vadd.f32 %v6161_v9, %v469_v12 }
 0x274   :  { %v491_v14 = vsel %vm249_vm8, %v483_v13, -inf }
 0x275   :  { %492 = vmax.xlane.f32.xlu2 %v491_v14 }
 0x28d   :  { %v298_v16 = vpop.f32.mrf.mxu2  ;;  %v326_v17 = vpop.f32.mrf.mxu3 }
 0x28e   :  { %v470_v18 = vmul.f32 0.35355338, %v298_v16  ;;  %v471_v19 = vmul.f32 0.35355338, %v326_v17 }
 0x28f   :  { %v354_v20 = vpop.f32.mrf.mxu1 }
 0x290   :  { %v484_v21 = vadd.f32 %v6162_v15, %v470_v18  ;;  %v485_v22 = vadd.f32 %v6161_v9, %v471_v19  ;;  %v472_v23 = vmul.f32 0.35355338, %v354_v20 }
 0x292   :  { %v494_v24 = vsel %vm249_vm8, %v484_v21, -inf  ;;  %v497_v25 = vsel %vm249_vm8, %v485_v22, -inf  ;;  %v486_v28 = vadd.f32 %v6162_v15, %v472_v23 }
 0x293   :  { %495 = vmax.xlane.f32.xlu1 %v494_v24  ;;  %498 = vmax.xlane.f32.xlu0 %v497_v25 }
 0x294   :  { %v500_v33 = vsel %vm249_vm8, %v486_v28, -inf }
 0x295   :  { %v382_v26 = vpop.f32.mrf.mxu2 }
 0x296   :  { %v473_v27 = vmul.f32 0.35355338, %v382_v26 }
 0x297   :  { %v438_v29 = vpop.f32.mrf.mxu1 }
 0x298   :  { %v475_v30 = vmul.f32 0.35355338, %v438_v29  ;;  %v487_v31 = vadd.f32 %v6161_v9, %v473_v27 }
 0x29a   :  { %v503_v32 = vsel %vm249_vm8, %v487_v31, -inf  ;;  %v6600_v34 = vadd.f32 %v6161_v9, %v475_v30 }
 0x29b   :  { %504 = vmax.xlane.f32.xlu2 %v503_v32  ;;  %501 = vmax.xlane.f32.xlu1 %v500_v33 }
 0x29c   :  { %v509_v35 = vsel %vm249_vm8, %v6600_v34, -inf }
 0x29d   :  { %v466_v36 = vpop.f32.mrf.mxu2  ;;  %510 = vmax.xlane.f32.xlu0 %v509_v35 }
 0x29e   :  { %v476_v37 = vmul.f32 0.35355338, %v466_v36 }
 0x2a0   :  { %v490_v38 = vadd.f32 %v6162_v15, %v476_v37 }
 0x2a2   :  { %v512_v39 = vsel %vm249_vm8, %v490_v38, -inf }
 0x2a3   :  { %513 = vmax.xlane.f32.xlu2 %v512_v39 }
 0x2a5   :  { %v410_v40 = vpop.f32.mrf.mxu3 }
 0x2a6   :  { %v474_v41 = vmul.f32 0.35355338, %v410_v40 }
 0x2a8   :  { %v488_v42 = vadd.f32 %v6162_v15, %v474_v41 }
 0x2aa   :  { %v506_v43 = vsel %vm249_vm8, %v488_v42, -inf }
 0x2ab   :  { %507 = vmax.xlane.f32.xlu1 %v506_v43 }
 0x2b1   :  { %6109 = vrot.lane.b32.xlu0 %v6608_v44, %s6457_s29 }
 0x2bb   :  { %6104 = vrot.lane.b32.xlu2 %v6608_v44, %s6458_s30 }
 0x2e8   :  { %v493_v45 = vpop.xlane.xlu2 %492 }
 0x2e9   :  { %v515_v46 = vsub.f32 %v483_v13, %v493_v45 }
 0x2eb   :  { %v523_v47 = vmul.f32 1.442695, %v515_v46 }
 0x2ed   :  { %6191 = vpow2.f32 %v523_v47 }
 0x2f3   :  { %v6614_v49 = vpop.eup %6191 }
 0x2f4   :  { %v539_v50 = vsel %vm249_vm8, %v6614_v49, 0.0 }
 0x2f5   :  { %540 = vadd.xlane.f32.xlu0 %v539_v50 }
 0x306   :  { %v496_v51 = vpop.xlane.xlu1 %495  ;;  %v499_v52 = vpop.xlane.xlu0 %498 }
 0x307   :  { %v517_v54 = vsub.f32 %v485_v22, %v499_v52  ;;  %v516_v1 = vsub.f32 %v484_v21, %v496_v51 }
 0x309   :  { %v527_v55 = vmul.f32 1.442695, %v517_v54  ;;  %v525_v3 = vmul.f32 1.442695, %v516_v1 }
 0x30b   :  { %6193 = vpow2.f32 %v527_v55 }
 0x30e   :  { %v505_v57 = vpop.xlane.xlu2 %504  ;;  %v502_v59 = vpop.xlane.xlu1 %501 }
 0x30f   :  { %v519_v60 = vsub.f32 %v487_v31, %v505_v57  ;;  %v518_v61 = vsub.f32 %v486_v28, %v502_v59 }
 0x310   :  { %v511_v11 = vpop.xlane.xlu0 %510 }
 0x311   :  { %v531_v62 = vmul.f32 1.442695, %v519_v60  ;;  %v529_v63 = vmul.f32 1.442695, %v518_v61  ;;  %v6618_v0 = vpop.eup %6193  ;;  %v521_v20 = vsub.f32 %v6600_v34, %v511_v11 }
 0x312   :  { %v545_v2 = vsel %vm249_vm8, %v6618_v0, 0.0 }
 0x313   :  { %6195 = vpow2.f32 %v531_v62  ;;  %546 = vadd.xlane.f32.xlu1 %v545_v2  ;;  %v535_v27 = vmul.f32 1.442695, %v521_v20 }
 0x314   :  { %6197 = vpow2.f32 %v529_v63 }
 0x315   :  { %6199 = vpow2.f32 %v525_v3 }
 0x316   :  { %v514_v4 = vpop.xlane.xlu2 %513 }
 0x317   :  { %v522_v5 = vsub.f32 %v490_v38, %v514_v4 }
 0x319   :  { %v6622_v6 = vpop.eup %6195  ;;  %v537_v7 = vmul.f32 1.442695, %v522_v5 }
 0x31a   :  { %v6624_v8 = vpop.eup %6197  ;;  %v551_v9 = vsel %vm249_vm8, %v6622_v6, 0.0 }
 0x31b   :  { %6201 = vpow2.f32 %v537_v7  ;;  %v548_v12 = vsel %vm249_vm8, %v6624_v8, 0.0  ;;  %552 = vadd.xlane.f32.xlu0 %v551_v9  ;;  %v6630_v18 = vpop.eup %6199 }
 0x31c   :  { %549 = vadd.xlane.f32.xlu2 %v548_v12  ;;  %v542_v23 = vsel %vm249_vm8, %v6630_v18, 0.0 }
 0x31e   :  { %v6105_v13 = vpop.permute.xlu2 %6104  ;;  %v508_v14 = vpop.xlane.xlu1 %507 }
 0x31f   :  { %v6107_v15 = vunpack.i.h.bf16 %v6105_v13  ;;  %v6106_v16 = vunpack.i.l.bf16 %v6105_v13  ;;  %v520_v17 = vsub.f32 %v488_v42, %v508_v14 }
 0x321   :  { %v6632_v19 = vpop.eup %6201  ;;  %v533_v21 = vmul.f32 1.442695, %v520_v17  ;;  %704 = vmatpush.msra.mxu3 %v6106_v16  ;;  %730 = vmatpush.msrb.mxu2 %v6107_v15 }
 0x322   :  { %v560_v22 = vsel %vm249_vm8, %v6632_v19, 0.0 }
 0x323   :  { %6203 = vpow2.f32 %v533_v21  ;;  %561 = vadd.xlane.f32.xlu0 %v560_v22  ;;  %v6110_v24 = vpop.permute.xlu0 %6109 }
 0x324   :  { %543 = vadd.xlane.f32.xlu2 %v542_v23  ;;  %v6112_v25 = vunpack.i.h.bf16 %v6110_v24  ;;  %v6111_v26 = vunpack.i.l.bf16 %v6110_v24  ;;  %6205 = vpow2.f32 %v535_v27 }
 0x326   :  { %756 = vmatpush.msrb.mxu1 %v6111_v26  ;;  %782 = vmatpush.msra.mxu2 %v6112_v25 }
 0x329   :  { %v6639_v28 = vpop.eup %6203 }
 0x32a   :  { %v554_v29 = vsel %vm249_vm8, %v6639_v28, 0.0  ;;  %v6643_v30 = vpop.eup %6205 }
 0x32b   :  { %555 = vadd.xlane.f32.xlu1 %v554_v29  ;;  %v557_v31 = vsel %vm249_vm8, %v6643_v30, 0.0 }
 0x333   :  { %558 = vadd.xlane.f32.xlu1 %v557_v31 }
 0x337   :  { %813 = vrot.lane.b32.xlu0 %v6546_v58, %s8110_s1 }
 0x33c   :  { %6114 = vrot.lane.b32.xlu2 %v6608_v44, %s8112_s2 }
 0x34c   :  { %787 = vrot.lane.b32.xlu1 %v6538_v56, %s8110_s1 }
 0x368   :  { %v541_v32 = vpop.xlane.xlu0 %540 }
 0x369   :  { %6207 = vrcp.f32 %v541_v32  ;;  %v574_v36 = vand.u32 2147483648, %v541_v32  ;;  %v572_v38 = vand.u32 2147483647, %v541_v32  ;;  %vm568_vm10 = vweird.f32 %v541_v32 }
 0x36b   :  { %v575_v58 = vor.u32 1.1754944e-38, %v574_v36  ;;  %vm573_vm12 = vcmp.eq.f32.partialorder %v572_v38, 8.507059e+37 }
 0x36f   :  { %v6208_v33 = vpop.eup %6207 }
 0x370   :  { %v564_v34 = vmul.f32 %v6208_v33, %v541_v32  ;;  %vm569_vm9 = vweird.f32 %v6208_v33 }
 0x371   :  { %vm570_vm11 = vmor %vm568_vm10, %vm569_vm9 }
 0x372   :  { %v565_v35 = vsub.f32 1.0, %v564_v34 }
 0x374   :  { %v566_v37 = vmul.f32 %v6208_v33, %v565_v35 }
 0x376   :  { %v567_v39 = vadd.f32 %v6208_v33, %v566_v37 }
 0x378   :  { %v571_v40 = vsel %vm570_vm11, %v6208_v33, %v567_v39 }
 0x379   :  { %v576_v41 = vsel %vm573_vm12, %v575_v58, %v571_v40 }
 0x37a   :  { %v577_v42 = vmul.f32 %v6614_v49, %v576_v41 }
 0x37c   :  { %5826 = vmatmul.msk.f32.vlgmr.msra.gmra.mxu3 %vm249_vm8, %v577_v42 }
 0x386   :  { %v547_v56 = vpop.xlane.xlu1 %546 }
 0x387   :  { %6209 = vrcp.f32 %v547_v56  ;;  %v604_v51 = vand.u32 2147483648, %v547_v56  ;;  %vm598_vm14 = vweird.f32 %v547_v56  ;;  %v602_v54 = vand.u32 2147483647, %v547_v56 }
 0x389   :  { %v605_v60 = vor.u32 1.1754944e-38, %v604_v51  ;;  %vm603_vm1 = vcmp.eq.f32.partialorder %v602_v54, 8.507059e+37 }
 0x38d   :  { %v6210_v43 = vpop.eup %6209 }
 0x38e   :  { %v6655_v44 = vpop.xlane.xlu0 %552  ;;  %v594_v45 = vmul.f32 %v6210_v43, %v547_v56  ;;  %vm599_vm13 = vweird.f32 %v6210_v43 }
 0x38f   :  { %v6657_v46 = vpop.xlane.xlu2 %549  ;;  %vm600_vm15 = vmor %vm598_vm14, %vm599_vm13 }
 0x390   :  { %v595_v47 = vsub.f32 1.0, %v594_v45  ;;  %6211 = vrcp.f32 %v6657_v46  ;;  %v619_v27 = vand.u32 2147483648, %v6657_v46  ;;  %vm613_vm7 = vweird.f32 %v6657_v46 }
 0x391   :  { %v617_v33 = vand.u32 2147483647, %v6657_v46 }
 0x392   :  { %v596_v50 = vmul.f32 %v6210_v43, %v595_v47 }
 0x393   :  { %vm618_vm12 = vcmp.eq.f32.partialorder %v617_v33, 8.507059e+37 }
 0x394   :  { %v597_v52 = vadd.f32 %v6210_v43, %v596_v50 }
 0x396   :  { %v601_v49 = vsel %vm600_vm15, %v6210_v43, %v597_v52  ;;  %v6660_v57 = vpop.xlane.xlu0 %561  ;;  %v6662_v59 = vpop.eup %6211 }
 0x397   :  { %v544_v55 = vpop.xlane.xlu2 %543  ;;  %v606_v61 = vsel %vm603_vm1, %v605_v60, %v601_v49  ;;  %v609_v62 = vmul.f32 %v6662_v59, %v6657_v46  ;;  %vm614_vm4 = vweird.f32 %v6662_v59  ;;  %v679_v49 = vand.u32 2147483648, %v6660_v57 }
 0x398   :  { %6213 = vrcp.f32 %v544_v55  ;;  %v607_v63 = vmul.f32 %v6618_v0, %v606_v61  ;;  %v587_v12 = vand.u32 2147483647, %v544_v55  ;;  %v589_v13 = vand.u32 2147483648, %v544_v55  ;;  %vm6690_vm9 = vmor %vm613_vm7, %vm614_vm4 }
 0x399   :  { %6215 = vrcp.f32 %v6660_v57  ;;  %v610_v3 = vsub.f32 1.0, %v609_v62  ;;  %vm583_vm3 = vweird.f32 %v544_v55  ;;  %vm673_vm1 = vweird.f32 %v6660_v57 }
 0x39a   :  { %5828 = vmatmul.msk.f32.vlgmr.msrb.gmra.mxu1 %vm249_vm8, %v607_v63  ;;  %6217 = vrcp.f32 %v6655_v44  ;;  %vm588_vm6 = vcmp.eq.f32.partialorder %v587_v12, 8.507059e+37  ;;  %v590_v21 = vor.u32 1.1754944e-38, %v589_v13  ;;  %v677_v60 = vand.u32 2147483647, %v6660_v57 }
 0x39b   :  { %v611_v14 = vmul.f32 %v6662_v59, %v610_v3 }
 0x39c   :  { %vm678_vm7 = vcmp.eq.f32.partialorder %v677_v60, 8.507059e+37 }
 0x39d   :  { %v612_v24 = vadd.f32 %v6662_v59, %v611_v14 }
 0x39e   :  { %v6214_v1 = vpop.eup %6213  ;;  %v556_v2 = vpop.xlane.xlu1 %555 }
 0x39f   :  { %v579_v4 = vmul.f32 %v6214_v1, %v544_v55  ;;  %v6115_v5 = vpop.permute.xlu2 %6114  ;;  %6219 = vrcp.f32 %v556_v2  ;;  %v6670_v7 = vpop.eup %6215  ;;  %vm584_vm2 = vweird.f32 %v6214_v1  ;;  %v649_v34 = vand.u32 2147483648, %v556_v2 }
 0x3a0   :  { %v6116_v9 = vunpack.i.l.bf16 %v6115_v5  ;;  %v669_v15 = vmul.f32 %v6670_v7, %v6660_v57  ;;  %v6675_v16 = vpop.eup %6217  ;;  %vm585_vm5 = vmor %vm583_vm3, %vm584_vm2  ;;  %v6117_v38 = vunpack.i.h.bf16 %v6115_v5  ;;  %v647_v58 = vand.u32 2147483647, %v556_v2 }
 0x3a1   :  { %v580_v11 = vsub.f32 1.0, %v579_v4  ;;  %v624_v29 = vmul.f32 %v6675_v16, %v6655_v44  ;;  %v616_v40 = vsel %vm6690_vm9, %v6662_v59, %v612_v24  ;;  %vm643_vm11 = vweird.f32 %v556_v2 }
 0x3a2   :  { %860 = vmatpush.msra.mxu1 %v6116_v9  ;;  %v670_v26 = vsub.f32 1.0, %v669_v15  ;;  %v650_v45 = vor.u32 1.1754944e-38, %v649_v34  ;;  %vm648_vm14 = vcmp.eq.f32.partialorder %v647_v58, 8.507059e+37  ;;  %vm674_vm15 = vweird.f32 %v6670_v7 }
 0x3a3   :  { %v581_v0 = vmul.f32 %v6214_v1, %v580_v11  ;;  %v625_v42 = vsub.f32 1.0, %v624_v29  ;;  %vm6709_vm2 = vmor %vm673_vm1, %vm674_vm15  ;;  %vm629_vm4 = vweird.f32 %v6675_v16  ;;  %v680_v57 = vor.u32 1.1754944e-38, %v679_v49  ;;  %v209_v29 = vld [vmem:[%s6748_s15] sm:$0xff] }
 0x3a4   :  { %v671_v41 = vmul.f32 %v6670_v7, %v670_v26  ;;  %v634_v4 = vand.u32 2147483648, %v6655_v44  ;;  %v632_v9 = vand.u32 2147483647, %v6655_v44  ;;  %v211_v26 = vld [vmem:[%s6748_s15 + $0x10] sm:$0xff] }
 0x3a5   :  { %v6220_v17 = vpop.eup %6219  ;;  %v582_v20 = vadd.f32 %v6214_v1, %v581_v0  ;;  %v626_v54 = vmul.f32 %v6675_v16, %v625_v42 }
 0x3a6   :  { %v639_v22 = vmul.f32 %v6220_v17, %v556_v2  ;;  %v6678_v23 = vpop.xlane.xlu1 %558  ;;  %vm644_vm10 = vweird.f32 %v6220_v17  ;;  %v672_v51 = vadd.f32 %v6670_v7, %v671_v41  ;;  %v635_v0 = vor.u32 1.1754944e-38, %v634_v4 }
 0x3a7   :  { %v586_v25 = vsel %vm585_vm5, %v6214_v1, %v582_v20  ;;  %6221 = vrcp.f32 %v6678_v23  ;;  %vm645_vm13 = vmor %vm643_vm11, %vm644_vm10  ;;  %v664_v61 = vand.u32 2147483648, %v6678_v23  ;;  %v662_v2 = vand.u32 2147483647, %v6678_v23 }
 0x3a8   :  { %v640_v31 = vsub.f32 1.0, %v639_v22  ;;  %v591_v32 = vsel %vm588_vm6, %v590_v21, %v586_v25  ;;  %vm658_vm5 = vweird.f32 %v6678_v23  ;;  %vm628_vm6 = vweird.f32 %v6655_v44  ;;  %v212_v25 = vld [vmem:[%s6748_s15 + $0x18] sm:$0xff] }
 0x3a9   :  { %v814_v35 = vpop.permute.xlu0 %813  ;;  %v592_v36 = vmul.f32 %v6630_v18, %v591_v32  ;;  %v620_v18 = vor.u32 1.1754944e-38, %v619_v27  ;;  %v665_v5 = vor.u32 1.1754944e-38, %v664_v61  ;;  %vm663_vm10 = vcmp.eq.f32.partialorder %v662_v2, 8.507059e+37  ;;  %vm630_vm11 = vmor %vm628_vm6, %vm629_vm4  ;;  %v210_v27 = vld [vmem:[%s6748_s15 + $0x8] sm:$0xff] }
 0x3aa   :  { %v641_v39 = vmul.f32 %v6220_v17, %v640_v31  ;;  %834 = vmatpush.msrb.mxu0 %v814_v35  ;;  %v1008_v2 = vld [vmem:[%s6779_s11 + $0x8] sm:$0xff]  ;;  %vm1074_vm6 = vcmask 523264  }
 0x3ab   :  { %5827 = vmatmul.msk.f32.vlgmr.msrb.gmra.mxu2 %vm249_vm8, %v592_v36  ;;  %v621_v47 = vsel %vm618_vm12, %v620_v18, %v616_v40  ;;  %vm633_vm12 = vcmp.eq.f32.partialorder %v632_v9, 8.507059e+37  ;;  %v6163_v18 = vld [vmem:[%s6741_s7] ss:$0 sm:$0xff] }
 0x3ac   :  { %886 = vmatpush.msrb.mxu2 %v6117_v38  ;;  %v642_v56 = vadd.f32 %v6220_v17, %v641_v39  ;;  %v622_v62 = vmul.f32 %v6624_v8, %v621_v47  ;;  %v627_v8 = vadd.f32 %v6675_v16, %v626_v54 }
 0x3ad   :  { %v6222_v43 = vpop.eup %6221 }
 0x3ae   :  { %v654_v46 = vmul.f32 %v6222_v43, %v6678_v23  ;;  %v646_v50 = vsel %vm645_vm13, %v6220_v17, %v642_v56  ;;  %vm659_vm3 = vweird.f32 %v6222_v43  ;;  %v631_v13 = vsel %vm630_vm11, %v6675_v16, %v627_v8 }
 0x3af   :  { %v651_v52 = vsel %vm648_vm14, %v650_v45, %v646_v50  ;;  %vm660_vm9 = vmor %vm658_vm5, %vm659_vm3  ;;  %v636_v44 = vsel %vm633_vm12, %v635_v0, %v631_v13  ;;  %vm917_vm13 = vcmask 130048   ;;  %vm920_vm14 = vcmask 195584  }
 0x3b0   :  { %v655_v55 = vsub.f32 1.0, %v654_v46  ;;  %v652_v59 = vmul.f32 %v6639_v28, %v651_v52  ;;  %v676_v28 = vsel %vm6709_vm2, %v6670_v7, %v672_v51  ;;  %v637_v20 = vmul.f32 %v6622_v6, %v636_v44 }
 0x3b1   :  { %v681_v7 = vsel %vm678_vm7, %v680_v57, %v676_v28  ;;  %v1007_v28 = vld [vmem:[%s6779_s11] sm:$0xff] }
 0x3b2   :  { %v656_v1 = vmul.f32 %v6222_v43, %v655_v55  ;;  %5831 = vmatmul.msk.f32.vlgmr.msrb.gmra.mxu0 %vm249_vm8, %v652_v59  ;;  %v682_v15 = vmul.f32 %v6632_v19, %v681_v7 }
 0x3b3   :  { %5829 = vmatmul.msk.f32.vlgmr.msra.gmra.mxu2 %vm249_vm8, %v622_v62 }
 0x3b4   :  { %v657_v3 = vadd.f32 %v6222_v43, %v656_v1  ;;  %v1009_v1 = vld [vmem:[%s6779_s11 + $0x10] sm:$0xff] }
 0x3b6   :  { %v661_v11 = vsel %vm660_vm9, %v6222_v43, %v657_v3 }
 0x3b7   :  { %v666_v12 = vsel %vm663_vm10, %v665_v5, %v661_v11 }
 0x3b8   :  { %v667_v14 = vmul.f32 %v6643_v30, %v666_v12 }
 0x3ba   :  { %5832 = vmatmul.msk.f32.vlgmr.msra.gmra.mxu1 %vm249_vm8, %v667_v14  ;;  %v6794_v14 = vld [vmem:[%s6791_s16] sm:$0xf] }
 0x3bb   :  { %5833 = vmatmul.msk.f32.vlgmr.msrb.gmra.mxu2 %vm249_vm8, %v682_v15 }
 0x3be   :  { %v788_v17 = vpop.permute.xlu1 %787 }
 0x3bf   :  { %808 = vmatpush.msrb.mxu3 %v788_v17 }
 0x3c0   :  { %5830 = vmatmul.msk.f32.vlgmr.msrb.gmra.mxu3 %vm249_vm8, %v637_v20  ;;  %v1001_v20 = vperm.slane %v6794_v14, 0 }
 0x3c1   :  { %944 = vmatpush.msra.mxu3 %v212_v25 }
 0x3c3   :  { %945 = vmatpush.msra.mxu3 %v211_v26 }
 0x3c5   :  { %946 = vmatpush.msra.mxu3 %v210_v27 }
 0x3c7   :  { %947 = vmatpush.msra.mxu3 %v209_v29 }
 0x3ff   :  { %v706_v22 = vpop.f32.mrf.mxu3 }
 0x417   :  { %v758_v21 = vpop.f32.mrf.mxu1 }
 0x418   :  { %893 = vrot.lane.b32.xlu2 %v758_v21, %s8108_s10 }
 0x42e   :  { %v732_v16 = vpop.f32.mrf.mxu2 }
 0x42f   :  { %v836_v24 = vpop.f32.mrf.mxu0 }
 0x436   :  { %v784_v30 = vpop.f32.mrf.mxu2 }
 0x437   :  { %895 = vrot.lane.b32.xlu2 %v784_v30, %s8108_s10  ;;  %v862_v19 = vpop.f32.mrf.mxu1 }
 0x438   :  { %909 = vrot.lane.b32.xlu1 %v862_v19, %s8106_s3  ;;  %v1004_v19 = vperm.slane %v6794_v14, 1 }
 0x43e   :  { %v888_v23 = vpop.f32.mrf.mxu2 }
 0x440   :  { %911 = vrot.lane.b32.xlu1 %v888_v23, %s8106_s3 }
 0x443   :  { %v810_v6 = vpop.f32.mrf.mxu3 }
 0x444   :  { %901 = vrot.lane.b32.xlu0 %v810_v6, %s8104_s8 }
 0x44c   :  { %903 = vrot.lane.b32.xlu0 %v836_v24, %s8104_s8  ;;  %s6808_s8 = sld [smem:[%s8103_s0 + %s6468_s6]]  }
 0x472   :  { %v894_v31 = vpop.permute.xlu2 %893 }
 0x473   :  { %v915_v33 = vsel %vm249_vm8, %v706_v22, %v894_v31 }
 0x491   :  { %v896_v37 = vpop.permute.xlu2 %895 }
 0x492   :  { %v916_v38 = vsel %vm249_vm8, %v732_v16, %v896_v37  ;;  %v1064_v37 = vld [vmem:[%s6808_s8 + $0x10] sm:$0xff] }
 0x4aa   :  { %v910_v32 = vpop.permute.xlu1 %909 }
 0x4b2   :  { %v912_v58 = vpop.permute.xlu1 %911 }
 0x4b6   :  { %v902_v34 = vpop.permute.xlu0 %901 }
 0x4b7   :  { %v918_v35 = vsel %vm917_vm13, %v915_v33, %v902_v34  ;;  %v1068_v33 = vld [vmem:[%s6808_s8 + $0x30] sm:$0xff]  ;;  %v1067_v34 = vld [vmem:[%s6808_s8 + $0x28] sm:$0xff] }
 0x4b8   :  { %v921_v36 = vsel %vm920_vm14, %v918_v35, %v910_v32  ;;  %v1069_v32 = vld [vmem:[%s6808_s8 + $0x38] sm:$0xff]  ;;  %v1066_v35 = vld [vmem:[%s6808_s8 + $0x20] sm:$0xff] }
 0x4b9   :  { %5834 = vmatmul.msk.f32.vlgmr.msra.gmra.mxu3 %vm145_vm0, %v921_v36  ;;  %1089 = vmatpush.msrb.mxu1 %v1069_v32  ;;  %v1065_v36 = vld [vmem:[%s6808_s8 + $0x18] sm:$0xff] }
 0x4bb   :  { %1090 = vmatpush.msrb.mxu1 %v1068_v33 }
 0x4bd   :  { %1091 = vmatpush.msrb.mxu1 %v1067_v34 }
 0x4be   :  { %v904_v39 = vpop.permute.xlu0 %903 }
 0x4bf   :  { %v919_v40 = vsel %vm917_vm13, %v916_v38, %v904_v39  ;;  %1092 = vmatpush.msrb.mxu1 %v1066_v35  ;;  %v1063_v38 = vld [vmem:[%s6808_s8 + $0x8] sm:$0xff]  ;;  %v1062_v39 = vld [vmem:[%s6808_s8] sm:$0xff] }
 0x4c0   :  { %v922_v41 = vsel %vm920_vm14, %v919_v40, %v912_v58  ;;  %v6164_v58 = vld [vmem:[%s6774_s27] ss:$0 sm:$0xff] }
 0x4c1   :  { %5835 = vmatmul.msk.f32.gmra.mxu3 %vm145_vm0, %v922_v41  ;;  %1093 = vmatpush.msrb.mxu1 %v1065_v36 }
 0x4c3   :  { %1094 = vmatpush.msrb.mxu1 %v1064_v37 }
 0x4c5   :  { %1095 = vmatpush.msrb.mxu1 %v1063_v38  ;;  %v1150_v38 = vperm.slane %v6794_v14, 2 }
 0x4c7   :  { %1096 = vmatpush.msrb.mxu1 %v1062_v39 }
 0x53c   :  { %v949_v42 = vpop.f32.mrf.mxu3 }
 0x53d   :  { %v950_v56 = vadd.f32 %v6163_v18, %v949_v42 }
 0x53f   :  { %v955_v43 = vadd.f32 %v950_v56, %v6529_v48 }
 0x541   :  { %v957_v45 = vsel %vm145_vm0, %v955_v43, 0.0 }
 0x542   :  { %958 = vadd.xlane.f32.xlu2 %v957_v45 }
 0x544   :  { %v952_v46 = vpop.f32.mrf.mxu3 }
 0x545   :  { %v953_v47 = vadd.f32 %v6163_v18, %v952_v46 }
 0x547   :  { %v956_v50 = vadd.f32 %v953_v47, %v6533_v53  ;;  %v1010_v53 = vld [vmem:[%s6779_s11 + $0x18] sm:$0xff] }
 0x548   :  { %1033 = vmatpush.msra.mxu0 %v1010_v53 }
 0x549   :  { %v960_v51 = vsel %vm145_vm0, %v956_v50, 0.0 }
 0x54a   :  { %961 = vadd.xlane.f32.xlu0 %v960_v51  ;;  %1034 = vmatpush.msra.mxu0 %v1009_v1  ;;  %v6165_v1 = vld [vmem:[%s6803_s5] ss:$0 sm:$0xff] }
 0x54c   :  { %1035 = vmatpush.msra.mxu0 %v1008_v2 }
 0x54e   :  { %1036 = vmatpush.msra.mxu0 %v1007_v28 }
 0x5b5   :  { %v959_v52 = vpop.xlane.xlu2 %958 }
 0x5b6   :  { %v963_v54 = vmul.f32 %v959_v52, %v6500_v10 }
 0x5b8   :  { %v965_v49 = vsub.f32 %v955_v43, %v963_v54 }
 0x5ba   :  { %v967_v55 = vmul.f32 %v965_v49, %v965_v49 }
 0x5bc   :  { %v969_v59 = vsel %vm145_vm0, %v967_v55, 0.0 }
 0x5bd   :  { %970 = vadd.xlane.f32.xlu1 %v969_v59  ;;  %v962_v60 = vpop.xlane.xlu0 %961 }
 0x5be   :  { %v964_v48 = vmul.f32 %v962_v60, %v6500_v10 }
 0x5c0   :  { %v966_v61 = vsub.f32 %v956_v50, %v964_v48 }
 0x5c2   :  { %v968_v62 = vmul.f32 %v966_v61, %v966_v61 }
 0x5c4   :  { %v972_v63 = vsel %vm145_vm0, %v968_v62, 0.0 }
 0x5c5   :  { %973 = vadd.xlane.f32.xlu2 %v972_v63 }
 0x630   :  { %v971_v8 = vpop.xlane.xlu1 %970 }
 0x631   :  { %v975_v57 = vmul.f32 %v971_v8, %v6500_v10 }
 0x633   :  { %v977_v3 = vadd.f32 1e-12, %v975_v57 }
 0x635   :  { %6223 = vrsqrt.f32 %v977_v3  ;;  %vm985_vm1 = vweird.f32 %v977_v3 }
 0x638   :  { %v974_v4 = vpop.xlane.xlu2 %973 }
 0x639   :  { %v976_v5 = vmul.f32 %v974_v4, %v6500_v10 }
 0x63b   :  { %v6224_v9 = vpop.eup %6223  ;;  %v978_v11 = vadd.f32 1e-12, %v976_v5 }
 0x63c   :  { %v980_v7 = vmul.f32 %v6224_v9, %v977_v3  ;;  %vm986_vm15 = vweird.f32 %v6224_v9 }
 0x63d   :  { %6225 = vrsqrt.f32 %v978_v11  ;;  %vm987_vm2 = vmor %vm985_vm1, %vm986_vm15  ;;  %vm995_vm4 = vweird.f32 %v978_v11 }
 0x63e   :  { %v981_v12 = vmul.f32 %v6224_v9, %v980_v7 }
 0x640   :  { %v982_v13 = vmul.f32 0.5, %v981_v12 }
 0x642   :  { %v983_v0 = vsub.f32 1.5, %v982_v13 }
 0x643   :  { %v6226_v15 = vpop.eup %6225 }
 0x644   :  { %v984_v44 = vmul.f32 %v6224_v9, %v983_v0  ;;  %v990_v17 = vmul.f32 %v6226_v15, %v978_v11  ;;  %vm996_vm3 = vweird.f32 %v6226_v15 }
 0x645   :  { %vm997_vm5 = vmor %vm995_vm4, %vm996_vm3 }
 0x646   :  { %v988_v21 = vsel %vm987_vm2, %v6224_v9, %v984_v44  ;;  %v991_v16 = vmul.f32 %v6226_v15, %v990_v17 }
 0x647   :  { %v999_v30 = vmul.f32 %v988_v21, %v965_v49 }
 0x648   :  { %v992_v22 = vmul.f32 0.5, %v991_v16  ;;  %v5844_v16 = vld [vmem:[%s6515_s13 + $0x38] sm:$0xff] }
 0x649   :  { %v1002_v23 = vmul.f32 %v1001_v20, %v999_v30  ;;  %1193 = vmatpush.msra.mxu2 %v5844_v16  ;;  %v5843_v30 = vld [vmem:[%s6515_s13 + $0x30] sm:$0xff] }
 0x64a   :  { %v993_v6 = vsub.f32 1.5, %v992_v22  ;;  %v5841_v22 = vld [vmem:[%s6515_s13 + $0x20] sm:$0xff] }
 0x64b   :  { %v1005_v24 = vadd.f32 %v1004_v19, %v1002_v23  ;;  %1194 = vmatpush.msra.mxu2 %v5843_v30  ;;  %v6436_v30 = vld [vmem:[%s6573_s28 + $0x1] ss:$0 sm:$0xff] }
 0x64c   :  { %v994_v25 = vmul.f32 %v6226_v15, %v993_v6 }
 0x64d   :  { %5836 = vmatmul.msk.f32.vlgmr.msra.gmra.mxu0 %vm145_vm0, %v1005_v24 }
 0x64e   :  { %v998_v26 = vsel %vm997_vm5, %v6226_v15, %v994_v25 }
 0x64f   :  { %v1000_v27 = vmul.f32 %v998_v26, %v966_v61 }
 0x651   :  { %v1003_v29 = vmul.f32 %v1001_v20, %v1000_v27 }
 0x653   :  { %v1006_v31 = vadd.f32 %v1004_v19, %v1003_v29  ;;  %v5842_v19 = vld [vmem:[%s6515_s13 + $0x28] sm:$0xff]  ;;  %s6469_s13 = smov 1  }
 0x654   :  { %1195 = vmatpush.msra.mxu2 %v5842_v19  ;;  %s5776_s26 = sld [smem:[%s8103_s0 + %s6469_s13]]  }
 0x655   :  { %5837 = vmatmul.msk.f32.gmra.mxu0 %vm145_vm0, %v1006_v31  ;;  %s7278_s13 = sld [smem:[%s8103_s0 + %s6474_s4]]   ;;  %s6477_s4 = smov 6  }
 0x656   :  { %1196 = vmatpush.msra.mxu2 %v5841_v22 }
 0x6ca   :  { %v1038_v40 = vpop.f32.mrf.mxu0 }
 0x6cb   :  { %v1039_v41 = vadd.f32 %v6164_v58, %v1038_v40 }
 0x6cd   :  { %v1046_v18 = vmul.f32 0.044715, %v1039_v41  ;;  %v1044_v59 = vmul.f32 0.5, %v1039_v41 }
 0x6cf   :  { %v1048_v42 = vmul.f32 %v1046_v18, %v1039_v41 }
 0x6d1   :  { %v1050_v56 = vmul.f32 %v1048_v42, %v1039_v41 }
 0x6d2   :  { %v1041_v43 = vpop.f32.mrf.mxu0 }
 0x6d3   :  { %v1052_v45 = vadd.f32 %v1050_v56, %v1039_v41  ;;  %v1042_v46 = vadd.f32 %v6164_v58, %v1041_v43  ;;  %v1153_v41 = vperm.slane %v6794_v14, 3  ;;  %v6166_v14 = vld [vmem:[%s6509_s9 + $0x1] ss:$0 sm:$0xff]  ;;  %s8120_s9 = smov 16  }
 0x6d5   :  { %v1054_v47 = vmul.f32 0.7978846, %v1052_v45  ;;  %v1047_v50 = vmul.f32 0.044715, %v1042_v46  ;;  %v1045_v62 = vmul.f32 0.5, %v1042_v46 }
 0x6d7   :  { %6227 = vtanh.f32 %v1054_v47  ;;  %v1049_v51 = vmul.f32 %v1047_v50, %v1042_v46 }
 0x6d9   :  { %v1051_v52 = vmul.f32 %v1049_v51, %v1042_v46 }
 0x6db   :  { %v1053_v54 = vadd.f32 %v1051_v52, %v1042_v46 }
 0x6dd   :  { %v6228_v49 = vpop.eup %6227  ;;  %v1055_v55 = vmul.f32 0.7978846, %v1053_v54 }
 0x6de   :  { %v1058_v60 = vadd.f32 1.0, %v6228_v49 }
 0x6df   :  { %6229 = vtanh.f32 %v1055_v55 }
 0x6e0   :  { %v1060_v48 = vmul.f32 %v1058_v60, %v1044_v59 }
 0x6e2   :  { %5838 = vmatmul.msk.f32.vlgmr.msrb.gmra.mxu1 %vm1074_vm6, %v1060_v48 }
 0x6e5   :  { %v6230_v61 = vpop.eup %6229 }
 0x6e6   :  { %v1059_v63 = vadd.f32 1.0, %v6230_v61 }
 0x6e8   :  { %v1061_v53 = vmul.f32 %v1059_v63, %v1045_v62 }
 0x6ea   :  { %5839 = vmatmul.msk.f32.gmra.mxu1 %vm1074_vm6, %v1061_v53 }
 0x75f   :  { %v1098_v2 = vpop.f32.mrf.mxu1 }
 0x760   :  { %v1099_v28 = vadd.f32 %v6165_v1, %v1098_v2 }
 0x762   :  { %v1104_v8 = vadd.f32 %v1099_v28, %v1005_v24 }
 0x764   :  { %v1106_v57 = vsel %vm145_vm0, %v1104_v8, 0.0 }
 0x765   :  { %1107 = vadd.xlane.f32.xlu0 %v1106_v57 }
 0x767   :  { %v1101_v3 = vpop.f32.mrf.mxu1 }
 0x768   :  { %v1102_v4 = vadd.f32 %v6165_v1, %v1101_v3 }
 0x76a   :  { %v1105_v5 = vadd.f32 %v1102_v4, %v1006_v31 }
 0x76c   :  { %v1109_v9 = vsel %vm145_vm0, %v1105_v5, 0.0 }
 0x76d   :  { %1110 = vadd.xlane.f32.xlu1 %v1109_v9 }
 0x7d8   :  { %v1108_v11 = vpop.xlane.xlu0 %1107 }
 0x7d9   :  { %v1112_v7 = vmul.f32 %v1108_v11, %v6500_v10 }
 0x7db   :  { %v1114_v12 = vsub.f32 %v1104_v8, %v1112_v7 }
 0x7dd   :  { %v1116_v13 = vmul.f32 %v1114_v12, %v1114_v12 }
 0x7df   :  { %v1118_v0 = vsel %vm145_vm0, %v1116_v13, 0.0 }
 0x7e0   :  { %v1111_v15 = vpop.xlane.xlu1 %1110  ;;  %1119 = vadd.xlane.f32.xlu2 %v1118_v0 }
 0x7e1   :  { %v1113_v44 = vmul.f32 %v1111_v15, %v6500_v10 }
 0x7e3   :  { %v1115_v17 = vsub.f32 %v1105_v5, %v1113_v44 }
 0x7e5   :  { %v1117_v20 = vmul.f32 %v1115_v17, %v1115_v17 }
 0x7e7   :  { %v1121_v21 = vsel %vm145_vm0, %v1117_v20, 0.0 }
 0x7e8   :  { %1122 = vadd.xlane.f32.xlu0 %v1121_v21 }
 0x853   :  { %v1120_v23 = vpop.xlane.xlu2 %1119 }
 0x854   :  { %v1124_v6 = vmul.f32 %v1120_v23, %v6500_v10 }
 0x856   :  { %v1126_v24 = vadd.f32 1e-12, %v1124_v6 }
 0x858   :  { %6231 = vrsqrt.f32 %v1126_v24  ;;  %vm1134_vm9 = vweird.f32 %v1126_v24 }
 0x85b   :  { %v1123_v25 = vpop.xlane.xlu0 %1122 }
 0x85c   :  { %v1125_v26 = vmul.f32 %v1123_v25, %v6500_v10 }
 0x85e   :  { %v6232_v27 = vpop.eup %6231  ;;  %v1127_v29 = vadd.f32 1e-12, %v1125_v26 }
 0x85f   :  { %v1129_v31 = vmul.f32 %v6232_v27, %v1126_v24  ;;  %vm1135_vm7 = vweird.f32 %v6232_v27 }
 0x860   :  { %6233 = vrsqrt.f32 %v1127_v29  ;;  %vm1136_vm10 = vmor %vm1134_vm9, %vm1135_vm7  ;;  %vm1144_vm12 = vweird.f32 %v1127_v29 }
 0x861   :  { %v1130_v32 = vmul.f32 %v6232_v27, %v1129_v31 }
 0x863   :  { %v1131_v33 = vmul.f32 0.5, %v1130_v32 }
 0x865   :  { %v1132_v34 = vsub.f32 1.5, %v1131_v33 }
 0x866   :  { %v6234_v35 = vpop.eup %6233 }
 0x867   :  { %v1133_v36 = vmul.f32 %v6232_v27, %v1132_v34  ;;  %v1139_v37 = vmul.f32 %v6234_v35, %v1127_v29  ;;  %vm1145_vm11 = vweird.f32 %v6234_v35 }
 0x868   :  { %vm1146_vm15 = vmor %vm1144_vm12, %vm1145_vm11 }
 0x869   :  { %v1137_v39 = vsel %vm1136_vm10, %v6232_v27, %v1133_v36  ;;  %v1140_v58 = vmul.f32 %v6234_v35, %v1139_v37 }
 0x86a   :  { %v1148_v40 = vmul.f32 %v1137_v39, %v1114_v12  ;;  %v6435_v12 = vld [vmem:[%s6573_s28] ss:$0 sm:$0xff]  ;;  %s7045_s28 = sld [smem:[%s8103_s0 + %s6471_s12]]   ;;  %s6482_s12 = smov 23  }
 0x86b   :  { %v1141_v18 = vmul.f32 0.5, %v1140_v58 }
 0x86c   :  { %v1151_v42 = vmul.f32 %v1150_v38, %v1148_v40 }
 0x86d   :  { %v1142_v56 = vsub.f32 1.5, %v1141_v18 }
 0x86e   :  { %v6836_v43 = vadd.f32 %v1153_v41, %v1151_v42 }
 0x86f   :  { %v1143_v45 = vmul.f32 %v6234_v35, %v1142_v56 }
 0x870   :  { %5851 = vmatmul.msk.f32.vlgmr.msra.gmra.mxu2 %vm145_vm0, %v6836_v43 }
 0x871   :  { %v1147_v46 = vsel %vm1146_vm15, %v6234_v35, %v1143_v45 }
 0x872   :  { %v1149_v47 = vmul.f32 %v1147_v46, %v1115_v17 }
 0x874   :  { %v1152_v50 = vmul.f32 %v1150_v38, %v1149_v47 }
 0x876   :  { %v6840_v51 = vadd.f32 %v1153_v41, %v1152_v50 }
 0x878   :  { %5852 = vmatmul.msk.f32.gmra.mxu2 %vm145_vm0, %v6840_v51 }
 0x8f3   :  { %v1198_v52 = vpop.f32.mrf.mxu2 }
 0x8f4   :  { %v6845_v54 = vadd.f32 %v6166_v14, %v1198_v52 }
 0x8f6   :  { %1258 = vrot.lane.b32.xlu0 %v6845_v54, %s6452_s21  ;;  %1260 = vrot.lane.b32.xlu2 %v6845_v54, %s6449_s18 }
 0x8f7   :  { %1205 = vrot.lane.b32.xlu1 %v6845_v54, %s6450_s19 }
 0x8fb   :  { %v1201_v49 = vpop.f32.mrf.mxu2 }
 0x8fc   :  { %v6853_v55 = vadd.f32 %v6166_v14, %v1201_v49 }
 0x8fe   :  { %1372 = vrot.lane.b32.xlu0 %v6845_v54, %s6455_s24  ;;  %1232 = vrot.lane.b32.xlu2 %v6853_v55, %s6450_s19 }
 0x8ff   :  { %1288 = vrot.lane.b32.xlu1 %v6853_v55, %s6449_s18 }
 0x906   :  { %1370 = vrot.lane.b32.xlu0 %v6845_v54, %s6453_s22  ;;  %1400 = vrot.lane.b32.xlu2 %v6853_v55, %s6455_s24 }
 0x907   :  { %1286 = vrot.lane.b32.xlu1 %v6853_v55, %s6452_s21 }
 0x90e   :  { %1398 = vrot.lane.b32.xlu0 %v6853_v55, %s6453_s22  ;;  %1314 = vrot.lane.b32.xlu2 %v6845_v54, %s6454_s23 }
 0x90f   :  { %1316 = vrot.lane.b32.xlu1 %v6845_v54, %s6451_s20 }
 0x916   :  { %1342 = vrot.lane.b32.xlu0 %v6853_v55, %s6454_s23  ;;  %1686 = vrot.lane.b32.xlu2 %v6845_v54, %s6457_s29 }
 0x917   :  { %1344 = vrot.lane.b32.xlu1 %v6853_v55, %s6451_s20 }
 0x91e   :  { %1634 = vrot.lane.b32.xlu0 %v6845_v54, %s6458_s30 }
 0x950   :  { %v1261_v59 = vpop.permute.xlu2 %1260 }
 0x951   :  { %5857 = vmatpush.xpose.msk.msrb.mxu2 %vm249_vm8, %v1261_v59 }
 0x958   :  { %v1233_v60 = vpop.permute.xlu2 %1232 }
 0x959   :  { %5855 = vmatpush.xpose.msk.msrb.mxu0 %vm249_vm8, %v1233_v60 }
 0x95c   :  { %5856 = vmatmul.msk.f32.vlgmr.msrb.gmra.mxu0 %vm249_vm8, %v6853_v55 }
 0x960   :  { %v1401_v48 = vpop.permute.xlu2 %1400 }
 0x968   :  { %v1315_v61 = vpop.permute.xlu2 %1314  ;;  %v1259_v62 = vpop.permute.xlu0 %1258 }
 0x969   :  { %v1206_v63 = vpop.permute.xlu1 %1205  ;;  %5858 = vmatmul.msk.f32.vlgmr.msrb.gmra.mxu2 %vm249_vm8, %v1259_v62 }
 0x96a   :  { %5853 = vmatpush.xpose.msk.msrb.mxu3 %vm249_vm8, %v1206_v63 }
 0x96d   :  { %5854 = vmatmul.msk.f32.vlgmr.msrb.gmra.mxu3 %vm249_vm8, %v6845_v54 }
 0x970   :  { %v1687_v53 = vpop.permute.xlu2 %1686  ;;  %v1373_v1 = vpop.permute.xlu0 %1372 }
 0x971   :  { %v1289_v2 = vpop.permute.xlu1 %1288  ;;  %5865 = vmatpush.xpose.msk.msra.mxu2 %vm249_vm8, %v1373_v1 }
 0x972   :  { %5859 = vmatpush.xpose.msk.msra.mxu3 %vm249_vm8, %v1289_v2 }
 0x975   :  { %1707 = vmatpush.msrb.mxu2 %v1687_v53 }
 0x976   :  { %5867 = vmatpush.xpose.msk.msrb.mxu3 %vm249_vm8, %v1401_v48 }
 0x978   :  { %v1371_v28 = vpop.permute.xlu0 %1370 }
 0x979   :  { %v1287_v8 = vpop.permute.xlu1 %1286  ;;  %5866 = vmatmul.msk.f32.vlgmr.msra.gmra.mxu2 %vm249_vm8, %v1371_v28 }
 0x97a   :  { %5860 = vmatmul.msk.f32.vlgmr.msra.gmra.mxu3 %vm249_vm8, %v1287_v8 }
 0x980   :  { %v1399_v57 = vpop.permute.xlu0 %1398 }
 0x981   :  { %v1317_v3 = vpop.permute.xlu1 %1316 }
 0x982   :  { %5861 = vmatpush.xpose.msk.msra.mxu0 %vm249_vm8, %v1317_v3  ;;  %5868 = vmatmul.msk.f32.vlgmr.msrb.gmra.mxu3 %vm249_vm8, %v1399_v57 }
 0x985   :  { %5862 = vmatmul.msk.f32.vlgmr.msra.gmra.mxu0 %vm249_vm8, %v1315_v61 }
 0x988   :  { %v1343_v4 = vpop.permute.xlu0 %1342 }
 0x989   :  { %v1345_v5 = vpop.permute.xlu1 %1344 }
 0x98a   :  { %5863 = vmatpush.xpose.msk.msra.mxu1 %vm249_vm8, %v1345_v5 }
 0x98d   :  { %5864 = vmatmul.msk.f32.vlgmr.msra.gmra.mxu1 %vm249_vm8, %v1343_v4 }
 0x990   :  { %v1635_v9 = vpop.permute.xlu0 %1634 }
 0x991   :  { %1655 = vmatpush.msrb.mxu0 %v1635_v9 }
 0x9d9   :  { %v1255_v17 = vpop.f32.mrf.mxu0 }
 0x9da   :  { %v1427_v21 = vmul.f32 0.35355338, %v1255_v17 }
 0x9dc   :  { %v1435_v19 = vadd.f32 %v6436_v30, %v1427_v21 }
 0x9de   :  { %v1445_v24 = vsel %vm249_vm8, %v1435_v19, -inf }
 0x9ec   :  { %v1283_v11 = vpop.f32.mrf.mxu2 }
 0x9ed   :  { %v1428_v7 = vmul.f32 0.35355338, %v1283_v11 }
 0x9ef   :  { %v1436_v13 = vadd.f32 %v6435_v12, %v1428_v7 }
 0x9f0   :  { %v1228_v0 = vpop.f32.mrf.mxu3 }
 0x9f1   :  { %v1426_v15 = vmul.f32 0.35355338, %v1228_v0  ;;  %v1448_v44 = vsel %vm249_vm8, %v1436_v13, -inf }
 0x9f2   :  { %1449 = vmax.xlane.f32.xlu2 %v1448_v44 }
 0x9f3   :  { %v1434_v20 = vadd.f32 %v6435_v12, %v1426_v15 }
 0x9f5   :  { %v1442_v16 = vsel %vm249_vm8, %v1434_v20, -inf }
 0x9f6   :  { %1443 = vmax.xlane.f32.xlu1 %v1442_v16 }
 0x9fc   :  { %v1395_v22 = vpop.f32.mrf.mxu2 }
 0x9fd   :  { %v1311_v23 = vpop.f32.mrf.mxu3  ;;  %v1432_v6 = vmul.f32 0.35355338, %v1395_v22 }
 0x9fe   :  { %v1429_v25 = vmul.f32 0.35355338, %v1311_v23  ;;  %1446 = vmax.xlane.f32.xlu1 %v1445_v24 }
 0x9ff   :  { %v1440_v26 = vadd.f32 %v6435_v12, %v1432_v6 }
 0xa00   :  { %v6904_v27 = vadd.f32 %v6436_v30, %v1429_v25 }
 0xa01   :  { %v1460_v29 = vsel %vm249_vm8, %v1440_v26, -inf }
 0xa02   :  { %v1339_v31 = vpop.f32.mrf.mxu0  ;;  %v1451_v32 = vsel %vm249_vm8, %v6904_v27, -inf  ;;  %1461 = vmax.xlane.f32.xlu2 %v1460_v29 }
 0xa03   :  { %v1430_v33 = vmul.f32 0.35355338, %v1339_v31  ;;  %1452 = vmax.xlane.f32.xlu0 %v1451_v32 }
 0xa05   :  { %v1423_v34 = vpop.f32.mrf.mxu3  ;;  %v6909_v36 = vadd.f32 %v6435_v12, %v1430_v33 }
 0xa06   :  { %v1433_v35 = vmul.f32 0.35355338, %v1423_v34 }
 0xa07   :  { %v1454_v39 = vsel %vm249_vm8, %v6909_v36, -inf }
 0xa08   :  { %v1441_v37 = vadd.f32 %v6436_v30, %v1433_v35 }
 0xa0a   :  { %v1367_v38 = vpop.f32.mrf.mxu1  ;;  %v1463_v58 = vsel %vm249_vm8, %v1441_v37, -inf }
 0xa0b   :  { %v1431_v40 = vmul.f32 0.35355338, %v1367_v38  ;;  %1455 = vmax.xlane.f32.xlu0 %v1454_v39  ;;  %1464 = vmax.xlane.f32.xlu2 %v1463_v58 }
 0xa0d   :  { %v1439_v41 = vadd.f32 %v6436_v30, %v1431_v40 }
 0xa0f   :  { %v1457_v18 = vsel %vm249_vm8, %v1439_v41, -inf }
 0xa10   :  { %1458 = vmax.xlane.f32.xlu1 %v1457_v18 }
 0xa1f   :  { %1660 = vrot.lane.b32.xlu0 %v6853_v55, %s6458_s30 }
 0xa23   :  { %1790 = vrot.lane.b32.xlu2 %v6845_v54, %s8112_s2 }
 0xa29   :  { %1712 = vrot.lane.b32.xlu1 %v6853_v55, %s6457_s29 }
 0xa65   :  { %v1450_v42 = vpop.xlane.xlu2 %1449 }
 0xa66   :  { %v1468_v56 = vsub.f32 %v1436_v13, %v1450_v42 }
 0xa68   :  { %v1478_v45 = vmul.f32 1.442695, %v1468_v56 }
 0xa69   :  { %v1444_v46 = vpop.xlane.xlu1 %1443 }
 0xa6a   :  { %6235 = vpow2.f32 %v1478_v45  ;;  %v1466_v47 = vsub.f32 %v1434_v20, %v1444_v46 }
 0xa6c   :  { %v1474_v50 = vmul.f32 1.442695, %v1466_v47 }
 0xa6e   :  { %6237 = vpow2.f32 %v1474_v50 }
 0xa70   :  { %v6921_v14 = vpop.eup %6235 }
 0xa71   :  { %v1447_v52 = vpop.xlane.xlu1 %1446  ;;  %v1496_v49 = vsel %vm249_vm8, %v6921_v14, 0.0 }
 0xa72   :  { %v1467_v59 = vsub.f32 %v1435_v19, %v1447_v52  ;;  %1497 = vadd.xlane.f32.xlu0 %v1496_v49 }
 0xa74   :  { %v6925_v60 = vpop.eup %6237  ;;  %v1476_v48 = vmul.f32 1.442695, %v1467_v59 }
 0xa75   :  { %v1462_v61 = vpop.xlane.xlu2 %1461  ;;  %v1490_v62 = vsel %vm249_vm8, %v6925_v60, 0.0 }
 0xa76   :  { %6239 = vpow2.f32 %v1476_v48  ;;  %v1472_v63 = vsub.f32 %v1440_v26, %v1462_v61  ;;  %1491 = vadd.xlane.f32.xlu2 %v1490_v62  ;;  %v1453_v8 = vpop.xlane.xlu0 %1452 }
 0xa77   :  { %v1469_v7 = vsub.f32 %v6904_v27, %v1453_v8 }
 0xa78   :  { %v1486_v53 = vmul.f32 1.442695, %v1472_v63 }
 0xa79   :  { %v1480_v44 = vmul.f32 1.442695, %v1469_v7 }
 0xa7a   :  { %6241 = vpow2.f32 %v1486_v53 }
 0xa7c   :  { %v6929_v1 = vpop.eup %6239 }
 0xa7d   :  { %v1493_v2 = vsel %vm249_vm8, %v6929_v1, 0.0 }
 0xa7e   :  { %1494 = vadd.xlane.f32.xlu2 %v1493_v2  ;;  %v1465_v28 = vpop.xlane.xlu2 %1464  ;;  %v1456_v15 = vpop.xlane.xlu0 %1455 }
 0xa7f   :  { %v1473_v57 = vsub.f32 %v1441_v37, %v1465_v28  ;;  %v1470_v21 = vsub.f32 %v6909_v36, %v1456_v15 }
 0xa80   :  { %v6933_v3 = vpop.eup %6241 }
 0xa81   :  { %v1488_v4 = vmul.f32 1.442695, %v1473_v57  ;;  %v1508_v5 = vsel %vm249_vm8, %v6933_v3, 0.0  ;;  %v1482_v19 = vmul.f32 1.442695, %v1470_v21 }
 0xa82   :  { %1509 = vadd.xlane.f32.xlu0 %v1508_v5 }
 0xa83   :  { %6243 = vpow2.f32 %v1488_v4  ;;  %v1459_v9 = vpop.xlane.xlu1 %1458 }
 0xa84   :  { %v1471_v11 = vsub.f32 %v1439_v41, %v1459_v9 }
 0xa86   :  { %v1484_v12 = vmul.f32 1.442695, %v1471_v11  ;;  %v1791_v13 = vpop.permute.xlu2 %1790 }
 0xa87   :  { %1811 = vmatpush.msra.mxu2 %v1791_v13 }
 0xa88   :  { %6245 = vpow2.f32 %v1484_v12 }
 0xa89   :  { %v6938_v0 = vpop.eup %6243  ;;  %6247 = vpow2.f32 %v1480_v44 }
 0xa8a   :  { %v1511_v17 = vsel %vm249_vm8, %v6938_v0, 0.0  ;;  %6249 = vpow2.f32 %v1482_v19 }
 0xa8b   :  { %1512 = vadd.xlane.f32.xlu0 %v1511_v17 }
 0xa8e   :  { %v6942_v20 = vpop.eup %6245 }
 0xa8f   :  { %v1505_v16 = vsel %vm249_vm8, %v6942_v20, 0.0  ;;  %v6947_v22 = vpop.eup %6247 }
 0xa90   :  { %1506 = vadd.xlane.f32.xlu1 %v1505_v16  ;;  %v1499_v23 = vsel %vm249_vm8, %v6947_v22, 0.0  ;;  %v6953_v24 = vpop.eup %6249 }
 0xa91   :  { %v1661_v30 = vpop.permute.xlu0 %1660  ;;  %v1502_v25 = vsel %vm249_vm8, %v6953_v24, 0.0 }
 0xa92   :  { %1681 = vmatpush.msrb.mxu1 %v1661_v30 }
 0xa96   :  { %1738 = vrot.lane.b32.xlu2 %v6845_v54, %s8110_s1 }
 0xa98   :  { %1500 = vadd.xlane.f32.xlu1 %v1499_v23 }
 0xa9b   :  { %v1713_v6 = vpop.permute.xlu1 %1712 }
 0xa9c   :  { %1733 = vmatpush.msra.mxu3 %v1713_v6 }
 0xa9f   :  { %1816 = vrot.lane.b32.xlu0 %v6853_v55, %s8112_s2 }
 0xaa0   :  { %1503 = vadd.xlane.f32.xlu1 %v1502_v25 }
 0xab9   :  { %1764 = vrot.lane.b32.xlu1 %v6853_v55, %s8110_s1 }
 0xae5   :  { %v1498_v26 = vpop.xlane.xlu0 %1497 }
 0xae6   :  { %6251 = vrcp.f32 %v1498_v26  ;;  %v1555_v33 = vand.u32 2147483648, %v1498_v26  ;;  %v1553_v37 = vand.u32 2147483647, %v1498_v26  ;;  %vm1549_vm2 = vweird.f32 %v1498_v26 }
 0xae8   :  { %v1556_v55 = vor.u32 1.1754944e-38, %v1555_v33  ;;  %vm1554_vm5 = vcmp.eq.f32.partialorder %v1553_v37, 8.507059e+37 }
 0xae9   :  { %v1492_v54 = vpop.xlane.xlu2 %1491 }
 0xaea   :  { %6253 = vrcp.f32 %v1492_v54  ;;  %v1525_v58 = vand.u32 2147483648, %v1492_v54  ;;  %v1523_v18 = vand.u32 2147483647, %v1492_v54  ;;  %vm1519_vm7 = vweird.f32 %v1492_v54 }
 0xaec   :  { %v6252_v27 = vpop.eup %6251  ;;  %v1526_v47 = vor.u32 1.1754944e-38, %v1525_v58  ;;  %vm1524_vm10 = vcmp.eq.f32.partialorder %v1523_v18, 8.507059e+37 }
 0xaed   :  { %v1545_v29 = vmul.f32 %v6252_v27, %v1498_v26  ;;  %vm1550_vm1 = vweird.f32 %v6252_v27 }
 0xaee   :  { %vm1551_vm3 = vmor %vm1549_vm2, %vm1550_vm1 }
 0xaef   :  { %v1546_v31 = vsub.f32 1.0, %v1545_v29 }
 0xaf0   :  { %v6254_v32 = vpop.eup %6253 }
 0xaf1   :  { %v1547_v34 = vmul.f32 %v6252_v27, %v1546_v31  ;;  %v1515_v35 = vmul.f32 %v6254_v32, %v1492_v54  ;;  %v1495_v36 = vpop.xlane.xlu2 %1494  ;;  %vm1520_vm4 = vweird.f32 %v6254_v32 }
 0xaf2   :  { %6255 = vrcp.f32 %v1495_v36  ;;  %vm1521_vm9 = vmor %vm1519_vm7, %vm1520_vm4  ;;  %v1538_v53 = vand.u32 2147483647, %v1495_v36  ;;  %v1540_v2 = vand.u32 2147483648, %v1495_v36  ;;  %vm1534_vm12 = vweird.f32 %v1495_v36 }
 0xaf3   :  { %v1548_v38 = vadd.f32 %v6252_v27, %v1547_v34  ;;  %v1516_v39 = vsub.f32 1.0, %v1515_v35 }
 0xaf4   :  { %vm1539_vm1 = vcmp.eq.f32.partialorder %v1538_v53, 8.507059e+37  ;;  %v1541_v4 = vor.u32 1.1754944e-38, %v1540_v2 }
 0xaf5   :  { %v1552_v40 = vsel %vm1551_vm3, %v6252_v27, %v1548_v38  ;;  %v1517_v41 = vmul.f32 %v6254_v32, %v1516_v39  ;;  %v1510_v42 = vpop.xlane.xlu0 %1509 }
 0xaf6   :  { %6257 = vrcp.f32 %v1510_v42  ;;  %v1557_v45 = vsel %vm1554_vm5, %v1556_v55, %v1552_v40  ;;  %v1615_v11 = vand.u32 2147483648, %v1510_v42  ;;  %v1613_v7 = vand.u32 2147483647, %v1510_v42 }
 0xaf7   :  { %v1518_v56 = vadd.f32 %v6254_v32, %v1517_v41  ;;  %v1558_v50 = vmul.f32 %v6921_v14, %v1557_v45  ;;  %vm1609_vm3 = vweird.f32 %v1510_v42 }
 0xaf8   :  { %v6256_v46 = vpop.eup %6255  ;;  %v1616_v21 = vor.u32 1.1754944e-38, %v1615_v11  ;;  %vm1614_vm5 = vcmp.eq.f32.partialorder %v1613_v7, 8.507059e+37 }
 0xaf9   :  { %v1522_v52 = vsel %vm1521_vm9, %v6254_v32, %v1518_v56  ;;  %v1530_v49 = vmul.f32 %v6256_v46, %v1495_v36  ;;  %v1739_v59 = vpop.permute.xlu2 %1738  ;;  %5871 = vmatmul.msk.f32.vlgmr.msrb.gmra.mxu2 %vm249_vm8, %v1558_v50  ;;  %vm1535_vm11 = vweird.f32 %v6256_v46 }
 0xafa   :  { %1759 = vmatpush.msra.mxu0 %v1739_v59  ;;  %v1527_v48 = vsel %vm1524_vm10, %v1526_v47, %v1522_v52  ;;  %vm1536_vm15 = vmor %vm1534_vm12, %vm1535_vm11 }
 0xafb   :  { %v1531_v61 = vsub.f32 1.0, %v1530_v49  ;;  %v1528_v62 = vmul.f32 %v6925_v60, %v1527_v48 }
 0xafc   :  { %v6258_v63 = vpop.eup %6257 }
 0xafd   :  { %v1532_v28 = vmul.f32 %v6256_v46, %v1531_v61  ;;  %v1605_v8 = vmul.f32 %v6258_v63, %v1510_v42  ;;  %5869 = vmatmul.msk.f32.vlgmr.msrb.gmra.mxu0 %vm249_vm8, %v1528_v62  ;;  %vm1610_vm2 = vweird.f32 %v6258_v63 }
 0xafe   :  { %v1513_v13 = vpop.xlane.xlu0 %1512  ;;  %vm1611_vm4 = vmor %vm1609_vm3, %vm1610_vm2 }
 0xaff   :  { %v1533_v14 = vadd.f32 %v6256_v46, %v1532_v28  ;;  %v1606_v57 = vsub.f32 1.0, %v1605_v8  ;;  %6259 = vrcp.f32 %v1513_v13  ;;  %v1628_v41 = vand.u32 2147483647, %v1513_v13 }
 0xb00   :  { %v1630_v18 = vand.u32 2147483648, %v1513_v13 }
 0xb01   :  { %v1537_v5 = vsel %vm1536_vm15, %v6256_v46, %v1533_v14  ;;  %v1607_v9 = vmul.f32 %v6258_v63, %v1606_v57  ;;  %vm1624_vm15 = vweird.f32 %v1513_v13  ;;  %vm1629_vm3 = vcmp.eq.f32.partialorder %v1628_v41, 8.507059e+37  ;;  %v6167_v41 = vld [vmem:[%s6741_s7 + $0x1] ss:$0 sm:$0xff]  ;;  %s6470_s7 = smov 17  }
 0xb02   :  { %v1542_v60 = vsel %vm1539_vm1, %v1541_v4, %v1537_v5  ;;  %v1631_v48 = vor.u32 1.1754944e-38, %v1630_v18  ;;  %s7036_s6 = sld [smem:[%s8103_s0 + %s6470_s7]]  }
 0xb03   :  { %v1608_v12 = vadd.f32 %v6258_v63, %v1607_v9  ;;  %v6965_v15 = vpop.xlane.xlu1 %1506  ;;  %v1543_v44 = vmul.f32 %v6929_v1, %v1542_v60 }
 0xb04   :  { %6261 = vrcp.f32 %v6965_v15  ;;  %v1600_v62 = vand.u32 2147483648, %v6965_v15  ;;  %v1598_v2 = vand.u32 2147483647, %v6965_v15 }
 0xb05   :  { %v1612_v17 = vsel %vm1611_vm4, %v6258_v63, %v1608_v12  ;;  %5870 = vmatmul.msk.f32.vlgmr.msrb.gmra.mxu1 %vm249_vm8, %v1543_v44  ;;  %v6260_v23 = vpop.eup %6259 }
 0xb06   :  { %v1617_v16 = vsel %vm1614_vm5, %v1616_v21, %v1612_v17  ;;  %v1620_v6 = vmul.f32 %v6260_v23, %v1513_v13  ;;  %vm1625_vm10 = vweird.f32 %v6260_v23  ;;  %v1601_v5 = vor.u32 1.1754944e-38, %v1600_v62  ;;  %v2108_v17 = vld [vmem:[%s5776_s26] sm:$0xff] }
 0xb07   :  { %v1618_v30 = vmul.f32 %v6933_v3, %v1617_v16  ;;  %vm6978_vm1 = vmor %vm1624_vm15, %vm1625_vm10  ;;  %v2110_v21 = vsel %vm145_vm0, %v2108_v17, 0.0  ;;  %v5849_v16 = vld [vmem:[%s6748_s15 + $0x38] sm:$0xff] }
 0xb08   :  { %v1621_v54 = vsub.f32 1.0, %v1620_v6  ;;  %1893 = vmatpush.msrb.mxu0 %v5849_v16  ;;  %v2109_v6 = vld [vmem:[%s5776_s26 + $0x8] sm:$0xff]  ;;  %v2165_v62 = vld [vmem:[%s7036_s6] sm:$0xff]  ;;  %s6479_s26 = smov 22  }
 0xb09   :  { %5875 = vmatmul.msk.f32.vlgmr.msra.gmra.mxu2 %vm249_vm8, %v1618_v30  ;;  %v5848_v30 = vld [vmem:[%s6748_s15 + $0x30] sm:$0xff] }
 0xb0a   :  { %v6972_v25 = vpop.eup %6261  ;;  %v1622_v33 = vmul.f32 %v6260_v23, %v1621_v54  ;;  %1894 = vmatpush.msrb.mxu0 %v5848_v30 }
 0xb0b   :  { %v1501_v19 = vpop.xlane.xlu1 %1500  ;;  %v1590_v3 = vmul.f32 %v6972_v25, %v6965_v15  ;;  %vm1595_vm4 = vweird.f32 %v6972_v25 }
 0xb0c   :  { %6263 = vrcp.f32 %v1501_v19  ;;  %v1570_v32 = vand.u32 2147483648, %v1501_v19  ;;  %v1568_v35 = vand.u32 2147483647, %v1501_v19  ;;  %vm1564_vm9 = vweird.f32 %v1501_v19 }
 0xb0d   :  { %v1591_v36 = vsub.f32 1.0, %v1590_v3  ;;  %v1623_v55 = vadd.f32 %v6260_v23, %v1622_v33 }
 0xb0e   :  { %v1571_v39 = vor.u32 1.1754944e-38, %v1570_v32  ;;  %vm1569_vm12 = vcmp.eq.f32.partialorder %v1568_v35, 8.507059e+37 }
 0xb0f   :  { %v1592_v56 = vmul.f32 %v6972_v25, %v1591_v36  ;;  %v1627_v52 = vsel %vm6978_vm1, %v6260_v23, %v1623_v55  ;;  %v5846_v23 = vld [vmem:[%s6748_s15 + $0x20] sm:$0xff] }
 0xb10   :  { %v1632_v53 = vsel %vm1629_vm3, %v1631_v48, %v1627_v52 }
 0xb11   :  { %v1817_v1 = vpop.permute.xlu0 %1816  ;;  %v1593_v61 = vadd.f32 %v6972_v25, %v1592_v56  ;;  %v1633_v4 = vmul.f32 %v6938_v0, %v1632_v53 }
 0xb12   :  { %v6264_v26 = vpop.eup %6263  ;;  %1837 = vmatpush.msrb.mxu3 %v1817_v1 }
 0xb13   :  { %v1560_v27 = vmul.f32 %v6264_v26, %v1501_v19  ;;  %v1504_v29 = vpop.xlane.xlu1 %1503  ;;  %vm1565_vm7 = vweird.f32 %v6264_v26  ;;  %v5847_v19 = vld [vmem:[%s6748_s15 + $0x28] sm:$0xff]  ;;  %s7051_s15 = sld [smem:[%s8103_s0 + %s6472_s25]]   ;;  %s6475_s25 = smov 19  }
 0xb14   :  { %6265 = vrcp.f32 %v1504_v29  ;;  %vm1566_vm11 = vmor %vm1564_vm9, %vm1565_vm7  ;;  %v1585_v50 = vand.u32 2147483648, %v1504_v29  ;;  %v1583_v59 = vand.u32 2147483647, %v1504_v29  ;;  %vm1579_vm5 = vweird.f32 %v1504_v29  ;;  %1895 = vmatpush.msrb.mxu0 %v5847_v19 }
 0xb15   :  { %v1561_v31 = vsub.f32 1.0, %v1560_v27  ;;  %vm1594_vm9 = vweird.f32 %v6965_v15 }
 0xb16   :  { %v1586_v63 = vor.u32 1.1754944e-38, %v1585_v50  ;;  %vm1584_vm10 = vcmp.eq.f32.partialorder %v1583_v59, 8.507059e+37  ;;  %1896 = vmatpush.msrb.mxu0 %v5846_v23 }
 0xb17   :  { %v1562_v34 = vmul.f32 %v6264_v26, %v1561_v31 }
 0xb19   :  { %v1563_v37 = vadd.f32 %v6264_v26, %v1562_v34 }
 0xb1a   :  { %v6266_v38 = vpop.eup %6265 }
 0xb1b   :  { %v1567_v58 = vsel %vm1566_vm11, %v6264_v26, %v1563_v37  ;;  %v1575_v40 = vmul.f32 %v6266_v38, %v1504_v29  ;;  %vm1580_vm2 = vweird.f32 %v6266_v38  ;;  %vm1596_vm11 = vmor %vm1594_vm9, %vm1595_vm4 }
 0xb1c   :  { %v1572_v42 = vsel %vm1569_vm12, %v1571_v39, %v1567_v58  ;;  %vm1581_vm7 = vmor %vm1579_vm5, %vm1580_vm2  ;;  %v1597_v14 = vsel %vm1596_vm11, %v6972_v25, %v1593_v61  ;;  %vm1599_vm12 = vcmp.eq.f32.partialorder %v1598_v2, 8.507059e+37  ;;  %v2113_v25 = vsel %vm145_vm0, %v2109_v6, 0.0 }
 0xb1d   :  { %v1576_v45 = vsub.f32 1.0, %v1575_v40  ;;  %v1573_v46 = vmul.f32 %v6947_v22, %v1572_v42  ;;  %v1602_v9 = vsel %vm1599_vm12, %v1601_v5, %v1597_v14 }
 0xb1e   :  { %v1603_v7 = vmul.f32 %v6942_v20, %v1602_v9  ;;  %v6437_v9 = vld [vmem:[%s6526_s17] sm:$0xf]  ;;  %s6473_s17 = smov 4  }
 0xb1f   :  { %v1577_v49 = vmul.f32 %v6266_v38, %v1576_v45  ;;  %5872 = vmatmul.msk.f32.vlgmr.msra.gmra.mxu3 %vm249_vm8, %v1573_v46 }
 0xb21   :  { %v1578_v22 = vadd.f32 %v6266_v38, %v1577_v49 }
 0xb23   :  { %v1582_v28 = vsel %vm1581_vm7, %v6266_v38, %v1578_v22  ;;  %v2167_v22 = vld [vmem:[%s7036_s6 + $0x10] sm:$0xff] }
 0xb24   :  { %v1587_v8 = vsel %vm1584_vm10, %v1586_v63, %v1582_v28 }
 0xb25   :  { %v1588_v57 = vmul.f32 %v6953_v24, %v1587_v8 }
 0xb27   :  { %5873 = vmatmul.msk.f32.vlgmr.msra.gmra.mxu0 %vm249_vm8, %v1588_v57  ;;  %5876 = vmatmul.msk.f32.vlgmr.msrb.gmra.mxu3 %vm249_vm8, %v1633_v4 }
 0xb2b   :  { %v1765_v11 = vpop.permute.xlu1 %1764 }
 0xb2c   :  { %1785 = vmatpush.msra.mxu1 %v1765_v11  ;;  %v2154_v11 = vperm.slane %v6437_v9, 2 }
 0xb2d   :  { %5874 = vmatmul.msk.f32.vlgmr.msra.gmra.mxu1 %vm249_vm8, %v1603_v7 }
 0xb7a   :  { %v1657_v0 = vpop.f32.mrf.mxu0 }
 0xb7c   :  { %v1709_v60 = vpop.f32.mrf.mxu2 }
 0xb7d   :  { %1844 = vrot.lane.b32.xlu2 %v1709_v60, %s8108_s10  ;;  %v2157_v60 = vperm.slane %v6437_v9, 3 }
 0xb82   :  { %v1683_v13 = vpop.f32.mrf.mxu1 }
 0xb8c   :  { %v1813_v12 = vpop.f32.mrf.mxu2 }
 0xb8d   :  { %1860 = vrot.lane.b32.xlu1 %v1813_v12, %s8106_s3 }
 0xba2   :  { %v1735_v24 = vpop.f32.mrf.mxu3 }
 0xba3   :  { %1846 = vrot.lane.b32.xlu2 %v1735_v24, %s8108_s10  ;;  %v2160_v24 = vld [vmem:[%s7051_s15] sm:$0xff] }
 0xba4   :  { %v1761_v15 = vpop.f32.mrf.mxu0 }
 0xba5   :  { %1852 = vrot.lane.b32.xlu0 %v1761_v15, %s8120_s9 }
 0xbaa   :  { %v1839_v20 = vpop.f32.mrf.mxu3  ;;  %v1787_v44 = vpop.f32.mrf.mxu1 }
 0xbab   :  { %1862 = vrot.lane.b32.xlu1 %v1839_v20, %s8106_s3 }
 0xbad   :  { %1854 = vrot.lane.b32.xlu0 %v1787_v44, %s8120_s9 }
 0xbcc   :  { %2111 = vadd.xlane.f32.xlu2 %v2110_v21 }
 0xbd7   :  { %2114 = vadd.xlane.f32.xlu0 %v2113_v25  ;;  %v1845_v1 = vpop.permute.xlu2 %1844 }
 0xbd8   :  { %v1866_v26 = vsel %vm249_vm8, %v1657_v0, %v1845_v1 }
 0xbfd   :  { %v1847_v31 = vpop.permute.xlu2 %1846 }
 0xbfe   :  { %v1867_v32 = vsel %vm249_vm8, %v1683_v13, %v1847_v31 }
 0xbff   :  { %v1861_v27 = vpop.permute.xlu1 %1860 }
 0xc17   :  { %v1853_v54 = vpop.permute.xlu0 %1852 }
 0xc18   :  { %v1868_v29 = vsel %vm917_vm13, %v1866_v26, %v1853_v54 }
 0xc19   :  { %v1870_v3 = vsel %vm920_vm14, %v1868_v29, %v1861_v27 }
 0xc1a   :  { %5877 = vmatmul.msk.f32.vlgmr.msrb.gmra.mxu0 %vm145_vm0, %v1870_v3 }
 0xc1d   :  { %v1863_v34 = vpop.permute.xlu1 %1862 }
 0xc1f   :  { %v1855_v33 = vpop.permute.xlu0 %1854 }
 0xc20   :  { %v1869_v35 = vsel %vm917_vm13, %v1867_v32, %v1855_v33 }
 0xc21   :  { %v1871_v36 = vsel %vm920_vm14, %v1869_v35, %v1863_v34 }
 0xc22   :  { %5878 = vmatmul.msk.f32.gmra.mxu0 %vm145_vm0, %v1871_v36 }
 0xc3f   :  { %v2112_v37 = vpop.xlane.xlu2 %2111 }
 0xc40   :  { %v2116_v38 = vmul.f32 %v2112_v37, %v6500_v10  ;;  %v2161_v37 = vld [vmem:[%s7051_s15 + $0x8] sm:$0xff]  ;;  %s6476_s15 = smov 21  }
 0xc42   :  { %v2118_v39 = vsub.f32 %v2108_v17, %v2116_v38 }
 0xc44   :  { %v2120_v55 = vmul.f32 %v2118_v39, %v2118_v39 }
 0xc46   :  { %v2122_v58 = vsel %vm145_vm0, %v2120_v55, 0.0  ;;  %v6168_v55 = vld [vmem:[%s7045_s28] ss:$0 sm:$0xff] }
 0xc47   :  { %2123 = vadd.xlane.f32.xlu0 %v2122_v58 }
 0xc4a   :  { %v2115_v40 = vpop.xlane.xlu0 %2114 }
 0xc4b   :  { %v2117_v18 = vmul.f32 %v2115_v40, %v6500_v10 }
 0xc4d   :  { %v7025_v46 = vsub.f32 %v2109_v6, %v2117_v18  ;;  %v5881_v18 = vld [vmem:[%s6779_s11 + $0x30] sm:$0xff] }
 0xc4f   :  { %v2121_v50 = vmul.f32 %v7025_v46, %v7025_v46 }
 0xc51   :  { %v2125_v48 = vsel %vm145_vm0, %v2121_v50, 0.0 }
 0xc97   :  { %v1898_v42 = vpop.f32.mrf.mxu0 }
 0xc98   :  { %v1899_v56 = vadd.f32 %v6167_v41, %v1898_v42  ;;  %v5880_v42 = vld [vmem:[%s6779_s11 + $0x28] sm:$0xff] }
 0xc9a   :  { %v1904_v45 = vadd.f32 %v1899_v56, %v6836_v43  ;;  %v2168_v43 = vld [vmem:[%s7036_s6 + $0x18] sm:$0xff]  ;;  %v5879_v56 = vld [vmem:[%s6779_s11 + $0x20] sm:$0xff] }
 0xc9b   :  { %2196 = vmatpush.msra.mxu3 %v2168_v43 }
 0xc9c   :  { %v1906_v47 = vsel %vm145_vm0, %v1904_v45, 0.0 }
 0xc9d   :  { %1907 = vadd.xlane.f32.xlu1 %v1906_v47  ;;  %2197 = vmatpush.msra.mxu3 %v2167_v22  ;;  %v5840_v22 = vld [vmem:[%s6791_s16 + $0x4] sm:$0xf] }
 0xc9f   :  { %v1901_v52 = vpop.f32.mrf.mxu0 }
 0xca0   :  { %v1902_v49 = vadd.f32 %v6167_v41, %v1901_v52  ;;  %v5882_v41 = vld [vmem:[%s6779_s11 + $0x38] sm:$0xff]  ;;  %s7160_s11 = sld [smem:[%s8103_s0 + %s6473_s17]]  }
 0xca1   :  { %1984 = vmatpush.msrb.mxu1 %v5882_v41  ;;  %s7345_s17 = sld [smem:[%s8103_s0 + %s6479_s26]]  }
 0xca2   :  { %v1905_v59 = vadd.f32 %v1902_v49, %v6840_v51  ;;  %v2166_v51 = vld [vmem:[%s7036_s6 + $0x8] sm:$0xff]  ;;  %s7591_s26 = sld [smem:[%s8103_s0 + %s6482_s12]]  }
 0xca3   :  { %2198 = vmatpush.msra.mxu3 %v2166_v51  ;;  %1985 = vmatpush.msrb.mxu1 %v5881_v18 }
 0xca4   :  { %v1909_v61 = vsel %vm145_vm0, %v1905_v59, 0.0 }
 0xca5   :  { %1910 = vadd.xlane.f32.xlu2 %v1909_v61  ;;  %2126 = vadd.xlane.f32.xlu1 %v2125_v48 }
 0xca6   :  { %2199 = vmatpush.msra.mxu3 %v2165_v62  ;;  %1986 = vmatpush.msrb.mxu1 %v5880_v42 }
 0xca8   :  { %1987 = vmatpush.msrb.mxu1 %v5879_v56 }
 0xcba   :  { %v2124_v63 = vpop.xlane.xlu0 %2123 }
 0xcbb   :  { %v2128_v53 = vmul.f32 %v2124_v63, %v6500_v10 }
 0xcbd   :  { %v2130_v2 = vadd.f32 1e-12, %v2128_v53 }
 0xcbf   :  { %6267 = vrsqrt.f32 %v2130_v2  ;;  %vm2138_vm15 = vweird.f32 %v2130_v2 }
 0xcc5   :  { %v6268_v28 = vpop.eup %6267 }
 0xcc6   :  { %v2133_v8 = vmul.f32 %v6268_v28, %v2130_v2  ;;  %vm2139_vm1 = vweird.f32 %v6268_v28  ;;  %v1950_v2 = vperm.slane %v5840_v22, 0 }
 0xcc7   :  { %vm2140_vm2 = vmor %vm2138_vm15, %vm2139_vm1 }
 0xcc8   :  { %v2134_v14 = vmul.f32 %v6268_v28, %v2133_v8 }
 0xcca   :  { %v2135_v57 = vmul.f32 0.5, %v2134_v14 }
 0xccc   :  { %v2136_v4 = vsub.f32 1.5, %v2135_v57  ;;  %v1953_v57 = vperm.slane %v5840_v22, 1 }
 0xcce   :  { %v2137_v5 = vmul.f32 %v6268_v28, %v2136_v4 }
 0xcd0   :  { %v2141_v7 = vsel %vm2140_vm2, %v6268_v28, %v2137_v5 }
 0xcd1   :  { %v2152_v12 = vmul.f32 %v2141_v7, %v2118_v39 }
 0xcd3   :  { %v2155_v0 = vmul.f32 %v2154_v11, %v2152_v12 }
 0xcd5   :  { %v2158_v13 = vadd.f32 %v2157_v60, %v2155_v0 }
 0xcd7   :  { %v7055_v15 = vadd.f32 %v2160_v24, %v2158_v13 }
 0xcd9   :  { %5897 = vmatmul.msk.f32.vlgmr.msra.gmra.mxu3 %vm145_vm0, %v7055_v15 }
 0xd10   :  { %v1908_v20 = vpop.xlane.xlu1 %1907 }
 0xd11   :  { %v1912_v44 = vmul.f32 %v1908_v20, %v6500_v10 }
 0xd13   :  { %v7060_v17 = vsub.f32 %v1904_v45, %v1912_v44 }
 0xd15   :  { %v1916_v21 = vmul.f32 %v7060_v17, %v7060_v17 }
 0xd17   :  { %v1918_v16 = vsel %vm145_vm0, %v1916_v21, 0.0 }
 0xd18   :  { %1919 = vadd.xlane.f32.xlu2 %v1918_v16  ;;  %v1911_v30 = vpop.xlane.xlu2 %1910  ;;  %v2127_v19 = vpop.xlane.xlu1 %2126 }
 0xd19   :  { %v1913_v23 = vmul.f32 %v1911_v30, %v6500_v10  ;;  %v2129_v6 = vmul.f32 %v2127_v19, %v6500_v10  ;;  %v5893_v19 = vld [vmem:[%s6808_s8 + $0x78] sm:$0xff] }
 0xd1a   :  { %2041 = vmatpush.msrb.mxu2 %v5893_v19 }
 0xd1b   :  { %v7067_v25 = vsub.f32 %v1905_v59, %v1913_v23  ;;  %v2131_v1 = vadd.f32 1e-12, %v2129_v6  ;;  %v5892_v23 = vld [vmem:[%s6808_s8 + $0x70] sm:$0xff]  ;;  %v5891_v6 = vld [vmem:[%s6808_s8 + $0x68] sm:$0xff] }
 0xd1c   :  { %2042 = vmatpush.msrb.mxu2 %v5892_v23 }
 0xd1d   :  { %6269 = vrsqrt.f32 %v2131_v1  ;;  %v1917_v26 = vmul.f32 %v7067_v25, %v7067_v25  ;;  %vm2148_vm3 = vweird.f32 %v2131_v1 }
 0xd1e   :  { %2043 = vmatpush.msrb.mxu2 %v5891_v6 }
 0xd1f   :  { %v1921_v54 = vsel %vm145_vm0, %v1917_v26, 0.0  ;;  %v5888_v26 = vld [vmem:[%s6808_s8 + $0x50] sm:$0xff] }
 0xd20   :  { %1922 = vadd.xlane.f32.xlu0 %v1921_v54  ;;  %v5887_v54 = vld [vmem:[%s6808_s8 + $0x48] sm:$0xff] }
 0xd23   :  { %v6270_v27 = vpop.eup %6269 }
 0xd24   :  { %v2143_v29 = vmul.f32 %v6270_v27, %v2131_v1  ;;  %vm2149_vm4 = vweird.f32 %v6270_v27  ;;  %v5889_v1 = vld [vmem:[%s6808_s8 + $0x58] sm:$0xff] }
 0xd25   :  { %vm2150_vm5 = vmor %vm2148_vm3, %vm2149_vm4 }
 0xd26   :  { %v2144_v3 = vmul.f32 %v6270_v27, %v2143_v29 }
 0xd28   :  { %v2145_v31 = vmul.f32 0.5, %v2144_v3 }
 0xd2a   :  { %v2146_v32 = vsub.f32 1.5, %v2145_v31 }
 0xd2c   :  { %v2147_v33 = vmul.f32 %v6270_v27, %v2146_v32  ;;  %v6169_v32 = vld [vmem:[%s6774_s27 + $0x1] ss:$0 sm:$0xff]  ;;  %s7319_s27 = sld [smem:[%s8103_s0 + %s6476_s15]]   ;;  %s6483_s15 = smov 26  }
 0xd2e   :  { %v2151_v34 = vsel %vm2150_vm5, %v6270_v27, %v2147_v33  ;;  %v5886_v27 = vld [vmem:[%s6808_s8 + $0x40] sm:$0xff] }
 0xd2f   :  { %v2153_v35 = vmul.f32 %v2151_v34, %v7025_v46 }
 0xd31   :  { %v2156_v36 = vmul.f32 %v2154_v11, %v2153_v35 }
 0xd33   :  { %v2159_v38 = vadd.f32 %v2157_v60, %v2156_v36 }
 0xd35   :  { %v7074_v39 = vadd.f32 %v2161_v37, %v2159_v38 }
 0xd37   :  { %5898 = vmatmul.msk.f32.gmra.mxu3 %vm145_vm0, %v7074_v39 }
 0xd5c   :  { %v2201_v58 = vpop.f32.mrf.mxu3 }
 0xd5d   :  { %v7079_v40 = vadd.f32 %v6168_v55, %v2201_v58 }
 0xd5f   :  { %2375 = vrot.lane.b32.xlu0 %v7079_v40, %s6455_s24  ;;  %2261 = vrot.lane.b32.xlu2 %v7079_v40, %s6452_s21 }
 0xd60   :  { %2263 = vrot.lane.b32.xlu1 %v7079_v40, %s6449_s18 }
 0xd67   :  { %2208 = vrot.lane.b32.xlu0 %v7079_v40, %s6450_s19 }
 0xd68   :  { %2373 = vrot.lane.b32.xlu1 %v7079_v40, %s6453_s22 }
 0xd70   :  { %2319 = vrot.lane.b32.xlu1 %v7079_v40, %s6451_s20 }
 0xd8b   :  { %v1920_v45 = vpop.xlane.xlu2 %1919 }
 0xd8c   :  { %v1924_v46 = vmul.f32 %v1920_v45, %v6500_v10 }
 0xd8e   :  { %v1926_v47 = vadd.f32 1e-12, %v1924_v46 }
 0xd90   :  { %6271 = vrsqrt.f32 %v1926_v47  ;;  %vm1934_vm9 = vweird.f32 %v1926_v47 }
 0xd93   :  { %v1923_v50 = vpop.xlane.xlu0 %1922 }
 0xd94   :  { %v1925_v52 = vmul.f32 %v1923_v50, %v6500_v10 }
 0xd96   :  { %v6272_v49 = vpop.eup %6271  ;;  %v1927_v59 = vadd.f32 1e-12, %v1925_v52 }
 0xd97   :  { %v1929_v48 = vmul.f32 %v6272_v49, %v1926_v47  ;;  %vm1935_vm7 = vweird.f32 %v6272_v49 }
 0xd98   :  { %6273 = vrsqrt.f32 %v1927_v59  ;;  %vm1936_vm10 = vmor %vm1934_vm9, %vm1935_vm7  ;;  %vm1944_vm12 = vweird.f32 %v1927_v59 }
 0xd99   :  { %v1930_v61 = vmul.f32 %v6272_v49, %v1929_v48 }
 0xd9b   :  { %v1931_v43 = vmul.f32 0.5, %v1930_v61 }
 0xd9d   :  { %v1932_v51 = vsub.f32 1.5, %v1931_v43 }
 0xd9e   :  { %v6274_v62 = vpop.eup %6273 }
 0xd9f   :  { %v1933_v63 = vmul.f32 %v6272_v49, %v1932_v51  ;;  %v1939_v53 = vmul.f32 %v6274_v62, %v1927_v59  ;;  %vm1945_vm11 = vweird.f32 %v6274_v62 }
 0xda0   :  { %vm1946_vm15 = vmor %vm1944_vm12, %vm1945_vm11 }
 0xda1   :  { %v1937_v28 = vsel %vm1936_vm10, %v6272_v49, %v1933_v63  ;;  %v1940_v8 = vmul.f32 %v6274_v62, %v1939_v53 }
 0xda2   :  { %v1948_v14 = vmul.f32 %v1937_v28, %v7060_v17 }
 0xda3   :  { %v1941_v4 = vmul.f32 0.5, %v1940_v8  ;;  %v137_v8 = vld [vmem:[%s7160_s11] sm:$0xff] }
 0xda4   :  { %v1951_v5 = vmul.f32 %v1950_v2, %v1948_v14 }
 0xda5   :  { %v1942_v9 = vsub.f32 1.5, %v1941_v4 }
 0xda6   :  { %v7101_v11 = vadd.f32 %v1953_v57, %v1951_v5 }
 0xda7   :  { %v1943_v7 = vmul.f32 %v6274_v62, %v1942_v9 }
 0xda8   :  { %5884 = vmatmul.msk.f32.vlgmr.msrb.gmra.mxu1 %vm145_vm0, %v7101_v11 }
 0xda9   :  { %v1947_v60 = vsel %vm1946_vm15, %v6274_v62, %v1943_v7 }
 0xdaa   :  { %v1949_v12 = vmul.f32 %v1947_v60, %v7067_v25  ;;  %v5890_v25 = vld [vmem:[%s6808_s8 + $0x60] sm:$0xff]  ;;  %s6480_s8 = smov 29  }
 0xdab   :  { %2044 = vmatpush.msrb.mxu2 %v5890_v25  ;;  %s7353_s14 = sld [smem:[%s8103_s0 + %s6480_s8]]   ;;  %s6485_s8 = smov 27  }
 0xdac   :  { %v1952_v0 = vmul.f32 %v1950_v2, %v1949_v12 }
 0xdad   :  { %2045 = vmatpush.msrb.mxu2 %v5889_v1 }
 0xdae   :  { %v7106_v24 = vadd.f32 %v1953_v57, %v1952_v0 }
 0xdaf   :  { %2046 = vmatpush.msrb.mxu2 %v5888_v26 }
 0xdb0   :  { %5885 = vmatmul.msk.f32.gmra.mxu1 %vm145_vm0, %v7106_v24 }
 0xdb1   :  { %2047 = vmatpush.msrb.mxu2 %v5887_v54 }
 0xdb3   :  { %2048 = vmatpush.msrb.mxu2 %v5886_v27 }
 0xdb9   :  { %v2262_v21 = vpop.permute.xlu2 %2261 }
 0xdba   :  { %v2204_v13 = vpop.f32.mrf.mxu3 }
 0xdbb   :  { %v7110_v20 = vadd.f32 %v6168_v55, %v2204_v13 }
 0xdbd   :  { %2347 = vrot.lane.b32.xlu0 %v7110_v20, %s6451_s20  ;;  %2235 = vrot.lane.b32.xlu2 %v7110_v20, %s6450_s19 }
 0xdbe   :  { %2289 = vrot.lane.b32.xlu1 %v7110_v20, %s6452_s21 }
 0xdc5   :  { %2291 = vrot.lane.b32.xlu0 %v7110_v20, %s6449_s18  ;;  %2345 = vrot.lane.b32.xlu2 %v7110_v20, %s6454_s23 }
 0xdcd   :  { %2403 = vrot.lane.b32.xlu0 %v7110_v20, %s6455_s24  ;;  %2317 = vrot.lane.b32.xlu2 %v7079_v40, %s6454_s23 }
 0xdd1   :  { %v2376_v44 = vpop.permute.xlu0 %2375 }
 0xdd2   :  { %v2264_v17 = vpop.permute.xlu1 %2263 }
 0xdd3   :  { %5903 = vmatpush.xpose.msk.msrb.mxu3 %vm249_vm8, %v2264_v17 }
 0xdd5   :  { %2401 = vrot.lane.b32.xlu2 %v7110_v20, %s6453_s22 }
 0xdd6   :  { %5904 = vmatmul.msk.f32.vlgmr.msrb.gmra.mxu3 %vm249_vm8, %v2262_v21  ;;  %v138_v21 = vld [vmem:[%s7160_s11 + $0x8] sm:$0xff] }
 0xdd7   :  { %5911 = vmatpush.xpose.msk.msra.mxu3 %vm249_vm8, %v2376_v44 }
 0xdd9   :  { %v2209_v16 = vpop.permute.xlu0 %2208 }
 0xdda   :  { %5899 = vmatpush.xpose.msk.msra.mxu0 %vm249_vm8, %v2209_v16  ;;  %v2374_v30 = vpop.permute.xlu1 %2373 }
 0xddd   :  { %5900 = vmatmul.msk.f32.vlgmr.msra.gmra.mxu0 %vm249_vm8, %v7079_v40 }
 0xdde   :  { %5912 = vmatmul.msk.f32.vlgmr.msra.gmra.mxu3 %vm249_vm8, %v2374_v30 }
 0xde2   :  { %v2320_v3 = vpop.permute.xlu1 %2319 }
 0xe17   :  { %v2236_v29 = vpop.permute.xlu2 %2235 }
 0xe18   :  { %5901 = vmatpush.xpose.msk.msra.mxu1 %vm249_vm8, %v2236_v29 }
 0xe1b   :  { %5902 = vmatmul.msk.f32.vlgmr.msra.gmra.mxu1 %vm249_vm8, %v7110_v20 }
 0xe1c   :  { %5907 = vmatpush.xpose.msk.msrb.mxu1 %vm249_vm8, %v2320_v3 }
 0xe1f   :  { %v2346_v31 = vpop.permute.xlu2 %2345 }
 0xe25   :  { %v1989_v33 = vpop.f32.mrf.mxu1 }
 0xe26   :  { %v1990_v34 = vadd.f32 %v6169_v32, %v1989_v33 }
 0xe27   :  { %v2318_v35 = vpop.permute.xlu2 %2317 }
 0xe28   :  { %v1997_v36 = vmul.f32 0.044715, %v1990_v34  ;;  %5908 = vmatmul.msk.f32.vlgmr.msrb.gmra.mxu1 %vm249_vm8, %v2318_v35  ;;  %v1995_v59 = vmul.f32 0.5, %v1990_v34 }
 0xe2a   :  { %v1999_v37 = vmul.f32 %v1997_v36, %v1990_v34 }
 0xe2c   :  { %v2001_v38 = vmul.f32 %v1999_v37, %v1990_v34 }
 0xe2d   :  { %v1992_v55 = vpop.f32.mrf.mxu1 }
 0xe2e   :  { %v2003_v58 = vadd.f32 %v2001_v38, %v1990_v34  ;;  %v1993_v41 = vadd.f32 %v6169_v32, %v1992_v55 }
 0xe2f   :  { %v2348_v18 = vpop.permute.xlu0 %2347  ;;  %v2402_v53 = vpop.permute.xlu2 %2401 }
 0xe30   :  { %v2005_v42 = vmul.f32 0.7978846, %v2003_v58  ;;  %v1998_v56 = vmul.f32 0.044715, %v1993_v41  ;;  %5909 = vmatpush.xpose.msk.msra.mxu2 %vm249_vm8, %v2348_v18  ;;  %v2290_v61 = vpop.permute.xlu1 %2289  ;;  %v1996_v62 = vmul.f32 0.5, %v1993_v41 }
 0xe32   :  { %6275 = vtanh.f32 %v2005_v42  ;;  %v2000_v45 = vmul.f32 %v1998_v56, %v1993_v41 }
 0xe34   :  { %v2002_v46 = vmul.f32 %v2000_v45, %v1993_v41 }
 0xe36   :  { %v2004_v47 = vadd.f32 %v2002_v46, %v1993_v41 }
 0xe37   :  { %v2292_v50 = vpop.permute.xlu0 %2291 }
 0xe38   :  { %v6276_v52 = vpop.eup %6275  ;;  %5905 = vmatpush.xpose.msk.msrb.mxu0 %vm249_vm8, %v2292_v50  ;;  %v2006_v49 = vmul.f32 0.7978846, %v2004_v47 }
 0xe39   :  { %v2009_v48 = vadd.f32 1.0, %v6276_v52 }
 0xe3a   :  { %6277 = vtanh.f32 %v2006_v49 }
 0xe3b   :  { %5906 = vmatmul.msk.f32.vlgmr.msrb.gmra.mxu0 %vm249_vm8, %v2290_v61  ;;  %v2011_v43 = vmul.f32 %v2009_v48, %v1995_v59 }
 0xe3d   :  { %5895 = vmatmul.msk.f32.vlgmr.msrb.gmra.mxu2 %vm1074_vm6, %v2011_v43 }
 0xe3f   :  { %v2404_v22 = vpop.permute.xlu0 %2403 }
 0xe40   :  { %v6278_v51 = vpop.eup %6277  ;;  %5913 = vmatpush.xpose.msk.msra.mxu0 %vm249_vm8, %v2404_v22  ;;  %v6118_v22 = vpack.i.bf16 %v7110_v20, %v7079_v40 }
 0xe41   :  { %v2010_v63 = vadd.f32 1.0, %v6278_v51 }
 0xe43   :  { %5914 = vmatmul.msk.f32.vlgmr.msra.gmra.mxu0 %vm249_vm8, %v2402_v53  ;;  %v2012_v2 = vmul.f32 %v2010_v63, %v1996_v62 }
 0xe45   :  { %5896 = vmatmul.msk.f32.gmra.mxu2 %vm1074_vm6, %v2012_v2 }
 0xe4d   :  { %5910 = vmatmul.msk.f32.vlgmr.msra.gmra.mxu2 %vm249_vm8, %v2346_v31 }
 0xe59   :  { %v2286_v28 = vpop.f32.mrf.mxu3 }
 0xe5a   :  { %v2431_v14 = vmul.f32 0.35355338, %v2286_v28  ;;  %v2231_v57 = vpop.f32.mrf.mxu0 }
 0xe5b   :  { %v2429_v4 = vmul.f32 0.35355338, %v2231_v57 }
 0xe5c   :  { %v2439_v5 = vadd.f32 %v2431_v14, %v137_v8 }
 0xe5d   :  { %v2437_v9 = vadd.f32 %v2429_v4, %v137_v8 }
 0xe5e   :  { %v2451_v7 = vsel %vm249_vm8, %v2439_v5, -inf }
 0xe5f   :  { %2452 = vmax.xlane.f32.xlu1 %v2451_v7  ;;  %v2445_v60 = vsel %vm249_vm8, %v2437_v9, -inf }
 0xe60   :  { %2446 = vmax.xlane.f32.xlu0 %v2445_v60 }
 0xe61   :  { %v2398_v12 = vpop.f32.mrf.mxu3 }
 0xe62   :  { %v2435_v0 = vmul.f32 0.35355338, %v2398_v12 }
 0xe64   :  { %v2443_v13 = vadd.f32 %v2435_v0, %v137_v8 }
 0xe66   :  { %v2463_v44 = vsel %vm249_vm8, %v2443_v13, -inf }
 0xe67   :  { %2464 = vmax.xlane.f32.xlu1 %v2463_v44 }
 0xe98   :  { %v2258_v17 = vpop.f32.mrf.mxu1 }
 0xe99   :  { %v2430_v16 = vmul.f32 0.35355338, %v2258_v17 }
 0xe9b   :  { %v2438_v30 = vadd.f32 %v2430_v16, %v138_v21 }
 0xe9d   :  { %v2448_v19 = vsel %vm249_vm8, %v2438_v30, -inf }
 0xe9e   :  { %2449 = vmax.xlane.f32.xlu2 %v2448_v19 }
 0xea5   :  { %v2342_v23 = vpop.f32.mrf.mxu1 }
 0xea6   :  { %v2433_v6 = vmul.f32 0.35355338, %v2342_v23 }
 0xea8   :  { %v2441_v25 = vadd.f32 %v2433_v6, %v137_v8 }
 0xeaa   :  { %v2457_v1 = vsel %vm249_vm8, %v2441_v25, -inf }
 0xeab   :  { %2458 = vmax.xlane.f32.xlu2 %v2457_v1 }
 0xeb8   :  { %v2314_v26 = vpop.f32.mrf.mxu0 }
 0xeb9   :  { %v2432_v54 = vmul.f32 0.35355338, %v2314_v26 }
 0xebb   :  { %v2440_v27 = vadd.f32 %v2432_v54, %v138_v21 }
 0xebd   :  { %v2454_v29 = vsel %vm249_vm8, %v2440_v27, -inf }
 0xebe   :  { %2455 = vmax.xlane.f32.xlu0 %v2454_v29 }
 0xec0   :  { %v7170_v3 = vpop.f32.mrf.mxu2  ;;  %v2426_v31 = vpop.f32.mrf.mxu0 }
 0xec1   :  { %v2436_v32 = vmul.f32 0.35355338, %v2426_v31 }
 0xec3   :  { %v2444_v33 = vadd.f32 %v2436_v32, %v138_v21 }
 0xec5   :  { %v2466_v34 = vsel %vm249_vm8, %v2444_v33, -inf }
 0xec6   :  { %2467 = vmax.xlane.f32.xlu2 %v2466_v34 }
 0xec8   :  { %v7173_v35 = vpop.f32.mrf.mxu2 }
 0xed0   :  { %v2370_v36 = vpop.f32.mrf.mxu2 }
 0xed1   :  { %v2434_v37 = vmul.f32 0.35355338, %v2370_v36 }
 0xed2   :  { %v2453_v38 = vpop.xlane.xlu1 %2452 }
 0xed3   :  { %v2471_v55 = vsub.f32 %v2439_v5, %v2453_v38  ;;  %v2447_v58 = vpop.xlane.xlu0 %2446  ;;  %v2442_v41 = vadd.f32 %v2434_v37, %v138_v21 }
 0xed4   :  { %v2469_v18 = vsub.f32 %v2437_v9, %v2447_v58 }
 0xed5   :  { %v2481_v42 = vmul.f32 1.442695, %v2471_v55  ;;  %v2460_v56 = vsel %vm249_vm8, %v2442_v41, -inf }
 0xed6   :  { %v2477_v45 = vmul.f32 1.442695, %v2469_v18  ;;  %2461 = vmax.xlane.f32.xlu1 %v2460_v56 }
 0xed7   :  { %6279 = vpow2.f32 %v2481_v42 }
 0xed8   :  { %6281 = vpow2.f32 %v2477_v45 }
 0xeda   :  { %v2465_v46 = vpop.xlane.xlu1 %2464 }
 0xedb   :  { %v2475_v47 = vsub.f32 %v2443_v13, %v2465_v46 }
 0xedd   :  { %v7176_v50 = vpop.eup %6279  ;;  %v2489_v52 = vmul.f32 1.442695, %v2475_v47 }
 0xede   :  { %v7178_v49 = vpop.eup %6281  ;;  %v2499_v59 = vsel %vm249_vm8, %v7176_v50, 0.0 }
 0xedf   :  { %6283 = vpow2.f32 %v2489_v52  ;;  %2500 = vadd.xlane.f32.xlu0 %v2499_v59  ;;  %v2493_v48 = vsel %vm249_vm8, %v7178_v49, 0.0 }
 0xee0   :  { %2494 = vadd.xlane.f32.xlu1 %v2493_v48 }
 0xee5   :  { %v7184_v61 = vpop.eup %6283 }
 0xee6   :  { %v2511_v43 = vsel %vm249_vm8, %v7184_v61, 0.0 }
 0xee7   :  { %2512 = vadd.xlane.f32.xlu0 %v2511_v43 }
 0xefb   :  { %6119 = vrot.lane.b32.xlu0 %v6118_v22, %s6458_s30 }
 0xf11   :  { %v2450_v51 = vpop.xlane.xlu2 %2449 }
 0xf12   :  { %v2470_v62 = vsub.f32 %v2438_v30, %v2450_v51 }
 0xf14   :  { %v2479_v63 = vmul.f32 1.442695, %v2470_v62 }
 0xf16   :  { %6285 = vpow2.f32 %v2479_v63 }
 0xf1c   :  { %v7191_v53 = vpop.eup %6285 }
 0xf1d   :  { %v2496_v2 = vsel %vm249_vm8, %v7191_v53, 0.0 }
 0xf1e   :  { %v2459_v28 = vpop.xlane.xlu2 %2458  ;;  %2497 = vadd.xlane.f32.xlu2 %v2496_v2 }
 0xf1f   :  { %v2473_v8 = vsub.f32 %v2441_v25, %v2459_v28 }
 0xf21   :  { %v2485_v14 = vmul.f32 1.442695, %v2473_v8 }
 0xf23   :  { %6287 = vpow2.f32 %v2485_v14 }
 0xf29   :  { %v7195_v57 = vpop.eup %6287 }
 0xf2a   :  { %v2505_v4 = vsel %vm249_vm8, %v7195_v57, 0.0 }
 0xf2b   :  { %2506 = vadd.xlane.f32.xlu1 %v2505_v4 }
 0xf31   :  { %v2456_v5 = vpop.xlane.xlu0 %2455 }
 0xf32   :  { %v2472_v9 = vsub.f32 %v2440_v27, %v2456_v5 }
 0xf34   :  { %v2483_v7 = vmul.f32 1.442695, %v2472_v9 }
 0xf36   :  { %6289 = vpow2.f32 %v2483_v7 }
 0xf39   :  { %v2468_v60 = vpop.xlane.xlu2 %2467 }
 0xf3a   :  { %v2476_v12 = vsub.f32 %v2444_v33, %v2468_v60 }
 0xf3c   :  { %v7199_v0 = vpop.eup %6289  ;;  %v2491_v13 = vmul.f32 1.442695, %v2476_v12 }
 0xf3d   :  { %v2502_v44 = vsel %vm249_vm8, %v7199_v0, 0.0 }
 0xf3e   :  { %6291 = vpow2.f32 %v2491_v13  ;;  %2503 = vadd.xlane.f32.xlu2 %v2502_v44 }
 0xf44   :  { %v7203_v17 = vpop.eup %6291  ;;  %2689 = vrot.lane.b32.xlu1 %v7079_v40, %s6457_s29 }
 0xf45   :  { %v2514_v21 = vsel %vm249_vm8, %v7203_v17, 0.0 }
 0xf46   :  { %2515 = vadd.xlane.f32.xlu2 %v2514_v21 }
 0xf49   :  { %v2462_v16 = vpop.xlane.xlu1 %2461 }
 0xf4a   :  { %v2474_v30 = vsub.f32 %v2442_v41, %v2462_v16 }
 0xf4c   :  { %v2487_v19 = vmul.f32 1.442695, %v2474_v30  ;;  %6124 = vrot.lane.b32.xlu1 %v6118_v22, %s8110_s1 }
 0xf4e   :  { %6293 = vpow2.f32 %v2487_v19 }
 0xf52   :  { %v7216_v26 = vpop.xlane.xlu0 %2500 }
 0xf53   :  { %v2495_v23 = vpop.xlane.xlu1 %2494  ;;  %v2558_v9 = vand.u32 2147483648, %v7216_v26  ;;  %vm2552_vm12 = vweird.f32 %v7216_v26  ;;  %v2556_v7 = vand.u32 2147483647, %v7216_v26 }
 0xf54   :  { %v7210_v6 = vpop.eup %6293  ;;  %6295 = vrcp.f32 %v2495_v23  ;;  %2819 = vrot.lane.b32.xlu1 %v7110_v20, %s8112_s2  ;;  %v2528_v33 = vand.u32 2147483648, %v2495_v23  ;;  %vm2522_vm2 = vweird.f32 %v2495_v23  ;;  %v2526_v34 = vand.u32 2147483647, %v2495_v23 }
 0xf55   :  { %v2508_v25 = vsel %vm249_vm8, %v7210_v6, 0.0  ;;  %v2559_v13 = vor.u32 1.1754944e-38, %v2558_v9 }
 0xf56   :  { %2509 = vadd.xlane.f32.xlu0 %v2508_v25  ;;  %v2529_v37 = vor.u32 1.1754944e-38, %v2528_v33  ;;  %vm2527_vm4 = vcmp.eq.f32.partialorder %v2526_v34, 8.507059e+37 }
 0xf5a   :  { %v6296_v1 = vpop.eup %6295  ;;  %v7220_v32 = vpop.xlane.xlu0 %2512 }
 0xf5b   :  { %v2518_v54 = vmul.f32 %v6296_v1, %v2495_v23  ;;  %vm2523_vm1 = vweird.f32 %v6296_v1 }
 0xf5c   :  { %vm2524_vm3 = vmor %vm2522_vm2, %vm2523_vm1  ;;  %vm2557_vm1 = vcmp.eq.f32.partialorder %v2556_v7, 8.507059e+37 }
 0xf5d   :  { %v2519_v27 = vsub.f32 1.0, %v2518_v54 }
 0xf5e   :  { %2793 = vrot.lane.b32.xlu2 %v7079_v40, %s8112_s2  ;;  %s7635_s2 = sld [smem:[%s8103_s0 + %s6485_s8]]  }
 0xf5f   :  { %v2520_v29 = vmul.f32 %v6296_v1, %v2519_v27 }
 0xf61   :  { %v2521_v31 = vadd.f32 %v6296_v1, %v2520_v29  ;;  %v2616_v29 = vand.u32 2147483647, %v7220_v32 }
 0xf63   :  { %v2525_v36 = vsel %vm2524_vm3, %v6296_v1, %v2521_v31 }
 0xf64   :  { %v2530_v38 = vsel %vm2527_vm4, %v2529_v37, %v2525_v36 }
 0xf65   :  { %v2531_v40 = vmul.f32 %v7178_v49, %v2530_v38 }
 0xf6a   :  { %2715 = vrot.lane.b32.xlu0 %v7110_v20, %s6457_s29 }
 0xf6d   :  { %v6120_v55 = vpop.permute.xlu0 %6119 }
 0xf6e   :  { %v6122_v58 = vunpack.i.h.bf16 %v6120_v55  ;;  %v6121_v41 = vunpack.i.l.bf16 %v6120_v55 }
 0xf70   :  { %2658 = vmatpush.msra.mxu1 %v6121_v41  ;;  %2684 = vmatpush.msrb.mxu2 %v6122_v58 }
 0xf71   :  { %5915 = vmatmul.msk.f32.vlgmr.msra.gmra.mxu1 %vm249_vm8, %v2531_v40 }
 0xf91   :  { %v2498_v18 = vpop.xlane.xlu2 %2497 }
 0xf92   :  { %6297 = vrcp.f32 %v2498_v18  ;;  %v2543_v46 = vand.u32 2147483648, %v2498_v18  ;;  %v2541_v52 = vand.u32 2147483647, %v2498_v18  ;;  %vm2537_vm7 = vweird.f32 %v2498_v18 }
 0xf93   :  { %6299 = vrcp.f32 %v7216_v26 }
 0xf94   :  { %v2544_v43 = vor.u32 1.1754944e-38, %v2543_v46  ;;  %vm2542_vm10 = vcmp.eq.f32.partialorder %v2541_v52, 8.507059e+37 }
 0xf98   :  { %v6298_v42 = vpop.eup %6297 }
 0xf99   :  { %v2533_v56 = vmul.f32 %v6298_v42, %v2498_v18  ;;  %v6300_v20 = vpop.eup %6299  ;;  %vm2538_vm5 = vweird.f32 %v6298_v42 }
 0xf9a   :  { %v2548_v49 = vmul.f32 %v6300_v20, %v7216_v26  ;;  %vm2539_vm9 = vmor %vm2537_vm7, %vm2538_vm5  ;;  %vm2553_vm11 = vweird.f32 %v6300_v20  ;;  %v2618_v26 = vand.u32 2147483648, %v7220_v32  ;;  %vm2612_vm5 = vweird.f32 %v7220_v32 }
 0xf9b   :  { %v2534_v45 = vsub.f32 1.0, %v2533_v56  ;;  %vm2554_vm15 = vmor %vm2552_vm12, %vm2553_vm11  ;;  %vm2617_vm11 = vcmp.eq.f32.partialorder %v2616_v29, 8.507059e+37 }
 0xf9c   :  { %v2549_v63 = vsub.f32 1.0, %v2548_v49  ;;  %v2619_v36 = vor.u32 1.1754944e-38, %v2618_v26 }
 0xf9d   :  { %v2535_v47 = vmul.f32 %v6298_v42, %v2534_v45 }
 0xf9e   :  { %v2507_v59 = vpop.xlane.xlu1 %2506  ;;  %v2550_v8 = vmul.f32 %v6300_v20, %v2549_v63 }
 0xf9f   :  { %v2536_v48 = vadd.f32 %v6298_v42, %v2535_v47  ;;  %6301 = vrcp.f32 %v2507_v59  ;;  %v2588_v54 = vand.u32 2147483648, %v2507_v59  ;;  %vm2582_vm4 = vweird.f32 %v2507_v59 }
 0xfa0   :  { %6303 = vrcp.f32 %v7220_v32  ;;  %v2551_v5 = vadd.f32 %v6300_v20, %v2550_v8  ;;  %v2586_v27 = vand.u32 2147483647, %v2507_v59 }
 0xfa1   :  { %v2540_v22 = vsel %vm2539_vm9, %v6298_v42, %v2536_v48  ;;  %v2589_v34 = vor.u32 1.1754944e-38, %v2588_v54 }
 0xfa2   :  { %v2545_v51 = vsel %vm2542_vm10, %v2544_v43, %v2540_v22  ;;  %v2555_v12 = vsel %vm2554_vm15, %v6300_v20, %v2551_v5  ;;  %vm2587_vm10 = vcmp.eq.f32.partialorder %v2586_v27, 8.507059e+37 }
 0xfa3   :  { %v2546_v62 = vmul.f32 %v7191_v53, %v2545_v51  ;;  %v2560_v30 = vsel %vm2557_vm1, %v2559_v13, %v2555_v12 }
 0xfa4   :  { %v2561_v25 = vmul.f32 %v7176_v50, %v2560_v30 }
 0xfa5   :  { %5916 = vmatmul.msk.f32.vlgmr.msrb.gmra.mxu2 %vm249_vm8, %v2546_v62  ;;  %v6302_v2 = vpop.eup %6301 }
 0xfa6   :  { %v6304_v28 = vpop.eup %6303  ;;  %v2578_v14 = vmul.f32 %v6302_v2, %v2507_v59  ;;  %vm2583_vm2 = vweird.f32 %v6302_v2 }
 0xfa7   :  { %v2608_v4 = vmul.f32 %v6304_v28, %v7220_v32  ;;  %vm2613_vm3 = vweird.f32 %v6304_v28  ;;  %vm2584_vm7 = vmor %vm2582_vm4, %vm2583_vm2 }
 0xfa8   :  { %v2579_v60 = vsub.f32 1.0, %v2578_v14  ;;  %vm2614_vm9 = vmor %vm2612_vm5, %vm2613_vm3 }
 0xfa9   :  { %v2609_v53 = vsub.f32 1.0, %v2608_v4 }
 0xfaa   :  { %v2580_v21 = vmul.f32 %v6302_v2, %v2579_v60 }
 0xfab   :  { %v2610_v16 = vmul.f32 %v6304_v28, %v2609_v53 }
 0xfac   :  { %v2581_v19 = vadd.f32 %v6302_v2, %v2580_v21 }
 0xfad   :  { %v2611_v1 = vadd.f32 %v6304_v28, %v2610_v16 }
 0xfae   :  { %v2585_v33 = vsel %vm2584_vm7, %v6302_v2, %v2581_v19 }
 0xfaf   :  { %v2615_v50 = vsel %vm2614_vm9, %v6304_v28, %v2611_v1  ;;  %v2590_v37 = vsel %vm2587_vm10, %v2589_v34, %v2585_v33 }
 0xfb0   :  { %v2620_v55 = vsel %vm2617_vm11, %v2619_v36, %v2615_v50  ;;  %v2591_v40 = vmul.f32 %v7195_v57, %v2590_v37 }
 0xfb1   :  { %v7235_v44 = vpop.xlane.xlu2 %2503  ;;  %v2621_v18 = vmul.f32 %v7184_v61, %v2620_v55 }
 0xfb2   :  { %6305 = vrcp.f32 %v7235_v44  ;;  %v2573_v49 = vand.u32 2147483648, %v7235_v44  ;;  %vm2567_vm15 = vweird.f32 %v7235_v44  ;;  %v2571_v22 = vand.u32 2147483647, %v7235_v44 }
 0xfb4   :  { %v2574_v8 = vor.u32 1.1754944e-38, %v2573_v49  ;;  %vm2572_vm4 = vcmp.eq.f32.partialorder %v2571_v22, 8.507059e+37 }
 0xfb6   :  { %v2690_v23 = vpop.permute.xlu1 %2689 }
 0xfb7   :  { %2710 = vmatpush.msrb.mxu3 %v2690_v23 }
 0xfb8   :  { %5917 = vmatmul.msk.f32.vlgmr.msrb.gmra.mxu3 %vm249_vm8, %v2561_v25  ;;  %v6306_v42 = vpop.eup %6305 }
 0xfb9   :  { %v7242_v31 = vpop.xlane.xlu2 %2515  ;;  %v2563_v56 = vmul.f32 %v6306_v42, %v7235_v44  ;;  %vm2568_vm12 = vweird.f32 %v6306_v42 }
 0xfba   :  { %6307 = vrcp.f32 %v7242_v31  ;;  %vm2569_vm1 = vmor %vm2567_vm15, %vm2568_vm12  ;;  %v2633_v53 = vand.u32 2147483648, %v7242_v31  ;;  %vm2627_vm10 = vweird.f32 %v7242_v31  ;;  %v2631_v13 = vand.u32 2147483647, %v7242_v31 }
 0xfbb   :  { %v2564_v46 = vsub.f32 1.0, %v2563_v56 }
 0xfbc   :  { %v2634_v19 = vor.u32 1.1754944e-38, %v2633_v53  ;;  %vm2632_vm12 = vcmp.eq.f32.partialorder %v2631_v13, 8.507059e+37  ;;  %v2971_v53 = vld [vmem:[%s7319_s27] sm:$0xff]  ;;  %v2973_v13 = vld [vmem:[%s7319_s27 + $0x10] sm:$0xff] }
 0xfbd   :  { %v2565_v57 = vmul.f32 %v6306_v42, %v2564_v46 }
 0xfbe   :  { %v6125_v38 = vpop.permute.xlu1 %6124 }
 0xfbf   :  { %v6127_v58 = vunpack.i.h.bf16 %v6125_v38  ;;  %v6126_v41 = vunpack.i.l.bf16 %v6125_v38  ;;  %v2566_v61 = vadd.f32 %v6306_v42, %v2565_v57 }
 0xfc0   :  { %v6308_v20 = vpop.eup %6307 }
 0xfc1   :  { %v2794_v32 = vpop.permute.xlu2 %2793  ;;  %2762 = vmatpush.msrb.mxu1 %v6126_v41  ;;  %2788 = vmatpush.msra.mxu2 %v6127_v58  ;;  %v2623_v47 = vmul.f32 %v6308_v20, %v7242_v31  ;;  %v2570_v2 = vsel %vm2569_vm1, %v6306_v42, %v2566_v61  ;;  %vm2628_vm9 = vweird.f32 %v6308_v20  ;;  %v6170_v31 = vld [vmem:[%s6803_s5 + $0x1] ss:$0 sm:$0xff]  ;;  %s7283_s5 = sld [smem:[%s8103_s0 + %s6475_s25]]  }
 0xfc2   :  { %5919 = vmatmul.msk.f32.vlgmr.msrb.gmra.mxu1 %vm249_vm8, %v2591_v40  ;;  %2814 = vmatpush.msra.mxu3 %v2794_v32  ;;  %v2575_v9 = vsel %vm2572_vm4, %v2574_v8, %v2570_v2  ;;  %vm2629_vm11 = vmor %vm2627_vm10, %vm2628_vm9  ;;  %v2051_v33 = vadd.f32 %v6170_v31, %v7170_v3  ;;  %v2054_v34 = vadd.f32 %v6170_v31, %v7173_v35  ;;  %s5781_s25 = sld [smem:[%s8103_s0 + %s6477_s4]]  }
 0xfc3   :  { %5921 = vmatmul.msk.f32.vlgmr.msra.gmra.mxu3 %vm249_vm8, %v2621_v18  ;;  %v2624_v48 = vsub.f32 1.0, %v2623_v47  ;;  %v2576_v21 = vmul.f32 %v7199_v0, %v2575_v9  ;;  %v6171_v47 = vld [vmem:[%s7278_s13] ss:$0 sm:$0xff]  ;;  %s7584_s4 = sld [smem:[%s8103_s0 + %s8106_s3]]  }
 0xfc4   :  { %v2056_v50 = vadd.f32 %v2051_v33, %v7101_v11  ;;  %v2057_v11 = vadd.f32 %v2054_v34, %v7106_v24 }
 0xfc5   :  { %v2625_v28 = vmul.f32 %v6308_v20, %v2624_v48 }
 0xfc6   :  { %v2820_v30 = vpop.permute.xlu1 %2819  ;;  %v2058_v36 = vsel %vm145_vm0, %v2056_v50, 0.0  ;;  %v2061_v3 = vsel %vm145_vm0, %v2057_v11, 0.0 }
 0xfc7   :  { %v2626_v7 = vadd.f32 %v6308_v20, %v2625_v28  ;;  %v2173_v35 = vld [vmem:[%s7283_s5 + $0x18] sm:$0xff]  ;;  %v2172_v37 = vld [vmem:[%s7283_s5 + $0x10] sm:$0xff]  ;;  %v2171_v38 = vld [vmem:[%s7283_s5 + $0x8] sm:$0xff] }
 0xfc8   :  { %2896 = vmatpush.msra.mxu1 %v2173_v35  ;;  %v2170_v55 = vld [vmem:[%s7283_s5] sm:$0xff] }
 0xfc9   :  { %v2510_v45 = vpop.xlane.xlu0 %2509  ;;  %v2630_v16 = vsel %vm2629_vm11, %v6308_v20, %v2626_v7  ;;  %v2974_v7 = vld [vmem:[%s7319_s27 + $0x18] sm:$0xff] }
 0xfca   :  { %6309 = vrcp.f32 %v2510_v45  ;;  %v2603_v51 = vand.u32 2147483648, %v2510_v45  ;;  %v2601_v63 = vand.u32 2147483647, %v2510_v45  ;;  %vm2597_vm3 = vweird.f32 %v2510_v45  ;;  %2897 = vmatpush.msra.mxu1 %v2172_v37  ;;  %3002 = vmatpush.msrb.mxu2 %v2974_v7 }
 0xfcb   :  { %v2635_v23 = vsel %vm2632_vm12, %v2634_v19, %v2630_v16  ;;  %v142_v19 = vld [vmem:[%s5781_s25 + $0x8] sm:$0xff] }
 0xfcc   :  { %v2604_v4 = vor.u32 1.1754944e-38, %v2603_v51  ;;  %vm2602_vm7 = vcmp.eq.f32.partialorder %v2601_v63, 8.507059e+37  ;;  %2898 = vmatpush.msra.mxu1 %v2171_v38  ;;  %3003 = vmatpush.msrb.mxu2 %v2973_v13 }
 0xfce   :  { %2899 = vmatpush.msra.mxu1 %v2170_v55 }
 0xfd0   :  { %v6310_v52 = vpop.eup %6309 }
 0xfd1   :  { %v2593_v59 = vmul.f32 %v6310_v52, %v2510_v45  ;;  %vm2598_vm2 = vweird.f32 %v6310_v52 }
 0xfd2   :  { %vm2599_vm5 = vmor %vm2597_vm3, %vm2598_vm2 }
 0xfd3   :  { %v2594_v43 = vsub.f32 1.0, %v2593_v59 }
 0xfd5   :  { %v2595_v62 = vmul.f32 %v6310_v52, %v2594_v43 }
 0xfd7   :  { %v2596_v14 = vadd.f32 %v6310_v52, %v2595_v62 }
 0xfd9   :  { %v2600_v5 = vsel %vm2599_vm5, %v6310_v52, %v2596_v14 }
 0xfda   :  { %v2605_v60 = vsel %vm2602_vm7, %v2604_v4, %v2600_v5 }
 0xfdb   :  { %v2606_v12 = vmul.f32 %v7210_v6, %v2605_v60  ;;  %v2636_v6 = vmul.f32 %v7203_v17, %v2635_v23  ;;  %v6478_v23 = vmov 0  }
 0xfdc   :  { %v2716_v44 = vpop.permute.xlu0 %2715  ;;  %6139 = vset.pattern.permute.xlu0 %v6478_v23  ;;  %6138 = vset.pattern.permute.xlu2 %v6478_v23 }
 0xfdd   :  { %2736 = vmatpush.msrb.mxu0 %v2716_v44  ;;  %5920 = vmatmul.msk.f32.vlgmr.msra.gmra.mxu2 %vm249_vm8, %v2606_v12  ;;  %v2972_v12 = vld [vmem:[%s7319_s27 + $0x8] sm:$0xff] }
 0xfde   :  { %5918 = vmatmul.msk.f32.vlgmr.msrb.gmra.mxu0 %vm249_vm8, %v2576_v21  ;;  %v6133_v44 = vpack.i.bf16 %v2971_v53, %v2972_v12  ;;  %3004 = vmatpush.msrb.mxu2 %v2972_v12 }
 0xfdf   :  { %2840 = vmatpush.msra.mxu0 %v2820_v30 }
 0xfe0   :  { %3005 = vmatpush.msrb.mxu2 %v2971_v53 }
 0xfe6   :  { %5922 = vmatmul.msk.f32.vlgmr.msra.gmra.mxu0 %vm249_vm8, %v2636_v6 }
 0xfee   :  { %v2660_v25 = vpop.f32.mrf.mxu1 }
0x1028   :  { %v2686_v26 = vpop.f32.mrf.mxu2 }
0x103b   :  { %v2712_v1 = vpop.f32.mrf.mxu3 }
0x103c   :  { %2847 = vrot.lane.b32.xlu0 %v2712_v1, %s8108_s10 }
0x103f   :  { %v2764_v0 = vpop.f32.mrf.mxu1 }
0x1040   :  { %2855 = vrot.lane.b32.xlu2 %v2764_v0, %s8120_s9 }
0x1046   :  { %v2816_v54 = vpop.f32.mrf.mxu3 }
0x1047   :  { %2863 = vrot.lane.b32.xlu1 %v2816_v54, %s8106_s3 }
0x105b   :  { %v2738_v27 = vpop.f32.mrf.mxu0 }
0x105c   :  { %2849 = vrot.lane.b32.xlu0 %v2738_v27, %s8108_s10  ;;  %v141_v27 = vld [vmem:[%s5781_s25] sm:$0xff]  ;;  %s6484_s25 = smov 25  }
0x105d   :  { %s7626_s1 = sld [smem:[%s8103_s0 + %s6484_s25]]  }
0x1060   :  { %v2790_v29 = vpop.f32.mrf.mxu2 }
0x1061   :  { %2857 = vrot.lane.b32.xlu2 %v2790_v29, %s8120_s9 }
0x1063   :  { %v2842_v17 = vpop.f32.mrf.mxu0 }
0x1064   :  { %2865 = vrot.lane.b32.xlu1 %v2842_v17, %s8106_s3 }
0x1086   :  { %2059 = vadd.xlane.f32.xlu0 %v2058_v36 }
0x108e   :  { %2062 = vadd.xlane.f32.xlu1 %v2061_v3 }
0x109a   :  { %v2856_v40 = vpop.permute.xlu2 %2855 }
0x10ae   :  { %v2848_v58 = vpop.permute.xlu0 %2847 }
0x10af   :  { %v2869_v41 = vsel %vm249_vm8, %v2660_v25, %v2848_v58  ;;  %v6128_v25 = vpack.i.bf16 %v2973_v13, %v2974_v7 }
0x10b0   :  { %v2871_v18 = vsel %vm917_vm13, %v2869_v41, %v2856_v40 }
0x10b9   :  { %v2864_v32 = vpop.permute.xlu1 %2863 }
0x10ba   :  { %v2873_v24 = vsel %vm920_vm14, %v2871_v18, %v2864_v32 }
0x10bb   :  { %5923 = vmatmul.msk.f32.vlgmr.msra.gmra.mxu1 %vm145_vm0, %v2873_v24  ;;  %v2858_v45 = vpop.permute.xlu2 %2857 }
0x10ce   :  { %v2850_v42 = vpop.permute.xlu0 %2849 }
0x10cf   :  { %v2870_v56 = vsel %vm249_vm8, %v2686_v26, %v2850_v42 }
0x10d0   :  { %v2872_v20 = vsel %vm917_vm13, %v2870_v56, %v2858_v45 }
0x10d6   :  { %v2866_v46 = vpop.permute.xlu1 %2865 }
0x10d7   :  { %v2874_v57 = vsel %vm920_vm14, %v2872_v20, %v2866_v46 }
0x10d8   :  { %5924 = vmatmul.msk.f32.gmra.mxu1 %vm145_vm0, %v2874_v57  ;;  %v7356_v57 = vld [vmem:[%s7345_s17] ss:$0 sm:$0xff] }
0x10f9   :  { %v2060_v52 = vpop.xlane.xlu0 %2059 }
0x10fa   :  { %v2064_v61 = vmul.f32 %v2060_v52, %v6500_v10 }
0x10fc   :  { %v7302_v43 = vsub.f32 %v2056_v50, %v2064_v61  ;;  %v6438_v61 = vld [vmem:[%s6791_s16 + $0x4] sm:$0xf]  ;;  %s6481_s16 = smov 5  }
0x10fd   :  { %s7402_s7 = sld [smem:[%s8103_s0 + %s6481_s16]]  }
0x10fe   :  { %v2068_v51 = vmul.f32 %v7302_v43, %v7302_v43  ;;  %s7621_s16 = sld [smem:[%s8103_s0 + %s6483_s15]]  }
0x1100   :  { %v2070_v62 = vsel %vm145_vm0, %v2068_v51, 0.0 }
0x1101   :  { %v2063_v63 = vpop.xlane.xlu1 %2062 }
0x1102   :  { %v2065_v28 = vmul.f32 %v2063_v63, %v6500_v10  ;;  %v7363_v63 = vld [vmem:[%s7353_s14] sm:$0x3f] }
0x1104   :  { %v7310_v4 = vsub.f32 %v2057_v11, %v2065_v28 }
0x1106   :  { %v2069_v5 = vmul.f32 %v7310_v4, %v7310_v4 }
0x1108   :  { %v2073_v9 = vsel %vm145_vm0, %v2069_v5, 0.0  ;;  %v2105_v5 = vperm.slane %v6438_v61, 3 }
0x1138   :  { %v2901_v59 = vpop.f32.mrf.mxu1 }
0x1139   :  { %v2902_v48 = vadd.f32 %v6171_v47, %v2901_v59 }
0x113b   :  { %v2907_v49 = vadd.f32 %v2902_v48, %v7055_v15  ;;  %v2102_v48 = vperm.slane %v6438_v61, 2 }
0x113d   :  { %v2909_v22 = vsel %vm145_vm0, %v2907_v49, 0.0 }
0x113e   :  { %2910 = vadd.xlane.f32.xlu2 %v2909_v22 }
0x1146   :  { %2071 = vadd.xlane.f32.xlu2 %v2070_v62 }
0x1155   :  { %v2904_v2 = vpop.f32.mrf.mxu1 }
0x1156   :  { %v2905_v8 = vadd.f32 %v6171_v47, %v2904_v2 }
0x1158   :  { %v2908_v14 = vadd.f32 %v2905_v8, %v7074_v39 }
0x115a   :  { %v2912_v15 = vsel %vm145_vm0, %v2908_v14, 0.0 }
0x115b   :  { %2913 = vadd.xlane.f32.xlu0 %v2912_v15 }
0x1163   :  { %2074 = vadd.xlane.f32.xlu0 %v2073_v9  ;;  %v2953_v9 = vperm.slane %v7363_v63, 0 }
0x1177   :  { %6134 = vrot.lane.b32.xlu0 %v6133_v44, %s6450_s19 }
0x117f   :  { %2966 = vperm.xlu0 %6139, %v142_v19  }
0x11b1   :  { %v2911_v39 = vpop.xlane.xlu2 %2910 }
0x11b2   :  { %v2915_v60 = vmul.f32 %v2911_v39, %v6500_v10 }
0x11b4   :  { %v7326_v21 = vsub.f32 %v2907_v49, %v2915_v60 }
0x11b6   :  { %v2919_v16 = vmul.f32 %v7326_v21, %v7326_v21 }
0x11b8   :  { %v2921_v30 = vsel %vm145_vm0, %v2919_v16, 0.0  ;;  %v2956_v16 = vperm.slane %v7363_v63, 1 }
0x11b9   :  { %2922 = vadd.xlane.f32.xlu1 %v2921_v30  ;;  %v2072_v29 = vpop.xlane.xlu2 %2071 }
0x11ba   :  { %v2076_v17 = vmul.f32 %v2072_v29, %v6500_v10 }
0x11bc   :  { %v2078_v31 = vadd.f32 1e-12, %v2076_v17 }
0x11be   :  { %6311 = vrsqrt.f32 %v2078_v31  ;;  %vm2086_vm1 = vweird.f32 %v2078_v31 }
0x11c4   :  { %v6312_v36 = vpop.eup %6311 }
0x11c5   :  { %v2081_v11 = vmul.f32 %v6312_v36, %v2078_v31  ;;  %vm2087_vm15 = vweird.f32 %v6312_v36 }
0x11c6   :  { %vm2088_vm2 = vmor %vm2086_vm1, %vm2087_vm15 }
0x11c7   :  { %v2082_v38 = vmul.f32 %v6312_v36, %v2081_v11 }
0x11c9   :  { %v2083_v58 = vmul.f32 0.5, %v2082_v38 }
0x11cb   :  { %v2084_v32 = vsub.f32 1.5, %v2083_v58 }
0x11cd   :  { %v2085_v56 = vmul.f32 %v6312_v36, %v2084_v32 }
0x11ce   :  { %v2914_v6 = vpop.xlane.xlu0 %2913 }
0x11cf   :  { %v2916_v1 = vmul.f32 %v2914_v6, %v6500_v10  ;;  %v2089_v47 = vsel %vm2088_vm2, %v6312_v36, %v2085_v56  ;;  %v6173_v56 = vld [vmem:[%s7402_s7] ss:$0 sm:$0xff] }
0x11d0   :  { %v2100_v49 = vmul.f32 %v2089_v47, %v7302_v43 }
0x11d1   :  { %v7336_v0 = vsub.f32 %v2908_v14, %v2916_v1 }
0x11d2   :  { %6129 = vrot.lane.b32.xlu1 %v6128_v25, %s6450_s19  ;;  %v2103_v14 = vmul.f32 %v2102_v48, %v2100_v49 }
0x11d3   :  { %v2920_v54 = vmul.f32 %v7336_v0, %v7336_v0 }
0x11d4   :  { %v7368_v12 = vadd.f32 %v2105_v5, %v2103_v14 }
0x11d5   :  { %v2924_v26 = vsel %vm145_vm0, %v2920_v54, 0.0 }
0x11d6   :  { %2925 = vadd.xlane.f32.xlu2 %v2924_v26  ;;  %v2075_v33 = vpop.xlane.xlu0 %2074 }
0x11d7   :  { %v2077_v50 = vmul.f32 %v2075_v33, %v6500_v10 }
0x11d9   :  { %v2079_v34 = vadd.f32 1e-12, %v2077_v50 }
0x11da   :  { %3029 = vrot.lane.b32.xlu1 %v7356_v57, %s6450_s19 }
0x11db   :  { %6313 = vrsqrt.f32 %v2079_v34  ;;  %vm2096_vm9 = vweird.f32 %v2079_v34 }
0x11e1   :  { %v6314_v55 = vpop.eup %6313 }
0x11e2   :  { %v2091_v41 = vmul.f32 %v6314_v55, %v2079_v34  ;;  %vm2097_vm5 = vweird.f32 %v6314_v55 }
0x11e3   :  { %vm2098_vm10 = vmor %vm2096_vm9, %vm2097_vm5 }
0x11e4   :  { %v2092_v24 = vmul.f32 %v6314_v55, %v2091_v41 }
0x11e6   :  { %v2093_v46 = vmul.f32 0.5, %v2092_v24 }
0x11e8   :  { %v2094_v52 = vsub.f32 1.5, %v2093_v46 }
0x11e9   :  { %v6135_v51 = vpop.permute.xlu0 %6134 }
0x11ea   :  { %v2095_v62 = vmul.f32 %v6314_v55, %v2094_v52  ;;  %v6136_v15 = vunpack.i.l.bf16 %v6135_v51  ;;  %v6137_v39 = vunpack.i.h.bf16 %v6135_v51 }
0x11ec   :  { %v2099_v60 = vsel %vm2098_vm10, %v6314_v55, %v2095_v62 }
0x11ed   :  { %v2101_v30 = vmul.f32 %v2099_v60, %v7310_v4 }
0x11ee   :  { %2961 = vperm.xlu2 %6138, %v141_v27  }
0x11ef   :  { %v2104_v19 = vmul.f32 %v2102_v48, %v2101_v30 }
0x11f1   :  { %v7381_v1 = vadd.f32 %v2105_v5, %v2104_v19  ;;  %v7386_v50 = vpop.permute.xlu0 %2966 }
0x122c   :  { %v2923_v3 = vpop.xlane.xlu1 %2922 }
0x122d   :  { %v2927_v35 = vmul.f32 %v2923_v3, %v6500_v10 }
0x122f   :  { %v2929_v37 = vadd.f32 1e-05, %v2927_v35 }
0x1231   :  { %6315 = vrsqrt.f32 %v2929_v37  ;;  %vm2937_vm4 = vweird.f32 %v2929_v37 }
0x1237   :  { %v6316_v40 = vpop.eup %6315 }
0x1238   :  { %v2932_v18 = vmul.f32 %v6316_v40, %v2929_v37  ;;  %vm2938_vm3 = vweird.f32 %v6316_v40 }
0x1239   :  { %vm2939_vm7 = vmor %vm2937_vm4, %vm2938_vm3 }
0x123a   :  { %v2933_v42 = vmul.f32 %v6316_v40, %v2932_v18 }
0x123c   :  { %v2934_v45 = vmul.f32 0.5, %v2933_v42 }
0x123e   :  { %v2935_v20 = vsub.f32 1.5, %v2934_v45 }
0x1240   :  { %v2936_v59 = vmul.f32 %v6316_v40, %v2935_v20 }
0x1242   :  { %v2940_v2 = vsel %vm2939_vm7, %v6316_v40, %v2936_v59 }
0x1243   :  { %v2951_v43 = vmul.f32 %v2940_v2, %v7326_v21 }
0x1244   :  { %v6130_v22 = vpop.permute.xlu1 %6129 }
0x1245   :  { %v6132_v28 = vunpack.i.h.bf16 %v6130_v22  ;;  %v6131_v8 = vunpack.i.l.bf16 %v6130_v22  ;;  %v2954_v13 = vmul.f32 %v2953_v9, %v2951_v43  ;;  %v6174_v43 = vld [vmem:[%s7402_s7 + $0x1] ss:$0 sm:$0xff] }
0x1247   :  { %3050 = vmatpush.msrb.mxu3 %v6131_v8  ;;  %v2957_v21 = vadd.f32 %v2956_v16, %v2954_v13 }
0x1249   :  { %3051 = vmatpush.msrb.mxu3 %v6132_v28  ;;  %v2926_v7 = vpop.xlane.xlu2 %2925 }
0x124a   :  { %v2928_v53 = vmul.f32 %v2926_v7, %v6500_v10 }
0x124b   :  { %3052 = vmatpush.msrb.mxu3 %v6136_v15 }
0x124c   :  { %v2930_v44 = vadd.f32 1e-05, %v2928_v53  ;;  %v3030_v11 = vpop.permute.xlu1 %3029 }
0x124d   :  { %3053 = vmatpush.msrb.mxu3 %v6137_v39 }
0x124e   :  { %6317 = vrsqrt.f32 %v2930_v44  ;;  %5927 = vmatmul.msk.f32.vlgmr.msrb.gmra.mxu3 %vm145_vm0, %v7368_v12  ;;  %vm2947_vm12 = vweird.f32 %v2930_v44 }
0x1251   :  { %v7374_v23 = vpop.permute.xlu2 %2961 }
0x1252   :  { %v7377_v6 = vmul.f32 %v7374_v23, %v2957_v21 }
0x1254   :  { %v6318_v25 = vpop.eup %6317  ;;  %5925 = vmatmul.msk.f32.vlgmr.msrb.gmra.mxu2 %vm145_vm0, %v7377_v6 }
0x1255   :  { %v2942_v54 = vmul.f32 %v6318_v25, %v2930_v44  ;;  %vm2948_vm11 = vweird.f32 %v6318_v25 }
0x1256   :  { %5928 = vmatmul.msk.f32.gmra.mxu3 %vm145_vm0, %v7381_v1  ;;  %vm2949_vm15 = vmor %vm2947_vm12, %vm2948_vm11 }
0x1257   :  { %v2943_v4 = vmul.f32 %v6318_v25, %v2942_v54 }
0x1259   :  { %v2944_v26 = vmul.f32 0.5, %v2943_v4 }
0x125b   :  { %v2945_v27 = vsub.f32 1.5, %v2944_v26 }
0x125d   :  { %v2946_v29 = vmul.f32 %v6318_v25, %v2945_v27 }
0x125f   :  { %v2950_v17 = vsel %vm2949_vm15, %v6318_v25, %v2946_v29 }
0x1260   :  { %v2952_v31 = vmul.f32 %v2950_v17, %v7336_v0 }
0x1262   :  { %v2955_v33 = vmul.f32 %v2953_v9, %v2952_v31 }
0x1264   :  { %v2958_v34 = vadd.f32 %v2956_v16, %v2955_v33 }
0x1266   :  { %v7389_v36 = vmul.f32 %v7386_v50, %v2958_v34 }
0x1268   :  { %5926 = vmatmul.msk.f32.gmra.mxu2 %vm145_vm0, %v7389_v36 }
0x12d1   :  { %v3055_v3 = vpop.f32.mrf.mxu3 }
0x12d2   :  { %v7393_v35 = vadd.f32 %v3055_v3, %v3030_v11 }
0x12d4   :  { %3171 = vrot.lane.b32.xlu2 %v7393_v35, %s6454_s23  ;;  %5929 = vmatpush.xpose.msk.msrb.mxu0 %vm249_vm8, %v7393_v35 }
0x12d7   :  { %v3007_v0 = vpop.f32.mrf.mxu2 }
0x12d8   :  { %v3008_v37 = vadd.f32 %v7356_v57, %v3007_v0 }
0x12d9   :  { %v3058_v38 = vpop.f32.mrf.mxu3 }
0x12da   :  { %v7405_v55 = vadd.f32 %v3058_v38, %v3030_v11  ;;  %5930 = vmatmul.msk.f32.vlgmr.msrb.gmra.mxu0 %vm249_vm8, %v3008_v37 }
0x12dc   :  { %3143 = vrot.lane.b32.xlu1 %v7405_v55, %s6452_s21  ;;  %5931 = vmatpush.xpose.msk.msra.mxu0 %vm249_vm8, %v7405_v55  ;;  %v6140_v38 = vpack.i.bf16 %v7405_v55, %v7393_v35 }
0x12dd   :  { %3169 = vrot.lane.b32.xlu2 %v3008_v37, %s6454_s23 }
0x12e4   :  { %3115 = vrot.lane.b32.xlu1 %v7393_v35, %s6452_s21 }
0x12e5   :  { %3113 = vrot.lane.b32.xlu2 %v3008_v37, %s6452_s21 }
0x12eb   :  { %v3010_v58 = vpop.f32.mrf.mxu2 }
0x12ec   :  { %v3011_v41 = vadd.f32 %v7356_v57, %v3010_v58 }
0x12ed   :  { %3227 = vrot.lane.b32.xlu2 %v7393_v35, %s6453_s22 }
0x12ee   :  { %3253 = vrot.lane.b32.xlu1 %v3011_v41, %s6453_s22  ;;  %3141 = vrot.lane.b32.xlu0 %v3011_v41, %s6452_s21 }
0x12ef   :  { %5932 = vmatmul.msk.f32.vlgmr.msra.gmra.mxu0 %vm249_vm8, %v3011_v41 }
0x12f5   :  { %3197 = vrot.lane.b32.xlu2 %v3011_v41, %s6454_s23 }
0x12f6   :  { %3199 = vrot.lane.b32.xlu1 %v7405_v55, %s6454_s23  ;;  %3255 = vrot.lane.b32.xlu0 %v7405_v55, %s6453_s22 }
0x12fe   :  { %3225 = vrot.lane.b32.xlu0 %v3008_v37, %s6453_s22 }
0x132e   :  { %v3172_v40 = vpop.permute.xlu2 %3171 }
0x132f   :  { %5937 = vmatpush.xpose.msk.msra.mxu3 %vm249_vm8, %v3172_v40 }
0x1337   :  { %v3170_v32 = vpop.permute.xlu2 %3169 }
0x1338   :  { %5938 = vmatmul.msk.f32.vlgmr.msra.gmra.mxu3 %vm249_vm8, %v3170_v32 }
0x133f   :  { %v3114_v18 = vpop.permute.xlu2 %3113 }
0x1347   :  { %v3228_v45 = vpop.permute.xlu2 %3227 }
0x134e   :  { %v3144_v24 = vpop.permute.xlu1 %3143 }
0x134f   :  { %5935 = vmatpush.xpose.msk.msra.mxu2 %vm249_vm8, %v3144_v24  ;;  %v3198_v49 = vpop.permute.xlu2 %3197 }
0x1356   :  { %v3116_v42 = vpop.permute.xlu1 %3115 }
0x1357   :  { %v3084_v46 = vpop.f32.mrf.mxu0  ;;  %5933 = vmatpush.xpose.msk.msrb.mxu1 %vm249_vm8, %v3116_v42 }
0x1358   :  { %v3281_v20 = vmul.f32 0.35355338, %v3084_v46 }
0x135a   :  { %v3295_v57 = vadd.f32 %v6173_v56, %v3281_v20  ;;  %5934 = vmatmul.msk.f32.vlgmr.msrb.gmra.mxu1 %vm249_vm8, %v3114_v18 }
0x135b   :  { %5941 = vmatpush.xpose.msk.msra.mxu1 %vm249_vm8, %v3228_v45 }
0x135c   :  { %v3303_v47 = vsel %vm249_vm8, %v3295_v57, -inf }
0x135d   :  { %3304 = vmax.xlane.f32.xlu0 %v3303_v47 }
0x1360   :  { %v3254_v52 = vpop.permute.xlu1 %3253  ;;  %v3142_v59 = vpop.permute.xlu0 %3141 }
0x1361   :  { %5936 = vmatmul.msk.f32.vlgmr.msra.gmra.mxu2 %vm249_vm8, %v3142_v59 }
0x1368   :  { %v3200_v61 = vpop.permute.xlu1 %3199  ;;  %v3256_v48 = vpop.permute.xlu0 %3255 }
0x1369   :  { %5939 = vmatpush.xpose.msk.msrb.mxu0 %vm249_vm8, %v3200_v61  ;;  %5943 = vmatpush.xpose.msk.msrb.mxu2 %vm249_vm8, %v3256_v48 }
0x136c   :  { %5940 = vmatmul.msk.f32.vlgmr.msrb.gmra.mxu0 %vm249_vm8, %v3198_v49  ;;  %5944 = vmatmul.msk.f32.vlgmr.msrb.gmra.mxu2 %vm249_vm8, %v3254_v52  ;;  %v3110_v15 = vpop.f32.mrf.mxu0 }
0x136d   :  { %v3282_v9 = vmul.f32 0.35355338, %v3110_v15 }
0x136f   :  { %v3296_v7 = vadd.f32 %v6174_v43, %v3282_v9 }
0x1370   :  { %v3226_v22 = vpop.permute.xlu0 %3225 }
0x1371   :  { %5942 = vmatmul.msk.f32.vlgmr.msra.gmra.mxu1 %vm249_vm8, %v3226_v22  ;;  %v3306_v53 = vsel %vm249_vm8, %v3296_v7, -inf }
0x13bb   :  { %v3194_v51 = vpop.f32.mrf.mxu3 }
0x13bc   :  { %v3285_v62 = vmul.f32 0.35355338, %v3194_v51 }
0x13be   :  { %v3299_v2 = vadd.f32 %v6173_v56, %v3285_v62 }
0x13c0   :  { %v3315_v28 = vsel %vm249_vm8, %v3299_v2, -inf }
0x13c1   :  { %3316 = vmax.xlane.f32.xlu2 %v3315_v28 }
0x13d0   :  { %v3305_v44 = vpop.xlane.xlu0 %3304 }
0x13d1   :  { %v3327_v19 = vsub.f32 %v3295_v57, %v3305_v44 }
0x13d3   :  { %v3335_v4 = vmul.f32 1.442695, %v3327_v19 }
0x13d5   :  { %6319 = vpow2.f32 %v3335_v4 }
0x13d7   :  { %v3138_v8 = vpop.f32.mrf.mxu1 }
0x13d8   :  { %v3283_v14 = vmul.f32 0.35355338, %v3138_v8 }
0x13da   :  { %v3297_v5 = vadd.f32 %v6173_v56, %v3283_v14 }
0x13db   :  { %v7450_v0 = vpop.eup %6319 }
0x13dc   :  { %v3309_v39 = vsel %vm249_vm8, %v3297_v5, -inf  ;;  %v3351_v37 = vsel %vm249_vm8, %v7450_v0, 0.0 }
0x13dd   :  { %3310 = vmax.xlane.f32.xlu1 %v3309_v39 }
0x13e4   :  { %v3166_v60 = vpop.f32.mrf.mxu2 }
0x13e5   :  { %v3284_v13 = vmul.f32 0.35355338, %v3166_v60  ;;  %3307 = vmax.xlane.f32.xlu1 %v3306_v53 }
0x13e7   :  { %v3298_v16 = vadd.f32 %v6174_v43, %v3284_v13 }
0x13e9   :  { %v3222_v30 = vpop.f32.mrf.mxu0  ;;  %v3312_v21 = vsel %vm249_vm8, %v3298_v16, -inf }
0x13ea   :  { %v3286_v25 = vmul.f32 0.35355338, %v3222_v30  ;;  %3313 = vmax.xlane.f32.xlu0 %v3312_v21 }
0x13ec   :  { %v3300_v54 = vadd.f32 %v6174_v43, %v3286_v25 }
0x13ee   :  { %v3250_v26 = vpop.f32.mrf.mxu1  ;;  %v3318_v27 = vsel %vm249_vm8, %v3300_v54, -inf }
0x13ef   :  { %v3287_v29 = vmul.f32 0.35355338, %v3250_v26  ;;  %v3278_v17 = vpop.f32.mrf.mxu2  ;;  %3319 = vmax.xlane.f32.xlu1 %v3318_v27 }
0x13f0   :  { %v3288_v31 = vmul.f32 0.35355338, %v3278_v17 }
0x13f1   :  { %v3301_v33 = vadd.f32 %v6173_v56, %v3287_v29 }
0x13f2   :  { %v3302_v34 = vadd.f32 %v6174_v43, %v3288_v31 }
0x13f3   :  { %v3321_v11 = vsel %vm249_vm8, %v3301_v33, -inf }
0x13f4   :  { %3322 = vmax.xlane.f32.xlu2 %v3321_v11  ;;  %v3324_v3 = vsel %vm249_vm8, %v3302_v34, -inf }
0x13f5   :  { %3325 = vmax.xlane.f32.xlu0 %v3324_v3 }
0x13fc   :  { %3352 = vadd.xlane.f32.xlu2 %v3351_v37 }
0x1414   :  { %6141 = vrot.lane.b32.xlu2 %v6140_v38, %s6449_s18 }
0x1434   :  { %v3317_v58 = vpop.xlane.xlu2 %3316 }
0x1435   :  { %v3331_v41 = vsub.f32 %v3299_v2, %v3317_v58 }
0x1437   :  { %v3343_v40 = vmul.f32 1.442695, %v3331_v41 }
0x1439   :  { %6321 = vpow2.f32 %v3343_v40 }
0x143f   :  { %v7457_v32 = vpop.eup %6321 }
0x1440   :  { %v3363_v18 = vsel %vm249_vm8, %v7457_v32, 0.0 }
0x1441   :  { %3364 = vadd.xlane.f32.xlu1 %v3363_v18 }
0x1450   :  { %v3311_v24 = vpop.xlane.xlu1 %3310 }
0x1451   :  { %v3329_v42 = vsub.f32 %v3297_v5, %v3311_v24 }
0x1453   :  { %v3339_v56 = vmul.f32 1.442695, %v3329_v42 }
0x1455   :  { %6323 = vpow2.f32 %v3339_v56 }
0x1458   :  { %v3308_v45 = vpop.xlane.xlu1 %3307 }
0x1459   :  { %v3328_v46 = vsub.f32 %v3296_v7, %v3308_v45 }
0x145b   :  { %v7461_v20 = vpop.eup %6323  ;;  %v3337_v57 = vmul.f32 1.442695, %v3328_v46 }
0x145c   :  { %v3357_v47 = vsel %vm249_vm8, %v7461_v20, 0.0 }
0x145d   :  { %6325 = vpow2.f32 %v3337_v57  ;;  %v3314_v52 = vpop.xlane.xlu0 %3313  ;;  %3358 = vadd.xlane.f32.xlu0 %v3357_v47 }
0x145e   :  { %v3330_v59 = vsub.f32 %v3298_v16, %v3314_v52 }
0x1460   :  { %v3341_v61 = vmul.f32 1.442695, %v3330_v59 }
0x1462   :  { %6327 = vpow2.f32 %v3341_v61  ;;  %v3320_v22 = vpop.xlane.xlu1 %3319 }
0x1463   :  { %v7465_v48 = vpop.eup %6325  ;;  %v3332_v15 = vsub.f32 %v3300_v54, %v3320_v22 }
0x1464   :  { %v3354_v49 = vsel %vm249_vm8, %v7465_v48, 0.0 }
0x1465   :  { %3355 = vadd.xlane.f32.xlu0 %v3354_v49  ;;  %v3345_v43 = vmul.f32 1.442695, %v3332_v15 }
0x1467   :  { %v3323_v51 = vpop.xlane.xlu2 %3322 }
0x1468   :  { %v7469_v62 = vpop.eup %6327  ;;  %v3333_v2 = vsub.f32 %v3301_v33, %v3323_v51  ;;  %v3326_v28 = vpop.xlane.xlu0 %3325 }
0x1469   :  { %v3334_v8 = vsub.f32 %v3302_v34, %v3326_v28  ;;  %v3360_v14 = vsel %vm249_vm8, %v7469_v62, 0.0 }
0x146a   :  { %v3347_v5 = vmul.f32 1.442695, %v3333_v2  ;;  %3361 = vadd.xlane.f32.xlu2 %v3360_v14 }
0x146b   :  { %v3349_v9 = vmul.f32 1.442695, %v3334_v8 }
0x146c   :  { %6329 = vpow2.f32 %v3347_v5 }
0x146d   :  { %6331 = vpow2.f32 %v3349_v9 }
0x146e   :  { %6333 = vpow2.f32 %v3345_v43 }
0x146f   :  { %v7473_v39 = vpop.xlane.xlu2 %3352 }
0x1470   :  { %6335 = vrcp.f32 %v7473_v39  ;;  %v3386_v24 = vand.u32 2147483648, %v7473_v39  ;;  %vm3380_vm7 = vweird.f32 %v7473_v39  ;;  %v3384_v56 = vand.u32 2147483647, %v7473_v39 }
0x1472   :  { %v7475_v7 = vpop.eup %6329  ;;  %v3387_v52 = vor.u32 1.1754944e-38, %v3386_v24  ;;  %vm3385_vm10 = vcmp.eq.f32.partialorder %v3384_v56, 8.507059e+37 }
0x1473   :  { %v7477_v60 = vpop.eup %6331  ;;  %v3369_v53 = vsel %vm249_vm8, %v7475_v7, 0.0 }
0x1474   :  { %3370 = vadd.xlane.f32.xlu1 %v3369_v53  ;;  %v3372_v13 = vsel %vm249_vm8, %v7477_v60, 0.0  ;;  %v7483_v16 = vpop.eup %6333 }
0x1475   :  { %3373 = vadd.xlane.f32.xlu2 %v3372_v13  ;;  %v3366_v19 = vsel %vm249_vm8, %v7483_v16, 0.0 }
0x1476   :  { %v6336_v54 = vpop.eup %6335 }
0x1477   :  { %v6142_v44 = vpop.permute.xlu2 %6141  ;;  %v3376_v4 = vmul.f32 %v6336_v54, %v7473_v39  ;;  %vm3381_vm3 = vweird.f32 %v6336_v54 }
0x1478   :  { %v6144_v30 = vunpack.i.h.bf16 %v6142_v44  ;;  %v6143_v21 = vunpack.i.l.bf16 %v6142_v44  ;;  %vm3382_vm9 = vmor %vm3380_vm7, %vm3381_vm3 }
0x1479   :  { %3495 = vrot.lane.b32.xlu0 %v7393_v35, %s6450_s19  ;;  %v3377_v27 = vsub.f32 1.0, %v3376_v4 }
0x147a   :  { %3568 = vmatpush.msrb.mxu1 %v6143_v21  ;;  %3594 = vmatpush.msra.mxu2 %v6144_v30 }
0x147c   :  { %3367 = vadd.xlane.f32.xlu1 %v3366_v19 }
0x1481   :  { %3521 = vrot.lane.b32.xlu0 %v7405_v55, %s6450_s19 }
0x1489   :  { %6146 = vrot.lane.b32.xlu0 %v6140_v38, %s6455_s24 }
0x148d   :  { %3625 = vrot.lane.b32.xlu2 %v7405_v55, %s6451_s20  ;;  %v3378_v55 = vmul.f32 %v6336_v54, %v3377_v27 }
0x148f   :  { %v3379_v41 = vadd.f32 %v6336_v54, %v3378_v55 }
0x1491   :  { %v3383_v47 = vsel %vm3382_vm9, %v6336_v54, %v3379_v41 }
0x1492   :  { %v3388_v49 = vsel %vm3385_vm10, %v3387_v52, %v3383_v47 }
0x1493   :  { %v3389_v53 = vmul.f32 %v7450_v0, %v3388_v49 }
0x1495   :  { %3599 = vrot.lane.b32.xlu1 %v7393_v35, %s6451_s20 }
0x14b4   :  { %v7503_v38 = vpop.xlane.xlu1 %3364 }
0x14d0   :  { %v3359_v25 = vpop.xlane.xlu0 %3358 }
0x14d1   :  { %6337 = vrcp.f32 %v3359_v25  ;;  %v3416_v33 = vand.u32 2147483648, %v3359_v25  ;;  %v3414_v35 = vand.u32 2147483647, %v3359_v25  ;;  %vm3410_vm2 = vweird.f32 %v3359_v25 }
0x14d3   :  { %v3417_v58 = vor.u32 1.1754944e-38, %v3416_v33  ;;  %vm3415_vm5 = vcmp.eq.f32.partialorder %v3414_v35, 8.507059e+37 }
0x14d7   :  { %v6338_v26 = vpop.eup %6337 }
0x14d8   :  { %v3406_v29 = vmul.f32 %v6338_v26, %v3359_v25  ;;  %v7498_v17 = vpop.xlane.xlu0 %3355  ;;  %vm3411_vm1 = vweird.f32 %v6338_v26 }
0x14d9   :  { %6339 = vrcp.f32 %v7498_v17  ;;  %vm3412_vm4 = vmor %vm3410_vm2, %vm3411_vm1  ;;  %vm3395_vm15 = vweird.f32 %v7498_v17  ;;  %v3401_v15 = vand.u32 2147483648, %v7498_v17  ;;  %v3399_v9 = vand.u32 2147483647, %v7498_v17 }
0x14da   :  { %v3407_v31 = vsub.f32 1.0, %v3406_v29 }
0x14db   :  { %v3402_v25 = vor.u32 1.1754944e-38, %v3401_v15 }
0x14dc   :  { %v3408_v34 = vmul.f32 %v6338_v26, %v3407_v31 }
0x14dd   :  { %v3362_v11 = vpop.xlane.xlu2 %3361 }
0x14de   :  { %v3409_v3 = vadd.f32 %v6338_v26, %v3408_v34  ;;  %6341 = vrcp.f32 %v3362_v11  ;;  %v3429_v2 = vand.u32 2147483647, %v3362_v11  ;;  %vm3425_vm2 = vweird.f32 %v3362_v11 }
0x14df   :  { %v7501_v37 = vpop.eup %6339  ;;  %6343 = vrcp.f32 %v7503_v38 }
0x14e0   :  { %v3413_v40 = vsel %vm3412_vm4, %v6338_v26, %v3409_v3  ;;  %v3391_v18 = vmul.f32 %v7501_v37, %v7498_v17  ;;  %vm3396_vm11 = vweird.f32 %v7501_v37  ;;  %vm3430_vm4 = vcmp.eq.f32.partialorder %v3429_v2, 8.507059e+37 }
0x14e1   :  { %v3418_v42 = vsel %vm3415_vm5, %v3417_v58, %v3413_v40  ;;  %vm7524_vm1 = vmor %vm3395_vm15, %vm3396_vm11  ;;  %vm3400_vm5 = vcmp.eq.f32.partialorder %v3399_v9, 8.507059e+37 }
0x14e2   :  { %v3392_v45 = vsub.f32 1.0, %v3391_v18  ;;  %v3419_v46 = vmul.f32 %v7461_v20, %v3418_v42  ;;  %v3431_v20 = vand.u32 2147483648, %v3362_v11 }
0x14e4   :  { %v6342_v57 = vpop.eup %6341  ;;  %5947 = vmatmul.msk.f32.vlgmr.msrb.gmra.mxu1 %vm249_vm8, %v3419_v46  ;;  %v3393_v59 = vmul.f32 %v7501_v37, %v3392_v45  ;;  %v3432_v44 = vor.u32 1.1754944e-38, %v3431_v20 }
0x14e5   :  { %v3421_v61 = vmul.f32 %v6342_v57, %v3362_v11  ;;  %vm3426_vm12 = vweird.f32 %v6342_v57  ;;  %v7530_v13 = vpop.eup %6343 }
0x14e6   :  { %v3394_v8 = vadd.f32 %v7501_v37, %v3393_v59  ;;  %vm3427_vm3 = vmor %vm3425_vm2, %vm3426_vm12  ;;  %v3436_v0 = vmul.f32 %v7530_v13, %v7503_v38 }
0x14e7   :  { %v3422_v22 = vsub.f32 1.0, %v3421_v61  ;;  %v7514_v51 = vpop.xlane.xlu1 %3370 }
0x14e8   :  { %6345 = vrcp.f32 %v7514_v51  ;;  %v7518_v28 = vpop.xlane.xlu2 %3373  ;;  %v3398_v30 = vsel %vm7524_vm1, %v7501_v37, %v3394_v8  ;;  %v3437_v34 = vsub.f32 1.0, %v3436_v0  ;;  %v3476_v37 = vand.u32 2147483648, %v7514_v51 }
0x14e9   :  { %v3423_v14 = vmul.f32 %v6342_v57, %v3422_v22  ;;  %6347 = vrcp.f32 %v7518_v28  ;;  %v3403_v17 = vsel %vm3400_vm5, %v3402_v25, %v3398_v30  ;;  %vm3470_vm10 = vweird.f32 %v7514_v51 }
0x14ea   :  { %v3404_v3 = vmul.f32 %v7465_v48, %v3403_v17  ;;  %v3474_v40 = vand.u32 2147483647, %v7514_v51  ;;  %v3489_v18 = vand.u32 2147483647, %v7518_v28  ;;  %vm3485_vm12 = vweird.f32 %v7518_v28  ;;  %v2978_v17 = vld [vmem:[%s7591_s26 + $0x10] sm:$0xff] }
0x14eb   :  { %v3424_v43 = vadd.f32 %v6342_v57, %v3423_v14  ;;  %v3496_v39 = vpop.permute.xlu0 %3495  ;;  %v3438_v46 = vmul.f32 %v7530_v13, %v3437_v34 }
0x14ec   :  { %3516 = vmatpush.msrb.mxu3 %v3496_v39  ;;  %vm3475_vm1 = vcmp.eq.f32.partialorder %v3474_v40, 8.507059e+37  ;;  %vm3490_vm2 = vcmp.eq.f32.partialorder %v3489_v18, 8.507059e+37 }
0x14ed   :  { %v3428_v21 = vsel %vm3427_vm3, %v6342_v57, %v3424_v43  ;;  %5945 = vmatmul.msk.f32.vlgmr.msrb.gmra.mxu3 %vm249_vm8, %v3389_v53  ;;  %v3477_v57 = vor.u32 1.1754944e-38, %v3476_v37  ;;  %v3446_v43 = vand.u32 2147483648, %v7503_v38  ;;  %v3444_v53 = vand.u32 2147483647, %v7503_v38 }
0x14ee   :  { %v6346_v19 = vpop.eup %6345  ;;  %v3433_v54 = vsel %vm3430_vm4, %v3432_v44, %v3428_v21  ;;  %vm3441_vm4 = vweird.f32 %v7530_v13 }
0x14ef   :  { %v6348_v4 = vpop.eup %6347  ;;  %v3466_v26 = vmul.f32 %v6346_v19, %v7514_v51  ;;  %v7539_v27 = vpop.xlane.xlu1 %3367  ;;  %v3434_v29 = vmul.f32 %v7469_v62, %v3433_v54  ;;  %vm3471_vm7 = vweird.f32 %v6346_v19  ;;  %v3491_v62 = vand.u32 2147483648, %v7518_v28 }
0x14f0   :  { %v3481_v31 = vmul.f32 %v6348_v4, %v7518_v28  ;;  %6349 = vrcp.f32 %v7539_v27  ;;  %vm3486_vm9 = vweird.f32 %v6348_v4  ;;  %v3626_v24 = vpop.permute.xlu2 %3625  ;;  %vm3472_vm11 = vmor %vm3470_vm10, %vm3471_vm7  ;;  %v3461_v22 = vand.u32 2147483648, %v7539_v27 }
0x14f1   :  { %v3467_v33 = vsub.f32 1.0, %v3466_v26  ;;  %5948 = vmatmul.msk.f32.vlgmr.msra.gmra.mxu2 %vm249_vm8, %v3434_v29  ;;  %vm3487_vm15 = vmor %vm3485_vm12, %vm3486_vm9  ;;  %v3492_v52 = vor.u32 1.1754944e-38, %v3491_v62  ;;  %v3459_v2 = vand.u32 2147483647, %v7539_v27  ;;  %v3439_v28 = vadd.f32 %v7530_v13, %v3438_v46  ;;  %v2979_v29 = vld [vmem:[%s7591_s26 + $0x18] sm:$0xff] }
0x14f2   :  { %v3482_v55 = vsub.f32 1.0, %v3481_v31  ;;  %vm3455_vm5 = vweird.f32 %v7539_v27  ;;  %v3462_v39 = vor.u32 1.1754944e-38, %v3461_v22  ;;  %vm3440_vm9 = vweird.f32 %v7503_v38  ;;  %v2977_v31 = vld [vmem:[%s7591_s26 + $0x8] sm:$0xff] }
0x14f3   :  { %v3468_v35 = vmul.f32 %v6346_v19, %v3467_v33  ;;  %v3522_v11 = vpop.permute.xlu0 %3521  ;;  %vm3460_vm10 = vcmp.eq.f32.partialorder %v3459_v2, 8.507059e+37  ;;  %v3447_v21 = vor.u32 1.1754944e-38, %v3446_v43  ;;  %vm3445_vm12 = vcmp.eq.f32.partialorder %v3444_v53, 8.507059e+37  ;;  %v2976_v33 = vld [vmem:[%s7591_s26] sm:$0xff] }
0x14f4   :  { %v3483_v58 = vmul.f32 %v6348_v4, %v3482_v55  ;;  %3542 = vmatpush.msra.mxu0 %v3522_v11 }
0x14f5   :  { %v3469_v41 = vadd.f32 %v6346_v19, %v3468_v35  ;;  %5946 = vmatmul.msk.f32.vlgmr.msra.gmra.mxu0 %vm249_vm8, %v3404_v3 }
0x14f6   :  { %v6350_v42 = vpop.eup %6349  ;;  %v3484_v48 = vadd.f32 %v6348_v4, %v3483_v58  ;;  %3646 = vmatpush.msrb.mxu0 %v3626_v24 }
0x14f7   :  { %v3473_v56 = vsel %vm3472_vm11, %v6346_v19, %v3469_v41  ;;  %v3451_v45 = vmul.f32 %v6350_v42, %v7539_v27  ;;  %vm3456_vm3 = vweird.f32 %v6350_v42  ;;  %vm3442_vm11 = vmor %vm3440_vm9, %vm3441_vm4 }
0x14f8   :  { %v3488_v47 = vsel %vm3487_vm15, %v6348_v4, %v3484_v48  ;;  %v3478_v61 = vsel %vm3475_vm1, %v3477_v57, %v3473_v56  ;;  %vm3457_vm7 = vmor %vm3455_vm5, %vm3456_vm3 }
0x14f9   :  { %v3452_v59 = vsub.f32 1.0, %v3451_v45  ;;  %v3493_v49 = vsel %vm3490_vm2, %v3492_v52, %v3488_v47  ;;  %v3479_v5 = vmul.f32 %v7475_v7, %v3478_v61 }
0x14fa   :  { %v3494_v9 = vmul.f32 %v7477_v60, %v3493_v49  ;;  %v3443_v60 = vsel %vm3442_vm11, %v7530_v13, %v3439_v28 }
0x14fb   :  { %v3453_v51 = vmul.f32 %v6350_v42, %v3452_v59  ;;  %v6147_v20 = vpop.permute.xlu0 %6146  ;;  %v3448_v19 = vsel %vm3445_vm12, %v3447_v21, %v3443_v60  ;;  %v3863_v21 = vld [vmem:[%s7635_s2 + $0x28] sm:$0xff] }
0x14fc   :  { %v6149_v8 = vunpack.i.h.bf16 %v6147_v20  ;;  %v6148_v14 = vunpack.i.l.bf16 %v6147_v20  ;;  %v3449_v25 = vmul.f32 %v7457_v32, %v3448_v19 }
0x14fd   :  { %v3454_v15 = vadd.f32 %v6350_v42, %v3453_v51 }
0x14fe   :  { %3672 = vmatpush.msra.mxu1 %v6148_v14  ;;  %3698 = vmatpush.msrb.mxu2 %v6149_v8  ;;  %v3822_v14 = vld [vmem:[%s7626_s1 + $0x18] sm:$0xff] }
0x14ff   :  { %v3458_v44 = vsel %vm3457_vm7, %v6350_v42, %v3454_v15  ;;  %5951 = vmatmul.msk.f32.vlgmr.msra.gmra.mxu1 %vm249_vm8, %v3479_v5  ;;  %5952 = vmatmul.msk.f32.vlgmr.msrb.gmra.mxu2 %vm249_vm8, %v3494_v9  ;;  %v6175_v42 = vld [vmem:[%s7584_s4] ss:$0 sm:$0xff]  ;;  %v3821_v15 = vld [vmem:[%s7626_s1 + $0x10] sm:$0xff]  ;;  %v3820_v5 = vld [vmem:[%s7626_s1 + $0x8] sm:$0xff] }
0x1500   :  { %v3463_v7 = vsel %vm3460_vm10, %v3462_v39, %v3458_v44  ;;  %3845 = vmatpush.msra.mxu0 %v3822_v14  ;;  %v3819_v9 = vld [vmem:[%s7626_s1] sm:$0xff]  ;;  %v3865_v44 = vld [vmem:[%s7635_s2 + $0x38] sm:$0xff] }
0x1501   :  { %v3464_v30 = vmul.f32 %v7483_v16, %v3463_v7  ;;  %v3864_v7 = vld [vmem:[%s7635_s2 + $0x30] sm:$0xff]  ;;  %3884 = vmatpush.msrb.mxu1 %v3865_v44 }
0x1502   :  { %3846 = vmatpush.msra.mxu0 %v3821_v15 }
0x1503   :  { %5950 = vmatmul.msk.f32.vlgmr.msrb.gmra.mxu0 %vm249_vm8, %v3464_v30  ;;  %3885 = vmatpush.msrb.mxu1 %v3864_v7 }
0x1504   :  { %3847 = vmatpush.msra.mxu0 %v3820_v5 }
0x1505   :  { %3886 = vmatpush.msrb.mxu1 %v3863_v21  ;;  %v5961_v21 = vld [vmem:[%s7036_s6 + $0x28] sm:$0xff] }
0x1506   :  { %3848 = vmatpush.msra.mxu0 %v3819_v9 }
0x1507   :  { %v3600_v38 = vpop.permute.xlu1 %3599 }
0x1508   :  { %3620 = vmatpush.msra.mxu3 %v3600_v38 }
0x1509   :  { %5949 = vmatmul.msk.f32.vlgmr.msra.gmra.mxu3 %vm249_vm8, %v3449_v25  ;;  %v3862_v25 = vld [vmem:[%s7635_s2 + $0x20] sm:$0xff] }
0x150a   :  { %3754 = vmatpush.msrb.mxu3 %v2979_v29  ;;  %3887 = vmatpush.msrb.mxu1 %v3862_v25  ;;  %v3811_v29 = vperm.slane %v7363_v63, 2 }
0x150c   :  { %3755 = vmatpush.msrb.mxu3 %v2978_v17 }
0x150e   :  { %3756 = vmatpush.msrb.mxu3 %v2977_v31 }
0x1510   :  { %3757 = vmatpush.msrb.mxu3 %v2976_v33  ;;  %v3814_v33 = vperm.slane %v7363_v63, 3 }
0x1561   :  { %v3570_v54 = vpop.f32.mrf.mxu1 }
0x1562   :  { %3705 = vrot.lane.b32.xlu0 %v3570_v54, %s8108_s10 }
0x1570   :  { %v3518_v16 = vpop.f32.mrf.mxu3 }
0x1572   :  { %v3544_v32 = vpop.f32.mrf.mxu0 }
0x1574   :  { %v3596_v4 = vpop.f32.mrf.mxu2 }
0x1575   :  { %3707 = vrot.lane.b32.xlu0 %v3596_v4, %s8108_s10  ;;  %v3861_v4 = vld [vmem:[%s7635_s2 + $0x18] sm:$0xff]  ;;  %s6486_s10 = smov 28  }
0x1576   :  { %3888 = vmatpush.msrb.mxu1 %v3861_v4  ;;  %s7654_s8 = sld [smem:[%s8103_s0 + %s6486_s10]]  }
0x157c   :  { %v3674_v13 = vpop.f32.mrf.mxu1 }
0x157d   :  { %3721 = vrot.lane.b32.xlu2 %v3674_v13, %s8106_s3 }
0x1580   :  { %v3648_v27 = vpop.f32.mrf.mxu0 }
0x1582   :  { %v3700_v0 = vpop.f32.mrf.mxu2 }
0x1585   :  { %3723 = vrot.lane.b32.xlu2 %v3700_v0, %s8106_s3 }
0x158c   :  { %v3622_v26 = vpop.f32.mrf.mxu3 }
0x158d   :  { %3713 = vrot.lane.b32.xlu1 %v3622_v26, %s8120_s9 }
0x1595   :  { %3715 = vrot.lane.b32.xlu1 %v3648_v27, %s8120_s9 }
0x15d4   :  { %v3706_v55 = vpop.permute.xlu0 %3705 }
0x15d5   :  { %v3727_v35 = vsel %vm249_vm8, %v3518_v16, %v3706_v55 }
0x15d7   :  { %v3722_v34 = vpop.permute.xlu2 %3721 }
0x15df   :  { %v3724_v40 = vpop.permute.xlu2 %3723 }
0x15e7   :  { %v3708_v58 = vpop.permute.xlu0 %3707 }
0x15e8   :  { %v3728_v62 = vsel %vm249_vm8, %v3544_v32, %v3708_v58 }
0x15ff   :  { %v3714_v11 = vpop.permute.xlu1 %3713 }
0x1600   :  { %v3729_v3 = vsel %vm917_vm13, %v3727_v35, %v3714_v11 }
0x1601   :  { %v3731_v37 = vsel %vm920_vm14, %v3729_v3, %v3722_v34 }
0x1602   :  { %5953 = vmatmul.msk.f32.vlgmr.msrb.gmra.mxu3 %vm145_vm0, %v3731_v37 }
0x1607   :  { %v3716_v41 = vpop.permute.xlu1 %3715 }
0x1608   :  { %v3730_v18 = vsel %vm917_vm13, %v3728_v62, %v3716_v41 }
0x1609   :  { %v3732_v24 = vsel %vm920_vm14, %v3730_v18, %v3724_v40 }
0x160a   :  { %5954 = vmatmul.msk.f32.gmra.mxu3 %vm145_vm0, %v3732_v24  ;;  %v3860_v24 = vld [vmem:[%s7635_s2 + $0x10] sm:$0xff] }
0x160b   :  { %3889 = vmatpush.msrb.mxu1 %v3860_v24 }
0x1685   :  { %v3759_v48 = vpop.f32.mrf.mxu3 }
0x1686   :  { %v3760_v56 = vadd.f32 %v6175_v42, %v3759_v48  ;;  %v3858_v48 = vld [vmem:[%s7635_s2] sm:$0xff] }
0x1688   :  { %v3765_v45 = vadd.f32 %v3760_v56, %v7377_v6  ;;  %v6176_v56 = vld [vmem:[%s7621_s16] ss:$0 sm:$0xff] }
0x168a   :  { %v3767_v46 = vsel %vm145_vm0, %v3765_v45, 0.0 }
0x168b   :  { %3768 = vadd.xlane.f32.xlu0 %v3767_v46 }
0x168d   :  { %v3762_v57 = vpop.f32.mrf.mxu3 }
0x168e   :  { %v3763_v47 = vadd.f32 %v6175_v42, %v3762_v57  ;;  %v3859_v42 = vld [vmem:[%s7635_s2 + $0x8] sm:$0xff] }
0x168f   :  { %3890 = vmatpush.msrb.mxu1 %v3859_v42 }
0x1690   :  { %v3766_v52 = vadd.f32 %v3763_v47, %v7389_v36 }
0x1691   :  { %3891 = vmatpush.msrb.mxu1 %v3858_v48 }
0x1692   :  { %v3770_v59 = vsel %vm145_vm0, %v3766_v52, 0.0 }
0x1693   :  { %3771 = vadd.xlane.f32.xlu1 %v3770_v59 }
0x16fe   :  { %v3769_v61 = vpop.xlane.xlu0 %3768 }
0x16ff   :  { %v3773_v49 = vmul.f32 %v3769_v61, %v6500_v10  ;;  %v6177_v61 = vld [vmem:[%s7654_s8] ss:$0 sm:$0xff] }
0x1701   :  { %v3775_v22 = vsub.f32 %v3765_v45, %v3773_v49 }
0x1703   :  { %v3777_v51 = vmul.f32 %v3775_v22, %v3775_v22 }
0x1705   :  { %v3779_v2 = vsel %vm145_vm0, %v3777_v51, 0.0 }
0x1706   :  { %3780 = vadd.xlane.f32.xlu2 %v3779_v2  ;;  %v3772_v20 = vpop.xlane.xlu1 %3771 }
0x1707   :  { %v3774_v6 = vmul.f32 %v3772_v20, %v6500_v10 }
0x1709   :  { %v7613_v28 = vsub.f32 %v3766_v52, %v3774_v6 }
0x170b   :  { %v3778_v8 = vmul.f32 %v7613_v28, %v7613_v28 }
0x170d   :  { %v3782_v36 = vsel %vm145_vm0, %v3778_v8, 0.0 }
0x170e   :  { %3783 = vadd.xlane.f32.xlu0 %v3782_v36 }
0x1779   :  { %v3781_v43 = vpop.xlane.xlu2 %3780 }
0x177a   :  { %v3785_v39 = vmul.f32 %v3781_v43, %v6500_v10 }
0x177c   :  { %v3787_v53 = vadd.f32 1e-05, %v3785_v39 }
0x177e   :  { %6351 = vrsqrt.f32 %v3787_v53  ;;  %vm3795_vm1 = vweird.f32 %v3787_v53 }
0x1781   :  { %v3784_v60 = vpop.xlane.xlu0 %3783 }
0x1782   :  { %v3786_v30 = vmul.f32 %v3784_v60, %v6500_v10  ;;  %v5963_v60 = vld [vmem:[%s7036_s6 + $0x38] sm:$0xff] }
0x1783   :  { %3990 = vmatpush.msra.mxu2 %v5963_v60 }
0x1784   :  { %v6352_v19 = vpop.eup %6351  ;;  %v3788_v38 = vadd.f32 1e-05, %v3786_v30  ;;  %v5962_v30 = vld [vmem:[%s7036_s6 + $0x30] sm:$0xff] }
0x1785   :  { %v3790_v54 = vmul.f32 %v6352_v19, %v3787_v53  ;;  %vm3796_vm15 = vweird.f32 %v6352_v19  ;;  %3991 = vmatpush.msra.mxu2 %v5962_v30 }
0x1786   :  { %6353 = vrsqrt.f32 %v3788_v38  ;;  %vm3797_vm2 = vmor %vm3795_vm1, %vm3796_vm15  ;;  %vm3805_vm4 = vweird.f32 %v3788_v38 }
0x1787   :  { %v3791_v13 = vmul.f32 %v6352_v19, %v3790_v54  ;;  %3992 = vmatpush.msra.mxu2 %v5961_v21 }
0x1789   :  { %v3792_v16 = vmul.f32 0.5, %v3791_v13 }
0x178b   :  { %v3793_v0 = vsub.f32 1.5, %v3792_v16 }
0x178c   :  { %v6354_v32 = vpop.eup %6353 }
0x178d   :  { %v3794_v26 = vmul.f32 %v6352_v19, %v3793_v0  ;;  %v3800_v27 = vmul.f32 %v6354_v32, %v3788_v38  ;;  %vm3806_vm3 = vweird.f32 %v6354_v32 }
0x178e   :  { %vm3807_vm5 = vmor %vm3805_vm4, %vm3806_vm3 }
0x178f   :  { %v3798_v17 = vsel %vm3797_vm2, %v6352_v19, %v3794_v26  ;;  %v3801_v31 = vmul.f32 %v6354_v32, %v3800_v27  ;;  %v5960_v19 = vld [vmem:[%s7036_s6 + $0x20] sm:$0xff]  ;;  %s8124_s6 = smov 48  }
0x1790   :  { %v3809_v55 = vmul.f32 %v3798_v17, %v3775_v22  ;;  %3993 = vmatpush.msra.mxu2 %v5960_v19 }
0x1791   :  { %v3802_v34 = vmul.f32 0.5, %v3801_v31 }
0x1792   :  { %v3812_v35 = vmul.f32 %v3811_v29, %v3809_v55  ;;  %v6439_v55 = vld [vmem:[%s7353_s14] sm:$0x3f] }
0x1793   :  { %v3803_v11 = vsub.f32 1.5, %v3802_v34  ;;  %v3945_v34 = vperm.slane %v6439_v55, 4 }
0x1794   :  { %v3815_v3 = vadd.f32 %v3814_v33, %v3812_v35 }
0x1795   :  { %v3804_v37 = vmul.f32 %v6354_v32, %v3803_v11 }
0x1796   :  { %v3817_v58 = vmul.f32 %v3815_v3, %v7374_v23  ;;  %v3948_v3 = vperm.slane %v6439_v55, 5 }
0x1797   :  { %v3808_v62 = vsel %vm3807_vm5, %v6354_v32, %v3804_v37 }
0x1798   :  { %v3810_v41 = vmul.f32 %v3808_v62, %v7613_v28  ;;  %5955 = vmatmul.msk.f32.vlgmr.msra.gmra.mxu0 %vm145_vm0, %v3817_v58 }
0x179a   :  { %v3813_v63 = vmul.f32 %v3811_v29, %v3810_v41 }
0x179c   :  { %v3816_v40 = vadd.f32 %v3814_v33, %v3813_v63 }
0x179e   :  { %v3818_v18 = vmul.f32 %v3816_v40, %v7386_v50 }
0x17a0   :  { %5956 = vmatmul.msk.f32.gmra.mxu0 %vm145_vm0, %v3818_v18 }
0x1815   :  { %v3850_v45 = vpop.f32.mrf.mxu0 }
0x1816   :  { %v3851_v46 = vadd.f32 %v6176_v56, %v3850_v45 }
0x1818   :  { %v3856_v57 = vmax.f32 %v3851_v46, 0.0  ;;  %v6178_v46 = vld [vmem:[%s7045_s28 + $0x1] ss:$0 sm:$0xff]  ;;  %s8126_s28 = smov 24  }
0x181a   :  { %5957 = vmatmul.msk.f32.vlgmr.msrb.gmra.mxu1 %vm1074_vm6, %v3856_v57 }
0x181d   :  { %v3853_v47 = vpop.f32.mrf.mxu0 }
0x181e   :  { %v3854_v52 = vadd.f32 %v6176_v56, %v3853_v47 }
0x1820   :  { %v3857_v59 = vmax.f32 %v3854_v52, 0.0 }
0x1822   :  { %5958 = vmatmul.msk.f32.gmra.mxu1 %vm1074_vm6, %v3857_v59 }
0x1897   :  { %v3893_v49 = vpop.f32.mrf.mxu1 }
0x1898   :  { %v3894_v22 = vadd.f32 %v6177_v61, %v3893_v49 }
0x189a   :  { %v3899_v51 = vadd.f32 %v3894_v22, %v3817_v58 }
0x189c   :  { %v3901_v2 = vsel %vm145_vm0, %v3899_v51, 0.0 }
0x189d   :  { %3902 = vadd.xlane.f32.xlu1 %v3901_v2 }
0x189f   :  { %v3896_v20 = vpop.f32.mrf.mxu1 }
0x18a0   :  { %v3897_v6 = vadd.f32 %v6177_v61, %v3896_v20 }
0x18a2   :  { %v3900_v28 = vadd.f32 %v3897_v6, %v3818_v18 }
0x18a4   :  { %v3904_v8 = vsel %vm145_vm0, %v3900_v28, 0.0 }
0x18a5   :  { %3905 = vadd.xlane.f32.xlu2 %v3904_v8 }
0x1910   :  { %v3903_v36 = vpop.xlane.xlu1 %3902 }
0x1911   :  { %v3907_v14 = vmul.f32 %v3903_v36, %v6500_v10 }
0x1913   :  { %v3909_v15 = vsub.f32 %v3899_v51, %v3907_v14 }
0x1915   :  { %v3911_v5 = vmul.f32 %v3909_v15, %v3909_v15 }
0x1917   :  { %v3913_v9 = vsel %vm145_vm0, %v3911_v5, 0.0 }
0x1918   :  { %v3906_v43 = vpop.xlane.xlu2 %3905  ;;  %3914 = vadd.xlane.f32.xlu0 %v3913_v9 }
0x1919   :  { %v3908_v39 = vmul.f32 %v3906_v43, %v6500_v10 }
0x191b   :  { %v3910_v53 = vsub.f32 %v3900_v28, %v3908_v39 }
0x191d   :  { %v3912_v44 = vmul.f32 %v3910_v53, %v3910_v53 }
0x191f   :  { %v3916_v7 = vsel %vm145_vm0, %v3912_v44, 0.0 }
0x1920   :  { %3917 = vadd.xlane.f32.xlu1 %v3916_v7  ;;  %v7742_v7 = vld [vmem:[%s7160_s11] sm:$0xff] }
0x198b   :  { %v3915_v38 = vpop.xlane.xlu0 %3914 }
0x198c   :  { %v3919_v25 = vmul.f32 %v3915_v38, %v6500_v10  ;;  %v6441_v38 = vld [vmem:[%s7160_s11 + $0x8] sm:$0xff] }
0x198e   :  { %v3921_v54 = vadd.f32 1e-05, %v3919_v25 }
0x1990   :  { %6355 = vrsqrt.f32 %v3921_v54  ;;  %vm3929_vm9 = vweird.f32 %v3921_v54 }
0x1993   :  { %v3918_v4 = vpop.xlane.xlu1 %3917 }
0x1994   :  { %v3920_v13 = vmul.f32 %v3918_v4, %v6500_v10 }
0x1996   :  { %v6356_v16 = vpop.eup %6355  ;;  %v3922_v0 = vadd.f32 1e-05, %v3920_v13 }
0x1997   :  { %v3924_v32 = vmul.f32 %v6356_v16, %v3921_v54  ;;  %vm3930_vm7 = vweird.f32 %v6356_v16 }
0x1998   :  { %6357 = vrsqrt.f32 %v3922_v0  ;;  %vm3931_vm10 = vmor %vm3929_vm9, %vm3930_vm7  ;;  %vm3939_vm12 = vweird.f32 %v3922_v0 }
0x1999   :  { %v3925_v26 = vmul.f32 %v6356_v16, %v3924_v32 }
0x199b   :  { %v3926_v27 = vmul.f32 0.5, %v3925_v26 }
0x199d   :  { %v3927_v29 = vsub.f32 1.5, %v3926_v27 }
0x199e   :  { %v6358_v17 = vpop.eup %6357 }
0x199f   :  { %v3928_v31 = vmul.f32 %v6356_v16, %v3927_v29  ;;  %v3934_v33 = vmul.f32 %v6358_v17, %v3922_v0  ;;  %vm3940_vm11 = vweird.f32 %v6358_v17 }
0x19a0   :  { %vm3941_vm15 = vmor %vm3939_vm12, %vm3940_vm11 }
0x19a1   :  { %v3932_v35 = vsel %vm3931_vm10, %v6356_v16, %v3928_v31  ;;  %v3935_v11 = vmul.f32 %v6358_v17, %v3934_v33 }
0x19a2   :  { %v3943_v37 = vmul.f32 %v3932_v35, %v3909_v15 }
0x19a3   :  { %v3936_v58 = vmul.f32 0.5, %v3935_v11 }
0x19a4   :  { %v3946_v62 = vmul.f32 %v3945_v34, %v3943_v37 }
0x19a5   :  { %v3937_v41 = vsub.f32 1.5, %v3936_v58 }
0x19a6   :  { %v3949_v63 = vadd.f32 %v3948_v3, %v3946_v62 }
0x19a7   :  { %v3938_v40 = vmul.f32 %v6358_v17, %v3937_v41 }
0x19a8   :  { %v7677_v18 = vmul.f32 %v3949_v63, %v7374_v23 }
0x19a9   :  { %v3942_v24 = vsel %vm3941_vm15, %v6358_v17, %v3938_v40 }
0x19aa   :  { %v3944_v42 = vmul.f32 %v3942_v24, %v3910_v53  ;;  %5970 = vmatmul.msk.f32.vlgmr.msra.gmra.mxu2 %vm145_vm0, %v7677_v18 }
0x19ac   :  { %v3947_v48 = vmul.f32 %v3945_v34, %v3944_v42 }
0x19ae   :  { %v3950_v56 = vadd.f32 %v3948_v3, %v3947_v48 }
0x19b0   :  { %v7682_v45 = vmul.f32 %v3950_v56, %v7386_v50 }
0x19b2   :  { %5971 = vmatmul.msk.f32.gmra.mxu2 %vm145_vm0, %v7682_v45 }
0x1a2d   :  { %v3995_v57 = vpop.f32.mrf.mxu2 }
0x1a2e   :  { %v7687_v47 = vadd.f32 %v6178_v46, %v3995_v57 }
0x1a30   :  { %4055 = vrot.lane.b32.xlu1 %v7687_v47, %s6452_s21  ;;  %4057 = vrot.lane.b32.xlu0 %v7687_v47, %s6449_s18 }
0x1a31   :  { %4002 = vrot.lane.b32.xlu2 %v7687_v47, %s6450_s19 }
0x1a35   :  { %v3998_v52 = vpop.f32.mrf.mxu2 }
0x1a36   :  { %v7695_v59 = vadd.f32 %v6178_v46, %v3998_v52 }
0x1a38   :  { %4169 = vrot.lane.b32.xlu0 %v7687_v47, %s6455_s24  ;;  %4083 = vrot.lane.b32.xlu1 %v7695_v59, %s6452_s21 }
0x1a39   :  { %4085 = vrot.lane.b32.xlu2 %v7695_v59, %s6449_s18 }
0x1a40   :  { %4167 = vrot.lane.b32.xlu0 %v7687_v47, %s6453_s22  ;;  %4113 = vrot.lane.b32.xlu1 %v7687_v47, %s6451_s20 }
0x1a41   :  { %4029 = vrot.lane.b32.xlu2 %v7695_v59, %s6450_s19 }
0x1a48   :  { %4195 = vrot.lane.b32.xlu0 %v7695_v59, %s6453_s22  ;;  %4141 = vrot.lane.b32.xlu1 %v7695_v59, %s6451_s20 }
0x1a49   :  { %4197 = vrot.lane.b32.xlu2 %v7695_v59, %s6455_s24 }
0x1a50   :  { %4139 = vrot.lane.b32.xlu0 %v7695_v59, %s6454_s23 }
0x1a51   :  { %4111 = vrot.lane.b32.xlu2 %v7687_v47, %s6454_s23 }
0x1a58   :  { %4431 = vrot.lane.b32.xlu0 %v7687_v47, %s6458_s30 }
0x1a59   :  { %4483 = vrot.lane.b32.xlu2 %v7687_v47, %s6457_s29 }
0x1a8b   :  { %v4003_v61 = vpop.permute.xlu2 %4002 }
0x1a8c   :  { %5972 = vmatpush.xpose.msk.msra.mxu3 %vm249_vm8, %v4003_v61 }
0x1a8f   :  { %5973 = vmatmul.msk.f32.vlgmr.msra.gmra.mxu3 %vm249_vm8, %v7687_v47 }
0x1a93   :  { %v4086_v49 = vpop.permute.xlu2 %4085 }
0x1a94   :  { %5978 = vmatpush.xpose.msk.msrb.mxu3 %vm249_vm8, %v4086_v49 }
0x1a9b   :  { %v4030_v22 = vpop.permute.xlu2 %4029 }
0x1a9c   :  { %5974 = vmatpush.xpose.msk.msrb.mxu0 %vm249_vm8, %v4030_v22 }
0x1a9f   :  { %5975 = vmatmul.msk.f32.vlgmr.msrb.gmra.mxu0 %vm249_vm8, %v7695_v59 }
0x1aa2   :  { %v4058_v51 = vpop.permute.xlu0 %4057  ;;  %v4056_v2 = vpop.permute.xlu1 %4055 }
0x1aa3   :  { %v4198_v20 = vpop.permute.xlu2 %4197  ;;  %5976 = vmatpush.xpose.msk.msrb.mxu2 %vm249_vm8, %v4058_v51 }
0x1aa4   :  { %5986 = vmatpush.xpose.msk.msra.mxu3 %vm249_vm8, %v4198_v20 }
0x1aa6   :  { %5977 = vmatmul.msk.f32.vlgmr.msrb.gmra.mxu2 %vm249_vm8, %v4056_v2 }
0x1aaa   :  { %v4170_v6 = vpop.permute.xlu0 %4169  ;;  %v4084_v28 = vpop.permute.xlu1 %4083 }
0x1aab   :  { %v4112_v8 = vpop.permute.xlu2 %4111  ;;  %5979 = vmatmul.msk.f32.vlgmr.msrb.gmra.mxu3 %vm249_vm8, %v4084_v28  ;;  %5984 = vmatpush.xpose.msk.msra.mxu2 %vm249_vm8, %v4170_v6 }
0x1ab2   :  { %v4168_v36 = vpop.permute.xlu0 %4167  ;;  %v4114_v14 = vpop.permute.xlu1 %4113 }
0x1ab3   :  { %v4484_v15 = vpop.permute.xlu2 %4483  ;;  %5980 = vmatpush.xpose.msk.msra.mxu0 %vm249_vm8, %v4114_v14  ;;  %5985 = vmatmul.msk.f32.vlgmr.msra.gmra.mxu2 %vm249_vm8, %v4168_v36 }
0x1ab4   :  { %4504 = vmatpush.msrb.mxu2 %v4484_v15 }
0x1ab6   :  { %5981 = vmatmul.msk.f32.vlgmr.msra.gmra.mxu0 %vm249_vm8, %v4112_v8 }
0x1aba   :  { %v4196_v5 = vpop.permute.xlu0 %4195  ;;  %v4142_v9 = vpop.permute.xlu1 %4141 }
0x1abb   :  { %5982 = vmatpush.xpose.msk.msra.mxu1 %vm249_vm8, %v4142_v9  ;;  %5987 = vmatmul.msk.f32.vlgmr.msra.gmra.mxu3 %vm249_vm8, %v4196_v5 }
0x1ac2   :  { %v4140_v43 = vpop.permute.xlu0 %4139 }
0x1ac3   :  { %5983 = vmatmul.msk.f32.vlgmr.msra.gmra.mxu1 %vm249_vm8, %v4140_v43 }
0x1aca   :  { %v4432_v39 = vpop.permute.xlu0 %4431 }
0x1acb   :  { %4452 = vmatpush.msrb.mxu0 %v4432_v39 }
0x1b12   :  { %v4025_v53 = vpop.f32.mrf.mxu3 }
0x1b13   :  { %v4223_v44 = vmul.f32 0.35355338, %v4025_v53 }
0x1b15   :  { %v4231_v60 = vadd.f32 %v7742_v7, %v4223_v44 }
0x1b17   :  { %v4239_v30 = vsel %vm249_vm8, %v4231_v60, -inf }
0x1b18   :  { %4240 = vmax.xlane.f32.xlu1 %v4239_v30 }
0x1b1c   :  { %v4052_v21 = vpop.f32.mrf.mxu0 }
0x1b1d   :  { %v4224_v19 = vmul.f32 0.35355338, %v4052_v21 }
0x1b1f   :  { %v7747_v25 = vadd.f32 %v6441_v38, %v4224_v19 }
0x1b21   :  { %v4242_v54 = vsel %vm249_vm8, %v7747_v25, -inf }
0x1b22   :  { %4243 = vmax.xlane.f32.xlu1 %v4242_v54 }
0x1b29   :  { %v4080_v4 = vpop.f32.mrf.mxu2 }
0x1b2a   :  { %v4225_v13 = vmul.f32 0.35355338, %v4080_v4 }
0x1b2c   :  { %v4233_v16 = vadd.f32 %v7742_v7, %v4225_v13 }
0x1b2e   :  { %v4245_v0 = vsel %vm249_vm8, %v4233_v16, -inf  ;;  %v4108_v35 = vpop.f32.mrf.mxu3 }
0x1b2f   :  { %4246 = vmax.xlane.f32.xlu2 %v4245_v0  ;;  %v4226_v20 = vmul.f32 0.35355338, %v4108_v35 }
0x1b31   :  { %v7773_v8 = vadd.f32 %v6441_v38, %v4226_v20 }
0x1b33   :  { %v4136_v36 = vpop.f32.mrf.mxu0  ;;  %v4248_v15 = vsel %vm249_vm8, %v7773_v8, -inf }
0x1b34   :  { %v4227_v14 = vmul.f32 0.35355338, %v4136_v36 }
0x1b36   :  { %v4192_v32 = vpop.f32.mrf.mxu2  ;;  %v7782_v43 = vadd.f32 %v7742_v7, %v4227_v14 }
0x1b37   :  { %v4229_v26 = vmul.f32 0.35355338, %v4192_v32 }
0x1b38   :  { %v4251_v39 = vsel %vm249_vm8, %v7782_v43, -inf }
0x1b39   :  { %v4237_v27 = vadd.f32 %v7742_v7, %v4229_v26 }
0x1b3b   :  { %v4257_v29 = vsel %vm249_vm8, %v4237_v27, -inf }
0x1b3c   :  { %4258 = vmax.xlane.f32.xlu2 %v4257_v29 }
0x1b3e   :  { %v4220_v37 = vpop.f32.mrf.mxu3 }
0x1b3f   :  { %v4230_v62 = vmul.f32 0.35355338, %v4220_v37 }
0x1b40   :  { %v4164_v17 = vpop.f32.mrf.mxu1 }
0x1b41   :  { %v4228_v31 = vmul.f32 0.35355338, %v4164_v17  ;;  %v4238_v63 = vadd.f32 %v6441_v38, %v4230_v62 }
0x1b43   :  { %v4236_v33 = vadd.f32 %v6441_v38, %v4228_v31  ;;  %v4260_v40 = vsel %vm249_vm8, %v4238_v63, -inf }
0x1b45   :  { %v4254_v55 = vsel %vm249_vm8, %v4236_v33, -inf }
0x1b46   :  { %4255 = vmax.xlane.f32.xlu1 %v4254_v55 }
0x1b5f   :  { %4509 = vrot.lane.b32.xlu1 %v7695_v59, %s6457_s29  ;;  %s8123_s29 = smov 40  }
0x1b8b   :  { %v4241_v34 = vpop.xlane.xlu1 %4240 }
0x1b8c   :  { %v4263_v11 = vsub.f32 %v4231_v60, %v4241_v34 }
0x1b8e   :  { %v4271_v3 = vmul.f32 1.442695, %v4263_v11 }
0x1b90   :  { %6359 = vpow2.f32 %v4271_v3 }
0x1b95   :  { %v4244_v61 = vpop.xlane.xlu1 %4243 }
0x1b96   :  { %v7758_v58 = vpop.eup %6359  ;;  %v4264_v53 = vsub.f32 %v7747_v25, %v4244_v61 }
0x1b97   :  { %v4287_v41 = vsel %vm249_vm8, %v7758_v58, 0.0 }
0x1b98   :  { %4288 = vadd.xlane.f32.xlu2 %v4287_v41  ;;  %v4273_v60 = vmul.f32 1.442695, %v4264_v53 }
0x1ba0   :  { %4261 = vmax.xlane.f32.xlu2 %v4260_v40 }
0x1ba2   :  { %v4247_v24 = vpop.xlane.xlu2 %4246 }
0x1ba3   :  { %v4265_v42 = vsub.f32 %v4233_v16, %v4247_v24 }
0x1ba5   :  { %v4275_v48 = vmul.f32 1.442695, %v4265_v42 }
0x1ba7   :  { %6361 = vpow2.f32 %v4275_v48 }
0x1bad   :  { %v7763_v56 = vpop.eup %6361 }
0x1bae   :  { %v4293_v46 = vsel %vm249_vm8, %v7763_v56, 0.0 }
0x1baf   :  { %4294 = vadd.xlane.f32.xlu0 %v4293_v46  ;;  %v4259_v57 = vpop.xlane.xlu2 %4258 }
0x1bb0   :  { %v4269_v52 = vsub.f32 %v4237_v27, %v4259_v57 }
0x1bb2   :  { %v4283_v49 = vmul.f32 1.442695, %v4269_v52 }
0x1bb4   :  { %6363 = vpow2.f32 %v4283_v49 }
0x1bb8   :  { %4587 = vrot.lane.b32.xlu2 %v7687_v47, %s8123_s29 }
0x1bb9   :  { %v4256_v22 = vpop.xlane.xlu1 %4255 }
0x1bba   :  { %v7769_v51 = vpop.eup %6363  ;;  %v4268_v2 = vsub.f32 %v4236_v33, %v4256_v22 }
0x1bbb   :  { %v4305_v6 = vsel %vm249_vm8, %v7769_v51, 0.0 }
0x1bbc   :  { %v4281_v28 = vmul.f32 1.442695, %v4268_v2  ;;  %4306 = vadd.xlane.f32.xlu0 %v4305_v6 }
0x1bbe   :  { %6365 = vpow2.f32 %v4281_v28 }
0x1bbf   :  { %6367 = vpow2.f32 %v4273_v60 }
0x1bc4   :  { %v7777_v5 = vpop.eup %6365  ;;  %4249 = vmax.xlane.f32.xlu0 %v4248_v15 }
0x1bc5   :  { %v4302_v9 = vsel %vm249_vm8, %v7777_v5, 0.0  ;;  %v7787_v30 = vpop.eup %6367 }
0x1bc6   :  { %4303 = vadd.xlane.f32.xlu1 %v4302_v9  ;;  %v4290_v21 = vsel %vm249_vm8, %v7787_v30, 0.0 }
0x1bcc   :  { %4252 = vmax.xlane.f32.xlu0 %v4251_v39 }
0x1bd1   :  { %v4510_v44 = vpop.permute.xlu1 %4509 }
0x1bd2   :  { %4530 = vmatpush.msrb.mxu3 %v4510_v44 }
0x1be0   :  { %4457 = vrot.lane.b32.xlu0 %v7695_v59, %s6458_s30  ;;  %s8125_s30 = smov 8  }
0x1be1   :  { %4291 = vadd.xlane.f32.xlu2 %v4290_v21 }
0x1bf9   :  { %4535 = vrot.lane.b32.xlu2 %v7687_v47, %s8124_s6 }
0x1c0b   :  { %v4289_v7 = vpop.xlane.xlu2 %4288 }
0x1c0c   :  { %6369 = vrcp.f32 %v4289_v7  ;;  %v4322_v13 = vand.u32 2147483648, %v4289_v7  ;;  %v4320_v32 = vand.u32 2147483647, %v4289_v7  ;;  %vm4316_vm2 = vweird.f32 %v4289_v7 }
0x1c0e   :  { %v4323_v27 = vor.u32 1.1754944e-38, %v4322_v13  ;;  %vm4321_vm4 = vcmp.eq.f32.partialorder %v4320_v32, 8.507059e+37 }
0x1c12   :  { %v6370_v19 = vpop.eup %6369 }
0x1c13   :  { %v4312_v38 = vmul.f32 %v6370_v19, %v4289_v7  ;;  %v4262_v25 = vpop.xlane.xlu2 %4261  ;;  %vm4317_vm1 = vweird.f32 %v6370_v19 }
0x1c14   :  { %v4270_v54 = vsub.f32 %v4238_v63, %v4262_v25  ;;  %vm4318_vm3 = vmor %vm4316_vm2, %vm4317_vm1 }
0x1c15   :  { %v4313_v4 = vsub.f32 1.0, %v4312_v38 }
0x1c16   :  { %v4285_v16 = vmul.f32 1.442695, %v4270_v54 }
0x1c17   :  { %v4314_v0 = vmul.f32 %v6370_v19, %v4313_v4 }
0x1c18   :  { %6371 = vpow2.f32 %v4285_v16 }
0x1c19   :  { %v4315_v26 = vadd.f32 %v6370_v19, %v4314_v0 }
0x1c1b   :  { %v4319_v29 = vsel %vm4318_vm3, %v6370_v19, %v4315_v26  ;;  %v4588_v47 = vpop.permute.xlu2 %4587 }
0x1c1c   :  { %v4324_v17 = vsel %vm4321_vm4, %v4323_v27, %v4319_v29  ;;  %4608 = vmatpush.msra.mxu2 %v4588_v47 }
0x1c1d   :  { %v4325_v31 = vmul.f32 %v7758_v58, %v4324_v17 }
0x1c1e   :  { %v7796_v33 = vpop.eup %6371 }
0x1c1f   :  { %5988 = vmatmul.msk.f32.vlgmr.msrb.gmra.mxu0 %vm249_vm8, %v4325_v31  ;;  %v4308_v55 = vsel %vm249_vm8, %v7796_v33, 0.0 }
0x1c20   :  { %4309 = vadd.xlane.f32.xlu0 %v4308_v55 }
0x1c22   :  { %v4295_v34 = vpop.xlane.xlu0 %4294 }
0x1c23   :  { %6373 = vrcp.f32 %v4295_v34  ;;  %v4352_v37 = vand.u32 2147483648, %v4295_v34  ;;  %v4350_v41 = vand.u32 2147483647, %v4295_v34  ;;  %vm4346_vm7 = vweird.f32 %v4295_v34 }
0x1c25   :  { %v4353_v58 = vor.u32 1.1754944e-38, %v4352_v37  ;;  %vm4351_vm10 = vcmp.eq.f32.partialorder %v4350_v41, 8.507059e+37 }
0x1c29   :  { %v6374_v35 = vpop.eup %6373 }
0x1c2a   :  { %v4342_v11 = vmul.f32 %v6374_v35, %v4295_v34  ;;  %vm4347_vm5 = vweird.f32 %v6374_v35 }
0x1c2b   :  { %vm4348_vm9 = vmor %vm4346_vm7, %vm4347_vm5 }
0x1c2c   :  { %v4343_v3 = vsub.f32 1.0, %v4342_v11 }
0x1c2e   :  { %v4344_v62 = vmul.f32 %v6374_v35, %v4343_v3 }
0x1c2f   :  { %v4307_v63 = vpop.xlane.xlu0 %4306 }
0x1c30   :  { %v4345_v40 = vadd.f32 %v6374_v35, %v4344_v62  ;;  %6375 = vrcp.f32 %v4307_v63  ;;  %v4412_v22 = vand.u32 2147483648, %v4307_v63  ;;  %v4410_v6 = vand.u32 2147483647, %v4307_v63 }
0x1c31   :  { %vm4406_vm12 = vweird.f32 %v4307_v63 }
0x1c32   :  { %v4349_v24 = vsel %vm4348_vm9, %v6374_v35, %v4345_v40  ;;  %vm4411_vm1 = vcmp.eq.f32.partialorder %v4410_v6, 8.507059e+37 }
0x1c33   :  { %v4354_v42 = vsel %vm4351_vm10, %v4353_v58, %v4349_v24 }
0x1c34   :  { %v4355_v48 = vmul.f32 %v7763_v56, %v4354_v42  ;;  %4613 = vrot.lane.b32.xlu0 %v7695_v59, %s8123_s29  ;;  %v4413_v56 = vor.u32 1.1754944e-38, %v4412_v22 }
0x1c36   :  { %v6376_v46 = vpop.eup %6375  ;;  %5990 = vmatmul.msk.f32.vlgmr.msrb.gmra.mxu2 %vm249_vm8, %v4355_v48 }
0x1c37   :  { %v4402_v57 = vmul.f32 %v6376_v46, %v4307_v63  ;;  %v4250_v52 = vpop.xlane.xlu0 %4249  ;;  %vm4407_vm11 = vweird.f32 %v6376_v46 }
0x1c38   :  { %v4266_v61 = vsub.f32 %v7773_v8, %v4250_v52  ;;  %vm4408_vm15 = vmor %vm4406_vm12, %vm4407_vm11 }
0x1c39   :  { %v4403_v49 = vsub.f32 1.0, %v4402_v57  ;;  %v7821_v17 = vpop.xlane.xlu1 %4303 }
0x1c3a   :  { %v4277_v2 = vmul.f32 1.442695, %v4266_v61 }
0x1c3b   :  { %v4404_v20 = vmul.f32 %v6376_v46, %v4403_v49 }
0x1c3c   :  { %6377 = vpow2.f32 %v4277_v2 }
0x1c3d   :  { %v4405_v28 = vadd.f32 %v6376_v46, %v4404_v20 }
0x1c3f   :  { %v4409_v36 = vsel %vm4408_vm15, %v6376_v46, %v4405_v28  ;;  %v4253_v14 = vpop.xlane.xlu0 %4252 }
0x1c40   :  { %v4414_v15 = vsel %vm4411_vm1, %v4413_v56, %v4409_v36  ;;  %v4267_v9 = vsub.f32 %v7782_v43, %v4253_v14 }
0x1c41   :  { %v4415_v39 = vmul.f32 %v7769_v51, %v4414_v15 }
0x1c42   :  { %v7808_v8 = vpop.eup %6377  ;;  %v4279_v53 = vmul.f32 1.442695, %v4267_v9 }
0x1c43   :  { %5994 = vmatmul.msk.f32.vlgmr.msra.gmra.mxu2 %vm249_vm8, %v4415_v39  ;;  %v4296_v44 = vsel %vm249_vm8, %v7808_v8, 0.0 }
0x1c44   :  { %6379 = vpow2.f32 %v4279_v53  ;;  %4297 = vadd.xlane.f32.xlu1 %v4296_v44 }
0x1c4a   :  { %v7813_v60 = vpop.eup %6379 }
0x1c4b   :  { %v4299_v21 = vsel %vm249_vm8, %v7813_v60, 0.0 }
0x1c4c   :  { %4300 = vadd.xlane.f32.xlu1 %v4299_v21 }
0x1c52   :  { %v4458_v7 = vpop.permute.xlu0 %4457 }
0x1c53   :  { %4478 = vmatpush.msrb.mxu1 %v4458_v7 }
0x1c54   :  { %v4292_v43 = vpop.xlane.xlu2 %4291 }
0x1c55   :  { %6381 = vrcp.f32 %v4292_v43  ;;  %v4337_v54 = vand.u32 2147483648, %v4292_v43  ;;  %v4335_v13 = vand.u32 2147483647, %v4292_v43  ;;  %vm4331_vm3 = vweird.f32 %v4292_v43 }
0x1c57   :  { %v4338_v0 = vor.u32 1.1754944e-38, %v4337_v54  ;;  %vm4336_vm5 = vcmp.eq.f32.partialorder %v4335_v13, 8.507059e+37 }
0x1c5b   :  { %v6382_v51 = vpop.eup %6381 }
0x1c5c   :  { %v4327_v19 = vmul.f32 %v6382_v51, %v4292_v43  ;;  %v4536_v38 = vpop.permute.xlu2 %4535  ;;  %vm4332_vm2 = vweird.f32 %v6382_v51 }
0x1c5d   :  { %4556 = vmatpush.msra.mxu0 %v4536_v38  ;;  %vm4333_vm4 = vmor %vm4331_vm3, %vm4332_vm2 }
0x1c5e   :  { %v4328_v25 = vsub.f32 1.0, %v4327_v19 }
0x1c60   :  { %v4329_v4 = vmul.f32 %v6382_v51, %v4328_v25 }
0x1c62   :  { %v4330_v16 = vadd.f32 %v6382_v51, %v4329_v4 }
0x1c64   :  { %v4334_v32 = vsel %vm4333_vm4, %v6382_v51, %v4330_v16  ;;  %v4395_v51 = vand.u32 2147483647, %v7821_v17 }
0x1c65   :  { %v4339_v26 = vsel %vm4336_vm5, %v4338_v0, %v4334_v32  ;;  %4561 = vrot.lane.b32.xlu1 %v7695_v59, %s8124_s6 }
0x1c66   :  { %v4340_v27 = vmul.f32 %v7787_v30, %v4339_v26 }
0x1c68   :  { %5989 = vmatmul.msk.f32.vlgmr.msrb.gmra.mxu1 %vm249_vm8, %v4340_v27 }
0x1c93   :  { %v4310_v29 = vpop.xlane.xlu0 %4309 }
0x1c94   :  { %6383 = vrcp.f32 %v4310_v29  ;;  %v4427_v20 = vand.u32 2147483648, %v4310_v29  ;;  %vm4421_vm15 = vweird.f32 %v4310_v29  ;;  %v4425_v28 = vand.u32 2147483647, %v4310_v29 }
0x1c95   :  { %6385 = vrcp.f32 %v7821_v17 }
0x1c96   :  { %v4428_v53 = vor.u32 1.1754944e-38, %v4427_v20  ;;  %vm4426_vm4 = vcmp.eq.f32.partialorder %v4425_v28, 8.507059e+37  ;;  %v6001_v20 = vld [vmem:[%s7319_s27 + $0x38] sm:$0xff]  ;;  %v5999_v28 = vld [vmem:[%s7319_s27 + $0x28] sm:$0xff] }
0x1c9a   :  { %v6384_v55 = vpop.eup %6383 }
0x1c9b   :  { %v4417_v35 = vmul.f32 %v6384_v55, %v4310_v29  ;;  %v7825_v59 = vpop.eup %6385  ;;  %vm4422_vm10 = vweird.f32 %v6384_v55 }
0x1c9c   :  { %v4387_v62 = vmul.f32 %v7825_v59, %v7821_v17  ;;  %vm4423_vm1 = vmor %vm4421_vm15, %vm4422_vm10  ;;  %vm4392_vm3 = vweird.f32 %v7825_v59  ;;  %v4454_v26 = vpop.f32.mrf.mxu0 }
0x1c9d   :  { %v4418_v11 = vsub.f32 1.0, %v4417_v35 }
0x1c9e   :  { %v4388_v42 = vsub.f32 1.0, %v4387_v62 }
0x1c9f   :  { %v4419_v40 = vmul.f32 %v6384_v55, %v4418_v11 }
0x1ca0   :  { %v4389_v2 = vmul.f32 %v7825_v59, %v4388_v42 }
0x1ca1   :  { %v4420_v61 = vadd.f32 %v6384_v55, %v4419_v40 }
0x1ca2   :  { %v4390_v44 = vadd.f32 %v7825_v59, %v4389_v2  ;;  %v6000_v2 = vld [vmem:[%s7319_s27 + $0x30] sm:$0xff] }
0x1ca3   :  { %v4424_v15 = vsel %vm4423_vm1, %v6384_v55, %v4420_v61  ;;  %v5965_v55 = vld [vmem:[%s7283_s5 + $0x20] sm:$0xff] }
0x1ca4   :  { %v4429_v7 = vsel %vm4426_vm4, %v4428_v53, %v4424_v15 }
0x1ca5   :  { %v4430_v54 = vmul.f32 %v7796_v33, %v4429_v7 }
0x1ca6   :  { %v4614_v47 = vpop.permute.xlu0 %4613 }
0x1ca7   :  { %4634 = vmatpush.msra.mxu3 %v4614_v47 }
0x1cb7   :  { %v4298_v31 = vpop.xlane.xlu1 %4297 }
0x1cb8   :  { %6387 = vrcp.f32 %v4298_v31  ;;  %v4367_v63 = vand.u32 2147483648, %v4298_v31  ;;  %v4365_v24 = vand.u32 2147483647, %v4298_v31  ;;  %vm4361_vm9 = vweird.f32 %v4298_v31 }
0x1cb9   :  { %v4506_v34 = vpop.f32.mrf.mxu2 }
0x1cba   :  { %4641 = vrot.lane.b32.xlu2 %v4506_v34, %s8125_s30  ;;  %v4368_v57 = vor.u32 1.1754944e-38, %v4367_v63  ;;  %vm4366_vm12 = vcmp.eq.f32.partialorder %v4365_v24, 8.507059e+37  ;;  %v6179_v24 = vld [vmem:[%s7278_s13 + $0x1] ss:$0 sm:$0xff] }
0x1cbe   :  { %v6388_v30 = vpop.eup %6387 }
0x1cbf   :  { %v4357_v3 = vmul.f32 %v6388_v30, %v4298_v31  ;;  %v4301_v37 = vpop.xlane.xlu1 %4300  ;;  %vm4362_vm7 = vweird.f32 %v6388_v30  ;;  %v5966_v31 = vld [vmem:[%s7283_s5 + $0x28] sm:$0xff] }
0x1cc0   :  { %6389 = vrcp.f32 %v4301_v37  ;;  %vm4363_vm11 = vmor %vm4361_vm9, %vm4362_vm7  ;;  %v4382_v14 = vand.u32 2147483648, %v4301_v37  ;;  %v4380_v39 = vand.u32 2147483647, %v4301_v37  ;;  %vm4376_vm5 = vweird.f32 %v4301_v37 }
0x1cc1   :  { %v4358_v41 = vsub.f32 1.0, %v4357_v3  ;;  %vm4391_vm9 = vweird.f32 %v7821_v17 }
0x1cc2   :  { %v4383_v43 = vor.u32 1.1754944e-38, %v4382_v14  ;;  %vm4381_vm10 = vcmp.eq.f32.partialorder %v4380_v39, 8.507059e+37 }
0x1cc3   :  { %v4359_v58 = vmul.f32 %v6388_v30, %v4358_v41 }
0x1cc5   :  { %v4360_v48 = vadd.f32 %v6388_v30, %v4359_v58 }
0x1cc6   :  { %v6390_v46 = vpop.eup %6389  ;;  %v4610_v52 = vpop.f32.mrf.mxu2 }
0x1cc7   :  { %v4364_v49 = vsel %vm4363_vm11, %v6388_v30, %v4360_v48  ;;  %v4372_v22 = vmul.f32 %v6390_v46, %v4301_v37  ;;  %4657 = vrot.lane.b32.xlu1 %v4610_v52, %s8126_s28  ;;  %vm4377_vm2 = vweird.f32 %v6390_v46  ;;  %vm4393_vm11 = vmor %vm4391_vm9, %vm4392_vm3 }
0x1cc8   :  { %v4369_v6 = vsel %vm4366_vm12, %v4368_v57, %v4364_v49  ;;  %vm4378_vm7 = vmor %vm4376_vm5, %vm4377_vm2  ;;  %v4394_v25 = vsel %vm4393_vm11, %v7825_v59, %v4390_v44  ;;  %vm4396_vm12 = vcmp.eq.f32.partialorder %v4395_v51, 8.507059e+37 }
0x1cc9   :  { %v4370_v56 = vmul.f32 %v7808_v8, %v4369_v6  ;;  %v4373_v36 = vsub.f32 1.0, %v4372_v22  ;;  %v4397_v8 = vand.u32 2147483648, %v7821_v17  ;;  %v5967_v17 = vld [vmem:[%s7283_s5 + $0x30] sm:$0xff]  ;;  %v6150_v6 = vpack.i.bf16 %v6000_v2, %v6001_v20 }
0x1ccb   :  { %v4374_v9 = vmul.f32 %v6390_v46, %v4373_v36  ;;  %5991 = vmatmul.msk.f32.vlgmr.msrb.gmra.mxu3 %vm249_vm8, %v4370_v56  ;;  %v4398_v13 = vor.u32 1.1754944e-38, %v4397_v8 }
0x1ccd   :  { %v4375_v21 = vadd.f32 %v6390_v46, %v4374_v9  ;;  %v4399_v16 = vsel %vm4396_vm12, %v4398_v13, %v4394_v25 }
0x1cce   :  { %v4400_v0 = vmul.f32 %v7777_v5, %v4399_v16  ;;  %v5968_v5 = vld [vmem:[%s7283_s5 + $0x38] sm:$0xff] }
0x1ccf   :  { %v4379_v19 = vsel %vm4378_vm7, %v6390_v46, %v4375_v21  ;;  %4690 = vmatpush.msrb.mxu0 %v5968_v5 }
0x1cd0   :  { %v4384_v38 = vsel %vm4381_vm10, %v4383_v43, %v4379_v19 }
0x1cd1   :  { %v4385_v4 = vmul.f32 %v7813_v60, %v4384_v38  ;;  %4691 = vmatpush.msrb.mxu0 %v5967_v17 }
0x1cd3   :  { %5992 = vmatmul.msk.f32.vlgmr.msra.gmra.mxu0 %vm249_vm8, %v4385_v4  ;;  %5995 = vmatmul.msk.f32.vlgmr.msra.gmra.mxu3 %vm249_vm8, %v4430_v54  ;;  %v6180_v54 = vld [vmem:[%s7345_s17 + $0x1] ss:$0 sm:$0xff] }
0x1cd4   :  { %4692 = vmatpush.msrb.mxu0 %v5966_v31 }
0x1cd6   :  { %4693 = vmatpush.msrb.mxu0 %v5965_v55 }
0x1cd7   :  { %v4562_v32 = vpop.permute.xlu1 %4561 }
0x1cd8   :  { %4582 = vmatpush.msra.mxu1 %v4562_v32 }
0x1cd9   :  { %5993 = vmatmul.msk.f32.vlgmr.msra.gmra.mxu1 %vm249_vm8, %v4400_v0 }
0x1cda   :  { %4790 = vmatpush.msrb.mxu1 %v6001_v20 }
0x1cdc   :  { %4791 = vmatpush.msrb.mxu1 %v6000_v2 }
0x1cde   :  { %4792 = vmatpush.msrb.mxu1 %v5999_v28 }
0x1ce5   :  { %v4480_v60 = vpop.f32.mrf.mxu1 }
0x1d14   :  { %v4642_v34 = vpop.permute.xlu2 %4641 }
0x1d15   :  { %v4663_v35 = vsel %vm249_vm8, %v4454_v26, %v4642_v34 }
0x1d39   :  { %v4658_v30 = vpop.permute.xlu1 %4657 }
0x1d4e   :  { %v4532_v33 = vpop.f32.mrf.mxu3 }
0x1d4f   :  { %4643 = vrot.lane.b32.xlu2 %v4532_v33, %s8125_s30 }
0x1d50   :  { %v4558_v27 = vpop.f32.mrf.mxu0 }
0x1d51   :  { %4649 = vrot.lane.b32.xlu0 %v4558_v27, %s8120_s9 }
0x1d56   :  { %v4636_v29 = vpop.f32.mrf.mxu3  ;;  %v4584_v47 = vpop.f32.mrf.mxu1 }
0x1d57   :  { %4659 = vrot.lane.b32.xlu1 %v4636_v29, %s8126_s28 }
0x1d59   :  { %4651 = vrot.lane.b32.xlu0 %v4584_v47, %s8120_s9 }
0x1da9   :  { %v4644_v37 = vpop.permute.xlu2 %4643 }
0x1daa   :  { %v4664_v62 = vsel %vm249_vm8, %v4480_v60, %v4644_v37  ;;  %v7882_v60 = vld [vmem:[%s7353_s14 + $0x8] sm:$0x3f] }
0x1dab   :  { %v4747_v17 = vperm.slane %v7882_v60, 0  ;;  %v4750_v34 = vperm.slane %v7882_v60, 1 }
0x1dc3   :  { %v4650_v59 = vpop.permute.xlu0 %4649 }
0x1dc4   :  { %v4665_v11 = vsel %vm917_vm13, %v4663_v35, %v4650_v59 }
0x1dc5   :  { %v4667_v3 = vsel %vm920_vm14, %v4665_v11, %v4658_v30 }
0x1dc6   :  { %5996 = vmatmul.msk.f32.vlgmr.msrb.gmra.mxu0 %vm145_vm0, %v4667_v3 }
0x1dc9   :  { %v4660_v63 = vpop.permute.xlu1 %4659 }
0x1dcb   :  { %v4652_v41 = vpop.permute.xlu0 %4651 }
0x1dcc   :  { %v4666_v40 = vsel %vm917_vm13, %v4664_v62, %v4652_v41 }
0x1dcd   :  { %v4668_v58 = vsel %vm920_vm14, %v4666_v40, %v4660_v63 }
0x1dce   :  { %5997 = vmatmul.msk.f32.gmra.mxu0 %vm145_vm0, %v4668_v58 }
0x1e43   :  { %v4695_v42 = vpop.f32.mrf.mxu0 }
0x1e44   :  { %v4696_v48 = vadd.f32 %v6179_v24, %v4695_v42 }
0x1e46   :  { %v4701_v46 = vadd.f32 %v4696_v48, %v7677_v18  ;;  %v5998_v18 = vld [vmem:[%s7319_s27 + $0x20] sm:$0xff] }
0x1e47   :  { %4793 = vmatpush.msrb.mxu1 %v5998_v18  ;;  %v6155_v8 = vpack.i.bf16 %v5998_v18, %v5999_v28 }
0x1e48   :  { %v4703_v57 = vsel %vm145_vm0, %v4701_v46, 0.0 }
0x1e49   :  { %4704 = vadd.xlane.f32.xlu2 %v4703_v57 }
0x1e4b   :  { %v4698_v52 = vpop.f32.mrf.mxu0 }
0x1e4c   :  { %v4699_v61 = vadd.f32 %v6179_v24, %v4698_v52 }
0x1e4e   :  { %v4702_v49 = vadd.f32 %v4699_v61, %v7682_v45 }
0x1e50   :  { %v4706_v22 = vsel %vm145_vm0, %v4702_v49, 0.0 }
0x1e51   :  { %4707 = vadd.xlane.f32.xlu0 %v4706_v22 }
0x1e65   :  { %6151 = vrot.lane.b32.xlu0 %v6150_v6, %s6450_s19 }
0x1ebc   :  { %v4705_v56 = vpop.xlane.xlu2 %4704 }
0x1ebd   :  { %v4709_v36 = vmul.f32 %v4705_v56, %v6500_v10 }
0x1ebf   :  { %v4711_v14 = vsub.f32 %v4701_v46, %v4709_v36 }
0x1ec1   :  { %v4713_v15 = vmul.f32 %v4711_v14, %v4711_v14 }
0x1ec3   :  { %v4715_v45 = vsel %vm145_vm0, %v4713_v15, 0.0 }
0x1ec4   :  { %4716 = vadd.xlane.f32.xlu1 %v4715_v45  ;;  %v4708_v9 = vpop.xlane.xlu0 %4707 }
0x1ec5   :  { %v4710_v39 = vmul.f32 %v4708_v9, %v6500_v10 }
0x1ec7   :  { %v4712_v53 = vsub.f32 %v4702_v49, %v4710_v39 }
0x1ec9   :  { %v4714_v44 = vmul.f32 %v4712_v53, %v4712_v53 }
0x1ecb   :  { %v4718_v21 = vsel %vm145_vm0, %v4714_v44, 0.0 }
0x1ecc   :  { %4719 = vadd.xlane.f32.xlu2 %v4718_v21  ;;  %v6442_v21 = vld [vmem:[%s7402_s7] ss:$0 sm:$0xff] }
0x1ed7   :  { %v6152_v7 = vpop.permute.xlu0 %6151 }
0x1ed8   :  { %v6153_v43 = vunpack.i.l.bf16 %v6152_v7  ;;  %v6154_v51 = vunpack.i.h.bf16 %v6152_v7 }
0x1eda   :  { %4832 = vmatpush.msrb.mxu2 %v6153_v43 }
0x1edc   :  { %4833 = vmatpush.msrb.mxu2 %v6154_v51 }
0x1edd   :  { %6156 = vrot.lane.b32.xlu1 %v6155_v8, %s6450_s19 }
0x1ee4   :  { %4817 = vrot.lane.b32.xlu2 %v6180_v54, %s6450_s19 }
0x1f37   :  { %v4717_v19 = vpop.xlane.xlu1 %4716 }
0x1f38   :  { %v4721_v38 = vmul.f32 %v4717_v19, %v6500_v10 }
0x1f3a   :  { %v4723_v25 = vadd.f32 1e-05, %v4721_v38 }
0x1f3c   :  { %6391 = vrsqrt.f32 %v4723_v25  ;;  %vm4731_vm1 = vweird.f32 %v4723_v25 }
0x1f3f   :  { %v4720_v4 = vpop.xlane.xlu2 %4719 }
0x1f40   :  { %v4722_v13 = vmul.f32 %v4720_v4, %v6500_v10 }
0x1f42   :  { %v6392_v16 = vpop.eup %6391  ;;  %v4724_v0 = vadd.f32 1e-05, %v4722_v13 }
0x1f43   :  { %v4726_v32 = vmul.f32 %v6392_v16, %v4723_v25  ;;  %vm4732_vm15 = vweird.f32 %v6392_v16  ;;  %v6443_v25 = vld [vmem:[%s7402_s7 + $0x1] ss:$0 sm:$0xff] }
0x1f44   :  { %6393 = vrsqrt.f32 %v4724_v0  ;;  %vm4733_vm2 = vmor %vm4731_vm1, %vm4732_vm15  ;;  %vm4741_vm4 = vweird.f32 %v4724_v0 }
0x1f45   :  { %v4727_v26 = vmul.f32 %v6392_v16, %v4726_v32 }
0x1f47   :  { %v4728_v33 = vmul.f32 0.5, %v4727_v26 }
0x1f49   :  { %v4729_v27 = vsub.f32 1.5, %v4728_v33 }
0x1f4a   :  { %v6394_v29 = vpop.eup %6393 }
0x1f4b   :  { %v4730_v47 = vmul.f32 %v6392_v16, %v4729_v27  ;;  %v4736_v5 = vmul.f32 %v6394_v29, %v4724_v0  ;;  %vm4742_vm3 = vweird.f32 %v6394_v29 }
0x1f4c   :  { %vm4743_vm5 = vmor %vm4741_vm4, %vm4742_vm3 }
0x1f4d   :  { %v4734_v31 = vsel %vm4733_vm2, %v6392_v16, %v4730_v47  ;;  %v4737_v55 = vmul.f32 %v6394_v29, %v4736_v5 }
0x1f4e   :  { %v4745_v35 = vmul.f32 %v4734_v31, %v4711_v14 }
0x1f4f   :  { %v4738_v59 = vmul.f32 0.5, %v4737_v55  ;;  %v6157_v30 = vpop.permute.xlu1 %6156 }
0x1f50   :  { %v4748_v11 = vmul.f32 %v4747_v17, %v4745_v35  ;;  %v6158_v3 = vunpack.i.l.bf16 %v6157_v30  ;;  %v6159_v41 = vunpack.i.h.bf16 %v6157_v30 }
0x1f51   :  { %v4739_v37 = vsub.f32 1.5, %v4738_v59 }
0x1f52   :  { %v4751_v62 = vadd.f32 %v4750_v34, %v4748_v11  ;;  %4834 = vmatpush.msrb.mxu2 %v6158_v3 }
0x1f53   :  { %v4740_v63 = vmul.f32 %v6394_v29, %v4739_v37 }
0x1f54   :  { %v7887_v40 = vmul.f32 %v4751_v62, %v7374_v23  ;;  %4835 = vmatpush.msrb.mxu2 %v6159_v41 }
0x1f55   :  { %v4744_v58 = vsel %vm4743_vm5, %v6394_v29, %v4740_v63  ;;  %6010 = vmatmul.msk.f32.vlgmr.msrb.gmra.mxu2 %vm145_vm0, %v7368_v12  ;;  %v4818_v12 = vpop.permute.xlu2 %4817 }
0x1f56   :  { %v4746_v24 = vmul.f32 %v4744_v58, %v4712_v53  ;;  %6008 = vmatmul.msk.f32.vlgmr.msrb.gmra.mxu1 %vm145_vm0, %v7887_v40 }
0x1f58   :  { %v4749_v42 = vmul.f32 %v4747_v17, %v4746_v24 }
0x1f5a   :  { %v4752_v48 = vadd.f32 %v4750_v34, %v4749_v42 }
0x1f5c   :  { %v7894_v46 = vmul.f32 %v4752_v48, %v7386_v50 }
0x1f5d   :  { %6011 = vmatmul.msk.f32.gmra.mxu2 %vm145_vm0, %v7381_v1 }
0x1f5e   :  { %6009 = vmatmul.msk.f32.gmra.mxu1 %vm145_vm0, %v7894_v46 }
0x1fd3   :  { %v4795_v57 = vpop.f32.mrf.mxu1 }
0x1fd4   :  { %v4796_v52 = vadd.f32 %v6180_v54, %v4795_v57 }
0x1fd6   :  { %4951 = vrot.lane.b32.xlu1 %v4796_v52, %s6454_s23 }
0x1fd8   :  { %v4837_v61 = vpop.f32.mrf.mxu2 }
0x1fd9   :  { %v7901_v49 = vadd.f32 %v4837_v61, %v4818_v12 }
0x1fdb   :  { %4953 = vrot.lane.b32.xlu0 %v7901_v49, %s6454_s23  ;;  %6012 = vmatpush.xpose.msk.msrb.mxu3 %vm249_vm8, %v7901_v49  ;;  %v4798_v2 = vpop.f32.mrf.mxu1 }
0x1fdc   :  { %v4799_v20 = vadd.f32 %v6180_v54, %v4798_v2 }
0x1fde   :  { %6013 = vmatmul.msk.f32.vlgmr.msrb.gmra.mxu3 %vm249_vm8, %v4796_v52 }
0x1fe0   :  { %v4840_v1 = vpop.f32.mrf.mxu2 }
0x1fe1   :  { %v7908_v22 = vadd.f32 %v4840_v1, %v4818_v12 }
0x1fe3   :  { %4925 = vrot.lane.b32.xlu2 %v7908_v22, %s6452_s21  ;;  %4981 = vrot.lane.b32.xlu1 %v7908_v22, %s6454_s23 }
0x1fe4   :  { %4897 = vrot.lane.b32.xlu0 %v7901_v49, %s6452_s21  ;;  %6014 = vmatpush.xpose.msk.msra.mxu3 %vm249_vm8, %v7908_v22 }
0x1fe7   :  { %6015 = vmatmul.msk.f32.vlgmr.msra.gmra.mxu3 %vm249_vm8, %v4799_v20 }
0x1feb   :  { %4895 = vrot.lane.b32.xlu2 %v4796_v52, %s6452_s21  ;;  %5009 = vrot.lane.b32.xlu1 %v7901_v49, %s6453_s22 }
0x1fec   :  { %4979 = vrot.lane.b32.xlu0 %v4799_v20, %s6454_s23 }
0x1ff3   :  { %5007 = vrot.lane.b32.xlu2 %v4796_v52, %s6453_s22  ;;  %5037 = vrot.lane.b32.xlu1 %v7908_v22, %s6453_s22 }
0x1ff4   :  { %4923 = vrot.lane.b32.xlu0 %v4799_v20, %s6452_s21 }
0x1ffb   :  { %5271 = vrot.lane.b32.xlu2 %v7901_v49, %s6450_s19 }
0x1ffc   :  { %5035 = vrot.lane.b32.xlu0 %v4799_v20, %s6453_s22  ;;  %s6488_s22 = smov 30  }
0x2004   :  { %5323 = vrot.lane.b32.xlu0 %v7901_v49, %s6449_s18 }
0x203d   :  { %v4926_v6 = vpop.permute.xlu2 %4925 }
0x203e   :  { %6018 = vmatpush.xpose.msk.msra.mxu1 %vm249_vm8, %v4926_v6 }
0x2045   :  { %v4896_v28 = vpop.permute.xlu2 %4895 }
0x2048   :  { %v4952_v18 = vpop.permute.xlu1 %4951 }
0x204d   :  { %v5008_v56 = vpop.permute.xlu2 %5007  ;;  %v4954_v36 = vpop.permute.xlu0 %4953 }
0x204e   :  { %6020 = vmatpush.xpose.msk.msra.mxu2 %vm249_vm8, %v4954_v36 }
0x2051   :  { %6021 = vmatmul.msk.f32.vlgmr.msra.gmra.mxu2 %vm249_vm8, %v4952_v18 }
0x2055   :  { %v4982_v14 = vpop.permute.xlu1 %4981  ;;  %v5272_v15 = vpop.permute.xlu2 %5271 }
0x2056   :  { %v4898_v45 = vpop.permute.xlu0 %4897  ;;  %6022 = vmatpush.xpose.msk.msrb.mxu3 %vm249_vm8, %v4982_v14  ;;  %5292 = vmatpush.msrb.mxu2 %v5272_v15 }
0x2057   :  { %6016 = vmatpush.xpose.msk.msra.mxu0 %vm249_vm8, %v4898_v45 }
0x205a   :  { %6017 = vmatmul.msk.f32.vlgmr.msra.gmra.mxu0 %vm249_vm8, %v4896_v28 }
0x205d   :  { %v5010_v9 = vpop.permute.xlu1 %5009 }
0x205e   :  { %v4980_v39 = vpop.permute.xlu0 %4979  ;;  %6024 = vmatpush.xpose.msk.msrb.mxu0 %vm249_vm8, %v5010_v9 }
0x205f   :  { %6023 = vmatmul.msk.f32.vlgmr.msrb.gmra.mxu3 %vm249_vm8, %v4980_v39 }
0x2061   :  { %v4866_v53 = vpop.f32.mrf.mxu3 }
0x2062   :  { %v5063_v44 = vmul.f32 0.35355338, %v4866_v53  ;;  %6025 = vmatmul.msk.f32.vlgmr.msrb.gmra.mxu0 %vm249_vm8, %v5008_v56 }
0x2064   :  { %v5071_v8 = vadd.f32 %v6442_v21, %v5063_v44 }
0x2065   :  { %v5038_v7 = vpop.permute.xlu1 %5037 }
0x2066   :  { %v4924_v43 = vpop.permute.xlu0 %4923  ;;  %6026 = vmatpush.xpose.msk.msrb.mxu1 %vm249_vm8, %v5038_v7  ;;  %v5079_v51 = vsel %vm249_vm8, %v5071_v8, -inf }
0x2067   :  { %6019 = vmatmul.msk.f32.vlgmr.msra.gmra.mxu1 %vm249_vm8, %v4924_v43  ;;  %5080 = vmax.xlane.f32.xlu2 %v5079_v51 }
0x206a   :  { %v4892_v19 = vpop.f32.mrf.mxu3 }
0x206b   :  { %v5064_v38 = vmul.f32 0.35355338, %v4892_v19 }
0x206d   :  { %v5072_v54 = vadd.f32 %v6443_v25, %v5064_v38 }
0x206e   :  { %v5036_v4 = vpop.permute.xlu0 %5035 }
0x206f   :  { %6027 = vmatmul.msk.f32.vlgmr.msrb.gmra.mxu1 %vm249_vm8, %v5036_v4  ;;  %v5082_v13 = vsel %vm249_vm8, %v5072_v54, -inf }
0x2070   :  { %5083 = vmax.xlane.f32.xlu0 %v5082_v13 }
0x2076   :  { %v5324_v16 = vpop.permute.xlu0 %5323 }
0x2077   :  { %5344 = vmatpush.msra.mxu0 %v5324_v16 }
0x20d4   :  { %v4976_v0 = vpop.f32.mrf.mxu2 }
0x20d5   :  { %v5067_v32 = vmul.f32 0.35355338, %v4976_v0 }
0x20d7   :  { %v5075_v26 = vadd.f32 %v6442_v21, %v5067_v32  ;;  %v4920_v33 = vpop.f32.mrf.mxu0 }
0x20d8   :  { %v5065_v27 = vmul.f32 0.35355338, %v4920_v33 }
0x20d9   :  { %v5091_v29 = vsel %vm249_vm8, %v5075_v26, -inf }
0x20da   :  { %v5073_v47 = vadd.f32 %v6442_v21, %v5065_v27  ;;  %5092 = vmax.xlane.f32.xlu2 %v5091_v29  ;;  %v5081_v48 = vpop.xlane.xlu2 %5080 }
0x20db   :  { %v5103_v57 = vsub.f32 %v5071_v8, %v5081_v48 }
0x20dc   :  { %v5085_v5 = vsel %vm249_vm8, %v5073_v47, -inf }
0x20dd   :  { %5086 = vmax.xlane.f32.xlu1 %v5085_v5  ;;  %v5111_v52 = vmul.f32 1.442695, %v5103_v57 }
0x20df   :  { %v5032_v17 = vpop.f32.mrf.mxu0  ;;  %6395 = vpow2.f32 %v5111_v52 }
0x20e0   :  { %v5069_v31 = vmul.f32 0.35355338, %v5032_v17 }
0x20e2   :  { %v5077_v55 = vadd.f32 %v6442_v21, %v5069_v31  ;;  %v5004_v34 = vpop.f32.mrf.mxu3 }
0x20e3   :  { %v5068_v35 = vmul.f32 0.35355338, %v5004_v34  ;;  %v5084_v61 = vpop.xlane.xlu0 %5083 }
0x20e4   :  { %v4948_v59 = vpop.f32.mrf.mxu1  ;;  %v5097_v30 = vsel %vm249_vm8, %v5077_v55, -inf  ;;  %v5104_v2 = vsub.f32 %v5072_v54, %v5084_v61 }
0x20e5   :  { %v5076_v11 = vadd.f32 %v6443_v25, %v5068_v35  ;;  %v5066_v3 = vmul.f32 0.35355338, %v4948_v59  ;;  %5098 = vmax.xlane.f32.xlu0 %v5097_v30  ;;  %v7960_v12 = vpop.eup %6395 }
0x20e6   :  { %v5127_v1 = vsel %vm249_vm8, %v7960_v12, 0.0  ;;  %v5113_v20 = vmul.f32 1.442695, %v5104_v2 }
0x20e7   :  { %v5074_v37 = vadd.f32 %v6443_v25, %v5066_v3  ;;  %v5094_v62 = vsel %vm249_vm8, %v5076_v11, -inf }
0x20e8   :  { %5095 = vmax.xlane.f32.xlu2 %v5094_v62  ;;  %6397 = vpow2.f32 %v5113_v20 }
0x20e9   :  { %v5088_v41 = vsel %vm249_vm8, %v5074_v37, -inf }
0x20ea   :  { %5089 = vmax.xlane.f32.xlu1 %v5088_v41 }
0x20ec   :  { %v5060_v63 = vpop.f32.mrf.mxu1 }
0x20ed   :  { %v5070_v58 = vmul.f32 0.35355338, %v5060_v63 }
0x20ee   :  { %v7964_v6 = vpop.eup %6397 }
0x20ef   :  { %v5078_v24 = vadd.f32 %v6443_v25, %v5070_v58  ;;  %v5130_v28 = vsel %vm249_vm8, %v7964_v6, 0.0 }
0x20f1   :  { %v5100_v42 = vsel %vm249_vm8, %v5078_v24, -inf }
0x20f2   :  { %5101 = vmax.xlane.f32.xlu1 %v5100_v42 }
0x20f9   :  { %5349 = vrot.lane.b32.xlu0 %v7908_v22, %s6449_s18  ;;  %s6487_s18 = smov 31  }
0x20fa   :  { %s8087_s21 = sld [smem:[%s8103_s0 + %s6487_s18]]  }
0x2100   :  { %5375 = vrot.lane.b32.xlu2 %v7901_v49, %s6451_s20 }
0x210b   :  { %5297 = vrot.lane.b32.xlu1 %v7908_v22, %s6450_s19 }
0x2123   :  { %5128 = vadd.xlane.f32.xlu0 %v5127_v1 }
0x2135   :  { %5131 = vadd.xlane.f32.xlu1 %v5130_v28 }
0x214d   :  { %v5093_v18 = vpop.xlane.xlu2 %5092 }
0x214e   :  { %v5107_v56 = vsub.f32 %v5075_v26, %v5093_v18 }
0x2150   :  { %v5119_v36 = vmul.f32 1.442695, %v5107_v56  ;;  %v5087_v14 = vpop.xlane.xlu1 %5086 }
0x2151   :  { %v5105_v15 = vsub.f32 %v5073_v47, %v5087_v14 }
0x2152   :  { %6399 = vpow2.f32 %v5119_v36 }
0x2153   :  { %v5115_v45 = vmul.f32 1.442695, %v5105_v15 }
0x2155   :  { %6401 = vpow2.f32 %v5115_v45 }
0x2158   :  { %v7968_v9 = vpop.eup %6399  ;;  %v5099_v39 = vpop.xlane.xlu0 %5098 }
0x2159   :  { %v5109_v53 = vsub.f32 %v5077_v55, %v5099_v39  ;;  %v5139_v44 = vsel %vm249_vm8, %v7968_v9, 0.0 }
0x215a   :  { %5140 = vadd.xlane.f32.xlu0 %v5139_v44 }
0x215b   :  { %v7972_v21 = vpop.eup %6401  ;;  %v5123_v8 = vmul.f32 1.442695, %v5109_v53  ;;  %v5096_v7 = vpop.xlane.xlu2 %5095 }
0x215c   :  { %v5108_v43 = vsub.f32 %v5076_v11, %v5096_v7  ;;  %v5133_v51 = vsel %vm249_vm8, %v7972_v21, 0.0 }
0x215d   :  { %6403 = vpow2.f32 %v5123_v8  ;;  %v5090_v19 = vpop.xlane.xlu1 %5089  ;;  %5134 = vadd.xlane.f32.xlu2 %v5133_v51 }
0x215e   :  { %v5121_v38 = vmul.f32 1.442695, %v5108_v43  ;;  %v5106_v25 = vsub.f32 %v5074_v37, %v5090_v19 }
0x2160   :  { %6405 = vpow2.f32 %v5121_v38  ;;  %v5117_v54 = vmul.f32 1.442695, %v5106_v25 }
0x2162   :  { %6407 = vpow2.f32 %v5117_v54 }
0x2163   :  { %v7976_v4 = vpop.eup %6403  ;;  %v5376_v13 = vpop.permute.xlu2 %5375 }
0x2164   :  { %5396 = vmatpush.msra.mxu2 %v5376_v13  ;;  %v5145_v16 = vsel %vm249_vm8, %v7976_v4, 0.0 }
0x2165   :  { %v5102_v0 = vpop.xlane.xlu1 %5101  ;;  %5146 = vadd.xlane.f32.xlu1 %v5145_v16 }
0x2166   :  { %v7980_v32 = vpop.eup %6405  ;;  %v5110_v26 = vsub.f32 %v5078_v24, %v5102_v0 }
0x2167   :  { %v5142_v33 = vsel %vm249_vm8, %v7980_v32, 0.0 }
0x2168   :  { %v7984_v27 = vpop.eup %6407  ;;  %v5125_v29 = vmul.f32 1.442695, %v5110_v26  ;;  %5143 = vadd.xlane.f32.xlu0 %v5142_v33 }
0x2169   :  { %v5136_v47 = vsel %vm249_vm8, %v7984_v27, 0.0 }
0x216a   :  { %6409 = vpow2.f32 %v5125_v29  ;;  %5137 = vadd.xlane.f32.xlu2 %v5136_v47 }
0x216b   :  { %v5350_v5 = vpop.permute.xlu0 %5349 }
0x216c   :  { %5370 = vmatpush.msra.mxu1 %v5350_v5 }
0x2170   :  { %v7988_v17 = vpop.eup %6409 }
0x2171   :  { %v5148_v31 = vsel %vm249_vm8, %v7988_v17, 0.0 }
0x2172   :  { %5149 = vadd.xlane.f32.xlu1 %v5148_v31 }
0x217c   :  { %5401 = vrot.lane.b32.xlu0 %v7908_v22, %s6451_s20 }
0x217d   :  { %v5298_v55 = vpop.permute.xlu1 %5297 }
0x217e   :  { %5318 = vmatpush.msra.mxu3 %v5298_v55 }
0x2182   :  { %5427 = vrot.lane.b32.xlu2 %v7901_v49, %s6455_s24 }
0x218b   :  { %5453 = vrot.lane.b32.xlu1 %v7908_v22, %s6455_s24 }
0x2196   :  { %v5129_v34 = vpop.xlane.xlu0 %5128 }
0x2197   :  { %6411 = vrcp.f32 %v5129_v34  ;;  %v5162_v11 = vand.u32 2147483648, %v5129_v34  ;;  %v5160_v37 = vand.u32 2147483647, %v5129_v34  ;;  %vm5156_vm9 = vweird.f32 %v5129_v34 }
0x2199   :  { %v5163_v41 = vor.u32 1.1754944e-38, %v5162_v11  ;;  %vm5161_vm11 = vcmp.eq.f32.partialorder %v5160_v37, 8.507059e+37 }
0x219d   :  { %v6412_v35 = vpop.eup %6411 }
0x219e   :  { %v5152_v59 = vmul.f32 %v6412_v35, %v5129_v34  ;;  %vm5157_vm7 = vweird.f32 %v6412_v35 }
0x219f   :  { %vm5158_vm10 = vmor %vm5156_vm9, %vm5157_vm7 }
0x21a0   :  { %v5153_v30 = vsub.f32 1.0, %v5152_v59 }
0x21a2   :  { %v5154_v3 = vmul.f32 %v6412_v35, %v5153_v30 }
0x21a4   :  { %v5155_v62 = vadd.f32 %v6412_v35, %v5154_v3 }
0x21a6   :  { %v5159_v63 = vsel %vm5158_vm10, %v6412_v35, %v5155_v62 }
0x21a7   :  { %v5164_v58 = vsel %vm5161_vm11, %v5163_v41, %v5159_v63 }
0x21a8   :  { %v5165_v49 = vmul.f32 %v7960_v12, %v5164_v58  ;;  %v5132_v24 = vpop.xlane.xlu1 %5131 }
0x21a9   :  { %6413 = vrcp.f32 %v5132_v24  ;;  %v5177_v57 = vand.u32 2147483648, %v5132_v24  ;;  %v5175_v61 = vand.u32 2147483647, %v5132_v24  ;;  %vm5171_vm15 = vweird.f32 %v5132_v24 }
0x21aa   :  { %6028 = vmatmul.msk.f32.vlgmr.msrb.gmra.mxu2 %vm249_vm8, %v5165_v49 }
0x21ab   :  { %v5178_v2 = vor.u32 1.1754944e-38, %v5177_v57  ;;  %vm5176_vm2 = vcmp.eq.f32.partialorder %v5175_v61, 8.507059e+37 }
0x21af   :  { %v6414_v22 = vpop.eup %6413 }
0x21b0   :  { %v5167_v42 = vmul.f32 %v6414_v22, %v5132_v24  ;;  %vm5172_vm12 = vweird.f32 %v6414_v22 }
0x21b1   :  { %vm5173_vm1 = vmor %vm5171_vm15, %vm5172_vm12 }
0x21b2   :  { %v5168_v48 = vsub.f32 1.0, %v5167_v42 }
0x21b4   :  { %v5169_v52 = vmul.f32 %v6414_v22, %v5168_v48 }
0x21b6   :  { %v5170_v1 = vadd.f32 %v6414_v22, %v5169_v52 }
0x21b8   :  { %v5174_v20 = vsel %vm5173_vm1, %v6414_v22, %v5170_v1 }
0x21b9   :  { %v5179_v28 = vsel %vm5176_vm2, %v5178_v2, %v5174_v20 }
0x21ba   :  { %v5180_v12 = vmul.f32 %v7964_v6, %v5179_v28 }
0x21bc   :  { %6029 = vmatmul.msk.f32.vlgmr.msra.gmra.mxu3 %vm249_vm8, %v5180_v12 }
0x21cd   :  { %v5141_v18 = vpop.xlane.xlu0 %5140 }
0x21ce   :  { %6415 = vrcp.f32 %v5141_v18  ;;  %v5222_v39 = vand.u32 2147483648, %v5141_v18  ;;  %v5220_v7 = vand.u32 2147483647, %v5141_v18  ;;  %vm5216_vm4 = vweird.f32 %v5141_v18 }
0x21d0   :  { %v5135_v56 = vpop.xlane.xlu2 %5134  ;;  %v5223_v6 = vor.u32 1.1754944e-38, %v5222_v39  ;;  %vm5221_vm9 = vcmp.eq.f32.partialorder %v5220_v7, 8.507059e+37 }
0x21d1   :  { %6417 = vrcp.f32 %v5135_v56  ;;  %v5192_v19 = vand.u32 2147483648, %v5135_v56  ;;  %v5190_v54 = vand.u32 2147483647, %v5135_v56  ;;  %vm5186_vm10 = vweird.f32 %v5135_v56 }
0x21d3   :  { %v5193_v47 = vor.u32 1.1754944e-38, %v5192_v19  ;;  %vm5191_vm12 = vcmp.eq.f32.partialorder %v5190_v54, 8.507059e+37 }
0x21d4   :  { %v6416_v36 = vpop.eup %6415 }
0x21d5   :  { %v5212_v14 = vmul.f32 %v6416_v36, %v5141_v18  ;;  %vm5217_vm3 = vweird.f32 %v6416_v36 }
0x21d6   :  { %vm5218_vm5 = vmor %vm5216_vm4, %vm5217_vm3 }
0x21d7   :  { %v6418_v15 = vpop.eup %6417  ;;  %v5213_v45 = vsub.f32 1.0, %v5212_v14 }
0x21d8   :  { %v5182_v53 = vmul.f32 %v6418_v15, %v5135_v56  ;;  %v5147_v44 = vpop.xlane.xlu1 %5146  ;;  %vm5187_vm7 = vweird.f32 %v6418_v15 }
0x21d9   :  { %v5214_v8 = vmul.f32 %v6416_v36, %v5213_v45  ;;  %6419 = vrcp.f32 %v5147_v44  ;;  %vm5188_vm11 = vmor %vm5186_vm10, %vm5187_vm7  ;;  %v5250_v34 = vand.u32 2147483647, %v5147_v44  ;;  %v5252_v11 = vand.u32 2147483648, %v5147_v44 }
0x21da   :  { %v5183_v43 = vsub.f32 1.0, %v5182_v53  ;;  %vm5246_vm1 = vweird.f32 %v5147_v44 }
0x21db   :  { %v5215_v51 = vadd.f32 %v6416_v36, %v5214_v8  ;;  %v5144_v38 = vpop.xlane.xlu0 %5143  ;;  %vm8009_vm2 = vcmp.eq.f32.partialorder %v5250_v34, 8.507059e+37  ;;  %v6004_v34 = vld [vmem:[%s7591_s26 + $0x28] sm:$0xff] }
0x21dc   :  { %v5184_v25 = vmul.f32 %v6418_v15, %v5183_v43  ;;  %6421 = vrcp.f32 %v5144_v38  ;;  %v5237_v22 = vand.u32 2147483648, %v5144_v38  ;;  %v5235_v48 = vand.u32 2147483647, %v5144_v38 }
0x21dd   :  { %v5219_v13 = vsel %vm5218_vm5, %v6416_v36, %v5215_v51  ;;  %v8002_v16 = vpop.xlane.xlu2 %5137  ;;  %vm5231_vm5 = vweird.f32 %v5144_v38 }
0x21de   :  { %v5224_v0 = vsel %vm5221_vm9, %v5223_v6, %v5219_v13  ;;  %v5185_v26 = vadd.f32 %v6418_v15, %v5184_v25  ;;  %6423 = vrcp.f32 %v8002_v16  ;;  %v5205_v61 = vand.u32 2147483647, %v8002_v16 }
0x21df   :  { %v6420_v33 = vpop.eup %6419  ;;  %v5225_v29 = vmul.f32 %v7968_v9, %v5224_v0  ;;  %v5207_v1 = vand.u32 2147483648, %v8002_v16  ;;  %v5238_v18 = vor.u32 1.1754944e-38, %v5237_v22  ;;  %vm5236_vm10 = vcmp.eq.f32.partialorder %v5235_v48, 8.507059e+37 }
0x21e0   :  { %v5189_v5 = vsel %vm5188_vm11, %v6418_v15, %v5185_v26  ;;  %v5242_v31 = vmul.f32 %v6420_v33, %v5147_v44  ;;  %vm5247_vm15 = vweird.f32 %v6420_v33  ;;  %vm5201_vm11 = vweird.f32 %v8002_v16 }
0x21e1   :  { %v5194_v55 = vsel %vm5191_vm12, %v5193_v47, %v5189_v5  ;;  %6032 = vmatmul.msk.f32.vlgmr.msra.gmra.mxu2 %vm249_vm8, %v5225_v29  ;;  %vm5248_vm3 = vmor %vm5246_vm1, %vm5247_vm15  ;;  %v5208_v45 = vor.u32 1.1754944e-38, %v5207_v1  ;;  %vm5206_vm15 = vcmp.eq.f32.partialorder %v5205_v61, 8.507059e+37 }
0x21e2   :  { %v6422_v35 = vpop.eup %6421  ;;  %v5195_v59 = vmul.f32 %v7972_v21, %v5194_v55  ;;  %v5243_v30 = vsub.f32 1.0, %v5242_v31  ;;  %v5253_v21 = vor.u32 1.1754944e-38, %v5252_v11  ;;  %v6006_v31 = vld [vmem:[%s7591_s26 + $0x38] sm:$0xff]  ;;  %v6005_v55 = vld [vmem:[%s7591_s26 + $0x30] sm:$0xff] }
0x21e3   :  { %v5227_v3 = vmul.f32 %v6422_v35, %v5144_v38  ;;  %vm5232_vm4 = vweird.f32 %v6422_v35  ;;  %5530 = vmatpush.msrb.mxu2 %v6006_v31 }
0x21e4   :  { %v6424_v37 = vpop.eup %6423  ;;  %v5244_v62 = vmul.f32 %v6420_v33, %v5243_v30  ;;  %6030 = vmatmul.msk.f32.vlgmr.msra.gmra.mxu0 %vm249_vm8, %v5195_v59  ;;  %vm5233_vm9 = vmor %vm5231_vm5, %vm5232_vm4 }
0x21e5   :  { %v5228_v41 = vsub.f32 1.0, %v5227_v3  ;;  %v5197_v63 = vmul.f32 %v6424_v37, %v8002_v16  ;;  %v5150_v58 = vpop.xlane.xlu1 %5149  ;;  %v5428_v49 = vpop.permute.xlu2 %5427  ;;  %vm5202_vm7 = vweird.f32 %v6424_v37  ;;  %5531 = vmatpush.msrb.mxu2 %v6005_v55 }
0x21e6   :  { %v5245_v24 = vadd.f32 %v6420_v33, %v5244_v62  ;;  %6425 = vrcp.f32 %v5150_v58  ;;  %5448 = vmatpush.msrb.mxu0 %v5428_v49  ;;  %vm5203_vm12 = vmor %vm5201_vm11, %vm5202_vm7  ;;  %v5267_v19 = vand.u32 2147483648, %v5150_v58  ;;  %v5265_v38 = vand.u32 2147483647, %v5150_v58 }
0x21e7   :  { %v5229_v42 = vmul.f32 %v6422_v35, %v5228_v41  ;;  %v5198_v57 = vsub.f32 1.0, %v5197_v63  ;;  %5532 = vmatpush.msrb.mxu2 %v6004_v34 }
0x21e8   :  { %v5249_v52 = vsel %vm5248_vm3, %v6420_v33, %v5245_v24  ;;  %v5268_v25 = vor.u32 1.1754944e-38, %v5267_v19  ;;  %vm5266_vm4 = vcmp.eq.f32.partialorder %v5265_v38, 8.507059e+37 }
0x21e9   :  { %v5254_v2 = vsel %vm8009_vm2, %v5253_v21, %v5249_v52  ;;  %v5230_v20 = vadd.f32 %v6422_v35, %v5229_v42  ;;  %v5199_v28 = vmul.f32 %v6424_v37, %v5198_v57  ;;  %vm5261_vm2 = vweird.f32 %v5150_v58  ;;  %v6181_v21 = vld [vmem:[%s7584_s4 + $0x1] ss:$0 sm:$0xff] }
0x21ea   :  { %v5255_v12 = vmul.f32 %v7976_v4, %v5254_v2 }
0x21eb   :  { %v5234_v56 = vsel %vm5233_vm9, %v6422_v35, %v5230_v20  ;;  %v5200_v36 = vadd.f32 %v6424_v37, %v5199_v28  ;;  %v6003_v35 = vld [vmem:[%s7591_s26 + $0x20] sm:$0xff] }
0x21ec   :  { %v6426_v14 = vpop.eup %6425  ;;  %v5239_v15 = vsel %vm5236_vm10, %v5238_v18, %v5234_v56  ;;  %6034 = vmatmul.msk.f32.vlgmr.msrb.gmra.mxu0 %vm249_vm8, %v5255_v12  ;;  %5533 = vmatpush.msrb.mxu2 %v6003_v35 }
0x21ed   :  { %v5240_v39 = vmul.f32 %v7980_v32, %v5239_v15  ;;  %v5204_v53 = vsel %vm5203_vm12, %v6424_v37, %v5200_v36  ;;  %v5257_v44 = vmul.f32 %v6426_v14, %v5150_v58  ;;  %vm5262_vm1 = vweird.f32 %v6426_v14 }
0x21ee   :  { %v5209_v8 = vsel %vm5206_vm15, %v5208_v45, %v5204_v53  ;;  %v5402_v4 = vpop.permute.xlu0 %5401  ;;  %vm5263_vm3 = vmor %vm5261_vm2, %vm5262_vm1  ;;  %v6041_v45 = vld [vmem:[%s7626_s1 + $0x38] sm:$0xff]  ;;  %v6039_v53 = vld [vmem:[%s7626_s1 + $0x28] sm:$0xff] }
0x21ef   :  { %v5210_v7 = vmul.f32 %v7984_v27, %v5209_v8  ;;  %v5258_v43 = vsub.f32 1.0, %v5257_v44  ;;  %5422 = vmatpush.msrb.mxu3 %v5402_v4  ;;  %v6038_v44 = vld [vmem:[%s7626_s1 + $0x20] sm:$0xff] }
0x21f0   :  { %6033 = vmatmul.msk.f32.vlgmr.msrb.gmra.mxu3 %vm249_vm8, %v5240_v39  ;;  %v6040_v39 = vld [vmem:[%s7626_s1 + $0x30] sm:$0xff]  ;;  %s5805_s1 = sld [smem:[%s8103_s0 + %s6488_s22]]  }
0x21f1   :  { %v5259_v51 = vmul.f32 %v6426_v14, %v5258_v43  ;;  %6031 = vmatmul.msk.f32.vlgmr.msra.gmra.mxu1 %vm249_vm8, %v5210_v7  ;;  %5623 = vmatpush.msra.mxu3 %v6041_v45 }
0x21f3   :  { %v5260_v6 = vadd.f32 %v6426_v14, %v5259_v51  ;;  %5624 = vmatpush.msra.mxu3 %v6040_v39 }
0x21f5   :  { %v5264_v32 = vsel %vm5263_vm3, %v6426_v14, %v5260_v6  ;;  %5625 = vmatpush.msra.mxu3 %v6039_v53 }
0x21f6   :  { %v5269_v54 = vsel %vm5266_vm4, %v5268_v25, %v5264_v32  ;;  %v6052_v32 = vld [vmem:[%s7635_s2 + $0x78] sm:$0xff]  ;;  %v6051_v25 = vld [vmem:[%s7635_s2 + $0x70] sm:$0xff] }
0x21f7   :  { %v5270_v13 = vmul.f32 %v7988_v17, %v5269_v54  ;;  %5626 = vmatpush.msra.mxu3 %v6038_v44  ;;  %5664 = vmatpush.msra.mxu0 %v6052_v32 }
0x21f9   :  { %5665 = vmatpush.msra.mxu0 %v6051_v25 }
0x21fd   :  { %v5454_v27 = vpop.permute.xlu1 %5453 }
0x21fe   :  { %5474 = vmatpush.msrb.mxu1 %v5454_v27 }
0x21ff   :  { %6035 = vmatmul.msk.f32.vlgmr.msrb.gmra.mxu1 %vm249_vm8, %v5270_v13 }
0x222d   :  { %v5294_v16 = vpop.f32.mrf.mxu2 }
0x223f   :  { %v5320_v29 = vpop.f32.mrf.mxu3 }
0x2261   :  { %v5346_v0 = vpop.f32.mrf.mxu0 }
0x2262   :  { %5481 = vrot.lane.b32.xlu2 %v5346_v0, %s8125_s30  ;;  %v5587_v0 = vperm.slane %v7882_v60, 2 }
0x2264   :  { %v5398_v26 = vpop.f32.mrf.mxu2 }
0x2265   :  { %5489 = vrot.lane.b32.xlu0 %v5398_v26, %s8120_s9 }
0x2269   :  { %v5450_v33 = vpop.f32.mrf.mxu0 }
0x226a   :  { %5497 = vrot.lane.b32.xlu1 %v5450_v33, %s8126_s28 }
0x226e   :  { %v5372_v17 = vpop.f32.mrf.mxu1 }
0x226f   :  { %5483 = vrot.lane.b32.xlu2 %v5372_v17, %s8125_s30  ;;  %v5590_v17 = vperm.slane %v7882_v60, 3 }
0x2273   :  { %v5424_v47 = vpop.f32.mrf.mxu3 }
0x2274   :  { %5491 = vrot.lane.b32.xlu0 %v5424_v47, %s8120_s9 }
0x227c   :  { %v5476_v5 = vpop.f32.mrf.mxu1 }
0x227d   :  { %5499 = vrot.lane.b32.xlu1 %v5476_v5, %s8126_s28  ;;  %v6048_v5 = vld [vmem:[%s7635_s2 + $0x58] sm:$0xff] }
0x22bc   :  { %v5482_v59 = vpop.permute.xlu2 %5481 }
0x22bd   :  { %v5503_v11 = vsel %vm249_vm8, %v5294_v16, %v5482_v59  ;;  %v6050_v16 = vld [vmem:[%s7635_s2 + $0x68] sm:$0xff] }
0x22be   :  { %5666 = vmatpush.msra.mxu0 %v6050_v16 }
0x22c9   :  { %v5484_v9 = vpop.permute.xlu2 %5483 }
0x22ca   :  { %v5504_v63 = vsel %vm249_vm8, %v5320_v29, %v5484_v9  ;;  %v6049_v29 = vld [vmem:[%s7635_s2 + $0x60] sm:$0xff] }
0x22cb   :  { %5667 = vmatpush.msra.mxu0 %v6049_v29 }
0x22cd   :  { %5668 = vmatpush.msra.mxu0 %v6048_v5 }
0x22d7   :  { %v5490_v30 = vpop.permute.xlu0 %5489 }
0x22d8   :  { %v5505_v3 = vsel %vm917_vm13, %v5503_v11, %v5490_v30 }
0x22dc   :  { %v5498_v37 = vpop.permute.xlu1 %5497 }
0x22dd   :  { %v5507_v62 = vsel %vm920_vm14, %v5505_v3, %v5498_v37 }
0x22de   :  { %6036 = vmatmul.msk.f32.vlgmr.msrb.gmra.mxu2 %vm145_vm0, %v5507_v62 }
0x22e6   :  { %v5492_v41 = vpop.permute.xlu0 %5491 }
0x22e7   :  { %v5506_v58 = vsel %vm917_vm13, %v5504_v63, %v5492_v41 }
0x22ef   :  { %v5500_v49 = vpop.permute.xlu1 %5499 }
0x22f0   :  { %v5508_v24 = vsel %vm920_vm14, %v5506_v58, %v5500_v49  ;;  %v6047_v58 = vld [vmem:[%s7635_s2 + $0x50] sm:$0xff]  ;;  %v6046_v49 = vld [vmem:[%s7635_s2 + $0x48] sm:$0xff] }
0x22f1   :  { %6037 = vmatmul.msk.f32.gmra.mxu2 %vm145_vm0, %v5508_v24  ;;  %5669 = vmatpush.msra.mxu0 %v6047_v58  ;;  %v6045_v24 = vld [vmem:[%s7635_s2 + $0x40] sm:$0xff]  ;;  %s6489_s2 = smov 32  }
0x22f2   :  { %s5807_s13 = sld [smem:[%s8103_s0 + %s6489_s2]]  }
0x22f3   :  { %5670 = vmatpush.msra.mxu0 %v6046_v49 }
0x22f5   :  { %5671 = vmatpush.msra.mxu0 %v6045_v24 }
0x2361   :  { %v5535_v22 = vpop.f32.mrf.mxu2 }
0x2362   :  { %v5536_v42 = vadd.f32 %v6181_v21, %v5535_v22 }
0x2364   :  { %v5541_v48 = vadd.f32 %v5536_v42, %v7887_v40 }
0x2366   :  { %v5543_v57 = vsel %vm145_vm0, %v5541_v48, 0.0 }
0x2367   :  { %5544 = vadd.xlane.f32.xlu2 %v5543_v57 }
0x2374   :  { %v5538_v52 = vpop.f32.mrf.mxu2 }
0x2375   :  { %v5539_v61 = vadd.f32 %v6181_v21, %v5538_v52  ;;  %v6182_v21 = vld [vmem:[%s7621_s16 + $0x1] ss:$0 sm:$0xff] }
0x2377   :  { %v5542_v1 = vadd.f32 %v5539_v61, %v7894_v46 }
0x2379   :  { %v5546_v2 = vsel %vm145_vm0, %v5542_v1, 0.0 }
0x237a   :  { %5547 = vadd.xlane.f32.xlu0 %v5546_v2 }
0x23da   :  { %v5545_v20 = vpop.xlane.xlu2 %5544 }
0x23db   :  { %v5549_v28 = vmul.f32 %v5545_v20, %v6500_v10 }
0x23dd   :  { %v5551_v12 = vsub.f32 %v5541_v48, %v5549_v28 }
0x23df   :  { %v5553_v18 = vmul.f32 %v5551_v12, %v5551_v12 }
0x23e1   :  { %v5555_v40 = vsel %vm145_vm0, %v5553_v18, 0.0 }
0x23e2   :  { %5556 = vadd.xlane.f32.xlu1 %v5555_v40 }
0x23ed   :  { %v5548_v56 = vpop.xlane.xlu0 %5547 }
0x23ee   :  { %v5550_v36 = vmul.f32 %v5548_v56, %v6500_v10 }
0x23f0   :  { %v5552_v14 = vsub.f32 %v5542_v1, %v5550_v36  ;;  %v6183_v1 = vld [vmem:[%s7654_s8 + $0x1] ss:$0 sm:$0xff] }
0x23f2   :  { %v5554_v15 = vmul.f32 %v5552_v14, %v5552_v14 }
0x23f4   :  { %v5558_v46 = vsel %vm145_vm0, %v5554_v15, 0.0 }
0x23f5   :  { %5559 = vadd.xlane.f32.xlu2 %v5558_v46 }
0x2455   :  { %v5557_v8 = vpop.xlane.xlu1 %5556 }
0x2456   :  { %v5561_v4 = vmul.f32 %v5557_v8, %v6500_v10 }
0x2458   :  { %v5563_v7 = vadd.f32 1e-05, %v5561_v4 }
0x245a   :  { %6427 = vrsqrt.f32 %v5563_v7  ;;  %vm5571_vm13 = vweird.f32 %v5563_v7 }
0x2460   :  { %v6428_v43 = vpop.eup %6427 }
0x2461   :  { %v5566_v51 = vmul.f32 %v6428_v43, %v5563_v7  ;;  %vm5572_vm8 = vweird.f32 %v6428_v43 }
0x2462   :  { %vm5573_vm14 = vmor %vm5571_vm13, %vm5572_vm8 }
0x2463   :  { %v5567_v6 = vmul.f32 %v6428_v43, %v5566_v51  ;;  %v5735_v51 = vld [vmem:[%s5805_s1 + $0x10] sm:$0xff] }
0x2465   :  { %v5568_v19 = vmul.f32 0.5, %v5567_v6  ;;  %v5734_v6 = vld [vmem:[%s5805_s1 + $0x8] sm:$0xff] }
0x2467   :  { %v5569_v38 = vsub.f32 1.5, %v5568_v19  ;;  %v5733_v19 = vld [vmem:[%s5805_s1] sm:$0xff] }
0x2468   :  { %v5560_v54 = vpop.xlane.xlu2 %5559 }
0x2469   :  { %v5570_v13 = vmul.f32 %v6428_v43, %v5569_v38  ;;  %v5562_v27 = vmul.f32 %v5560_v54, %v6500_v10 }
0x246b   :  { %v5574_v26 = vsel %vm5573_vm14, %v6428_v43, %v5570_v13  ;;  %v5564_v33 = vadd.f32 1e-05, %v5562_v27  ;;  %v5736_v43 = vld [vmem:[%s5805_s1 + $0x18] sm:$0xff] }
0x246c   :  { %v5585_v47 = vmul.f32 %v5574_v26, %v5551_v12  ;;  %5759 = vmatpush.msra.mxu1 %v5736_v43 }
0x246d   :  { %6429 = vrsqrt.f32 %v5564_v33  ;;  %vm5581_vm7 = vweird.f32 %v5564_v33 }
0x246e   :  { %v5588_v31 = vmul.f32 %v5587_v0, %v5585_v47  ;;  %5760 = vmatpush.msra.mxu1 %v5735_v51 }
0x2470   :  { %v5591_v55 = vadd.f32 %v5590_v17, %v5588_v31  ;;  %5761 = vmatpush.msra.mxu1 %v5734_v6 }
0x2472   :  { %v5593_v34 = vmul.f32 %v5591_v55, %v7374_v23  ;;  %5762 = vmatpush.msra.mxu1 %v5733_v19 }
0x2473   :  { %v6430_v35 = vpop.eup %6429 }
0x2474   :  { %v5576_v59 = vmul.f32 %v6430_v35, %v5564_v33  ;;  %6043 = vmatmul.msk.f32.vlgmr.msra.gmra.mxu3 %vm145_vm0, %v5593_v34  ;;  %vm5582_vm5 = vweird.f32 %v6430_v35 }
0x2475   :  { %vm5583_vm9 = vmor %vm5581_vm7, %vm5582_vm5 }
0x2476   :  { %v5577_v30 = vmul.f32 %v6430_v35, %v5576_v59 }
0x2478   :  { %v5578_v11 = vmul.f32 0.5, %v5577_v30 }
0x247a   :  { %v5579_v60 = vsub.f32 1.5, %v5578_v11 }
0x247c   :  { %v5580_v3 = vmul.f32 %v6430_v35, %v5579_v60 }
0x247e   :  { %v5584_v37 = vsel %vm5583_vm9, %v6430_v35, %v5580_v3 }
0x247f   :  { %v5586_v62 = vmul.f32 %v5584_v37, %v5552_v14 }
0x2481   :  { %v5589_v9 = vmul.f32 %v5587_v0, %v5586_v62 }
0x2483   :  { %v5592_v41 = vadd.f32 %v5590_v17, %v5589_v9  ;;  %v6444_v17 = vld [vmem:[%s7353_s14 + $0x8] sm:$0x3f] }
0x2484   :  { %v5725_v47 = vperm.slane %v6444_v17, 4  ;;  %v5728_v55 = vperm.slane %v6444_v17, 5 }
0x2485   :  { %v5594_v63 = vmul.f32 %v5592_v41, %v7386_v50 }
0x2487   :  { %6044 = vmatmul.msk.f32.gmra.mxu3 %vm145_vm0, %v5594_v63 }
0x24f7   :  { %v5628_v22 = vpop.f32.mrf.mxu3 }
0x24f8   :  { %v5629_v42 = vadd.f32 %v6182_v21, %v5628_v22 }
0x24fa   :  { %v5634_v48 = vmax.f32 %v5629_v42, 0.0 }
0x24fc   :  { %6054 = vmatmul.msk.f32.vlgmr.msra.gmra.mxu0 %vm1074_vm6, %v5634_v48 }
0x250a   :  { %v5631_v57 = vpop.f32.mrf.mxu3 }
0x250b   :  { %v5632_v52 = vadd.f32 %v6182_v21, %v5631_v57 }
0x250d   :  { %v5635_v61 = vmax.f32 %v5632_v52, 0.0 }
0x250f   :  { %6055 = vmatmul.msk.f32.gmra.mxu0 %vm1074_vm6, %v5635_v61 }
0x2579   :  { %v5673_v2 = vpop.f32.mrf.mxu0 }
0x257a   :  { %v5674_v20 = vadd.f32 %v6183_v1, %v5673_v2 }
0x257c   :  { %v5679_v28 = vadd.f32 %v5674_v20, %v5593_v34 }
0x257e   :  { %v5681_v12 = vsel %vm145_vm0, %v5679_v28, 0.0 }
0x257f   :  { %5682 = vadd.xlane.f32.xlu0 %v5681_v12 }
0x258c   :  { %v5676_v18 = vpop.f32.mrf.mxu0 }
0x258d   :  { %v5677_v40 = vadd.f32 %v6183_v1, %v5676_v18 }
0x258f   :  { %v5680_v56 = vadd.f32 %v5677_v40, %v5594_v63 }
0x2591   :  { %v5684_v36 = vsel %vm145_vm0, %v5680_v56, 0.0 }
0x2592   :  { %5685 = vadd.xlane.f32.xlu1 %v5684_v36 }
0x25f2   :  { %v5683_v14 = vpop.xlane.xlu0 %5682 }
0x25f3   :  { %v5687_v15 = vmul.f32 %v5683_v14, %v6500_v10 }
0x25f5   :  { %v5689_v46 = vsub.f32 %v5679_v28, %v5687_v15 }
0x25f7   :  { %v5691_v45 = vmul.f32 %v5689_v46, %v5689_v46 }
0x25f9   :  { %v5693_v39 = vsel %vm145_vm0, %v5691_v45, 0.0 }
0x25fa   :  { %5694 = vadd.xlane.f32.xlu2 %v5693_v39 }
0x2605   :  { %v5686_v53 = vpop.xlane.xlu1 %5685 }
0x2606   :  { %v5688_v44 = vmul.f32 %v5686_v53, %v6500_v10 }
0x2608   :  { %v5690_v8 = vsub.f32 %v5680_v56, %v5688_v44 }
0x260a   :  { %v5692_v4 = vmul.f32 %v5690_v8, %v5690_v8 }
0x260c   :  { %v5696_v7 = vsel %vm145_vm0, %v5692_v4, 0.0 }
0x260d   :  { %5697 = vadd.xlane.f32.xlu0 %v5696_v7 }
0x266d   :  { %v5695_v38 = vpop.xlane.xlu2 %5694 }
0x266e   :  { %v5699_v32 = vmul.f32 %v5695_v38, %v6500_v10 }
0x2670   :  { %v5701_v25 = vadd.f32 1e-05, %v5699_v32 }
0x2672   :  { %6431 = vrsqrt.f32 %v5701_v25  ;;  %vm5709_vm10 = vweird.f32 %v5701_v25 }
0x2678   :  { %v6432_v54 = vpop.eup %6431 }
0x2679   :  { %v5704_v13 = vmul.f32 %v6432_v54, %v5701_v25  ;;  %vm5710_vm6 = vweird.f32 %v6432_v54 }
0x267a   :  { %vm5711_vm11 = vmor %vm5709_vm10, %vm5710_vm6 }
0x267b   :  { %v5705_v27 = vmul.f32 %v6432_v54, %v5704_v13 }
0x267d   :  { %v5706_v16 = vmul.f32 0.5, %v5705_v27 }
0x267f   :  { %v5707_v0 = vsub.f32 1.5, %v5706_v16 }
0x2680   :  { %v5698_v26 = vpop.xlane.xlu0 %5697 }
0x2681   :  { %v5708_v33 = vmul.f32 %v6432_v54, %v5707_v0  ;;  %v5700_v29 = vmul.f32 %v5698_v26, %v6500_v10 }
0x2683   :  { %v5712_v5 = vsel %vm5711_vm11, %v6432_v54, %v5708_v33  ;;  %v5702_v31 = vadd.f32 1e-05, %v5700_v29 }
0x2684   :  { %v5723_v34 = vmul.f32 %v5712_v5, %v5689_v46 }
0x2685   :  { %6433 = vrsqrt.f32 %v5702_v31  ;;  %vm5719_vm15 = vweird.f32 %v5702_v31 }
0x2686   :  { %v5726_v35 = vmul.f32 %v5725_v47, %v5723_v34 }
0x2688   :  { %v5729_v59 = vadd.f32 %v5728_v55, %v5726_v35 }
0x268a   :  { %v5731_v30 = vmul.f32 %v5729_v59, %v7374_v23  ;;  %v6184_v23 = vld [vmem:[%s8087_s21] ss:$0 sm:$0xff] }
0x268b   :  { %v6434_v11 = vpop.eup %6433 }
0x268c   :  { %v5714_v60 = vmul.f32 %v6434_v11, %v5702_v31  ;;  %6056 = vmatmul.msk.f32.vlgmr.msra.gmra.mxu1 %vm145_vm0, %v5731_v30  ;;  %vm5720_vm12 = vweird.f32 %v6434_v11 }
0x268d   :  { %vm5721_vm1 = vmor %vm5719_vm15, %vm5720_vm12 }
0x268e   :  { %v5715_v3 = vmul.f32 %v6434_v11, %v5714_v60 }
0x2690   :  { %v5716_v37 = vmul.f32 0.5, %v5715_v3 }
0x2692   :  { %v5717_v10 = vsub.f32 1.5, %v5716_v37 }
0x2694   :  { %v5718_v62 = vmul.f32 %v6434_v11, %v5717_v10 }
0x2696   :  { %v5722_v9 = vsel %vm5721_vm1, %v6434_v11, %v5718_v62 }
0x2697   :  { %v5724_v41 = vmul.f32 %v5722_v9, %v5690_v8 }
0x2699   :  { %v5727_v63 = vmul.f32 %v5725_v47, %v5724_v41 }
0x269b   :  { %v5730_v58 = vadd.f32 %v5728_v55, %v5727_v63 }
0x269d   :  { %v5732_v49 = vmul.f32 %v5730_v58, %v7386_v50 }
0x269f   :  { %6057 = vmatmul.msk.f32.gmra.mxu1 %vm145_vm0, %v5732_v49 }
0x2709   :  { %v5764_v24 = vpop.f32.mrf.mxu1 }
0x270a   :  { %v5765_v21 = vadd.f32 %v6184_v23, %v5764_v24 }
0x270c   :  { %5770 = vst [vmem:[%s5807_s13] sm:$0xff] %v5765_v21 }
0x271c   :  { %v5767_v22 = vpop.f32.mrf.mxu1 }
0x271d   :  { %v5768_v42 = vadd.f32 %v6184_v23, %v5767_v22 }
0x271f   :  { %5771 = vst [vmem:[%s5807_s13 + $0x8] sm:$0xff] %v5768_v42 }

</bundles_post_ra>
